<compile_context>
chip_gen: v5e
topology: v5e:2x2
jax: 0.10.0
libtpu: 0.0.40
codegen_flags: <defaults>
</compile_context>

<pallas_src>
import functools

import jax
import jax.numpy as jnp
from jax.experimental import pallas as pl
from jax.experimental.pallas import tpu as pltpu


# ----------------------------------------------------------------------------
# Kernel
# ----------------------------------------------------------------------------
def _conv3x3_relu(act, w_ref, b_ref, mask_ref, img_w):
    """3x3 same-padded conv + bias + ReLU on lane-packed activations.

    act:      (Cin_pad, L) f32, lane = b_local*HW + y*W + x
    w_ref:    (Cout, 9*Cin_pad) bf16, column = t*Cin_pad + ci, t = kh*3 + kw
    b_ref:    (Cout, 1) f32
    mask_ref: (9, 1, L) f32, per-tap edge-validity mask (tiled per sample)
    returns   (Cout, L) f32
    """
    L = act.shape[1]
    taps = []
    for t in range(9):
        dy, dx = t // 3 - 1, t % 3 - 1
        off = dy * img_w + dx
        if off == 0:
            taps.append(act)                    # center tap: always valid
        else:
            # shifted[ci, l] = act[ci, l + off]; circular wrap / cross-sample
            # bleed is killed by the edge mask.
            shifted = pltpu.roll(act, shift=(-off) % L, axis=1)
            taps.append(shifted * mask_ref[t])
    stack = jnp.concatenate(taps, axis=0).astype(jnp.bfloat16)     # (9*Cin_pad, L)
    conv = jnp.dot(w_ref[...], stack, preferred_element_type=jnp.float32)
    return jnp.maximum(conv + b_ref[...], 0.0)


def _yolo_fused_kernel(x_ref, mask_ref, w1_ref, b1_ref, w2_ref, b2_ref,
                       wfc_ref, bfc_ref, o_ref, fc_buf, *, b_tile, hw, img_w):
    # One grid step == B_TILE samples packed on the lane axis.
    act0 = x_ref[...]                                              # (8,  L) f32
    act1 = _conv3x3_relu(act0, w1_ref, b1_ref, mask_ref, img_w)    # (16, L) f32
    act2 = _conv3x3_relu(act1, w2_ref, b2_ref, mask_ref, img_w)    # (32, L) f32

    # Repack (C, B*HW) -> (B, C*HW) sample-major flatten (PyTorch NCHW order)
    # using only aligned static ref slices, then one big-K fc matmul.
    act2_bf = act2.astype(jnp.bfloat16)
    c2 = act2_bf.shape[0]
    for b in range(b_tile):
        for c in range(c2):
            fc_buf[b:b + 1, c * hw:(c + 1) * hw] = \
                act2_bf[c:c + 1, b * hw:(b + 1) * hw]

    logits = jnp.dot(fc_buf[...], wfc_ref[...],
                     preferred_element_type=jnp.float32)           # (B, 128) f32
    o_ref[...] = logits + bfc_ref[...]


# ----------------------------------------------------------------------------
# One-time parameter preparation (outside the hot path)
# ----------------------------------------------------------------------------
def prepare_params(params, h=16, w=16, cin_pad=8, out_pad=128):
    hw = h * w
    cout1, cin1 = params["w1"].shape[0], params["w1"].shape[1]
    cout2, cin2 = params["w2"].shape[0], params["w2"].shape[1]
    n_cls = params["wfc"].shape[0]

    # conv weights: (Cout, Cin, KH, KW) -> (Cout, 9, Cin[_pad]) -> (Cout, 9*Cin_pad)
    w1 = jnp.transpose(params["w1"], (0, 2, 3, 1)).reshape(cout1, 9, cin1)
    w1 = jnp.pad(w1, ((0, 0), (0, 0), (0, cin_pad - cin1)))
    w1 = w1.reshape(cout1, 9 * cin_pad).astype(jnp.bfloat16)

    w2 = jnp.transpose(params["w2"], (0, 2, 3, 1)).reshape(cout2, 9 * cin2)
    w2 = w2.astype(jnp.bfloat16)

    # Per-tap edge-validity masks, (9, 1, HW) f32.
    p = jnp.arange(hw)
    y, x = p // w, p % w
    masks = []
    for t in range(9):
        dy, dx = t // 3 - 1, t % 3 - 1
        masks.append((y + dy >= 0) & (y + dy < h) & (x + dx >= 0) & (x + dx < w))
    mask = jnp.stack(masks).astype(jnp.float32).reshape(9, 1, hw)

    # fc: (10, C*HW) -> (C*HW, 128) bf16, output lanes zero-padded to 128.
    wfc = jnp.pad(params["wfc"].T, ((0, 0), (0, out_pad - n_cls))).astype(jnp.bfloat16)
    bfc = jnp.pad(params["bfc"], (0, out_pad - n_cls)).reshape(1, out_pad)
    bfc = bfc.astype(jnp.float32)

    return {
        "mask": mask,
        "w1": w1, "b1": params["b1"].reshape(cout1, 1).astype(jnp.float32),
        "w2": w2, "b2": params["b2"].reshape(cout2, 1).astype(jnp.float32),
        "wfc": wfc, "bfc": bfc,
    }


# ----------------------------------------------------------------------------
# Forward wrapper
# ----------------------------------------------------------------------------
def yolo_forward(x_nchw, prep, *, b_tile=4, num_classes=10):
    n, cin, h, w = x_nchw.shape
    hw = h * w
    cin_pad = prep["w1"].shape[1] // 9       # 8
    c2 = prep["w2"].shape[0]                 # 32
    kpad = prep["wfc"].shape[1]              # 128

    b_tile = min(b_tile, n)
    n_pad = ((n + b_tile - 1) // b_tile) * b_tile
    grid_n = n_pad // b_tile
    L = b_tile * hw

    # Wrapper glue only: lane-pack samples, zero-pad channels to 8 (and batch if needed).
    x2d = jnp.transpose(x_nchw, (1, 0, 2, 3)).reshape(cin, n * hw).astype(jnp.float32)
    x2d = jnp.pad(x2d, ((0, cin_pad - cin), (0, (n_pad - n) * hw)))

    # Edge masks tiled per sample across the B_TILE*HW lane axis.
    mask = jnp.tile(prep["mask"], (1, 1, b_tile))                  # (9, 1, L)

    kernel = functools.partial(_yolo_fused_kernel, b_tile=b_tile, hw=hw, img_w=w)

    out = pl.pallas_call(
        kernel,
        out_shape=jax.ShapeDtypeStruct((grid_n, b_tile, kpad), jnp.float32),
        grid=(grid_n,),
        in_specs=[
            pl.BlockSpec((cin_pad, L), lambda i: (0, i)),          # input samples
            pl.BlockSpec(mask.shape, lambda i: (0, 0, 0)),         # tap masks
            pl.BlockSpec(prep["w1"].shape, lambda i: (0, 0)),      # conv1 weight
            pl.BlockSpec(prep["b1"].shape, lambda i: (0, 0)),      # conv1 bias
            pl.BlockSpec(prep["w2"].shape, lambda i: (0, 0)),      # conv2 weight
            pl.BlockSpec(prep["b2"].shape, lambda i: (0, 0)),      # conv2 bias
            pl.BlockSpec(prep["wfc"].shape, lambda i: (0, 0)),     # fc weight (padded)
            pl.BlockSpec(prep["bfc"].shape, lambda i: (0, 0)),     # fc bias (padded)
        ],
        out_specs=pl.BlockSpec((None, b_tile, kpad), lambda i: (i, 0, 0)),
        scratch_shapes=[pltpu.VMEM((b_tile, c2 * hw), jnp.bfloat16)],
        compiler_params=pltpu.CompilerParams(
            dimension_semantics=("parallel",)),                    # v7x: 2 TCs
    )(x2d, mask, prep["w1"], prep["b1"], prep["w2"], prep["b2"],
      prep["wfc"], prep["bfc"])

    return out.reshape(n_pad, kpad)[:n, :num_classes]


# ----------------------------------------------------------------------------
# Params / reference / test
# ----------------------------------------------------------------------------
def init_params(key):
    ks = jax.random.split(key, 6)
    return {
        "w1": jax.random.normal(ks[0], (16, 3, 3, 3), jnp.float32) * 0.1,
        "b1": jax.random.normal(ks[1], (16,), jnp.float32) * 0.1,
        "w2": jax.random.normal(ks[2], (32, 16, 3, 3), jnp.float32) * 0.05,
        "b2": jax.random.normal(ks[3], (32,), jnp.float32) * 0.05,
        "wfc": jax.random.normal(ks[4], (10, 32 * 16 * 16), jnp.float32) * 0.01,
        "bfc": jax.random.normal(ks[5], (10,), jnp.float32) * 0.01,
    }


def reference_forward(x_nchw, params):
    # Pure-XLA reference mirroring the PyTorch graph (NCHW convs, f32).
    y = jax.lax.conv_general_dilated(
        x_nchw, params["w1"], (1, 1), ((1, 1), (1, 1)),
        dimension_numbers=("NCHW", "OIHW", "NCHW"))
    y = jax.nn.relu(y + params["b1"][None, :, None, None])
    y = jax.lax.conv_general_dilated(
        y, params["w2"], (1, 1), ((1, 1), (1, 1)),
        dimension_numbers=("NCHW", "OIHW", "NCHW"))
    y = jax.nn.relu(y + params["b2"][None, :, None, None])
    y = y.reshape(y.shape[0], -1)
    return y @ params["wfc"].T + params["bfc"]


if __name__ == "__main__":
    key = jax.random.PRNGKey(0)
    kx, kp = jax.random.split(key)
    # Spatial size must be 16x16 so 32*16*16 matches the fc input dim.
    # N=8 with B_TILE=4 -> grid of 2 steps (both v7x TensorCores get work).
    x = jax.random.normal(kx, (8, 3, 16, 16), jnp.float32)   # NCHW, like PyTorch
    params = init_params(kp)
    prep = prepare_params(params)                            # one-time weight prep

    fwd = jax.jit(yolo_forward)
    out = jax.block_until_ready(fwd(x, prep))
    ref = jax.block_until_ready(reference_forward(x, params))

    assert out.shape == (8, 10), out.shape
    max_err = float(jnp.max(jnp.abs(out - ref)))
    # Tolerance accounts for bf16 MXU operands (f32 accumulation everywhere).
    assert jnp.allclose(out, ref, atol=1e-2, rtol=2e-2), f"max_err={max_err}"
    print("KERNEL_OK")
</pallas_src>

<mosaic_0001>
module attributes {stable_mosaic.version = 11 : i64} {
  func.func @_yolo_fused_kernel(%arg0: i32, %arg1: memref<8x1024xf32, #tpu.memory_space<vmem>>, %arg2: memref<9x1x1024xf32, #tpu.memory_space<vmem>>, %arg3: memref<16x72xbf16, #tpu.memory_space<vmem>>, %arg4: memref<16x1xf32, #tpu.memory_space<vmem>>, %arg5: memref<32x144xbf16, #tpu.memory_space<vmem>>, %arg6: memref<32x1xf32, #tpu.memory_space<vmem>>, %arg7: memref<8192x128xbf16, #tpu.memory_space<vmem>>, %arg8: memref<1x128xf32, #tpu.memory_space<vmem>>, %arg9: memref<1x4x128xf32, #tpu.memory_space<vmem>>, %arg10: memref<4x8192xbf16, #tpu.memory_space<vmem>>) attributes {dimension_semantics = [#tpu.dimension_semantics<parallel>], iteration_bounds = array<i64: 2>, scalar_prefetch = 0 : i64, scratch_operands = 1 : i64, tpu.core_type = #tpu.core_type<tc>, window_params = [{transform_indices = @transform_0, window_bounds = array<i64: 8, 1024>}, {pipeline_mode = #tpu.pipeline_mode<synchronous>, transform_indices = @transform_1, window_bounds = array<i64: 9, 1, 1024>}, {pipeline_mode = #tpu.pipeline_mode<synchronous>, transform_indices = @transform_2, window_bounds = array<i64: 16, 72>}, {pipeline_mode = #tpu.pipeline_mode<synchronous>, transform_indices = @transform_3, window_bounds = array<i64: 16, 1>}, {pipeline_mode = #tpu.pipeline_mode<synchronous>, transform_indices = @transform_4, window_bounds = array<i64: 32, 144>}, {pipeline_mode = #tpu.pipeline_mode<synchronous>, transform_indices = @transform_5, window_bounds = array<i64: 32, 1>}, {pipeline_mode = #tpu.pipeline_mode<synchronous>, transform_indices = @transform_6, window_bounds = array<i64: 8192, 128>}, {pipeline_mode = #tpu.pipeline_mode<synchronous>, transform_indices = @transform_7, window_bounds = array<i64: 1, 128>}, {transform_indices = @transform_8, window_bounds = array<i64: 1, 4, 128>}]} {
    %c0 = arith.constant 0 : index
    %c0_0 = arith.constant 0 : index
    %0 = vector.load %arg1[%c0, %c0_0] : memref<8x1024xf32, #tpu.memory_space<vmem>>, vector<8x1024xf32>
    %c17_i32 = arith.constant 17 : i32
    %1 = tpu.dynamic_rotate %0 by %c17_i32 dim 1 : vector<8x1024xf32>, i32 -> vector<8x1024xf32>
    %c0_1 = arith.constant 0 : index
    %c0_2 = arith.constant 0 : index
    %c0_3 = arith.constant 0 : index
    %2 = vector.load %arg2[%c0_1, %c0_2, %c0_3] : memref<9x1x1024xf32, #tpu.memory_space<vmem>>, vector<1x1x1024xf32>
    %3 = vector.shape_cast %2 : vector<1x1x1024xf32> to vector<1x1024xf32>
    %4 = vector.broadcast %3 : vector<1x1024xf32> to vector<8x1024xf32>
    %5 = arith.mulf %1, %4 : vector<8x1024xf32>
    %c16_i32 = arith.constant 16 : i32
    %6 = tpu.dynamic_rotate %0 by %c16_i32 dim 1 : vector<8x1024xf32>, i32 -> vector<8x1024xf32>
    %c1 = arith.constant 1 : index
    %c0_4 = arith.constant 0 : index
    %c0_5 = arith.constant 0 : index
    %7 = vector.load %arg2[%c1, %c0_4, %c0_5] : memref<9x1x1024xf32, #tpu.memory_space<vmem>>, vector<1x1x1024xf32>
    %8 = vector.shape_cast %7 : vector<1x1x1024xf32> to vector<1x1024xf32>
    %9 = vector.broadcast %8 : vector<1x1024xf32> to vector<8x1024xf32>
    %10 = arith.mulf %6, %9 : vector<8x1024xf32>
    %c15_i32 = arith.constant 15 : i32
    %11 = tpu.dynamic_rotate %0 by %c15_i32 dim 1 : vector<8x1024xf32>, i32 -> vector<8x1024xf32>
    %c2 = arith.constant 2 : index
    %c0_6 = arith.constant 0 : index
    %c0_7 = arith.constant 0 : index
    %12 = vector.load %arg2[%c2, %c0_6, %c0_7] : memref<9x1x1024xf32, #tpu.memory_space<vmem>>, vector<1x1x1024xf32>
    %13 = vector.shape_cast %12 : vector<1x1x1024xf32> to vector<1x1024xf32>
    %14 = vector.broadcast %13 : vector<1x1024xf32> to vector<8x1024xf32>
    %15 = arith.mulf %11, %14 : vector<8x1024xf32>
    %c1_i32 = arith.constant 1 : i32
    %16 = tpu.dynamic_rotate %0 by %c1_i32 dim 1 : vector<8x1024xf32>, i32 -> vector<8x1024xf32>
    %c3 = arith.constant 3 : index
    %c0_8 = arith.constant 0 : index
    %c0_9 = arith.constant 0 : index
    %17 = vector.load %arg2[%c3, %c0_8, %c0_9] : memref<9x1x1024xf32, #tpu.memory_space<vmem>>, vector<1x1x1024xf32>
    %18 = vector.shape_cast %17 : vector<1x1x1024xf32> to vector<1x1024xf32>
    %19 = vector.broadcast %18 : vector<1x1024xf32> to vector<8x1024xf32>
    %20 = arith.mulf %16, %19 : vector<8x1024xf32>
    %c1023_i32 = arith.constant 1023 : i32
    %21 = tpu.dynamic_rotate %0 by %c1023_i32 dim 1 : vector<8x1024xf32>, i32 -> vector<8x1024xf32>
    %c5 = arith.constant 5 : index
    %c0_10 = arith.constant 0 : index
    %c0_11 = arith.constant 0 : index
    %22 = vector.load %arg2[%c5, %c0_10, %c0_11] : memref<9x1x1024xf32, #tpu.memory_space<vmem>>, vector<1x1x1024xf32>
    %23 = vector.shape_cast %22 : vector<1x1x1024xf32> to vector<1x1024xf32>
    %24 = vector.broadcast %23 : vector<1x1024xf32> to vector<8x1024xf32>
    %25 = arith.mulf %21, %24 : vector<8x1024xf32>
    %c1009_i32 = arith.constant 1009 : i32
    %26 = tpu.dynamic_rotate %0 by %c1009_i32 dim 1 : vector<8x1024xf32>, i32 -> vector<8x1024xf32>
    %c6 = arith.constant 6 : index
    %c0_12 = arith.constant 0 : index
    %c0_13 = arith.constant 0 : index
    %27 = vector.load %arg2[%c6, %c0_12, %c0_13] : memref<9x1x1024xf32, #tpu.memory_space<vmem>>, vector<1x1x1024xf32>
    %28 = vector.shape_cast %27 : vector<1x1x1024xf32> to vector<1x1024xf32>
    %29 = vector.broadcast %28 : vector<1x1024xf32> to vector<8x1024xf32>
    %30 = arith.mulf %26, %29 : vector<8x1024xf32>
    %c1008_i32 = arith.constant 1008 : i32
    %31 = tpu.dynamic_rotate %0 by %c1008_i32 dim 1 : vector<8x1024xf32>, i32 -> vector<8x1024xf32>
    %c7 = arith.constant 7 : index
    %c0_14 = arith.constant 0 : index
    %c0_15 = arith.constant 0 : index
    %32 = vector.load %arg2[%c7, %c0_14, %c0_15] : memref<9x1x1024xf32, #tpu.memory_space<vmem>>, vector<1x1x1024xf32>
    %33 = vector.shape_cast %32 : vector<1x1x1024xf32> to vector<1x1024xf32>
    %34 = vector.broadcast %33 : vector<1x1024xf32> to vector<8x1024xf32>
    %35 = arith.mulf %31, %34 : vector<8x1024xf32>
    %c1007_i32 = arith.constant 1007 : i32
    %36 = tpu.dynamic_rotate %0 by %c1007_i32 dim 1 : vector<8x1024xf32>, i32 -> vector<8x1024xf32>
    %c8 = arith.constant 8 : index
    %c0_16 = arith.constant 0 : index
    %c0_17 = arith.constant 0 : index
    %37 = vector.load %arg2[%c8, %c0_16, %c0_17] : memref<9x1x1024xf32, #tpu.memory_space<vmem>>, vector<1x1x1024xf32>
    %38 = vector.shape_cast %37 : vector<1x1x1024xf32> to vector<1x1024xf32>
    %39 = vector.broadcast %38 : vector<1x1024xf32> to vector<8x1024xf32>
    %40 = arith.mulf %36, %39 : vector<8x1024xf32>
    %41 = tpu.concatenate %5, %10, %15, %20, %0, %25, %30, %35, %40 in 0 : vector<8x1024xf32>, vector<8x1024xf32>, vector<8x1024xf32>, vector<8x1024xf32>, vector<8x1024xf32>, vector<8x1024xf32>, vector<8x1024xf32>, vector<8x1024xf32>, vector<8x1024xf32> -> vector<72x1024xf32>
    %42 = arith.truncf %41 : vector<72x1024xf32> to vector<72x1024xbf16>
    %c0_18 = arith.constant 0 : index
    %c0_19 = arith.constant 0 : index
    %43 = vector.load %arg3[%c0_18, %c0_19] : memref<16x72xbf16, #tpu.memory_space<vmem>>, vector<16x72xbf16>
    %cst = arith.constant dense<0.000000e+00> : vector<16x1024xf32>
    %44 = tpu.matmul %43, %42, %cst {dimension_numbers = #tpu.dot_dimension_numbers<[1], [0], [0], [1], [0, 0, 1, 1], [], []>} : vector<16x72xbf16>, vector<72x1024xbf16>, vector<16x1024xf32> -> vector<16x1024xf32>
    %c0_20 = arith.constant 0 : index
    %c0_21 = arith.constant 0 : index
    %45 = vector.load %arg4[%c0_20, %c0_21] : memref<16x1xf32, #tpu.memory_space<vmem>>, vector<16x1xf32>
    %46 = vector.broadcast %45 : vector<16x1xf32> to vector<16x1024xf32>
    %47 = arith.addf %44, %46 : vector<16x1024xf32>
    %cst_22 = arith.constant 0.000000e+00 : f32
    %48 = vector.broadcast %cst_22 : f32 to vector<16x1024xf32>
    %49 = arith.maximumf %47, %48 : vector<16x1024xf32>
    %c17_i32_23 = arith.constant 17 : i32
    %50 = tpu.dynamic_rotate %49 by %c17_i32_23 dim 1 : vector<16x1024xf32>, i32 -> vector<16x1024xf32>
    %c0_24 = arith.constant 0 : index
    %c0_25 = arith.constant 0 : index
    %c0_26 = arith.constant 0 : index
    %51 = vector.load %arg2[%c0_24, %c0_25, %c0_26] : memref<9x1x1024xf32, #tpu.memory_space<vmem>>, vector<1x1x1024xf32>
    %52 = vector.shape_cast %51 : vector<1x1x1024xf32> to vector<1x1024xf32>
    %53 = vector.broadcast %52 : vector<1x1024xf32> to vector<16x1024xf32>
    %54 = arith.mulf %50, %53 : vector<16x1024xf32>
    %c16_i32_27 = arith.constant 16 : i32
    %55 = tpu.dynamic_rotate %49 by %c16_i32_27 dim 1 : vector<16x1024xf32>, i32 -> vector<16x1024xf32>
    %c1_28 = arith.constant 1 : index
    %c0_29 = arith.constant 0 : index
    %c0_30 = arith.constant 0 : index
    %56 = vector.load %arg2[%c1_28, %c0_29, %c0_30] : memref<9x1x1024xf32, #tpu.memory_space<vmem>>, vector<1x1x1024xf32>
    %57 = vector.shape_cast %56 : vector<1x1x1024xf32> to vector<1x1024xf32>
    %58 = vector.broadcast %57 : vector<1x1024xf32> to vector<16x1024xf32>
    %59 = arith.mulf %55, %58 : vector<16x1024xf32>
    %c15_i32_31 = arith.constant 15 : i32
    %60 = tpu.dynamic_rotate %49 by %c15_i32_31 dim 1 : vector<16x1024xf32>, i32 -> vector<16x1024xf32>
    %c2_32 = arith.constant 2 : index
    %c0_33 = arith.constant 0 : index
    %c0_34 = arith.constant 0 : index
    %61 = vector.load %arg2[%c2_32, %c0_33, %c0_34] : memref<9x1x1024xf32, #tpu.memory_space<vmem>>, vector<1x1x1024xf32>
    %62 = vector.shape_cast %61 : vector<1x1x1024xf32> to vector<1x1024xf32>
    %63 = vector.broadcast %62 : vector<1x1024xf32> to vector<16x1024xf32>
    %64 = arith.mulf %60, %63 : vector<16x1024xf32>
    %c1_i32_35 = arith.constant 1 : i32
    %65 = tpu.dynamic_rotate %49 by %c1_i32_35 dim 1 : vector<16x1024xf32>, i32 -> vector<16x1024xf32>
    %c3_36 = arith.constant 3 : index
    %c0_37 = arith.constant 0 : index
    %c0_38 = arith.constant 0 : index
    %66 = vector.load %arg2[%c3_36, %c0_37, %c0_38] : memref<9x1x1024xf32, #tpu.memory_space<vmem>>, vector<1x1x1024xf32>
    %67 = vector.shape_cast %66 : vector<1x1x1024xf32> to vector<1x1024xf32>
    %68 = vector.broadcast %67 : vector<1x1024xf32> to vector<16x1024xf32>
    %69 = arith.mulf %65, %68 : vector<16x1024xf32>
    %c1023_i32_39 = arith.constant 1023 : i32
    %70 = tpu.dynamic_rotate %49 by %c1023_i32_39 dim 1 : vector<16x1024xf32>, i32 -> vector<16x1024xf32>
    %c5_40 = arith.constant 5 : index
    %c0_41 = arith.constant 0 : index
    %c0_42 = arith.constant 0 : index
    %71 = vector.load %arg2[%c5_40, %c0_41, %c0_42] : memref<9x1x1024xf32, #tpu.memory_space<vmem>>, vector<1x1x1024xf32>
    %72 = vector.shape_cast %71 : vector<1x1x1024xf32> to vector<1x1024xf32>
    %73 = vector.broadcast %72 : vector<1x1024xf32> to vector<16x1024xf32>
    %74 = arith.mulf %70, %73 : vector<16x1024xf32>
    %c1009_i32_43 = arith.constant 1009 : i32
    %75 = tpu.dynamic_rotate %49 by %c1009_i32_43 dim 1 : vector<16x1024xf32>, i32 -> vector<16x1024xf32>
    %c6_44 = arith.constant 6 : index
    %c0_45 = arith.constant 0 : index
    %c0_46 = arith.constant 0 : index
    %76 = vector.load %arg2[%c6_44, %c0_45, %c0_46] : memref<9x1x1024xf32, #tpu.memory_space<vmem>>, vector<1x1x1024xf32>
    %77 = vector.shape_cast %76 : vector<1x1x1024xf32> to vector<1x1024xf32>
    %78 = vector.broadcast %77 : vector<1x1024xf32> to vector<16x1024xf32>
    %79 = arith.mulf %75, %78 : vector<16x1024xf32>
    %c1008_i32_47 = arith.constant 1008 : i32
    %80 = tpu.dynamic_rotate %49 by %c1008_i32_47 dim 1 : vector<16x1024xf32>, i32 -> vector<16x1024xf32>
    %c7_48 = arith.constant 7 : index
    %c0_49 = arith.constant 0 : index
    %c0_50 = arith.constant 0 : index
    %81 = vector.load %arg2[%c7_48, %c0_49, %c0_50] : memref<9x1x1024xf32, #tpu.memory_space<vmem>>, vector<1x1x1024xf32>
    %82 = vector.shape_cast %81 : vector<1x1x1024xf32> to vector<1x1024xf32>
    %83 = vector.broadcast %82 : vector<1x1024xf32> to vector<16x1024xf32>
    %84 = arith.mulf %80, %83 : vector<16x1024xf32>
    %c1007_i32_51 = arith.constant 1007 : i32
    %85 = tpu.dynamic_rotate %49 by %c1007_i32_51 dim 1 : vector<16x1024xf32>, i32 -> vector<16x1024xf32>
    %c8_52 = arith.constant 8 : index
    %c0_53 = arith.constant 0 : index
    %c0_54 = arith.constant 0 : index
    %86 = vector.load %arg2[%c8_52, %c0_53, %c0_54] : memref<9x1x1024xf32, #tpu.memory_space<vmem>>, vector<1x1x1024xf32>
    %87 = vector.shape_cast %86 : vector<1x1x1024xf32> to vector<1x1024xf32>
    %88 = vector.broadcast %87 : vector<1x1024xf32> to vector<16x1024xf32>
    %89 = arith.mulf %85, %88 : vector<16x1024xf32>
    %90 = tpu.concatenate %54, %59, %64, %69, %49, %74, %79, %84, %89 in 0 : vector<16x1024xf32>, vector<16x1024xf32>, vector<16x1024xf32>, vector<16x1024xf32>, vector<16x1024xf32>, vector<16x1024xf32>, vector<16x1024xf32>, vector<16x1024xf32>, vector<16x1024xf32> -> vector<144x1024xf32>
    %91 = arith.truncf %90 : vector<144x1024xf32> to vector<144x1024xbf16>
    %c0_55 = arith.constant 0 : index
    %c0_56 = arith.constant 0 : index
    %92 = vector.load %arg5[%c0_55, %c0_56] : memref<32x144xbf16, #tpu.memory_space<vmem>>, vector<32x144xbf16>
    %cst_57 = arith.constant dense<0.000000e+00> : vector<32x1024xf32>
    %93 = tpu.matmul %92, %91, %cst_57 {dimension_numbers = #tpu.dot_dimension_numbers<[1], [0], [0], [1], [0, 0, 1, 1], [], []>} : vector<32x144xbf16>, vector<144x1024xbf16>, vector<32x1024xf32> -> vector<32x1024xf32>
    %c0_58 = arith.constant 0 : index
    %c0_59 = arith.constant 0 : index
    %94 = vector.load %arg6[%c0_58, %c0_59] : memref<32x1xf32, #tpu.memory_space<vmem>>, vector<32x1xf32>
    %95 = vector.broadcast %94 : vector<32x1xf32> to vector<32x1024xf32>
    %96 = arith.addf %93, %95 : vector<32x1024xf32>
    %cst_60 = arith.constant 0.000000e+00 : f32
    %97 = vector.broadcast %cst_60 : f32 to vector<32x1024xf32>
    %98 = arith.maximumf %96, %97 : vector<32x1024xf32>
    %99 = arith.truncf %98 : vector<32x1024xf32> to vector<32x1024xbf16>
    %100 = vector.extract_strided_slice %99 {offsets = [0, 0], sizes = [1, 256], strides = [1, 1]} : vector<32x1024xbf16> to vector<1x256xbf16>
    %c0_61 = arith.constant 0 : index
    %c0_62 = arith.constant 0 : index
    %101 = vector.load %arg10[%c0_61, %c0_62] : memref<4x8192xbf16, #tpu.memory_space<vmem>>, vector<1x256xbf16>
    tpu.vector_store %arg10[%c0_61, %c0_62], %100 {strides = array<i32>} : memref<4x8192xbf16, #tpu.memory_space<vmem>>, vector<1x256xbf16>,
    %102 = vector.extract_strided_slice %99 {offsets = [1, 0], sizes = [1, 256], strides = [1, 1]} : vector<32x1024xbf16> to vector<1x256xbf16>
    %c0_63 = arith.constant 0 : index
    %c256 = arith.constant 256 : index
    %103 = vector.load %arg10[%c0_63, %c256] : memref<4x8192xbf16, #tpu.memory_space<vmem>>, vector<1x256xbf16>
    tpu.vector_store %arg10[%c0_63, %c256], %102 {strides = array<i32>} : memref<4x8192xbf16, #tpu.memory_space<vmem>>, vector<1x256xbf16>,
    %104 = vector.extract_strided_slice %99 {offsets = [2, 0], sizes = [1, 256], strides = [1, 1]} : vector<32x1024xbf16> to vector<1x256xbf16>
    %c0_64 = arith.constant 0 : index
    %c512 = arith.constant 512 : index
    %105 = vector.load %arg10[%c0_64, %c512] : memref<4x8192xbf16, #tpu.memory_space<vmem>>, vector<1x256xbf16>
    tpu.vector_store %arg10[%c0_64, %c512], %104 {strides = array<i32>} : memref<4x8192xbf16, #tpu.memory_space<vmem>>, vector<1x256xbf16>,
    %106 = vector.extract_strided_slice %99 {offsets = [3, 0], sizes = [1, 256], strides = [1, 1]} : vector<32x1024xbf16> to vector<1x256xbf16>
    %c0_65 = arith.constant 0 : index
    %c768 = arith.constant 768 : index
    %107 = vector.load %arg10[%c0_65, %c768] : memref<4x8192xbf16, #tpu.memory_space<vmem>>, vector<1x256xbf16>
    tpu.vector_store %arg10[%c0_65, %c768], %106 {strides = array<i32>} : memref<4x8192xbf16, #tpu.memory_space<vmem>>, vector<1x256xbf16>,
    %108 = vector.extract_strided_slice %99 {offsets = [4, 0], sizes = [1, 256], strides = [1, 1]} : vector<32x1024xbf16> to vector<1x256xbf16>
    %c0_66 = arith.constant 0 : index
    %c1024 = arith.constant 1024 : index
    %109 = vector.load %arg10[%c0_66, %c1024] : memref<4x8192xbf16, #tpu.memory_space<vmem>>, vector<1x256xbf16>
    tpu.vector_store %arg10[%c0_66, %c1024], %108 {strides = array<i32>} : memref<4x8192xbf16, #tpu.memory_space<vmem>>, vector<1x256xbf16>,
    %110 = vector.extract_strided_slice %99 {offsets = [5, 0], sizes = [1, 256], strides = [1, 1]} : vector<32x1024xbf16> to vector<1x256xbf16>
    %c0_67 = arith.constant 0 : index
    %c1280 = arith.constant 1280 : index
    %111 = vector.load %arg10[%c0_67, %c1280] : memref<4x8192xbf16, #tpu.memory_space<vmem>>, vector<1x256xbf16>
    tpu.vector_store %arg10[%c0_67, %c1280], %110 {strides = array<i32>} : memref<4x8192xbf16, #tpu.memory_space<vmem>>, vector<1x256xbf16>,
    %112 = vector.extract_strided_slice %99 {offsets = [6, 0], sizes = [1, 256], strides = [1, 1]} : vector<32x1024xbf16> to vector<1x256xbf16>
    %c0_68 = arith.constant 0 : index
    %c1536 = arith.constant 1536 : index
    %113 = vector.load %arg10[%c0_68, %c1536] : memref<4x8192xbf16, #tpu.memory_space<vmem>>, vector<1x256xbf16>
    tpu.vector_store %arg10[%c0_68, %c1536], %112 {strides = array<i32>} : memref<4x8192xbf16, #tpu.memory_space<vmem>>, vector<1x256xbf16>,
    %114 = vector.extract_strided_slice %99 {offsets = [7, 0], sizes = [1, 256], strides = [1, 1]} : vector<32x1024xbf16> to vector<1x256xbf16>
    %c0_69 = arith.constant 0 : index
    %c1792 = arith.constant 1792 : index
    %115 = vector.load %arg10[%c0_69, %c1792] : memref<4x8192xbf16, #tpu.memory_space<vmem>>, vector<1x256xbf16>
    tpu.vector_store %arg10[%c0_69, %c1792], %114 {strides = array<i32>} : memref<4x8192xbf16, #tpu.memory_space<vmem>>, vector<1x256xbf16>,
    %116 = vector.extract_strided_slice %99 {offsets = [8, 0], sizes = [1, 256], strides = [1, 1]} : vector<32x1024xbf16> to vector<1x256xbf16>
    %c0_70 = arith.constant 0 : index
    %c2048 = arith.constant 2048 : index
    %117 = vector.load %arg10[%c0_70, %c2048] : memref<4x8192xbf16, #tpu.memory_space<vmem>>, vector<1x256xbf16>
    tpu.vector_store %arg10[%c0_70, %c2048], %116 {strides = array<i32>} : memref<4x8192xbf16, #tpu.memory_space<vmem>>, vector<1x256xbf16>,
    %118 = vector.extract_strided_slice %99 {offsets = [9, 0], sizes = [1, 256], strides = [1, 1]} : vector<32x1024xbf16> to vector<1x256xbf16>
    %c0_71 = arith.constant 0 : index
    %c2304 = arith.constant 2304 : index
    %119 = vector.load %arg10[%c0_71, %c2304] : memref<4x8192xbf16, #tpu.memory_space<vmem>>, vector<1x256xbf16>
    tpu.vector_store %arg10[%c0_71, %c2304], %118 {strides = array<i32>} : memref<4x8192xbf16, #tpu.memory_space<vmem>>, vector<1x256xbf16>,
    %120 = vector.extract_strided_slice %99 {offsets = [10, 0], sizes = [1, 256], strides = [1, 1]} : vector<32x1024xbf16> to vector<1x256xbf16>
    %c0_72 = arith.constant 0 : index
    %c2560 = arith.constant 2560 : index
    %121 = vector.load %arg10[%c0_72, %c2560] : memref<4x8192xbf16, #tpu.memory_space<vmem>>, vector<1x256xbf16>
    tpu.vector_store %arg10[%c0_72, %c2560], %120 {strides = array<i32>} : memref<4x8192xbf16, #tpu.memory_space<vmem>>, vector<1x256xbf16>,
    %122 = vector.extract_strided_slice %99 {offsets = [11, 0], sizes = [1, 256], strides = [1, 1]} : vector<32x1024xbf16> to vector<1x256xbf16>
    %c0_73 = arith.constant 0 : index
    %c2816 = arith.constant 2816 : index
    %123 = vector.load %arg10[%c0_73, %c2816] : memref<4x8192xbf16, #tpu.memory_space<vmem>>, vector<1x256xbf16>
    tpu.vector_store %arg10[%c0_73, %c2816], %122 {strides = array<i32>} : memref<4x8192xbf16, #tpu.memory_space<vmem>>, vector<1x256xbf16>,
    %124 = vector.extract_strided_slice %99 {offsets = [12, 0], sizes = [1, 256], strides = [1, 1]} : vector<32x1024xbf16> to vector<1x256xbf16>
    %c0_74 = arith.constant 0 : index
    %c3072 = arith.constant 3072 : index
    %125 = vector.load %arg10[%c0_74, %c3072] : memref<4x8192xbf16, #tpu.memory_space<vmem>>, vector<1x256xbf16>
    tpu.vector_store %arg10[%c0_74, %c3072], %124 {strides = array<i32>} : memref<4x8192xbf16, #tpu.memory_space<vmem>>, vector<1x256xbf16>,
    %126 = vector.extract_strided_slice %99 {offsets = [13, 0], sizes = [1, 256], strides = [1, 1]} : vector<32x1024xbf16> to vector<1x256xbf16>
    %c0_75 = arith.constant 0 : index
    %c3328 = arith.constant 3328 : index
    %127 = vector.load %arg10[%c0_75, %c3328] : memref<4x8192xbf16, #tpu.memory_space<vmem>>, vector<1x256xbf16>
    tpu.vector_store %arg10[%c0_75, %c3328], %126 {strides = array<i32>} : memref<4x8192xbf16, #tpu.memory_space<vmem>>, vector<1x256xbf16>,
    %128 = vector.extract_strided_slice %99 {offsets = [14, 0], sizes = [1, 256], strides = [1, 1]} : vector<32x1024xbf16> to vector<1x256xbf16>
    %c0_76 = arith.constant 0 : index
    %c3584 = arith.constant 3584 : index
    %129 = vector.load %arg10[%c0_76, %c3584] : memref<4x8192xbf16, #tpu.memory_space<vmem>>, vector<1x256xbf16>
    tpu.vector_store %arg10[%c0_76, %c3584], %128 {strides = array<i32>} : memref<4x8192xbf16, #tpu.memory_space<vmem>>, vector<1x256xbf16>,
    %130 = vector.extract_strided_slice %99 {offsets = [15, 0], sizes = [1, 256], strides = [1, 1]} : vector<32x1024xbf16> to vector<1x256xbf16>
    %c0_77 = arith.constant 0 : index
    %c3840 = arith.constant 3840 : index
    %131 = vector.load %arg10[%c0_77, %c3840] : memref<4x8192xbf16, #tpu.memory_space<vmem>>, vector<1x256xbf16>
    tpu.vector_store %arg10[%c0_77, %c3840], %130 {strides = array<i32>} : memref<4x8192xbf16, #tpu.memory_space<vmem>>, vector<1x256xbf16>,
    %132 = vector.extract_strided_slice %99 {offsets = [16, 0], sizes = [1, 256], strides = [1, 1]} : vector<32x1024xbf16> to vector<1x256xbf16>
    %c0_78 = arith.constant 0 : index
    %c4096 = arith.constant 4096 : index
    %133 = vector.load %arg10[%c0_78, %c4096] : memref<4x8192xbf16, #tpu.memory_space<vmem>>, vector<1x256xbf16>
    tpu.vector_store %arg10[%c0_78, %c4096], %132 {strides = array<i32>} : memref<4x8192xbf16, #tpu.memory_space<vmem>>, vector<1x256xbf16>,
    %134 = vector.extract_strided_slice %99 {offsets = [17, 0], sizes = [1, 256], strides = [1, 1]} : vector<32x1024xbf16> to vector<1x256xbf16>
    %c0_79 = arith.constant 0 : index
    %c4352 = arith.constant 4352 : index
    %135 = vector.load %arg10[%c0_79, %c4352] : memref<4x8192xbf16, #tpu.memory_space<vmem>>, vector<1x256xbf16>
    tpu.vector_store %arg10[%c0_79, %c4352], %134 {strides = array<i32>} : memref<4x8192xbf16, #tpu.memory_space<vmem>>, vector<1x256xbf16>,
    %136 = vector.extract_strided_slice %99 {offsets = [18, 0], sizes = [1, 256], strides = [1, 1]} : vector<32x1024xbf16> to vector<1x256xbf16>
    %c0_80 = arith.constant 0 : index
    %c4608 = arith.constant 4608 : index
    %137 = vector.load %arg10[%c0_80, %c4608] : memref<4x8192xbf16, #tpu.memory_space<vmem>>, vector<1x256xbf16>
    tpu.vector_store %arg10[%c0_80, %c4608], %136 {strides = array<i32>} : memref<4x8192xbf16, #tpu.memory_space<vmem>>, vector<1x256xbf16>,
    %138 = vector.extract_strided_slice %99 {offsets = [19, 0], sizes = [1, 256], strides = [1, 1]} : vector<32x1024xbf16> to vector<1x256xbf16>
    %c0_81 = arith.constant 0 : index
    %c4864 = arith.constant 4864 : index
    %139 = vector.load %arg10[%c0_81, %c4864] : memref<4x8192xbf16, #tpu.memory_space<vmem>>, vector<1x256xbf16>
    tpu.vector_store %arg10[%c0_81, %c4864], %138 {strides = array<i32>} : memref<4x8192xbf16, #tpu.memory_space<vmem>>, vector<1x256xbf16>,
    %140 = vector.extract_strided_slice %99 {offsets = [20, 0], sizes = [1, 256], strides = [1, 1]} : vector<32x1024xbf16> to vector<1x256xbf16>
    %c0_82 = arith.constant 0 : index
    %c5120 = arith.constant 5120 : index
    %141 = vector.load %arg10[%c0_82, %c5120] : memref<4x8192xbf16, #tpu.memory_space<vmem>>, vector<1x256xbf16>
    tpu.vector_store %arg10[%c0_82, %c5120], %140 {strides = array<i32>} : memref<4x8192xbf16, #tpu.memory_space<vmem>>, vector<1x256xbf16>,
    %142 = vector.extract_strided_slice %99 {offsets = [21, 0], sizes = [1, 256], strides = [1, 1]} : vector<32x1024xbf16> to vector<1x256xbf16>
    %c0_83 = arith.constant 0 : index
    %c5376 = arith.constant 5376 : index
    %143 = vector.load %arg10[%c0_83, %c5376] : memref<4x8192xbf16, #tpu.memory_space<vmem>>, vector<1x256xbf16>
    tpu.vector_store %arg10[%c0_83, %c5376], %142 {strides = array<i32>} : memref<4x8192xbf16, #tpu.memory_space<vmem>>, vector<1x256xbf16>,
    %144 = vector.extract_strided_slice %99 {offsets = [22, 0], sizes = [1, 256], strides = [1, 1]} : vector<32x1024xbf16> to vector<1x256xbf16>
    %c0_84 = arith.constant 0 : index
    %c5632 = arith.constant 5632 : index
    %145 = vector.load %arg10[%c0_84, %c5632] : memref<4x8192xbf16, #tpu.memory_space<vmem>>, vector<1x256xbf16>
    tpu.vector_store %arg10[%c0_84, %c5632], %144 {strides = array<i32>} : memref<4x8192xbf16, #tpu.memory_space<vmem>>, vector<1x256xbf16>,
    %146 = vector.extract_strided_slice %99 {offsets = [23, 0], sizes = [1, 256], strides = [1, 1]} : vector<32x1024xbf16> to vector<1x256xbf16>
    %c0_85 = arith.constant 0 : index
    %c5888 = arith.constant 5888 : index
    %147 = vector.load %arg10[%c0_85, %c5888] : memref<4x8192xbf16, #tpu.memory_space<vmem>>, vector<1x256xbf16>
    tpu.vector_store %arg10[%c0_85, %c5888], %146 {strides = array<i32>} : memref<4x8192xbf16, #tpu.memory_space<vmem>>, vector<1x256xbf16>,
    %148 = vector.extract_strided_slice %99 {offsets = [24, 0], sizes = [1, 256], strides = [1, 1]} : vector<32x1024xbf16> to vector<1x256xbf16>
    %c0_86 = arith.constant 0 : index
    %c6144 = arith.constant 6144 : index
    %149 = vector.load %arg10[%c0_86, %c6144] : memref<4x8192xbf16, #tpu.memory_space<vmem>>, vector<1x256xbf16>
    tpu.vector_store %arg10[%c0_86, %c6144], %148 {strides = array<i32>} : memref<4x8192xbf16, #tpu.memory_space<vmem>>, vector<1x256xbf16>,
    %150 = vector.extract_strided_slice %99 {offsets = [25, 0], sizes = [1, 256], strides = [1, 1]} : vector<32x1024xbf16> to vector<1x256xbf16>
    %c0_87 = arith.constant 0 : index
    %c6400 = arith.constant 6400 : index
    %151 = vector.load %arg10[%c0_87, %c6400] : memref<4x8192xbf16, #tpu.memory_space<vmem>>, vector<1x256xbf16>
    tpu.vector_store %arg10[%c0_87, %c6400], %150 {strides = array<i32>} : memref<4x8192xbf16, #tpu.memory_space<vmem>>, vector<1x256xbf16>,
    %152 = vector.extract_strided_slice %99 {offsets = [26, 0], sizes = [1, 256], strides = [1, 1]} : vector<32x1024xbf16> to vector<1x256xbf16>
    %c0_88 = arith.constant 0 : index
    %c6656 = arith.constant 6656 : index
    %153 = vector.load %arg10[%c0_88, %c6656] : memref<4x8192xbf16, #tpu.memory_space<vmem>>, vector<1x256xbf16>
    tpu.vector_store %arg10[%c0_88, %c6656], %152 {strides = array<i32>} : memref<4x8192xbf16, #tpu.memory_space<vmem>>, vector<1x256xbf16>,
    %154 = vector.extract_strided_slice %99 {offsets = [27, 0], sizes = [1, 256], strides = [1, 1]} : vector<32x1024xbf16> to vector<1x256xbf16>
    %c0_89 = arith.constant 0 : index
    %c6912 = arith.constant 6912 : index
    %155 = vector.load %arg10[%c0_89, %c6912] : memref<4x8192xbf16, #tpu.memory_space<vmem>>, vector<1x256xbf16>
    tpu.vector_store %arg10[%c0_89, %c6912], %154 {strides = array<i32>} : memref<4x8192xbf16, #tpu.memory_space<vmem>>, vector<1x256xbf16>,
    %156 = vector.extract_strided_slice %99 {offsets = [28, 0], sizes = [1, 256], strides = [1, 1]} : vector<32x1024xbf16> to vector<1x256xbf16>
    %c0_90 = arith.constant 0 : index
    %c7168 = arith.constant 7168 : index
    %157 = vector.load %arg10[%c0_90, %c7168] : memref<4x8192xbf16, #tpu.memory_space<vmem>>, vector<1x256xbf16>
    tpu.vector_store %arg10[%c0_90, %c7168], %156 {strides = array<i32>} : memref<4x8192xbf16, #tpu.memory_space<vmem>>, vector<1x256xbf16>,
    %158 = vector.extract_strided_slice %99 {offsets = [29, 0], sizes = [1, 256], strides = [1, 1]} : vector<32x1024xbf16> to vector<1x256xbf16>
    %c0_91 = arith.constant 0 : index
    %c7424 = arith.constant 7424 : index
    %159 = vector.load %arg10[%c0_91, %c7424] : memref<4x8192xbf16, #tpu.memory_space<vmem>>, vector<1x256xbf16>
    tpu.vector_store %arg10[%c0_91, %c7424], %158 {strides = array<i32>} : memref<4x8192xbf16, #tpu.memory_space<vmem>>, vector<1x256xbf16>,
    %160 = vector.extract_strided_slice %99 {offsets = [30, 0], sizes = [1, 256], strides = [1, 1]} : vector<32x1024xbf16> to vector<1x256xbf16>
    %c0_92 = arith.constant 0 : index
    %c7680 = arith.constant 7680 : index
    %161 = vector.load %arg10[%c0_92, %c7680] : memref<4x8192xbf16, #tpu.memory_space<vmem>>, vector<1x256xbf16>
    tpu.vector_store %arg10[%c0_92, %c7680], %160 {strides = array<i32>} : memref<4x8192xbf16, #tpu.memory_space<vmem>>, vector<1x256xbf16>,
    %162 = vector.extract_strided_slice %99 {offsets = [31, 0], sizes = [1, 256], strides = [1, 1]} : vector<32x1024xbf16> to vector<1x256xbf16>
    %c0_93 = arith.constant 0 : index
    %c7936 = arith.constant 7936 : index
    %163 = vector.load %arg10[%c0_93, %c7936] : memref<4x8192xbf16, #tpu.memory_space<vmem>>, vector<1x256xbf16>
    tpu.vector_store %arg10[%c0_93, %c7936], %162 {strides = array<i32>} : memref<4x8192xbf16, #tpu.memory_space<vmem>>, vector<1x256xbf16>,
    %164 = vector.extract_strided_slice %99 {offsets = [0, 256], sizes = [1, 256], strides = [1, 1]} : vector<32x1024xbf16> to vector<1x256xbf16>
    %c1_94 = arith.constant 1 : index
    %c0_95 = arith.constant 0 : index
    %165 = vector.load %arg10[%c1_94, %c0_95] : memref<4x8192xbf16, #tpu.memory_space<vmem>>, vector<1x256xbf16>
    tpu.vector_store %arg10[%c1_94, %c0_95], %164 {strides = array<i32>} : memref<4x8192xbf16, #tpu.memory_space<vmem>>, vector<1x256xbf16>,
    %166 = vector.extract_strided_slice %99 {offsets = [1, 256], sizes = [1, 256], strides = [1, 1]} : vector<32x1024xbf16> to vector<1x256xbf16>
    %c1_96 = arith.constant 1 : index
    %c256_97 = arith.constant 256 : index
    %167 = vector.load %arg10[%c1_96, %c256_97] : memref<4x8192xbf16, #tpu.memory_space<vmem>>, vector<1x256xbf16>
    tpu.vector_store %arg10[%c1_96, %c256_97], %166 {strides = array<i32>} : memref<4x8192xbf16, #tpu.memory_space<vmem>>, vector<1x256xbf16>,
    %168 = vector.extract_strided_slice %99 {offsets = [2, 256], sizes = [1, 256], strides = [1, 1]} : vector<32x1024xbf16> to vector<1x256xbf16>
    %c1_98 = arith.constant 1 : index
    %c512_99 = arith.constant 512 : index
    %169 = vector.load %arg10[%c1_98, %c512_99] : memref<4x8192xbf16, #tpu.memory_space<vmem>>, vector<1x256xbf16>
    tpu.vector_store %arg10[%c1_98, %c512_99], %168 {strides = array<i32>} : memref<4x8192xbf16, #tpu.memory_space<vmem>>, vector<1x256xbf16>,
    %170 = vector.extract_strided_slice %99 {offsets = [3, 256], sizes = [1, 256], strides = [1, 1]} : vector<32x1024xbf16> to vector<1x256xbf16>
    %c1_100 = arith.constant 1 : index
    %c768_101 = arith.constant 768 : index
    %171 = vector.load %arg10[%c1_100, %c768_101] : memref<4x8192xbf16, #tpu.memory_space<vmem>>, vector<1x256xbf16>
    tpu.vector_store %arg10[%c1_100, %c768_101], %170 {strides = array<i32>} : memref<4x8192xbf16, #tpu.memory_space<vmem>>, vector<1x256xbf16>,
    %172 = vector.extract_strided_slice %99 {offsets = [4, 256], sizes = [1, 256], strides = [1, 1]} : vector<32x1024xbf16> to vector<1x256xbf16>
    %c1_102 = arith.constant 1 : index
    %c1024_103 = arith.constant 1024 : index
    %173 = vector.load %arg10[%c1_102, %c1024_103] : memref<4x8192xbf16, #tpu.memory_space<vmem>>, vector<1x256xbf16>
    tpu.vector_store %arg10[%c1_102, %c1024_103], %172 {strides = array<i32>} : memref<4x8192xbf16, #tpu.memory_space<vmem>>, vector<1x256xbf16>,
    %174 = vector.extract_strided_slice %99 {offsets = [5, 256], sizes = [1, 256], strides = [1, 1]} : vector<32x1024xbf16> to vector<1x256xbf16>
    %c1_104 = arith.constant 1 : index
    %c1280_105 = arith.constant 1280 : index
    %175 = vector.load %arg10[%c1_104, %c1280_105] : memref<4x8192xbf16, #tpu.memory_space<vmem>>, vector<1x256xbf16>
    tpu.vector_store %arg10[%c1_104, %c1280_105], %174 {strides = array<i32>} : memref<4x8192xbf16, #tpu.memory_space<vmem>>, vector<1x256xbf16>,
    %176 = vector.extract_strided_slice %99 {offsets = [6, 256], sizes = [1, 256], strides = [1, 1]} : vector<32x1024xbf16> to vector<1x256xbf16>
    %c1_106 = arith.constant 1 : index
    %c1536_107 = arith.constant 1536 : index
    %177 = vector.load %arg10[%c1_106, %c1536_107] : memref<4x8192xbf16, #tpu.memory_space<vmem>>, vector<1x256xbf16>
    tpu.vector_store %arg10[%c1_106, %c1536_107], %176 {strides = array<i32>} : memref<4x8192xbf16, #tpu.memory_space<vmem>>, vector<1x256xbf16>,
    %178 = vector.extract_strided_slice %99 {offsets = [7, 256], sizes = [1, 256], strides = [1, 1]} : vector<32x1024xbf16> to vector<1x256xbf16>
    %c1_108 = arith.constant 1 : index
    %c1792_109 = arith.constant 1792 : index
    %179 = vector.load %arg10[%c1_108, %c1792_109] : memref<4x8192xbf16, #tpu.memory_space<vmem>>, vector<1x256xbf16>
    tpu.vector_store %arg10[%c1_108, %c1792_109], %178 {strides = array<i32>} : memref<4x8192xbf16, #tpu.memory_space<vmem>>, vector<1x256xbf16>,
    %180 = vector.extract_strided_slice %99 {offsets = [8, 256], sizes = [1, 256], strides = [1, 1]} : vector<32x1024xbf16> to vector<1x256xbf16>
    %c1_110 = arith.constant 1 : index
    %c2048_111 = arith.constant 2048 : index
    %181 = vector.load %arg10[%c1_110, %c2048_111] : memref<4x8192xbf16, #tpu.memory_space<vmem>>, vector<1x256xbf16>
    tpu.vector_store %arg10[%c1_110, %c2048_111], %180 {strides = array<i32>} : memref<4x8192xbf16, #tpu.memory_space<vmem>>, vector<1x256xbf16>,
    %182 = vector.extract_strided_slice %99 {offsets = [9, 256], sizes = [1, 256], strides = [1, 1]} : vector<32x1024xbf16> to vector<1x256xbf16>
    %c1_112 = arith.constant 1 : index
    %c2304_113 = arith.constant 2304 : index
    %183 = vector.load %arg10[%c1_112, %c2304_113] : memref<4x8192xbf16, #tpu.memory_space<vmem>>, vector<1x256xbf16>
    tpu.vector_store %arg10[%c1_112, %c2304_113], %182 {strides = array<i32>} : memref<4x8192xbf16, #tpu.memory_space<vmem>>, vector<1x256xbf16>,
    %184 = vector.extract_strided_slice %99 {offsets = [10, 256], sizes = [1, 256], strides = [1, 1]} : vector<32x1024xbf16> to vector<1x256xbf16>
    %c1_114 = arith.constant 1 : index
    %c2560_115 = arith.constant 2560 : index
    %185 = vector.load %arg10[%c1_114, %c2560_115] : memref<4x8192xbf16, #tpu.memory_space<vmem>>, vector<1x256xbf16>
    tpu.vector_store %arg10[%c1_114, %c2560_115], %184 {strides = array<i32>} : memref<4x8192xbf16, #tpu.memory_space<vmem>>, vector<1x256xbf16>,
    %186 = vector.extract_strided_slice %99 {offsets = [11, 256], sizes = [1, 256], strides = [1, 1]} : vector<32x1024xbf16> to vector<1x256xbf16>
    %c1_116 = arith.constant 1 : index
    %c2816_117 = arith.constant 2816 : index
    %187 = vector.load %arg10[%c1_116, %c2816_117] : memref<4x8192xbf16, #tpu.memory_space<vmem>>, vector<1x256xbf16>
    tpu.vector_store %arg10[%c1_116, %c2816_117], %186 {strides = array<i32>} : memref<4x8192xbf16, #tpu.memory_space<vmem>>, vector<1x256xbf16>,
    %188 = vector.extract_strided_slice %99 {offsets = [12, 256], sizes = [1, 256], strides = [1, 1]} : vector<32x1024xbf16> to vector<1x256xbf16>
    %c1_118 = arith.constant 1 : index
    %c3072_119 = arith.constant 3072 : index
    %189 = vector.load %arg10[%c1_118, %c3072_119] : memref<4x8192xbf16, #tpu.memory_space<vmem>>, vector<1x256xbf16>
    tpu.vector_store %arg10[%c1_118, %c3072_119], %188 {strides = array<i32>} : memref<4x8192xbf16, #tpu.memory_space<vmem>>, vector<1x256xbf16>,
    %190 = vector.extract_strided_slice %99 {offsets = [13, 256], sizes = [1, 256], strides = [1, 1]} : vector<32x1024xbf16> to vector<1x256xbf16>
    %c1_120 = arith.constant 1 : index
    %c3328_121 = arith.constant 3328 : index
    %191 = vector.load %arg10[%c1_120, %c3328_121] : memref<4x8192xbf16, #tpu.memory_space<vmem>>, vector<1x256xbf16>
    tpu.vector_store %arg10[%c1_120, %c3328_121], %190 {strides = array<i32>} : memref<4x8192xbf16, #tpu.memory_space<vmem>>, vector<1x256xbf16>,
    %192 = vector.extract_strided_slice %99 {offsets = [14, 256], sizes = [1, 256], strides = [1, 1]} : vector<32x1024xbf16> to vector<1x256xbf16>
    %c1_122 = arith.constant 1 : index
    %c3584_123 = arith.constant 3584 : index
    %193 = vector.load %arg10[%c1_122, %c3584_123] : memref<4x8192xbf16, #tpu.memory_space<vmem>>, vector<1x256xbf16>
    tpu.vector_store %arg10[%c1_122, %c3584_123], %192 {strides = array<i32>} : memref<4x8192xbf16, #tpu.memory_space<vmem>>, vector<1x256xbf16>,
    %194 = vector.extract_strided_slice %99 {offsets = [15, 256], sizes = [1, 256], strides = [1, 1]} : vector<32x1024xbf16> to vector<1x256xbf16>
    %c1_124 = arith.constant 1 : index
    %c3840_125 = arith.constant 3840 : index
    %195 = vector.load %arg10[%c1_124, %c3840_125] : memref<4x8192xbf16, #tpu.memory_space<vmem>>, vector<1x256xbf16>
    tpu.vector_store %arg10[%c1_124, %c3840_125], %194 {strides = array<i32>} : memref<4x8192xbf16, #tpu.memory_space<vmem>>, vector<1x256xbf16>,
    %196 = vector.extract_strided_slice %99 {offsets = [16, 256], sizes = [1, 256], strides = [1, 1]} : vector<32x1024xbf16> to vector<1x256xbf16>
    %c1_126 = arith.constant 1 : index
    %c4096_127 = arith.constant 4096 : index
    %197 = vector.load %arg10[%c1_126, %c4096_127] : memref<4x8192xbf16, #tpu.memory_space<vmem>>, vector<1x256xbf16>
    tpu.vector_store %arg10[%c1_126, %c4096_127], %196 {strides = array<i32>} : memref<4x8192xbf16, #tpu.memory_space<vmem>>, vector<1x256xbf16>,
    %198 = vector.extract_strided_slice %99 {offsets = [17, 256], sizes = [1, 256], strides = [1, 1]} : vector<32x1024xbf16> to vector<1x256xbf16>
    %c1_128 = arith.constant 1 : index
    %c4352_129 = arith.constant 4352 : index
    %199 = vector.load %arg10[%c1_128, %c4352_129] : memref<4x8192xbf16, #tpu.memory_space<vmem>>, vector<1x256xbf16>
    tpu.vector_store %arg10[%c1_128, %c4352_129], %198 {strides = array<i32>} : memref<4x8192xbf16, #tpu.memory_space<vmem>>, vector<1x256xbf16>,
    %200 = vector.extract_strided_slice %99 {offsets = [18, 256], sizes = [1, 256], strides = [1, 1]} : vector<32x1024xbf16> to vector<1x256xbf16>
    %c1_130 = arith.constant 1 : index
    %c4608_131 = arith.constant 4608 : index
    %201 = vector.load %arg10[%c1_130, %c4608_131] : memref<4x8192xbf16, #tpu.memory_space<vmem>>, vector<1x256xbf16>
    tpu.vector_store %arg10[%c1_130, %c4608_131], %200 {strides = array<i32>} : memref<4x8192xbf16, #tpu.memory_space<vmem>>, vector<1x256xbf16>,
    %202 = vector.extract_strided_slice %99 {offsets = [19, 256], sizes = [1, 256], strides = [1, 1]} : vector<32x1024xbf16> to vector<1x256xbf16>
    %c1_132 = arith.constant 1 : index
    %c4864_133 = arith.constant 4864 : index
    %203 = vector.load %arg10[%c1_132, %c4864_133] : memref<4x8192xbf16, #tpu.memory_space<vmem>>, vector<1x256xbf16>
    tpu.vector_store %arg10[%c1_132, %c4864_133], %202 {strides = array<i32>} : memref<4x8192xbf16, #tpu.memory_space<vmem>>, vector<1x256xbf16>,
    %204 = vector.extract_strided_slice %99 {offsets = [20, 256], sizes = [1, 256], strides = [1, 1]} : vector<32x1024xbf16> to vector<1x256xbf16>
    %c1_134 = arith.constant 1 : index
    %c5120_135 = arith.constant 5120 : index
    %205 = vector.load %arg10[%c1_134, %c5120_135] : memref<4x8192xbf16, #tpu.memory_space<vmem>>, vector<1x256xbf16>
    tpu.vector_store %arg10[%c1_134, %c5120_135], %204 {strides = array<i32>} : memref<4x8192xbf16, #tpu.memory_space<vmem>>, vector<1x256xbf16>,
    %206 = vector.extract_strided_slice %99 {offsets = [21, 256], sizes = [1, 256], strides = [1, 1]} : vector<32x1024xbf16> to vector<1x256xbf16>
    %c1_136 = arith.constant 1 : index
    %c5376_137 = arith.constant 5376 : index
    %207 = vector.load %arg10[%c1_136, %c5376_137] : memref<4x8192xbf16, #tpu.memory_space<vmem>>, vector<1x256xbf16>
    tpu.vector_store %arg10[%c1_136, %c5376_137], %206 {strides = array<i32>} : memref<4x8192xbf16, #tpu.memory_space<vmem>>, vector<1x256xbf16>,
    %208 = vector.extract_strided_slice %99 {offsets = [22, 256], sizes = [1, 256], strides = [1, 1]} : vector<32x1024xbf16> to vector<1x256xbf16>
    %c1_138 = arith.constant 1 : index
    %c5632_139 = arith.constant 5632 : index
    %209 = vector.load %arg10[%c1_138, %c5632_139] : memref<4x8192xbf16, #tpu.memory_space<vmem>>, vector<1x256xbf16>
    tpu.vector_store %arg10[%c1_138, %c5632_139], %208 {strides = array<i32>} : memref<4x8192xbf16, #tpu.memory_space<vmem>>, vector<1x256xbf16>,
    %210 = vector.extract_strided_slice %99 {offsets = [23, 256], sizes = [1, 256], strides = [1, 1]} : vector<32x1024xbf16> to vector<1x256xbf16>
    %c1_140 = arith.constant 1 : index
    %c5888_141 = arith.constant 5888 : index
    %211 = vector.load %arg10[%c1_140, %c5888_141] : memref<4x8192xbf16, #tpu.memory_space<vmem>>, vector<1x256xbf16>
    tpu.vector_store %arg10[%c1_140, %c5888_141], %210 {strides = array<i32>} : memref<4x8192xbf16, #tpu.memory_space<vmem>>, vector<1x256xbf16>,
    %212 = vector.extract_strided_slice %99 {offsets = [24, 256], sizes = [1, 256], strides = [1, 1]} : vector<32x1024xbf16> to vector<1x256xbf16>
    %c1_142 = arith.constant 1 : index
    %c6144_143 = arith.constant 6144 : index
    %213 = vector.load %arg10[%c1_142, %c6144_143] : memref<4x8192xbf16, #tpu.memory_space<vmem>>, vector<1x256xbf16>
    tpu.vector_store %arg10[%c1_142, %c6144_143], %212 {strides = array<i32>} : memref<4x8192xbf16, #tpu.memory_space<vmem>>, vector<1x256xbf16>,
    %214 = vector.extract_strided_slice %99 {offsets = [25, 256], sizes = [1, 256], strides = [1, 1]} : vector<32x1024xbf16> to vector<1x256xbf16>
    %c1_144 = arith.constant 1 : index
    %c6400_145 = arith.constant 6400 : index
    %215 = vector.load %arg10[%c1_144, %c6400_145] : memref<4x8192xbf16, #tpu.memory_space<vmem>>, vector<1x256xbf16>
    tpu.vector_store %arg10[%c1_144, %c6400_145], %214 {strides = array<i32>} : memref<4x8192xbf16, #tpu.memory_space<vmem>>, vector<1x256xbf16>,
    %216 = vector.extract_strided_slice %99 {offsets = [26, 256], sizes = [1, 256], strides = [1, 1]} : vector<32x1024xbf16> to vector<1x256xbf16>
    %c1_146 = arith.constant 1 : index
    %c6656_147 = arith.constant 6656 : index
    %217 = vector.load %arg10[%c1_146, %c6656_147] : memref<4x8192xbf16, #tpu.memory_space<vmem>>, vector<1x256xbf16>
    tpu.vector_store %arg10[%c1_146, %c6656_147], %216 {strides = array<i32>} : memref<4x8192xbf16, #tpu.memory_space<vmem>>, vector<1x256xbf16>,
    %218 = vector.extract_strided_slice %99 {offsets = [27, 256], sizes = [1, 256], strides = [1, 1]} : vector<32x1024xbf16> to vector<1x256xbf16>
    %c1_148 = arith.constant 1 : index
    %c6912_149 = arith.constant 6912 : index
    %219 = vector.load %arg10[%c1_148, %c6912_149] : memref<4x8192xbf16, #tpu.memory_space<vmem>>, vector<1x256xbf16>
    tpu.vector_store %arg10[%c1_148, %c6912_149], %218 {strides = array<i32>} : memref<4x8192xbf16, #tpu.memory_space<vmem>>, vector<1x256xbf16>,
    %220 = vector.extract_strided_slice %99 {offsets = [28, 256], sizes = [1, 256], strides = [1, 1]} : vector<32x1024xbf16> to vector<1x256xbf16>
    %c1_150 = arith.constant 1 : index
    %c7168_151 = arith.constant 7168 : index
    %221 = vector.load %arg10[%c1_150, %c7168_151] : memref<4x8192xbf16, #tpu.memory_space<vmem>>, vector<1x256xbf16>
    tpu.vector_store %arg10[%c1_150, %c7168_151], %220 {strides = array<i32>} : memref<4x8192xbf16, #tpu.memory_space<vmem>>, vector<1x256xbf16>,
    %222 = vector.extract_strided_slice %99 {offsets = [29, 256], sizes = [1, 256], strides = [1, 1]} : vector<32x1024xbf16> to vector<1x256xbf16>
    %c1_152 = arith.constant 1 : index
    %c7424_153 = arith.constant 7424 : index
    %223 = vector.load %arg10[%c1_152, %c7424_153] : memref<4x8192xbf16, #tpu.memory_space<vmem>>, vector<1x256xbf16>
    tpu.vector_store %arg10[%c1_152, %c7424_153], %222 {strides = array<i32>} : memref<4x8192xbf16, #tpu.memory_space<vmem>>, vector<1x256xbf16>,
    %224 = vector.extract_strided_slice %99 {offsets = [30, 256], sizes = [1, 256], strides = [1, 1]} : vector<32x1024xbf16> to vector<1x256xbf16>
    %c1_154 = arith.constant 1 : index
    %c7680_155 = arith.constant 7680 : index
    %225 = vector.load %arg10[%c1_154, %c7680_155] : memref<4x8192xbf16, #tpu.memory_space<vmem>>, vector<1x256xbf16>
    tpu.vector_store %arg10[%c1_154, %c7680_155], %224 {strides = array<i32>} : memref<4x8192xbf16, #tpu.memory_space<vmem>>, vector<1x256xbf16>,
    %226 = vector.extract_strided_slice %99 {offsets = [31, 256], sizes = [1, 256], strides = [1, 1]} : vector<32x1024xbf16> to vector<1x256xbf16>
    %c1_156 = arith.constant 1 : index
    %c7936_157 = arith.constant 7936 : index
    %227 = vector.load %arg10[%c1_156, %c7936_157] : memref<4x8192xbf16, #tpu.memory_space<vmem>>, vector<1x256xbf16>
    tpu.vector_store %arg10[%c1_156, %c7936_157], %226 {strides = array<i32>} : memref<4x8192xbf16, #tpu.memory_space<vmem>>, vector<1x256xbf16>,
    %228 = vector.extract_strided_slice %99 {offsets = [0, 512], sizes = [1, 256], strides = [1, 1]} : vector<32x1024xbf16> to vector<1x256xbf16>
    %c2_158 = arith.constant 2 : index
    %c0_159 = arith.constant 0 : index
    %229 = vector.load %arg10[%c2_158, %c0_159] : memref<4x8192xbf16, #tpu.memory_space<vmem>>, vector<1x256xbf16>
    tpu.vector_store %arg10[%c2_158, %c0_159], %228 {strides = array<i32>} : memref<4x8192xbf16, #tpu.memory_space<vmem>>, vector<1x256xbf16>,
    %230 = vector.extract_strided_slice %99 {offsets = [1, 512], sizes = [1, 256], strides = [1, 1]} : vector<32x1024xbf16> to vector<1x256xbf16>
    %c2_160 = arith.constant 2 : index
    %c256_161 = arith.constant 256 : index
    %231 = vector.load %arg10[%c2_160, %c256_161] : memref<4x8192xbf16, #tpu.memory_space<vmem>>, vector<1x256xbf16>
    tpu.vector_store %arg10[%c2_160, %c256_161], %230 {strides = array<i32>} : memref<4x8192xbf16, #tpu.memory_space<vmem>>, vector<1x256xbf16>,
    %232 = vector.extract_strided_slice %99 {offsets = [2, 512], sizes = [1, 256], strides = [1, 1]} : vector<32x1024xbf16> to vector<1x256xbf16>
    %c2_162 = arith.constant 2 : index
    %c512_163 = arith.constant 512 : index
    %233 = vector.load %arg10[%c2_162, %c512_163] : memref<4x8192xbf16, #tpu.memory_space<vmem>>, vector<1x256xbf16>
    tpu.vector_store %arg10[%c2_162, %c512_163], %232 {strides = array<i32>} : memref<4x8192xbf16, #tpu.memory_space<vmem>>, vector<1x256xbf16>,
    %234 = vector.extract_strided_slice %99 {offsets = [3, 512], sizes = [1, 256], strides = [1, 1]} : vector<32x1024xbf16> to vector<1x256xbf16>
    %c2_164 = arith.constant 2 : index
    %c768_165 = arith.constant 768 : index
    %235 = vector.load %arg10[%c2_164, %c768_165] : memref<4x8192xbf16, #tpu.memory_space<vmem>>, vector<1x256xbf16>
    tpu.vector_store %arg10[%c2_164, %c768_165], %234 {strides = array<i32>} : memref<4x8192xbf16, #tpu.memory_space<vmem>>, vector<1x256xbf16>,
    %236 = vector.extract_strided_slice %99 {offsets = [4, 512], sizes = [1, 256], strides = [1, 1]} : vector<32x1024xbf16> to vector<1x256xbf16>
    %c2_166 = arith.constant 2 : index
    %c1024_167 = arith.constant 1024 : index
    %237 = vector.load %arg10[%c2_166, %c1024_167] : memref<4x8192xbf16, #tpu.memory_space<vmem>>, vector<1x256xbf16>
    tpu.vector_store %arg10[%c2_166, %c1024_167], %236 {strides = array<i32>} : memref<4x8192xbf16, #tpu.memory_space<vmem>>, vector<1x256xbf16>,
    %238 = vector.extract_strided_slice %99 {offsets = [5, 512], sizes = [1, 256], strides = [1, 1]} : vector<32x1024xbf16> to vector<1x256xbf16>
    %c2_168 = arith.constant 2 : index
    %c1280_169 = arith.constant 1280 : index
    %239 = vector.load %arg10[%c2_168, %c1280_169] : memref<4x8192xbf16, #tpu.memory_space<vmem>>, vector<1x256xbf16>
    tpu.vector_store %arg10[%c2_168, %c1280_169], %238 {strides = array<i32>} : memref<4x8192xbf16, #tpu.memory_space<vmem>>, vector<1x256xbf16>,
    %240 = vector.extract_strided_slice %99 {offsets = [6, 512], sizes = [1, 256], strides = [1, 1]} : vector<32x1024xbf16> to vector<1x256xbf16>
    %c2_170 = arith.constant 2 : index
    %c1536_171 = arith.constant 1536 : index
    %241 = vector.load %arg10[%c2_170, %c1536_171] : memref<4x8192xbf16, #tpu.memory_space<vmem>>, vector<1x256xbf16>
    tpu.vector_store %arg10[%c2_170, %c1536_171], %240 {strides = array<i32>} : memref<4x8192xbf16, #tpu.memory_space<vmem>>, vector<1x256xbf16>,
    %242 = vector.extract_strided_slice %99 {offsets = [7, 512], sizes = [1, 256], strides = [1, 1]} : vector<32x1024xbf16> to vector<1x256xbf16>
    %c2_172 = arith.constant 2 : index
    %c1792_173 = arith.constant 1792 : index
    %243 = vector.load %arg10[%c2_172, %c1792_173] : memref<4x8192xbf16, #tpu.memory_space<vmem>>, vector<1x256xbf16>
    tpu.vector_store %arg10[%c2_172, %c1792_173], %242 {strides = array<i32>} : memref<4x8192xbf16, #tpu.memory_space<vmem>>, vector<1x256xbf16>,
    %244 = vector.extract_strided_slice %99 {offsets = [8, 512], sizes = [1, 256], strides = [1, 1]} : vector<32x1024xbf16> to vector<1x256xbf16>
    %c2_174 = arith.constant 2 : index
    %c2048_175 = arith.constant 2048 : index
    %245 = vector.load %arg10[%c2_174, %c2048_175] : memref<4x8192xbf16, #tpu.memory_space<vmem>>, vector<1x256xbf16>
    tpu.vector_store %arg10[%c2_174, %c2048_175], %244 {strides = array<i32>} : memref<4x8192xbf16, #tpu.memory_space<vmem>>, vector<1x256xbf16>,
    %246 = vector.extract_strided_slice %99 {offsets = [9, 512], sizes = [1, 256], strides = [1, 1]} : vector<32x1024xbf16> to vector<1x256xbf16>
    %c2_176 = arith.constant 2 : index
    %c2304_177 = arith.constant 2304 : index
    %247 = vector.load %arg10[%c2_176, %c2304_177] : memref<4x8192xbf16, #tpu.memory_space<vmem>>, vector<1x256xbf16>
    tpu.vector_store %arg10[%c2_176, %c2304_177], %246 {strides = array<i32>} : memref<4x8192xbf16, #tpu.memory_space<vmem>>, vector<1x256xbf16>,
    %248 = vector.extract_strided_slice %99 {offsets = [10, 512], sizes = [1, 256], strides = [1, 1]} : vector<32x1024xbf16> to vector<1x256xbf16>
    %c2_178 = arith.constant 2 : index
    %c2560_179 = arith.constant 2560 : index
    %249 = vector.load %arg10[%c2_178, %c2560_179] : memref<4x8192xbf16, #tpu.memory_space<vmem>>, vector<1x256xbf16>
    tpu.vector_store %arg10[%c2_178, %c2560_179], %248 {strides = array<i32>} : memref<4x8192xbf16, #tpu.memory_space<vmem>>, vector<1x256xbf16>,
    %250 = vector.extract_strided_slice %99 {offsets = [11, 512], sizes = [1, 256], strides = [1, 1]} : vector<32x1024xbf16> to vector<1x256xbf16>
    %c2_180 = arith.constant 2 : index
    %c2816_181 = arith.constant 2816 : index
    %251 = vector.load %arg10[%c2_180, %c2816_181] : memref<4x8192xbf16, #tpu.memory_space<vmem>>, vector<1x256xbf16>
    tpu.vector_store %arg10[%c2_180, %c2816_181], %250 {strides = array<i32>} : memref<4x8192xbf16, #tpu.memory_space<vmem>>, vector<1x256xbf16>,
    %252 = vector.extract_strided_slice %99 {offsets = [12, 512], sizes = [1, 256], strides = [1, 1]} : vector<32x1024xbf16> to vector<1x256xbf16>
    %c2_182 = arith.constant 2 : index
    %c3072_183 = arith.constant 3072 : index
    %253 = vector.load %arg10[%c2_182, %c3072_183] : memref<4x8192xbf16, #tpu.memory_space<vmem>>, vector<1x256xbf16>
    tpu.vector_store %arg10[%c2_182, %c3072_183], %252 {strides = array<i32>} : memref<4x8192xbf16, #tpu.memory_space<vmem>>, vector<1x256xbf16>,
    %254 = vector.extract_strided_slice %99 {offsets = [13, 512], sizes = [1, 256], strides = [1, 1]} : vector<32x1024xbf16> to vector<1x256xbf16>
    %c2_184 = arith.constant 2 : index
    %c3328_185 = arith.constant 3328 : index
    %255 = vector.load %arg10[%c2_184, %c3328_185] : memref<4x8192xbf16, #tpu.memory_space<vmem>>, vector<1x256xbf16>
    tpu.vector_store %arg10[%c2_184, %c3328_185], %254 {strides = array<i32>} : memref<4x8192xbf16, #tpu.memory_space<vmem>>, vector<1x256xbf16>,
    %256 = vector.extract_strided_slice %99 {offsets = [14, 512], sizes = [1, 256], strides = [1, 1]} : vector<32x1024xbf16> to vector<1x256xbf16>
    %c2_186 = arith.constant 2 : index
    %c3584_187 = arith.constant 3584 : index
    %257 = vector.load %arg10[%c2_186, %c3584_187] : memref<4x8192xbf16, #tpu.memory_space<vmem>>, vector<1x256xbf16>
    tpu.vector_store %arg10[%c2_186, %c3584_187], %256 {strides = array<i32>} : memref<4x8192xbf16, #tpu.memory_space<vmem>>, vector<1x256xbf16>,
    %258 = vector.extract_strided_slice %99 {offsets = [15, 512], sizes = [1, 256], strides = [1, 1]} : vector<32x1024xbf16> to vector<1x256xbf16>
    %c2_188 = arith.constant 2 : index
    %c3840_189 = arith.constant 3840 : index
    %259 = vector.load %arg10[%c2_188, %c3840_189] : memref<4x8192xbf16, #tpu.memory_space<vmem>>, vector<1x256xbf16>
    tpu.vector_store %arg10[%c2_188, %c3840_189], %258 {strides = array<i32>} : memref<4x8192xbf16, #tpu.memory_space<vmem>>, vector<1x256xbf16>,
    %260 = vector.extract_strided_slice %99 {offsets = [16, 512], sizes = [1, 256], strides = [1, 1]} : vector<32x1024xbf16> to vector<1x256xbf16>
    %c2_190 = arith.constant 2 : index
    %c4096_191 = arith.constant 4096 : index
    %261 = vector.load %arg10[%c2_190, %c4096_191] : memref<4x8192xbf16, #tpu.memory_space<vmem>>, vector<1x256xbf16>
    tpu.vector_store %arg10[%c2_190, %c4096_191], %260 {strides = array<i32>} : memref<4x8192xbf16, #tpu.memory_space<vmem>>, vector<1x256xbf16>,
    %262 = vector.extract_strided_slice %99 {offsets = [17, 512], sizes = [1, 256], strides = [1, 1]} : vector<32x1024xbf16> to vector<1x256xbf16>
    %c2_192 = arith.constant 2 : index
    %c4352_193 = arith.constant 4352 : index
    %263 = vector.load %arg10[%c2_192, %c4352_193] : memref<4x8192xbf16, #tpu.memory_space<vmem>>, vector<1x256xbf16>
    tpu.vector_store %arg10[%c2_192, %c4352_193], %262 {strides = array<i32>} : memref<4x8192xbf16, #tpu.memory_space<vmem>>, vector<1x256xbf16>,
    %264 = vector.extract_strided_slice %99 {offsets = [18, 512], sizes = [1, 256], strides = [1, 1]} : vector<32x1024xbf16> to vector<1x256xbf16>
    %c2_194 = arith.constant 2 : index
    %c4608_195 = arith.constant 4608 : index
    %265 = vector.load %arg10[%c2_194, %c4608_195] : memref<4x8192xbf16, #tpu.memory_space<vmem>>, vector<1x256xbf16>
    tpu.vector_store %arg10[%c2_194, %c4608_195], %264 {strides = array<i32>} : memref<4x8192xbf16, #tpu.memory_space<vmem>>, vector<1x256xbf16>,
    %266 = vector.extract_strided_slice %99 {offsets = [19, 512], sizes = [1, 256], strides = [1, 1]} : vector<32x1024xbf16> to vector<1x256xbf16>
    %c2_196 = arith.constant 2 : index
    %c4864_197 = arith.constant 4864 : index
    %267 = vector.load %arg10[%c2_196, %c4864_197] : memref<4x8192xbf16, #tpu.memory_space<vmem>>, vector<1x256xbf16>
    tpu.vector_store %arg10[%c2_196, %c4864_197], %266 {strides = array<i32>} : memref<4x8192xbf16, #tpu.memory_space<vmem>>, vector<1x256xbf16>,
    %268 = vector.extract_strided_slice %99 {offsets = [20, 512], sizes = [1, 256], strides = [1, 1]} : vector<32x1024xbf16> to vector<1x256xbf16>
    %c2_198 = arith.constant 2 : index
    %c5120_199 = arith.constant 5120 : index
    %269 = vector.load %arg10[%c2_198, %c5120_199] : memref<4x8192xbf16, #tpu.memory_space<vmem>>, vector<1x256xbf16>
    tpu.vector_store %arg10[%c2_198, %c5120_199], %268 {strides = array<i32>} : memref<4x8192xbf16, #tpu.memory_space<vmem>>, vector<1x256xbf16>,
    %270 = vector.extract_strided_slice %99 {offsets = [21, 512], sizes = [1, 256], strides = [1, 1]} : vector<32x1024xbf16> to vector<1x256xbf16>
    %c2_200 = arith.constant 2 : index
    %c5376_201 = arith.constant 5376 : index
    %271 = vector.load %arg10[%c2_200, %c5376_201] : memref<4x8192xbf16, #tpu.memory_space<vmem>>, vector<1x256xbf16>
    tpu.vector_store %arg10[%c2_200, %c5376_201], %270 {strides = array<i32>} : memref<4x8192xbf16, #tpu.memory_space<vmem>>, vector<1x256xbf16>,
    %272 = vector.extract_strided_slice %99 {offsets = [22, 512], sizes = [1, 256], strides = [1, 1]} : vector<32x1024xbf16> to vector<1x256xbf16>
    %c2_202 = arith.constant 2 : index
    %c5632_203 = arith.constant 5632 : index
    %273 = vector.load %arg10[%c2_202, %c5632_203] : memref<4x8192xbf16, #tpu.memory_space<vmem>>, vector<1x256xbf16>
    tpu.vector_store %arg10[%c2_202, %c5632_203], %272 {strides = array<i32>} : memref<4x8192xbf16, #tpu.memory_space<vmem>>, vector<1x256xbf16>,
    %274 = vector.extract_strided_slice %99 {offsets = [23, 512], sizes = [1, 256], strides = [1, 1]} : vector<32x1024xbf16> to vector<1x256xbf16>
    %c2_204 = arith.constant 2 : index
    %c5888_205 = arith.constant 5888 : index
    %275 = vector.load %arg10[%c2_204, %c5888_205] : memref<4x8192xbf16, #tpu.memory_space<vmem>>, vector<1x256xbf16>
    tpu.vector_store %arg10[%c2_204, %c5888_205], %274 {strides = array<i32>} : memref<4x8192xbf16, #tpu.memory_space<vmem>>, vector<1x256xbf16>,
    %276 = vector.extract_strided_slice %99 {offsets = [24, 512], sizes = [1, 256], strides = [1, 1]} : vector<32x1024xbf16> to vector<1x256xbf16>
    %c2_206 = arith.constant 2 : index
    %c6144_207 = arith.constant 6144 : index
    %277 = vector.load %arg10[%c2_206, %c6144_207] : memref<4x8192xbf16, #tpu.memory_space<vmem>>, vector<1x256xbf16>
    tpu.vector_store %arg10[%c2_206, %c6144_207], %276 {strides = array<i32>} : memref<4x8192xbf16, #tpu.memory_space<vmem>>, vector<1x256xbf16>,
    %278 = vector.extract_strided_slice %99 {offsets = [25, 512], sizes = [1, 256], strides = [1, 1]} : vector<32x1024xbf16> to vector<1x256xbf16>
    %c2_208 = arith.constant 2 : index
    %c6400_209 = arith.constant 6400 : index
    %279 = vector.load %arg10[%c2_208, %c6400_209] : memref<4x8192xbf16, #tpu.memory_space<vmem>>, vector<1x256xbf16>
    tpu.vector_store %arg10[%c2_208, %c6400_209], %278 {strides = array<i32>} : memref<4x8192xbf16, #tpu.memory_space<vmem>>, vector<1x256xbf16>,
    %280 = vector.extract_strided_slice %99 {offsets = [26, 512], sizes = [1, 256], strides = [1, 1]} : vector<32x1024xbf16> to vector<1x256xbf16>
    %c2_210 = arith.constant 2 : index
    %c6656_211 = arith.constant 6656 : index
    %281 = vector.load %arg10[%c2_210, %c6656_211] : memref<4x8192xbf16, #tpu.memory_space<vmem>>, vector<1x256xbf16>
    tpu.vector_store %arg10[%c2_210, %c6656_211], %280 {strides = array<i32>} : memref<4x8192xbf16, #tpu.memory_space<vmem>>, vector<1x256xbf16>,
    %282 = vector.extract_strided_slice %99 {offsets = [27, 512], sizes = [1, 256], strides = [1, 1]} : vector<32x1024xbf16> to vector<1x256xbf16>
    %c2_212 = arith.constant 2 : index
    %c6912_213 = arith.constant 6912 : index
    %283 = vector.load %arg10[%c2_212, %c6912_213] : memref<4x8192xbf16, #tpu.memory_space<vmem>>, vector<1x256xbf16>
    tpu.vector_store %arg10[%c2_212, %c6912_213], %282 {strides = array<i32>} : memref<4x8192xbf16, #tpu.memory_space<vmem>>, vector<1x256xbf16>,
    %284 = vector.extract_strided_slice %99 {offsets = [28, 512], sizes = [1, 256], strides = [1, 1]} : vector<32x1024xbf16> to vector<1x256xbf16>
    %c2_214 = arith.constant 2 : index
    %c7168_215 = arith.constant 7168 : index
    %285 = vector.load %arg10[%c2_214, %c7168_215] : memref<4x8192xbf16, #tpu.memory_space<vmem>>, vector<1x256xbf16>
    tpu.vector_store %arg10[%c2_214, %c7168_215], %284 {strides = array<i32>} : memref<4x8192xbf16, #tpu.memory_space<vmem>>, vector<1x256xbf16>,
    %286 = vector.extract_strided_slice %99 {offsets = [29, 512], sizes = [1, 256], strides = [1, 1]} : vector<32x1024xbf16> to vector<1x256xbf16>
    %c2_216 = arith.constant 2 : index
    %c7424_217 = arith.constant 7424 : index
    %287 = vector.load %arg10[%c2_216, %c7424_217] : memref<4x8192xbf16, #tpu.memory_space<vmem>>, vector<1x256xbf16>
    tpu.vector_store %arg10[%c2_216, %c7424_217], %286 {strides = array<i32>} : memref<4x8192xbf16, #tpu.memory_space<vmem>>, vector<1x256xbf16>,
    %288 = vector.extract_strided_slice %99 {offsets = [30, 512], sizes = [1, 256], strides = [1, 1]} : vector<32x1024xbf16> to vector<1x256xbf16>
    %c2_218 = arith.constant 2 : index
    %c7680_219 = arith.constant 7680 : index
    %289 = vector.load %arg10[%c2_218, %c7680_219] : memref<4x8192xbf16, #tpu.memory_space<vmem>>, vector<1x256xbf16>
    tpu.vector_store %arg10[%c2_218, %c7680_219], %288 {strides = array<i32>} : memref<4x8192xbf16, #tpu.memory_space<vmem>>, vector<1x256xbf16>,
    %290 = vector.extract_strided_slice %99 {offsets = [31, 512], sizes = [1, 256], strides = [1, 1]} : vector<32x1024xbf16> to vector<1x256xbf16>
    %c2_220 = arith.constant 2 : index
    %c7936_221 = arith.constant 7936 : index
    %291 = vector.load %arg10[%c2_220, %c7936_221] : memref<4x8192xbf16, #tpu.memory_space<vmem>>, vector<1x256xbf16>
    tpu.vector_store %arg10[%c2_220, %c7936_221], %290 {strides = array<i32>} : memref<4x8192xbf16, #tpu.memory_space<vmem>>, vector<1x256xbf16>,
    %292 = vector.extract_strided_slice %99 {offsets = [0, 768], sizes = [1, 256], strides = [1, 1]} : vector<32x1024xbf16> to vector<1x256xbf16>
    %c3_222 = arith.constant 3 : index
    %c0_223 = arith.constant 0 : index
    %293 = vector.load %arg10[%c3_222, %c0_223] : memref<4x8192xbf16, #tpu.memory_space<vmem>>, vector<1x256xbf16>
    tpu.vector_store %arg10[%c3_222, %c0_223], %292 {strides = array<i32>} : memref<4x8192xbf16, #tpu.memory_space<vmem>>, vector<1x256xbf16>,
    %294 = vector.extract_strided_slice %99 {offsets = [1, 768], sizes = [1, 256], strides = [1, 1]} : vector<32x1024xbf16> to vector<1x256xbf16>
    %c3_224 = arith.constant 3 : index
    %c256_225 = arith.constant 256 : index
    %295 = vector.load %arg10[%c3_224, %c256_225] : memref<4x8192xbf16, #tpu.memory_space<vmem>>, vector<1x256xbf16>
    tpu.vector_store %arg10[%c3_224, %c256_225], %294 {strides = array<i32>} : memref<4x8192xbf16, #tpu.memory_space<vmem>>, vector<1x256xbf16>,
    %296 = vector.extract_strided_slice %99 {offsets = [2, 768], sizes = [1, 256], strides = [1, 1]} : vector<32x1024xbf16> to vector<1x256xbf16>
    %c3_226 = arith.constant 3 : index
    %c512_227 = arith.constant 512 : index
    %297 = vector.load %arg10[%c3_226, %c512_227] : memref<4x8192xbf16, #tpu.memory_space<vmem>>, vector<1x256xbf16>
    tpu.vector_store %arg10[%c3_226, %c512_227], %296 {strides = array<i32>} : memref<4x8192xbf16, #tpu.memory_space<vmem>>, vector<1x256xbf16>,
    %298 = vector.extract_strided_slice %99 {offsets = [3, 768], sizes = [1, 256], strides = [1, 1]} : vector<32x1024xbf16> to vector<1x256xbf16>
    %c3_228 = arith.constant 3 : index
    %c768_229 = arith.constant 768 : index
    %299 = vector.load %arg10[%c3_228, %c768_229] : memref<4x8192xbf16, #tpu.memory_space<vmem>>, vector<1x256xbf16>
    tpu.vector_store %arg10[%c3_228, %c768_229], %298 {strides = array<i32>} : memref<4x8192xbf16, #tpu.memory_space<vmem>>, vector<1x256xbf16>,
    %300 = vector.extract_strided_slice %99 {offsets = [4, 768], sizes = [1, 256], strides = [1, 1]} : vector<32x1024xbf16> to vector<1x256xbf16>
    %c3_230 = arith.constant 3 : index
    %c1024_231 = arith.constant 1024 : index
    %301 = vector.load %arg10[%c3_230, %c1024_231] : memref<4x8192xbf16, #tpu.memory_space<vmem>>, vector<1x256xbf16>
    tpu.vector_store %arg10[%c3_230, %c1024_231], %300 {strides = array<i32>} : memref<4x8192xbf16, #tpu.memory_space<vmem>>, vector<1x256xbf16>,
    %302 = vector.extract_strided_slice %99 {offsets = [5, 768], sizes = [1, 256], strides = [1, 1]} : vector<32x1024xbf16> to vector<1x256xbf16>
    %c3_232 = arith.constant 3 : index
    %c1280_233 = arith.constant 1280 : index
    %303 = vector.load %arg10[%c3_232, %c1280_233] : memref<4x8192xbf16, #tpu.memory_space<vmem>>, vector<1x256xbf16>
    tpu.vector_store %arg10[%c3_232, %c1280_233], %302 {strides = array<i32>} : memref<4x8192xbf16, #tpu.memory_space<vmem>>, vector<1x256xbf16>,
    %304 = vector.extract_strided_slice %99 {offsets = [6, 768], sizes = [1, 256], strides = [1, 1]} : vector<32x1024xbf16> to vector<1x256xbf16>
    %c3_234 = arith.constant 3 : index
    %c1536_235 = arith.constant 1536 : index
    %305 = vector.load %arg10[%c3_234, %c1536_235] : memref<4x8192xbf16, #tpu.memory_space<vmem>>, vector<1x256xbf16>
    tpu.vector_store %arg10[%c3_234, %c1536_235], %304 {strides = array<i32>} : memref<4x8192xbf16, #tpu.memory_space<vmem>>, vector<1x256xbf16>,
    %306 = vector.extract_strided_slice %99 {offsets = [7, 768], sizes = [1, 256], strides = [1, 1]} : vector<32x1024xbf16> to vector<1x256xbf16>
    %c3_236 = arith.constant 3 : index
    %c1792_237 = arith.constant 1792 : index
    %307 = vector.load %arg10[%c3_236, %c1792_237] : memref<4x8192xbf16, #tpu.memory_space<vmem>>, vector<1x256xbf16>
    tpu.vector_store %arg10[%c3_236, %c1792_237], %306 {strides = array<i32>} : memref<4x8192xbf16, #tpu.memory_space<vmem>>, vector<1x256xbf16>,
    %308 = vector.extract_strided_slice %99 {offsets = [8, 768], sizes = [1, 256], strides = [1, 1]} : vector<32x1024xbf16> to vector<1x256xbf16>
    %c3_238 = arith.constant 3 : index
    %c2048_239 = arith.constant 2048 : index
    %309 = vector.load %arg10[%c3_238, %c2048_239] : memref<4x8192xbf16, #tpu.memory_space<vmem>>, vector<1x256xbf16>
    tpu.vector_store %arg10[%c3_238, %c2048_239], %308 {strides = array<i32>} : memref<4x8192xbf16, #tpu.memory_space<vmem>>, vector<1x256xbf16>,
    %310 = vector.extract_strided_slice %99 {offsets = [9, 768], sizes = [1, 256], strides = [1, 1]} : vector<32x1024xbf16> to vector<1x256xbf16>
    %c3_240 = arith.constant 3 : index
    %c2304_241 = arith.constant 2304 : index
    %311 = vector.load %arg10[%c3_240, %c2304_241] : memref<4x8192xbf16, #tpu.memory_space<vmem>>, vector<1x256xbf16>
    tpu.vector_store %arg10[%c3_240, %c2304_241], %310 {strides = array<i32>} : memref<4x8192xbf16, #tpu.memory_space<vmem>>, vector<1x256xbf16>,
    %312 = vector.extract_strided_slice %99 {offsets = [10, 768], sizes = [1, 256], strides = [1, 1]} : vector<32x1024xbf16> to vector<1x256xbf16>
    %c3_242 = arith.constant 3 : index
    %c2560_243 = arith.constant 2560 : index
    %313 = vector.load %arg10[%c3_242, %c2560_243] : memref<4x8192xbf16, #tpu.memory_space<vmem>>, vector<1x256xbf16>
    tpu.vector_store %arg10[%c3_242, %c2560_243], %312 {strides = array<i32>} : memref<4x8192xbf16, #tpu.memory_space<vmem>>, vector<1x256xbf16>,
    %314 = vector.extract_strided_slice %99 {offsets = [11, 768], sizes = [1, 256], strides = [1, 1]} : vector<32x1024xbf16> to vector<1x256xbf16>
    %c3_244 = arith.constant 3 : index
    %c2816_245 = arith.constant 2816 : index
    %315 = vector.load %arg10[%c3_244, %c2816_245] : memref<4x8192xbf16, #tpu.memory_space<vmem>>, vector<1x256xbf16>
    tpu.vector_store %arg10[%c3_244, %c2816_245], %314 {strides = array<i32>} : memref<4x8192xbf16, #tpu.memory_space<vmem>>, vector<1x256xbf16>,
    %316 = vector.extract_strided_slice %99 {offsets = [12, 768], sizes = [1, 256], strides = [1, 1]} : vector<32x1024xbf16> to vector<1x256xbf16>
    %c3_246 = arith.constant 3 : index
    %c3072_247 = arith.constant 3072 : index
    %317 = vector.load %arg10[%c3_246, %c3072_247] : memref<4x8192xbf16, #tpu.memory_space<vmem>>, vector<1x256xbf16>
    tpu.vector_store %arg10[%c3_246, %c3072_247], %316 {strides = array<i32>} : memref<4x8192xbf16, #tpu.memory_space<vmem>>, vector<1x256xbf16>,
    %318 = vector.extract_strided_slice %99 {offsets = [13, 768], sizes = [1, 256], strides = [1, 1]} : vector<32x1024xbf16> to vector<1x256xbf16>
    %c3_248 = arith.constant 3 : index
    %c3328_249 = arith.constant 3328 : index
    %319 = vector.load %arg10[%c3_248, %c3328_249] : memref<4x8192xbf16, #tpu.memory_space<vmem>>, vector<1x256xbf16>
    tpu.vector_store %arg10[%c3_248, %c3328_249], %318 {strides = array<i32>} : memref<4x8192xbf16, #tpu.memory_space<vmem>>, vector<1x256xbf16>,
    %320 = vector.extract_strided_slice %99 {offsets = [14, 768], sizes = [1, 256], strides = [1, 1]} : vector<32x1024xbf16> to vector<1x256xbf16>
    %c3_250 = arith.constant 3 : index
    %c3584_251 = arith.constant 3584 : index
    %321 = vector.load %arg10[%c3_250, %c3584_251] : memref<4x8192xbf16, #tpu.memory_space<vmem>>, vector<1x256xbf16>
    tpu.vector_store %arg10[%c3_250, %c3584_251], %320 {strides = array<i32>} : memref<4x8192xbf16, #tpu.memory_space<vmem>>, vector<1x256xbf16>,
    %322 = vector.extract_strided_slice %99 {offsets = [15, 768], sizes = [1, 256], strides = [1, 1]} : vector<32x1024xbf16> to vector<1x256xbf16>
    %c3_252 = arith.constant 3 : index
    %c3840_253 = arith.constant 3840 : index
    %323 = vector.load %arg10[%c3_252, %c3840_253] : memref<4x8192xbf16, #tpu.memory_space<vmem>>, vector<1x256xbf16>
    tpu.vector_store %arg10[%c3_252, %c3840_253], %322 {strides = array<i32>} : memref<4x8192xbf16, #tpu.memory_space<vmem>>, vector<1x256xbf16>,
    %324 = vector.extract_strided_slice %99 {offsets = [16, 768], sizes = [1, 256], strides = [1, 1]} : vector<32x1024xbf16> to vector<1x256xbf16>
    %c3_254 = arith.constant 3 : index
    %c4096_255 = arith.constant 4096 : index
    %325 = vector.load %arg10[%c3_254, %c4096_255] : memref<4x8192xbf16, #tpu.memory_space<vmem>>, vector<1x256xbf16>
    tpu.vector_store %arg10[%c3_254, %c4096_255], %324 {strides = array<i32>} : memref<4x8192xbf16, #tpu.memory_space<vmem>>, vector<1x256xbf16>,
    %326 = vector.extract_strided_slice %99 {offsets = [17, 768], sizes = [1, 256], strides = [1, 1]} : vector<32x1024xbf16> to vector<1x256xbf16>
    %c3_256 = arith.constant 3 : index
    %c4352_257 = arith.constant 4352 : index
    %327 = vector.load %arg10[%c3_256, %c4352_257] : memref<4x8192xbf16, #tpu.memory_space<vmem>>, vector<1x256xbf16>
    tpu.vector_store %arg10[%c3_256, %c4352_257], %326 {strides = array<i32>} : memref<4x8192xbf16, #tpu.memory_space<vmem>>, vector<1x256xbf16>,
    %328 = vector.extract_strided_slice %99 {offsets = [18, 768], sizes = [1, 256], strides = [1, 1]} : vector<32x1024xbf16> to vector<1x256xbf16>
    %c3_258 = arith.constant 3 : index
    %c4608_259 = arith.constant 4608 : index
    %329 = vector.load %arg10[%c3_258, %c4608_259] : memref<4x8192xbf16, #tpu.memory_space<vmem>>, vector<1x256xbf16>
    tpu.vector_store %arg10[%c3_258, %c4608_259], %328 {strides = array<i32>} : memref<4x8192xbf16, #tpu.memory_space<vmem>>, vector<1x256xbf16>,
    %330 = vector.extract_strided_slice %99 {offsets = [19, 768], sizes = [1, 256], strides = [1, 1]} : vector<32x1024xbf16> to vector<1x256xbf16>
    %c3_260 = arith.constant 3 : index
    %c4864_261 = arith.constant 4864 : index
    %331 = vector.load %arg10[%c3_260, %c4864_261] : memref<4x8192xbf16, #tpu.memory_space<vmem>>, vector<1x256xbf16>
    tpu.vector_store %arg10[%c3_260, %c4864_261], %330 {strides = array<i32>} : memref<4x8192xbf16, #tpu.memory_space<vmem>>, vector<1x256xbf16>,
    %332 = vector.extract_strided_slice %99 {offsets = [20, 768], sizes = [1, 256], strides = [1, 1]} : vector<32x1024xbf16> to vector<1x256xbf16>
    %c3_262 = arith.constant 3 : index
    %c5120_263 = arith.constant 5120 : index
    %333 = vector.load %arg10[%c3_262, %c5120_263] : memref<4x8192xbf16, #tpu.memory_space<vmem>>, vector<1x256xbf16>
    tpu.vector_store %arg10[%c3_262, %c5120_263], %332 {strides = array<i32>} : memref<4x8192xbf16, #tpu.memory_space<vmem>>, vector<1x256xbf16>,
    %334 = vector.extract_strided_slice %99 {offsets = [21, 768], sizes = [1, 256], strides = [1, 1]} : vector<32x1024xbf16> to vector<1x256xbf16>
    %c3_264 = arith.constant 3 : index
    %c5376_265 = arith.constant 5376 : index
    %335 = vector.load %arg10[%c3_264, %c5376_265] : memref<4x8192xbf16, #tpu.memory_space<vmem>>, vector<1x256xbf16>
    tpu.vector_store %arg10[%c3_264, %c5376_265], %334 {strides = array<i32>} : memref<4x8192xbf16, #tpu.memory_space<vmem>>, vector<1x256xbf16>,
    %336 = vector.extract_strided_slice %99 {offsets = [22, 768], sizes = [1, 256], strides = [1, 1]} : vector<32x1024xbf16> to vector<1x256xbf16>
    %c3_266 = arith.constant 3 : index
    %c5632_267 = arith.constant 5632 : index
    %337 = vector.load %arg10[%c3_266, %c5632_267] : memref<4x8192xbf16, #tpu.memory_space<vmem>>, vector<1x256xbf16>
    tpu.vector_store %arg10[%c3_266, %c5632_267], %336 {strides = array<i32>} : memref<4x8192xbf16, #tpu.memory_space<vmem>>, vector<1x256xbf16>,
    %338 = vector.extract_strided_slice %99 {offsets = [23, 768], sizes = [1, 256], strides = [1, 1]} : vector<32x1024xbf16> to vector<1x256xbf16>
    %c3_268 = arith.constant 3 : index
    %c5888_269 = arith.constant 5888 : index
    %339 = vector.load %arg10[%c3_268, %c5888_269] : memref<4x8192xbf16, #tpu.memory_space<vmem>>, vector<1x256xbf16>
    tpu.vector_store %arg10[%c3_268, %c5888_269], %338 {strides = array<i32>} : memref<4x8192xbf16, #tpu.memory_space<vmem>>, vector<1x256xbf16>,
    %340 = vector.extract_strided_slice %99 {offsets = [24, 768], sizes = [1, 256], strides = [1, 1]} : vector<32x1024xbf16> to vector<1x256xbf16>
    %c3_270 = arith.constant 3 : index
    %c6144_271 = arith.constant 6144 : index
    %341 = vector.load %arg10[%c3_270, %c6144_271] : memref<4x8192xbf16, #tpu.memory_space<vmem>>, vector<1x256xbf16>
    tpu.vector_store %arg10[%c3_270, %c6144_271], %340 {strides = array<i32>} : memref<4x8192xbf16, #tpu.memory_space<vmem>>, vector<1x256xbf16>,
    %342 = vector.extract_strided_slice %99 {offsets = [25, 768], sizes = [1, 256], strides = [1, 1]} : vector<32x1024xbf16> to vector<1x256xbf16>
    %c3_272 = arith.constant 3 : index
    %c6400_273 = arith.constant 6400 : index
    %343 = vector.load %arg10[%c3_272, %c6400_273] : memref<4x8192xbf16, #tpu.memory_space<vmem>>, vector<1x256xbf16>
    tpu.vector_store %arg10[%c3_272, %c6400_273], %342 {strides = array<i32>} : memref<4x8192xbf16, #tpu.memory_space<vmem>>, vector<1x256xbf16>,
    %344 = vector.extract_strided_slice %99 {offsets = [26, 768], sizes = [1, 256], strides = [1, 1]} : vector<32x1024xbf16> to vector<1x256xbf16>
    %c3_274 = arith.constant 3 : index
    %c6656_275 = arith.constant 6656 : index
    %345 = vector.load %arg10[%c3_274, %c6656_275] : memref<4x8192xbf16, #tpu.memory_space<vmem>>, vector<1x256xbf16>
    tpu.vector_store %arg10[%c3_274, %c6656_275], %344 {strides = array<i32>} : memref<4x8192xbf16, #tpu.memory_space<vmem>>, vector<1x256xbf16>,
    %346 = vector.extract_strided_slice %99 {offsets = [27, 768], sizes = [1, 256], strides = [1, 1]} : vector<32x1024xbf16> to vector<1x256xbf16>
    %c3_276 = arith.constant 3 : index
    %c6912_277 = arith.constant 6912 : index
    %347 = vector.load %arg10[%c3_276, %c6912_277] : memref<4x8192xbf16, #tpu.memory_space<vmem>>, vector<1x256xbf16>
    tpu.vector_store %arg10[%c3_276, %c6912_277], %346 {strides = array<i32>} : memref<4x8192xbf16, #tpu.memory_space<vmem>>, vector<1x256xbf16>,
    %348 = vector.extract_strided_slice %99 {offsets = [28, 768], sizes = [1, 256], strides = [1, 1]} : vector<32x1024xbf16> to vector<1x256xbf16>
    %c3_278 = arith.constant 3 : index
    %c7168_279 = arith.constant 7168 : index
    %349 = vector.load %arg10[%c3_278, %c7168_279] : memref<4x8192xbf16, #tpu.memory_space<vmem>>, vector<1x256xbf16>
    tpu.vector_store %arg10[%c3_278, %c7168_279], %348 {strides = array<i32>} : memref<4x8192xbf16, #tpu.memory_space<vmem>>, vector<1x256xbf16>,
    %350 = vector.extract_strided_slice %99 {offsets = [29, 768], sizes = [1, 256], strides = [1, 1]} : vector<32x1024xbf16> to vector<1x256xbf16>
    %c3_280 = arith.constant 3 : index
    %c7424_281 = arith.constant 7424 : index
    %351 = vector.load %arg10[%c3_280, %c7424_281] : memref<4x8192xbf16, #tpu.memory_space<vmem>>, vector<1x256xbf16>
    tpu.vector_store %arg10[%c3_280, %c7424_281], %350 {strides = array<i32>} : memref<4x8192xbf16, #tpu.memory_space<vmem>>, vector<1x256xbf16>,
    %352 = vector.extract_strided_slice %99 {offsets = [30, 768], sizes = [1, 256], strides = [1, 1]} : vector<32x1024xbf16> to vector<1x256xbf16>
    %c3_282 = arith.constant 3 : index
    %c7680_283 = arith.constant 7680 : index
    %353 = vector.load %arg10[%c3_282, %c7680_283] : memref<4x8192xbf16, #tpu.memory_space<vmem>>, vector<1x256xbf16>
    tpu.vector_store %arg10[%c3_282, %c7680_283], %352 {strides = array<i32>} : memref<4x8192xbf16, #tpu.memory_space<vmem>>, vector<1x256xbf16>,
    %354 = vector.extract_strided_slice %99 {offsets = [31, 768], sizes = [1, 256], strides = [1, 1]} : vector<32x1024xbf16> to vector<1x256xbf16>
    %c3_284 = arith.constant 3 : index
    %c7936_285 = arith.constant 7936 : index
    %355 = vector.load %arg10[%c3_284, %c7936_285] : memref<4x8192xbf16, #tpu.memory_space<vmem>>, vector<1x256xbf16>
    tpu.vector_store %arg10[%c3_284, %c7936_285], %354 {strides = array<i32>} : memref<4x8192xbf16, #tpu.memory_space<vmem>>, vector<1x256xbf16>,
    %c0_286 = arith.constant 0 : index
    %c0_287 = arith.constant 0 : index
    %356 = vector.load %arg10[%c0_286, %c0_287] : memref<4x8192xbf16, #tpu.memory_space<vmem>>, vector<4x8192xbf16>
    %c0_288 = arith.constant 0 : index
    %c0_289 = arith.constant 0 : index
    %357 = vector.load %arg7[%c0_288, %c0_289] : memref<8192x128xbf16, #tpu.memory_space<vmem>>, vector<8192x128xbf16>
    %cst_290 = arith.constant dense<0.000000e+00> : vector<4x128xf32>
    %358 = tpu.matmul %356, %357, %cst_290 {dimension_numbers = #tpu.dot_dimension_numbers<[1], [0], [0], [1], [0, 0, 1, 1], [], []>} : vector<4x8192xbf16>, vector<8192x128xbf16>, vector<4x128xf32> -> vector<4x128xf32>
    %c0_291 = arith.constant 0 : index
    %c0_292 = arith.constant 0 : index
    %359 = vector.load %arg8[%c0_291, %c0_292] : memref<1x128xf32, #tpu.memory_space<vmem>>, vector<1x128xf32>
    %360 = vector.broadcast %359 : vector<1x128xf32> to vector<4x128xf32>
    %361 = arith.addf %358, %360 : vector<4x128xf32>
    %c0_293 = arith.constant 0 : index
    %c0_294 = arith.constant 0 : index
    %c0_295 = arith.constant 0 : index
    %362 = vector.load %arg9[%c0_293, %c0_294, %c0_295] : memref<1x4x128xf32, #tpu.memory_space<vmem>>, vector<1x4x128xf32>
    %363 = vector.shape_cast %362 : vector<1x4x128xf32> to vector<4x128xf32>
    %364 = vector.shape_cast %361 : vector<4x128xf32> to vector<1x4x128xf32>
    tpu.vector_store %arg9[%c0_293, %c0_294, %c0_295], %364 {strides = array<i32>} : memref<1x4x128xf32, #tpu.memory_space<vmem>>, vector<1x4x128xf32>,
    return
  }
  func.func @transform_0(%arg0: i32) -> (i32, i32) {
    %c0_i32 = arith.constant 0 : i32
    %c0_i32_0 = arith.constant 0 : i32
    return %c0_i32, %arg0 : i32, i32
  }
  func.func @transform_1(%arg0: i32) -> (i32, i32, i32) {
    %c0_i32 = arith.constant 0 : i32
    %c0_i32_0 = arith.constant 0 : i32
    %c0_i32_1 = arith.constant 0 : i32
    %c0_i32_2 = arith.constant 0 : i32
    return %c0_i32, %c0_i32_0, %c0_i32_1 : i32, i32, i32
  }
  func.func @transform_2(%arg0: i32) -> (i32, i32) {
    %c0_i32 = arith.constant 0 : i32
    %c0_i32_0 = arith.constant 0 : i32
    %c0_i32_1 = arith.constant 0 : i32
    return %c0_i32, %c0_i32_0 : i32, i32
  }
  func.func @transform_3(%arg0: i32) -> (i32, i32) {
    %c0_i32 = arith.constant 0 : i32
    %c0_i32_0 = arith.constant 0 : i32
    %c0_i32_1 = arith.constant 0 : i32
    return %c0_i32, %c0_i32_0 : i32, i32
  }
  func.func @transform_4(%arg0: i32) -> (i32, i32) {
    %c0_i32 = arith.constant 0 : i32
    %c0_i32_0 = arith.constant 0 : i32
    %c0_i32_1 = arith.constant 0 : i32
    return %c0_i32, %c0_i32_0 : i32, i32
  }
  func.func @transform_5(%arg0: i32) -> (i32, i32) {
    %c0_i32 = arith.constant 0 : i32
    %c0_i32_0 = arith.constant 0 : i32
    %c0_i32_1 = arith.constant 0 : i32
    return %c0_i32, %c0_i32_0 : i32, i32
  }
  func.func @transform_6(%arg0: i32) -> (i32, i32) {
    %c0_i32 = arith.constant 0 : i32
    %c0_i32_0 = arith.constant 0 : i32
    %c0_i32_1 = arith.constant 0 : i32
    return %c0_i32, %c0_i32_0 : i32, i32
  }
  func.func @transform_7(%arg0: i32) -> (i32, i32) {
    %c0_i32 = arith.constant 0 : i32
    %c0_i32_0 = arith.constant 0 : i32
    %c0_i32_1 = arith.constant 0 : i32
    return %c0_i32, %c0_i32_0 : i32, i32
  }
  func.func @transform_8(%arg0: i32) -> (i32, i32, i32) {
    %c0_i32 = arith.constant 0 : i32
    %c0_i32_0 = arith.constant 0 : i32
    %c0_i32_1 = arith.constant 0 : i32
    return %arg0, %c0_i32, %c0_i32_0 : i32, i32, i32
  }
}

</mosaic_0001>

<bundles_post_ra>
// kernel: yolo_forward.1
= control target key start
LH: loop header
LB: loop body
LE: loop exit
PB: predicated region body
PF: predicated region fallthrough
CT: control target
= control target key end

     0   :  { %s13984_s0 = inlined_call_operand.vmem [shape: f32[8,2048], index: 0, kind: input, shape index: {}]   ;;  %s13985_s1 = inlined_call_operand.vmem [shape: f32[9,1,1024], index: 1, kind: input, shape index: {}]   ;;  %s13986_s2 = inlined_call_operand.hbm [shape: bf16[16,72], index: 2, kind: input, shape index: {}]   ;;  %s13987_s3 = inlined_call_operand.vmem [shape: f32[16,1], index: 3, kind: input, shape index: {}]   ;;  %s13988_s4 = inlined_call_operand.hbm [shape: bf16[32,144], index: 4, kind: input, shape index: {}]   ;;  %s13989_s5 = inlined_call_operand.vmem [shape: f32[32,1], index: 5, kind: input, shape index: {}]   ;;  %s13990_s6 = inlined_call_operand.hbm [shape: bf16[8192,128], index: 6, kind: input, shape index: {}]   ;;  %s13991_s7 = inlined_call_operand.hbm [shape: f32[1,128], index: 7, kind: input, shape index: {}]   ;;  %s13992_s8 = inlined_call_operand.hbm [shape: f32[2,4,128], index: 8, kind: output, shape index: {}]  }
   0x1   :  { %14110 = sst [smem:[#allocation79_spill]] %s13986_s2 }
   0x2   :  { %14111 = sst [smem:[#allocation80_spill]] %s13988_s4 }
   0x3   :  { %13 = vsyncpa [#allocation4], 0 }
   0x4   :  { %14 = vsyncpa [#allocation7], 0 }
   0x5   :  { %15 = vsyncpa [#allocation10], 0 }
   0x6   :  { %16 = vsyncpa [#allocation5], 0 }
   0x7   :  { %18 = vsyncpa [#allocation5 + $0x1], 0  ;;  %s11331_s27 = smov 0   ;;  %s11333_s28 = smov 0  }
   0x8   :  { %s11335_s29 = smov 0   ;;  %s11337_s30 = smov 0  }
   0x9 LB: > { %14112 = sst [smem:[#allocation16_spill]] %s11263_s29  ;;  %s11352_s9 = sadd.s32 4294967295, %s11267_s30   ;;  %s11267_s30 = sphi %s11337_s30, %s14255_s30   ;;  %s11263_s29 = sphi %s11335_s29, %s14257_s29   ;;  %s11259_s28 = sphi %s11333_s28, %s14259_s28   ;;  %s11255_s27 = sphi %s11331_s27, %s14258_s27  }
   0xa   : > { %s8293_s10 = sadd.s32 4294967294, %s11267_s30   ;;  %s11356_s11 = sadd.s32 1, %s11267_s30  }
   0xb   : > { %14113 = sst [smem:[#allocation17_spill]] %s11356_s11  ;;  %s204_s12 = sadd.s32 1, %s11263_s29 }
   0xc   : > { %s201_s13 = ssub.s32 %s11267_s30, %s11356_s11  ;;  %p214_p0 = scmp.ne.s32.totalorder %s11263_s29, %s11259_s28 }
   0xd   : > { %p202_p1 = scmp.eq.s32.totalorder %s201_s13, 0  ;;  %p215_p2 = scmp.eq.s32.totalorder %s11352_s9, 1 }
   0xe   : > { %p220_p3 = scmp.ne.s32.totalorder %s11259_s28, %s11255_s27  ;;  %p221_p4 = scmp.eq.s32.totalorder %s8293_s10, 1 }
   0xf   : > { %s11367_s14 = scalar_select %p202_p1, %s11263_s29, %s204_s12  }
  0x10   : > { %p11369_p5 = por %p215_p2, %p214_p0  ;;  %p11373_p6 = por %p221_p4, %p220_p3 }
  0x11   : > { %14114 = sst [smem:[#allocation18_spill]] %s11367_s14  ;;  %p8294_p7 = scmp.ge.s32.totalorder %s11267_s30, 1 }
  0x12   : > { %p228_p8 = scmp.lt.s32.totalorder %s11267_s30, 3  ;;  %p11011_p9 = scmp.eq.s32.totalorder %s11352_s9, 0 }
  0x13   : > { %s14118_s4 = sld [smem:[#allocation80_spill]]  ;;  %s11269_s21 = smov [#allocation6]  }
  0x14   : > { %p11380_p10 = pnand %p8294_p7, %p228_p8  ;;  %s261_s22 = sshll.u32 %s11269_s21, 4  ;;  %s262_s22 = int_to_ptr.vmem [resolvable:$true] %s261_s22 }
  0x15   : > { %s14120_s2 = sld [smem:[#allocation79_spill]]  ;;  %s11270_s10 = smov 128  }
  0x16   : > { %p10994_p11 = pneg %p11380_p10  ;;  %s11271_s12 = smov 8  }
  0x17   : > { %s11272_s13 = smov [#allocation3]   ;;  %s11273_s19 = smov 64  }
  0x18   : > { %p11391_p12 = pnand %p11011_p9, %p10994_p11  ;;  %s244_s18 = sshll.u32 %s11272_s13, 4  ;;  %s245_s18 = int_to_ptr.vmem [resolvable:$true] %s244_s18 }
  0x19   : > { %s259_s20 = sshll.u32 %s14118_s4, 4  ;;  %s11274_s21 = smov 4   ;;  %s260_s20 = int_to_ptr.hbm [resolvable:$true] %s259_s20 }
  0x1a   : > { %11000 = dma.hbm_to_vmem [thread:$0]  (!%p11391_p12), %s260_s20, 512, %s262_s22, [#allocation7], %s11270_s10, %s11270_s10, %s11271_s12  }
  0x1b   : > { %s242_s26 = sshll.u32 %s14120_s2, 4  ;;  %s276_s24 = sshll.u32 %s13990_s6, 4  ;;  %s243_s26 = int_to_ptr.hbm [resolvable:$true] %s242_s26  ;;  %s277_s24 = int_to_ptr.hbm [resolvable:$true] %s276_s24 }
  0x1c   : > { %10997 = dma.hbm_to_vmem [thread:$0]  (!%p11391_p12), %s243_s26, 128, %s245_s18, [#allocation4], %s11273_s19, %s11273_s19, %s11274_s21  }
  0x1d   : > { %s11275_s25 = smov [#allocation8]   ;;  %s291_s20 = sshll.u32 %s13991_s7, 4  ;;  %s292_s20 = int_to_ptr.hbm [resolvable:$true] %s291_s20 }
  0x1e   : > { %s278_s2 = sshll.u32 %s11275_s25, 4  ;;  %s11276_s22 = smov [#allocation9]   ;;  %s279_s2 = int_to_ptr.vmem [resolvable:$true] %s278_s2 }
  0x1f   : > { %11003 = dma.hbm_to_vmem [thread:$0]  (!%p11391_p12), %s277_s24, 65536, %s279_s2, [#allocation7], %s11273_s19, %s11273_s19, %s11274_s21  }
  0x20   : > { %s293_s10 = sshll.u32 %s11276_s22, 4  ;;  %315 = sbr.rel (%p11380_p10) target bundleno = 1882 (0x75a), region = 52  ;;  %s294_s10 = int_to_ptr.vmem [resolvable:$true] %s293_s10 }
  0x21   : > { %11006 = dma.hbm_to_vmem [thread:$0]  (!%p11391_p12), %s292_s20, 16, %s294_s10, [#allocation10]  }
  0x25   : > { %11238 = dma.done.wait (%p11011_p9), [#allocation4], 128  }
  0x26   : > { %11240 = vsyncadd (%p11011_p9), [#allocation4], 4294967168 }
  0x27   : > { %11242 = dma.done.wait (%p11011_p9), [#allocation7], 66048  }
  0x28   : > { %11244 = vsyncadd (%p11011_p9), [#allocation7], 4294901248 }
  0x29   : > { %11246 = dma.done.wait (%p11011_p9), [#allocation10], 16  }
  0x2a   : > { %11248 = vsyncadd (%p11011_p9), [#allocation10], 4294967280  ;;  %s8306_s2 = sshll.u32 %s11352_s9, 3  ;;  %s11277_s17 = smov 112   ;;  %v11285_v10 = vmov 0   ;;  %v396_v11 = vlaneseq  ;;  %v11558_v16 = vld [vmem:[%s13985_s1 + $0x40] sm:$0xff] }
  0x2b   : > { %p366_p13 = scmp.lt.s32.totalorder %s8306_s2, 15  ;;  %s11278_s23 = smov 113   ;;  %11069 = vset.pattern.permute.xlu2 %v11285_v10  ;;  %11070 = vset.pattern.permute.xlu0 %v11285_v10  ;;  %v11568_v17 = vperm.slane %v11558_v16, 2  ;;  %v11573_v18 = vld [vmem:[%s13985_s1 + $0x30] sm:$0xff]  ;;  %v11578_v19 = vld [vmem:[%s13985_s1 + $0x38] sm:$0xff]  ;;  %vm860_vm3 = vcmask 1043456  }
  0x2c   : > { %s11279_s26 = smov 111   ;;  %s11280_s12 = smov 127   ;;  %11071 = vset.pattern.permute.xlu1 %v11285_v10  ;;  %v11553_v15 = vand.u32 127, %v396_v11  ;;  %v11587_v24 = vperm.slane %v11573_v18, 2  ;;  %v11590_v25 = vperm.slane %v11578_v19, 2  ;;  %v11610_v33 = vperm.slane %v11558_v16, 3 }
  0x2d   : > { %s14261_s2 = smov (!%p366_p13, %s8306_s2), 15  ;;  %s11281_s13 = smov 15   ;;  %14121 = vst [vmem:[#allocation19_spill] sm:$0xff] %v11568_v17  ;;  %v11616_v35 = vperm.slane %v11558_v16, 0  ;;  %v11619_v36 = vperm.slane %v11558_v16, 1  ;;  %v11639_v48 = vld [vmem:[%s13985_s1 + $0x28] sm:$0xff] }
  0x2e   : > { %s8307_s4 = sshll.u32 %s14261_s2, 3  ;;  %s11282_s18 = smov 1   ;;  %vm761_vm0 = vcmp.lt.s32.totalorder %v11553_v15, 111  ;;  %vm709_vm1 = vcmp.lt.s32.totalorder %v11553_v15, 112  ;;  %vm657_vm2 = vcmp.lt.s32.totalorder %v11553_v15, 113  ;;  %14122 = vst [vmem:[#allocation20_spill] sm:$0xff] %v11610_v33 }
  0x2f   : > { %s11430_s14 = scalar_lea.vmem %s13984_s0, %s8307_s4  ;;  %s11283_s19 = smov 17   ;;  %vm605_vm4 = vcmp.lt.s32.totalorder %v11553_v15, 127  ;;  %v11652_v54 = vperm.slane %v11639_v48, 2  ;;  %v839_v60 = vld [vmem:[%s13987_s3] sm:$0xff]  ;;  %v11669_v62 = vperm.slane %v11573_v18, 3  ;;  %v11672_v63 = vperm.slane %v11578_v19, 3 }
  0x30   : > { %v11433_v0 = vld [vmem:[%s11430_s14 + $0x10] sm:$0xff]  ;;  %v11442_v1 = vld [vmem:[%s11430_s14 + $0x18] sm:$0xff]  ;;  %v11451_v2 = vld [vmem:[%s11430_s14 + $0x20] sm:$0xff]  ;;  %s11284_s21 = smov 16   ;;  %v11683_v11 = vperm.slane %v11578_v19, 1  ;;  %vm501_vm5 = vcmp.lt.s32.totalorder %v11553_v15, 15 }
  0x31   : > { %697 = vrot.lane.b32.xlu2 %v11433_v0, %s11277_s17  ;;  %645 = vrot.lane.b32.xlu1 %v11433_v0, %s11278_s23  ;;  %v11454_v3 = vld [vmem:[%s11430_s14 + $0x8] sm:$0xff]  ;;  %v11469_v4 = vld [vmem:[%s11430_s14] sm:$0xff]  ;;  %14123 = vst [vmem:[#allocation21_spill] sm:$0xff] %v11652_v54  ;;  %vm553_vm6 = vcmp.lt.s32.totalorder %v11553_v15, 1  ;;  %vm398_vm7 = vcmp.lt.s32.totalorder %v11553_v15, 17  ;;  %vm449_vm8 = vcmp.lt.s32.totalorder %v11553_v15, 16 }
  0x32   : > { %749 = vrot.lane.b32.xlu0 %v11433_v0, %s11279_s26  ;;  %v11508_v5 = vld [vmem:[%s11430_s14 + $0x38] sm:$0xff]  ;;  %v11541_v9 = vld [vmem:[%s11430_s14 + $0x30] sm:$0xff]  ;;  %v11600_v28 = vld [vmem:[%s11430_s14 + $0x28] sm:$0xff]  ;;  %14124 = vst [vmem:[#allocation22_spill] sm:$0xff] %v11669_v62  ;;  %vm856_vm9 = vcmask 588800   ;;  %vm1643_vm10 = vcmask 130048  }
  0x33   : > { %14125 = vst [vmem:[#allocation23_spill] sm:$0xff] %v11672_v63  ;;  %vm2009_vm11 = vcmask 1040384   ;;  %vm2010_vm12 = vsmask.f32 256  ;;  %vm2012_vm13 = vcmask 1042434   ;;  %s11213_s22 = scalar_lea.hbm %s13992_s8, 8 }
  0x34   : > { %vm2013_vm14 = vsmask.f32 2304  ;;  %vm2011_vm15 = vmand %vm2009_vm11, %vm2010_vm12 }
  0x39   : > { %699 = vrot.lane.b32.xlu2 %v11442_v1, %s11277_s17  ;;  %647 = vrot.lane.b32.xlu1 %v11442_v1, %s11278_s23 }
  0x3a   : > { %751 = vrot.lane.b32.xlu0 %v11442_v1, %s11279_s26 }
  0x41   : > { %593 = vrot.lane.b32.xlu2 %v11433_v0, %s11280_s12  ;;  %753 = vrot.lane.b32.xlu1 %v11451_v2, %s11279_s26 }
  0x42   : > { %747 = vrot.lane.b32.xlu0 %v11454_v3, %s11279_s26 }
  0x49   : > { %649 = vrot.lane.b32.xlu2 %v11451_v2, %s11278_s23  ;;  %643 = vrot.lane.b32.xlu1 %v11454_v3, %s11278_s23 }
  0x4a   : > { %595 = vrot.lane.b32.xlu0 %v11442_v1, %s11280_s12 }
  0x51   : > { %701 = vrot.lane.b32.xlu1 %v11451_v2, %s11277_s17  ;;  %745 = vrot.lane.b32.xlu2 %v11469_v4, %s11279_s26 }
  0x52   : > { %695 = vrot.lane.b32.xlu0 %v11454_v3, %s11277_s17 }
  0x59   : > { %489 = vrot.lane.b32.xlu1 %v11433_v0, %s11281_s13  ;;  %539 = vrot.lane.b32.xlu2 %v11454_v3, %s11282_s18 }
  0x5a   : > { %487 = vrot.lane.b32.xlu0 %v11454_v3, %s11281_s13 }
  0x61   : > { %591 = vrot.lane.b32.xlu1 %v11454_v3, %s11280_s12  ;;  %597 = vrot.lane.b32.xlu2 %v11451_v2, %s11280_s12 }
  0x62   : > { %541 = vrot.lane.b32.xlu0 %v11433_v0, %s11282_s18 }
  0x69   : > { %384 = vrot.lane.b32.xlu1 %v11433_v0, %s11283_s19  ;;  %435 = vrot.lane.b32.xlu2 %v11454_v3, %s11284_s21 }
  0x6a   : > { %382 = vrot.lane.b32.xlu0 %v11454_v3, %s11283_s19 }
  0x71   : > { %641 = vrot.lane.b32.xlu1 %v11469_v4, %s11278_s23  ;;  %693 = vrot.lane.b32.xlu2 %v11469_v4, %s11277_s17 }
  0x72   : > { %437 = vrot.lane.b32.xlu0 %v11433_v0, %s11284_s21 }
  0x79   : > { %491 = vrot.lane.b32.xlu1 %v11442_v1, %s11281_s13  ;;  %537 = vrot.lane.b32.xlu2 %v11469_v4, %s11282_s18 }
  0x7a   : > { %485 = vrot.lane.b32.xlu0 %v11469_v4, %s11281_s13 }
  0x81   : > { %589 = vrot.lane.b32.xlu1 %v11469_v4, %s11280_s12  ;;  %759 = vrot.lane.b32.xlu2 %v11508_v5, %s11279_s26 }
  0x82   : > { %543 = vrot.lane.b32.xlu0 %v11442_v1, %s11282_s18 }
  0x89   : > { %386 = vrot.lane.b32.xlu1 %v11442_v1, %s11283_s19  ;;  %433 = vrot.lane.b32.xlu2 %v11469_v4, %s11284_s21 }
  0x8a   : > { %380 = vrot.lane.b32.xlu0 %v11469_v4, %s11283_s19 }
  0x8b   : > { %v11522_v6 = vpop.permute.xlu2 %697 }
  0x91   : > { %499 = vrot.lane.b32.xlu1 %v11508_v5, %s11281_s13  ;;  %551 = vrot.lane.b32.xlu2 %v11508_v5, %s11282_s18 }
  0x92   : > { %439 = vrot.lane.b32.xlu0 %v11442_v1, %s11284_s21 }
  0x93   : > { %v11530_v7 = vpop.permute.xlu2 %699 }
  0x94   : > { %v714_v26 = vsel %vm709_vm1, %v11522_v6, %v11530_v7 }
  0x95   : > { %v739_v32 = vmul.f32 %v11590_v25, %v714_v26 }
  0x99   : > { %707 = vrot.lane.b32.xlu1 %v11508_v5, %s11277_s17  ;;  %394 = vrot.lane.b32.xlu2 %v11508_v5, %s11283_s19 }
  0x9a   : > { %655 = vrot.lane.b32.xlu0 %v11508_v5, %s11278_s23 }
  0x9b   : > { %v11538_v8 = vpop.permute.xlu2 %593 }
  0xa1   : > { %603 = vrot.lane.b32.xlu1 %v11508_v5, %s11280_s12  ;;  %497 = vrot.lane.b32.xlu2 %v11541_v9, %s11281_s13 }
  0xa2   : > { %447 = vrot.lane.b32.xlu0 %v11508_v5, %s11284_s21 }
  0xa3   : > { %v11549_v12 = vpop.permute.xlu2 %649  ;;  %v11551_v13 = vpop.permute.xlu1 %645 }
  0xa4   : > { %v750_v14 = vpop.permute.xlu0 %749 }
  0xa9   : > { %392 = vrot.lane.b32.xlu1 %v11541_v9, %s11283_s19  ;;  %445 = vrot.lane.b32.xlu2 %v11541_v9, %s11284_s21 }
  0xaa   : > { %549 = vrot.lane.b32.xlu0 %v11541_v9, %s11282_s18 }
  0xab   : > { %v648_v20 = vpop.permute.xlu1 %647  ;;  %v11582_v21 = vpop.permute.xlu2 %745 }
  0xac   : > { %v752_v22 = vpop.permute.xlu0 %751  ;;  %v662_v27 = vsel %vm657_vm2, %v11551_v13, %v648_v20  ;;  %v661_v10 = vsel %vm657_vm2, %v648_v20, %v11549_v12 }
  0xad   : > { %v766_v23 = vsel %vm761_vm0, %v750_v14, %v752_v22  ;;  %v687_v31 = vmul.f32 %v11587_v24, %v662_v27 }
  0xae   : > { %v791_v29 = vmul.f32 %v11568_v17, %v766_v23  ;;  %v11692_v23 = vperm.slane %v11639_v48, 3 }
  0xaf   : > { %v823_v41 = vpack.c.bf16 %v739_v32, %v687_v31 }
  0xb0   : > { %v831_v30 = vpack.c.bf16 %v791_v29, %v791_v29  ;;  %14126 = vst [vmem:[#allocation24_spill] sm:$0xff] %v11692_v23 }
  0xb1   : > { %651 = vrot.lane.b32.xlu1 %v11600_v28, %s11278_s23  ;;  %703 = vrot.lane.b32.xlu2 %v11600_v28, %s11277_s17 }
  0xb2   : > { %755 = vrot.lane.b32.xlu0 %v11600_v28, %s11279_s26  ;;  %v868_v34 = vsel %vm860_vm3, %v831_v30, 0  ;;  %v688_v30 = vmul.f32 %v11669_v62, %v661_v10 }
  0xb3   : > { %916 = vmatpush.bf16.msra.mxu2 %v868_v34  ;;  %v11621_v37 = vpop.permute.xlu1 %753  ;;  %v11623_v38 = vpop.permute.xlu2 %539 }
  0xb4   : > { %v748_v39 = vpop.permute.xlu0 %747  ;;  %v765_v40 = vsel %vm761_vm0, %v752_v22, %v11621_v37 }
  0xb5   : > { %v768_v42 = vsel %vm761_vm0, %v11582_v21, %v748_v39  ;;  %v767_v43 = vsel %vm761_vm0, %v748_v39, %v750_v14  ;;  %v792_v44 = vmul.f32 %v11610_v33, %v765_v40 }
  0xb6   : > { %v789_v45 = vmul.f32 %v11616_v35, %v768_v42  ;;  %v790_v46 = vmul.f32 %v11619_v36, %v767_v43 }
  0xb7   : > { %917 = vmatpush.bf16.msra.mxu2 %v823_v41  ;;  %v832_v47 = vpack.c.bf16 %v792_v44, %v792_v44 }
  0xb8   : > { %v829_v49 = vpack.c.bf16 %v789_v45, %v789_v45  ;;  %v830_v50 = vpack.c.bf16 %v790_v46, %v790_v46  ;;  %v11728_v45 = vld [vmem:[%s13985_s1 + $0x10] sm:$0xff]  ;;  %v11733_v46 = vld [vmem:[%s13985_s1 + $0x18] sm:$0xff] }
  0xb9   : > { %493 = vrot.lane.b32.xlu1 %v11451_v2, %s11281_s13  ;;  %545 = vrot.lane.b32.xlu2 %v11451_v2, %s11282_s18  ;;  %v871_v51 = vsel %vm860_vm3, %v832_v47, 0  ;;  %v11743_v47 = vperm.slane %v11728_v45, 2 }
  0xba   : > { %599 = vrot.lane.b32.xlu0 %v11600_v28, %s11280_s12  ;;  %v862_v52 = vsel %vm860_vm3, %v829_v49, 0  ;;  %v865_v53 = vsel %vm860_vm3, %v830_v50, 0  ;;  %930 = vmatpush.bf16.msra.mxu3 %v871_v51  ;;  %v11746_v49 = vperm.slane %v11733_v46, 2 }
  0xbb   : > { %888 = vmatpush.bf16.msra.mxu0 %v862_v52  ;;  %902 = vmatpush.bf16.msra.mxu1 %v865_v53  ;;  %v11654_v55 = vpop.permute.xlu1 %643  ;;  %v11656_v56 = vpop.permute.xlu2 %597  ;;  %14127 = vst [vmem:[#allocation25_spill] sm:$0xff] %v11743_v47 }
  0xbc   : > { %v596_v57 = vpop.permute.xlu0 %595  ;;  %v663_v14 = vsel %vm657_vm2, %v11654_v55, %v11551_v13  ;;  %14128 = vst [vmem:[#allocation26_spill] sm:$0xff] %v11746_v49 }
  0xbd   : > { %v610_v58 = vsel %vm605_vm4, %v11538_v8, %v596_v57  ;;  %v609_v20 = vsel %vm605_vm4, %v596_v57, %v11656_v56 }
  0xbe   : > { %v635_v59 = vmul.f32 %v11652_v54, %v610_v58  ;;  %v636_v40 = vmul.f32 %v11692_v23, %v609_v20 }
  0xc0   : > { %v815_v61 = vpack.c.bf16 %v635_v59, %v11433_v0  ;;  %v11680_v0 = vperm.slane %v11573_v18, 1  ;;  %v816_v42 = vpack.c.bf16 %v636_v40, %v11442_v1  ;;  %v11739_v1 = vperm.slane %v11639_v48, 1 }
  0xc1   : > { %441 = vrot.lane.b32.xlu1 %v11451_v2, %s11284_s21  ;;  %843 = vperm.xlu2 %11069, %v839_v60  }
  0xc2   : > { %918 = vmatpush.bf16.msra.mxu2 %v815_v61  ;;  %388 = vrot.lane.b32.xlu0 %v11451_v2, %s11283_s19  ;;  %v686_v32 = vmul.f32 %v11680_v0, %v663_v14 }
  0xc3   : > { %v11689_v22 = vpop.permute.xlu1 %701  ;;  %v11704_v13 = vpop.permute.xlu2 %435 }
  0xc4   : > { %v713_v26 = vsel %vm709_vm1, %v11530_v7, %v11689_v22  ;;  %v696_v27 = vpop.permute.xlu0 %695  ;;  %v840_v7 = vld [vmem:[%s13987_s3 + $0x8] sm:$0xff] }
  0xc5   : > { %v715_v29 = vsel %vm709_vm1, %v696_v27, %v11522_v6  ;;  %v740_v31 = vmul.f32 %v11672_v63, %v713_v26  ;;  %v11777_v26 = vld [vmem:[%s13985_s1] sm:$0xff]  ;;  %v11939_v63 = vperm.slane %v11573_v18, 7 }
  0xc6   : > { %v738_v34 = vmul.f32 %v11683_v11, %v715_v29  ;;  %v11788_v29 = vperm.slane %v11573_v18, 0 }
  0xc7   : > { %v824_v39 = vpack.c.bf16 %v740_v31, %v688_v30  ;;  %v11791_v30 = vperm.slane %v11578_v19, 0  ;;  %14137 = vst [vmem:[#allocation35_spill] sm:$0xff] %v11939_v63 }
  0xc8   : > { %v822_v41 = vpack.c.bf16 %v738_v34, %v686_v32  ;;  %v11798_v32 = vperm.slane %v11777_v26, 2 }
  0xc9   : > { %931 = vmatpush.bf16.msra.mxu3 %v824_v39  ;;  %757 = vrot.lane.b32.xlu1 %v11541_v9, %s11279_s26 }
  0xca   : > { %903 = vmatpush.bf16.msra.mxu1 %v822_v41  ;;  %653 = vrot.lane.b32.xlu2 %v11541_v9, %s11278_s23  ;;  %14129 = vst [vmem:[#allocation27_spill] sm:$0xff] %v11798_v32 }
  0xcb   : > { %v11718_v6 = vpop.permute.xlu1 %489  ;;  %848 = vperm.xlu0 %11070, %v840_v7   ;;  %v11723_v44 = vpop.permute.xlu2 %693 }
  0xcc   : > { %v11721_v43 = vpop.permute.xlu0 %487  ;;  %v716_v31 = vsel %vm709_vm1, %v11723_v44, %v696_v27 }
  0xcd   : > { %932 = vmatpush.bf16.msra.mxu3 %v816_v42  ;;  %v507_v50 = vsel %vm501_vm5, %v11721_v43, %v11718_v6 }
  0xce   : > { %v531_v59 = vmul.f32 %v11743_v47, %v507_v50  ;;  %v11877_v47 = vperm.slane %v11777_v26, 1 }
  0xd1   : > { %705 = vrot.lane.b32.xlu1 %v11541_v9, %s11277_s17 }
  0xd2   : > { %547 = vrot.lane.b32.xlu2 %v11600_v28, %s11282_s18 }
  0xd3   : > { %v592_v51 = vpop.permute.xlu1 %591  ;;  %601 = vrot.lane.b32.xlu0 %v11541_v9, %s11280_s12  ;;  %v11766_v14 = vpop.permute.xlu2 %537 }
  0xd4   : > { %v611_v52 = vsel %vm605_vm4, %v592_v51, %v11538_v8  ;;  %v542_v53 = vpop.permute.xlu0 %541 }
  0xd5   : > { %v559_v57 = vsel %vm553_vm6, %v11623_v38, %v542_v53  ;;  %v634_v58 = vmul.f32 %v11739_v1, %v611_v52  ;;  %v737_v52 = vmul.f32 %v11791_v30, %v716_v31  ;;  %v560_v31 = vsel %vm553_vm6, %v11766_v14, %v11623_v38 }
  0xd6   : > { %v583_v60 = vmul.f32 %v11746_v49, %v559_v57  ;;  %v11851_v38 = vperm.slane %v11728_v45, 3 }
  0xd7   : > { %v814_v61 = vpack.c.bf16 %v634_v58, %v11454_v3  ;;  %v11782_v3 = vld [vmem:[%s13985_s1 + $0x8] sm:$0xff] }
  0xd8   : > { %v807_v10 = vpack.c.bf16 %v583_v60, %v531_v59  ;;  %v11801_v34 = vperm.slane %v11782_v3, 2  ;;  %14131 = vst [vmem:[#allocation29_spill] sm:$0xff] %v11851_v38 }
  0xd9   : > { %904 = vmatpush.bf16.msra.mxu1 %v814_v61  ;;  %495 = vrot.lane.b32.xlu1 %v11600_v28, %s11281_s13  ;;  %v11824_v61 = vld [vmem:[#allocation3] sm:$0xff] }
  0xda   : > { %919 = vmatpush.bf16.msra.mxu2 %v807_v10  ;;  %14130 = vst [vmem:[#allocation28_spill] sm:$0xff] %v11801_v34  ;;  %v11830_v10 = vperm.slane %v11733_v46, 1 }
  0xdb   : > { %v11770_v8 = vpop.permute.xlu1 %384  ;;  %390 = vrot.lane.b32.xlu0 %v11600_v28, %s11283_s19  ;;  %v11806_v40 = vpop.permute.xlu2 %759 }
  0xdc   : > { %v383_v20 = vpop.permute.xlu0 %382 }
  0xdd   : > { %v404_v39 = vsel %vm398_vm7, %v383_v20, %v11770_v8 }
  0xde   : > { %v427_v57 = vmul.f32 %v11798_v32, %v404_v39 }
  0xe1   : > { %443 = vrot.lane.b32.xlu1 %v11600_v28, %s11284_s21 }
  0xe3   : > { %v11808_v41 = vpop.permute.xlu1 %641 }
  0xe4   : > { %v11810_v7 = vpop.permute.xlu0 %437  ;;  %v664_v27 = vsel %vm657_vm2, %v11808_v41, %v11654_v55  ;;  %v11827_v55 = vperm.slane %v11728_v45, 1 }
  0xe5   : > { %v455_v42 = vsel %vm449_vm8, %v11704_v13, %v11810_v7  ;;  %v685_v50 = vmul.f32 %v11788_v29, %v664_v27 }
  0xe6   : > { %v479_v58 = vmul.f32 %v11801_v34, %v455_v42  ;;  %v11838_v42 = vpop.permute.xlu2 %433 }
  0xe7   : > { %v821_v59 = vpack.c.bf16 %v737_v52, %v685_v50 }
  0xe8   : > { %v799_v60 = vpack.c.bf16 %v479_v58, %v427_v57  ;;  %v582_v57 = vmul.f32 %v11830_v10, %v560_v31 }
  0xe9   : > { %889 = vmatpush.bf16.msra.mxu0 %v821_v59  ;;  %v11848_v59 = vperm.slane %v11639_v48, 0 }
  0xea   : > { %920 = vmatpush.bf16.msra.mxu2 %v799_v60  ;;  %v11854_v60 = vperm.slane %v11733_v46, 3 }
  0xeb   : > { %v11836_v39 = vpop.permute.xlu1 %491 }
  0xec   : > { %v486_v27 = vpop.permute.xlu0 %485  ;;  %14132 = vst [vmem:[#allocation30_spill] sm:$0xff] %v11854_v60 }
  0xed   : > { %v508_v50 = vsel %vm501_vm5, %v486_v27, %v11721_v43  ;;  %8321 = vmatmul.msk.bf16.vlgmr.msra.gmra.mxu2 %vm856_vm9, %v11824_v61  ;;  %v506_v43 = vsel %vm501_vm5, %v11718_v6, %v11836_v39 }
  0xee   : > { %v530_v52 = vmul.f32 %v11827_v55, %v508_v50  ;;  %v11873_v17 = vpop.permute.xlu2 %551 }
  0xf0   : > { %v806_v58 = vpack.c.bf16 %v582_v57, %v530_v52 }
  0xf2   : > { %905 = vmatpush.bf16.msra.mxu1 %v806_v58  ;;  %v532_v58 = vmul.f32 %v11851_v38, %v506_v43  ;;  %v11903_v38 = vperm.slane %v11733_v46, 0 }
  0xf3   : > { %v11860_v33 = vpop.permute.xlu1 %589 }
  0xf4   : > { %v11862_v50 = vpop.permute.xlu0 %543  ;;  %v612_v31 = vsel %vm605_vm4, %v11860_v33, %v592_v51  ;;  %v11880_v51 = vperm.slane %v11782_v3, 1 }
  0xf5   : > { %v558_v52 = vsel %vm553_vm6, %v542_v53, %v11862_v50  ;;  %v633_v57 = vmul.f32 %v11848_v59, %v612_v31  ;;  %v456_v53 = vsel %vm449_vm8, %v11838_v42, %v11704_v13 }
  0xf6   : > { %v584_v32 = vmul.f32 %v11854_v60, %v558_v52  ;;  %v11893_v52 = vperm.slane %v11558_v16, 7  ;;  %v395_v13 = vpop.permute.xlu2 %394 }
  0xf7   : > { %v813_v6 = vpack.c.bf16 %v633_v57, %v11469_v4  ;;  %v769_v57 = vsel %vm761_vm0, %v11806_v40, %v11582_v21 }
  0xf8   : > { %v808_v34 = vpack.c.bf16 %v584_v32, %v532_v58  ;;  %14133 = vst [vmem:[#allocation31_spill] sm:$0xff] %v11893_v52  ;;  %v796_v21 = vmul.f32 %v11893_v52, %v769_v57 }
  0xf9   : > { %890 = vmatpush.bf16.msra.mxu0 %v813_v6  ;;  %v11900_v6 = vperm.slane %v11728_v45, 0 }
  0xfa   : > { %933 = vmatpush.bf16.msra.mxu3 %v808_v34  ;;  %v478_v34 = vmul.f32 %v11880_v51, %v456_v53  ;;  %v11910_v53 = vperm.slane %v11777_v26, 3  ;;  %v836_v23 = vpack.c.bf16 %v796_v21, %v796_v21  ;;  %v11960_v21 = vperm.slane %v11639_v48, 7 }
  0xfb   : > { %v11886_v43 = vpop.permute.xlu1 %386 }
  0xfc   : > { %v381_v31 = vpop.permute.xlu0 %380  ;;  %14134 = vst [vmem:[#allocation32_spill] sm:$0xff] %v11910_v53 }
  0xfd   : > { %v405_v4 = vsel %vm398_vm7, %v381_v31, %v383_v20  ;;  %v561_v20 = vsel %vm553_vm6, %v11873_v17, %v11766_v14  ;;  %14138 = vst [vmem:[#allocation36_spill] sm:$0xff] %v11960_v21 }
  0xfe   : > { %v426_v32 = vmul.f32 %v11877_v47, %v405_v4  ;;  %v11913_v4 = vperm.slane %v11782_v3, 3  ;;  %v581_v52 = vmul.f32 %v11903_v38, %v561_v20 }
 0x100   : > { %v798_v58 = vpack.c.bf16 %v478_v34, %v426_v32  ;;  %14135 = vst [vmem:[#allocation33_spill] sm:$0xff] %v11913_v4  ;;  %v403_v32 = vsel %vm398_vm7, %v11770_v8, %v11886_v43 }
 0x101   : > { %v428_v8 = vmul.f32 %v11910_v53, %v403_v32  ;;  %v12023_v53 = vperm.slane %v11558_v16, 4 }
 0x102   : > { %906 = vmatpush.bf16.msra.mxu1 %v798_v58 }
 0x103   : > { %v500_v34 = vpop.permute.xlu1 %499  ;;  %14143 = vst [vmem:[#allocation41_spill] sm:$0xff] %v12023_v53 }
 0x104   : > { %v11920_v60 = vpop.permute.xlu0 %439  ;;  %v509_v14 = vsel %vm501_vm5, %v500_v34, %v486_v27  ;;  %v11935_v27 = vperm.slane %v11578_v19, 7 }
 0x105   : > { %v454_v58 = vsel %vm449_vm8, %v11810_v7, %v11920_v60  ;;  %8320 = vmatmul.msk.bf16.vlgmr.msra.gmra.mxu1 %vm856_vm9, %v11824_v61  ;;  %v529_v57 = vmul.f32 %v11900_v6, %v509_v14  ;;  %v883_v7 = vsel %vm860_vm3, %v836_v23, 0  ;;  %v11941_v14 = vpop.permute.xlu2 %497 }
 0x106   : > { %v480_v49 = vmul.f32 %v11913_v4, %v454_v58  ;;  %14136 = vst [vmem:[#allocation34_spill] sm:$0xff] %v11935_v27  ;;  %v11963_v58 = vperm.slane %v11777_v26, 0  ;;  %v12029_v4 = vperm.slane %v11573_v18, 4 }
 0x107   : > { %v805_v54 = vpack.c.bf16 %v581_v52, %v529_v57 }
 0x108   : > { %v800_v62 = vpack.c.bf16 %v480_v49, %v428_v8  ;;  %14144 = vst [vmem:[#allocation42_spill] sm:$0xff] %v12029_v4 }
 0x109   : > { %891 = vmatpush.bf16.msra.mxu0 %v805_v54 }
 0x10a   : > { %934 = vmatpush.bf16.msra.mxu3 %v800_v62 }
 0x10b   : > { %v11943_v20 = vpop.permute.xlu1 %707 }
 0x10c   : > { %v11945_v32 = vpop.permute.xlu0 %655  ;;  %v717_v54 = vsel %vm709_vm1, %v11943_v20, %v11723_v44  ;;  %v11966_v44 = vperm.slane %v11782_v3, 0 }
 0x10d   : > { %v665_v62 = vsel %vm657_vm2, %v11945_v32, %v11808_v41  ;;  %8322 = vmatmul.msk.bf16.vlgmr.msra.gmra.mxu3 %vm856_vm9, %v11824_v61  ;;  %v744_v23 = vmul.f32 %v11935_v27, %v717_v54  ;;  %v406_v41 = vsel %vm398_vm7, %v395_v13, %v381_v31  ;;  %v11976_v54 = vpop.permute.xlu2 %445  ;;  %v11986_v27 = vperm.slane %v11728_v45, 7 }
 0x10e   : > { %986 = vmatpush.bf16.msrb.mxu3 %v883_v7  ;;  %v692_v49 = vmul.f32 %v11939_v63, %v665_v62 }
 0x10f   : > { %14139 = vst [vmem:[#allocation37_spill] sm:$0xff] %v11986_v27 }
 0x110   : > { %v828_v52 = vpack.c.bf16 %v744_v23, %v692_v49  ;;  %v425_v49 = vmul.f32 %v11963_v58, %v406_v41 }
 0x112   : > { %987 = vmatpush.bf16.msrb.mxu3 %v828_v52 }
 0x113   : > { %v11970_v57 = vpop.permute.xlu1 %603 }
 0x114   : > { %v448_v8 = vpop.permute.xlu0 %447  ;;  %v613_v7 = vsel %vm605_vm4, %v11970_v57, %v11860_v33  ;;  %v11989_v33 = vperm.slane %v11733_v46, 7 }
 0x115   : > { %v457_v62 = vsel %vm449_vm8, %v448_v8, %v11838_v42  ;;  %v640_v23 = vmul.f32 %v11960_v21, %v613_v7  ;;  %v502_v42 = vsel %vm501_vm5, %v11941_v14, %v500_v34 }
 0x116   : > { %v477_v31 = vmul.f32 %v11966_v44, %v457_v62  ;;  %14140 = vst [vmem:[#allocation38_spill] sm:$0xff] %v11989_v33  ;;  %v11999_v62 = vperm.slane %v11777_v26, 7  ;;  %v536_v34 = vmul.f32 %v11986_v27, %v502_v42 }
 0x117   : > { %v820_v52 = vpack.c.bf16 %v640_v23, %v11508_v5 }
 0x118   : > { %v797_v63 = vpack.c.bf16 %v477_v31, %v425_v49  ;;  %14141 = vst [vmem:[#allocation39_spill] sm:$0xff] %v11999_v62  ;;  %v12013_v49 = vperm.slane %v11782_v3, 7  ;;  %v12015_v31 = vpop.permute.xlu2 %703 }
 0x119   : > { %988 = vmatpush.bf16.msrb.mxu3 %v820_v52 }
 0x11a   : > { %892 = vmatpush.bf16.msra.mxu0 %v797_v63  ;;  %14142 = vst [vmem:[#allocation40_spill] sm:$0xff] %v12013_v49 }
 0x11b   : > { %v11994_v7 = vpop.permute.xlu1 %392 }
 0x11c   : > { %v11996_v41 = vpop.permute.xlu0 %549  ;;  %v399_v63 = vsel %vm398_vm7, %v11994_v7, %v395_v13 }
 0x11d   : > { %v554_v5 = vsel %vm553_vm6, %v11996_v41, %v11873_v17  ;;  %8319 = vmatmul.msk.bf16.vlgmr.msra.gmra.mxu0 %vm856_vm9, %v11824_v61  ;;  %v450_v17 = vsel %vm449_vm8, %v11976_v54, %v448_v8  ;;  %v432_v21 = vmul.f32 %v11999_v62, %v399_v63 }
 0x11e   : > { %v588_v23 = vmul.f32 %v11989_v33, %v554_v5  ;;  %v484_v13 = vmul.f32 %v12013_v49, %v450_v17 }
 0x120   : > { %v812_v52 = vpack.c.bf16 %v588_v23, %v536_v34  ;;  %v804_v27 = vpack.c.bf16 %v484_v13, %v432_v21  ;;  %v12036_v34 = vperm.slane %v11578_v19, 4  ;;  %v712_v21 = vsel %vm709_vm1, %v11689_v22, %v12015_v31 }
 0x122   : > { %989 = vmatpush.bf16.msrb.mxu3 %v812_v52  ;;  %14145 = vst [vmem:[#allocation43_spill] sm:$0xff] %v12036_v34  ;;  %v741_v52 = vmul.f32 %v12036_v34, %v712_v21 }
 0x123   : > { %v652_v42 = vpop.permute.xlu1 %651 }
 0x124   : > { %v756_v5 = vpop.permute.xlu0 %755  ;;  %v660_v8 = vsel %vm657_vm2, %v11549_v12, %v652_v42 }
 0x125   : > { %v764_v33 = vsel %vm761_vm0, %v11621_v37, %v756_v5  ;;  %v12042_v37 = vpop.permute.xlu2 %545  ;;  %v689_v17 = vmul.f32 %v12029_v4, %v660_v8 }
 0x126   : > { %990 = vmatpush.bf16.msrb.mxu3 %v804_v27  ;;  %v793_v63 = vmul.f32 %v12023_v53, %v764_v33  ;;  %v12049_v27 = vperm.slane %v11639_v48, 4 }
 0x127   : > { %v825_v62 = vpack.c.bf16 %v741_v52, %v689_v17  ;;  %v12075_v52 = vperm.slane %v11782_v3, 4 }
 0x128   : > { %v833_v23 = vpack.c.bf16 %v793_v63, %v793_v63  ;;  %14146 = vst [vmem:[#allocation44_spill] sm:$0xff] %v12049_v27  ;;  %v12058_v63 = vperm.slane %v11728_v45, 4 }
 0x129   : > { %8326 = vmatmul.msk.bf16.vlgmr.msrb.gmra.mxu3 %vm856_vm9, %v11824_v61  ;;  %14149 = vst [vmem:[#allocation47_spill] sm:$0xff] %v12075_v52 }
 0x12a   : > { %v874_v12 = vsel %vm860_vm3, %v833_v23, 0  ;;  %14147 = vst [vmem:[#allocation45_spill] sm:$0xff] %v12058_v63 }
 0x12b   : > { %944 = vmatpush.bf16.msrb.mxu0 %v874_v12  ;;  %v12051_v33 = vpop.permute.xlu1 %493  ;;  %v12066_v12 = vperm.slane %v11733_v46, 4 }
 0x12c   : > { %v600_v13 = vpop.permute.xlu0 %599  ;;  %v505_v23 = vsel %vm501_vm5, %v11836_v39, %v12051_v33 }
 0x12d   : > { %v608_v22 = vsel %vm605_vm4, %v11656_v56, %v600_v13  ;;  %14148 = vst [vmem:[#allocation46_spill] sm:$0xff] %v12066_v12  ;;  %v557_v56 = vsel %vm553_vm6, %v11862_v50, %v12042_v37  ;;  %v533_v17 = vmul.f32 %v12058_v63, %v505_v23  ;;  %v12081_v49 = vpop.permute.xlu2 %843  ;;  %v12098_v63 = vperm.slane %v11558_v16, 5 }
 0x12e   : > { %v637_v8 = vmul.f32 %v12049_v27, %v608_v22  ;;  %v12078_v22 = vperm.slane %v11777_v26, 4  ;;  %v585_v39 = vmul.f32 %v12066_v12, %v557_v56  ;;  %v12101_v12 = vperm.slane %v11558_v16, 6 }
 0x12f   : > { %945 = vmatpush.bf16.msrb.mxu0 %v825_v62  ;;  %14151 = vst [vmem:[#allocation49_spill] sm:$0xff] %v12098_v63  ;;  %v12115_v16 = vperm.slane %v11573_v18, 5 }
 0x130   : > { %v817_v21 = vpack.c.bf16 %v637_v8, %v11451_v2  ;;  %14150 = vst [vmem:[#allocation48_spill] sm:$0xff] %v12078_v22  ;;  %v809_v23 = vpack.c.bf16 %v585_v39, %v533_v17 }
 0x131   : > { %14152 = vst [vmem:[#allocation50_spill] sm:$0xff] %v12101_v12 }
 0x132   : > { %14153 = vst [vmem:[#allocation51_spill] sm:$0xff] %v12115_v16 }
 0x133   : > { %946 = vmatpush.bf16.msrb.mxu0 %v817_v21  ;;  %v12083_v62 = vpop.permute.xlu1 %441 }
 0x134   : > { %v12085_v53 = vpop.permute.xlu0 %388  ;;  %v453_v2 = vsel %vm449_vm8, %v11920_v60, %v12083_v62 }
 0x135   : > { %v402_v50 = vsel %vm398_vm7, %v11886_v43, %v12085_v53  ;;  %v481_v8 = vmul.f32 %v12075_v52, %v453_v2  ;;  %v654_v17 = vpop.permute.xlu2 %653 }
 0x136   : > { %v429_v56 = vmul.f32 %v12078_v22, %v402_v50 }
 0x137   : > { %947 = vmatpush.bf16.msrb.mxu0 %v809_v23 }
 0x138   : > { %v801_v21 = vpack.c.bf16 %v481_v8, %v429_v56 }
 0x13b   : > { %948 = vmatpush.bf16.msrb.mxu0 %v801_v21  ;;  %v758_v60 = vpop.permute.xlu1 %757  ;;  %v12127_v21 = vperm.slane %v11578_v19, 6 }
 0x13c   : > { %v762_v27 = vsel %vm761_vm0, %v758_v60, %v11806_v40  ;;  %v763_v43 = vsel %vm761_vm0, %v756_v5, %v758_v60  ;;  %v12118_v40 = vperm.slane %v11573_v18, 6  ;;  %v659_v5 = vsel %vm657_vm2, %v652_v42, %v654_v17 }
 0x13d   : > { %v794_v39 = vmul.f32 %v12098_v63, %v763_v43  ;;  %v795_v2 = vmul.f32 %v12101_v12, %v762_v27  ;;  %v12110_v50 = vpop.permute.xlu0 %848  ;;  %v12124_v27 = vperm.slane %v11578_v19, 5  ;;  %14156 = vst [vmem:[#allocation54_spill] sm:$0xff] %v12127_v21  ;;  %v658_v43 = vsel %vm657_vm2, %v654_v17, %v11945_v32 }
 0x13e   : > { %8323 = vmatmul.msk.bf16.vlgmr.msrb.gmra.mxu0 %vm856_vm9, %v11824_v61  ;;  %14154 = vst [vmem:[#allocation52_spill] sm:$0xff] %v12118_v40  ;;  %v690_v18 = vmul.f32 %v12115_v16, %v659_v5  ;;  %v12135_v42 = vperm.slane %v11639_v48, 5  ;;  %v691_v32 = vmul.f32 %v12118_v40, %v658_v43 }
 0x13f   : > { %v835_v8 = vpack.c.bf16 %v795_v2, %v795_v2  ;;  %v834_v23 = vpack.c.bf16 %v794_v39, %v794_v39  ;;  %14155 = vst [vmem:[#allocation53_spill] sm:$0xff] %v12124_v27  ;;  %v12138_v2 = vperm.slane %v11639_v48, 6 }
 0x140   : > { %14157 = vst [vmem:[#allocation55_spill] sm:$0xff] %v12135_v42 }
 0x141   : > { %v880_v56 = vsel %vm860_vm3, %v835_v8, 0  ;;  %v877_v60 = vsel %vm860_vm3, %v834_v23, 0  ;;  %14158 = vst [vmem:[#allocation56_spill] sm:$0xff] %v12138_v2  ;;  %vm2014_vm3 = vmand %vm2012_vm13, %vm2013_vm14 }
 0x142   : > { %972 = vmatpush.bf16.msrb.mxu2 %v880_v56  ;;  %958 = vmatpush.bf16.msrb.mxu1 %v877_v60  ;;  %v548_v56 = vpop.permute.xlu2 %547  ;;  %vm13097_vm12 = vmor %vm2014_vm3, %vm2011_vm15  ;;  %vm2827_vm15 = vsmask.f32 7942  ;;  %vm2829_vm3 = vsmask.f32 7950 }
 0x143   : > { %v706_v39 = vpop.permute.xlu1 %705  ;;  %v555_v12 = vsel %vm553_vm6, %v548_v56, %v11996_v41 }
 0x144   : > { %v710_v19 = vsel %vm709_vm1, %v706_v39, %v11943_v20  ;;  %v711_v8 = vsel %vm709_vm1, %v12015_v31, %v706_v39  ;;  %v12155_v20 = vperm.slane %v11733_v46, 5  ;;  %v12158_v31 = vperm.slane %v11733_v46, 6 }
 0x145   : > { %v742_v17 = vmul.f32 %v12124_v27, %v711_v8  ;;  %v743_v23 = vmul.f32 %v12127_v21, %v710_v19  ;;  %v602_v5 = vpop.permute.xlu0 %601  ;;  %v12172_v46 = vperm.slane %v11728_v45, 6 }
 0x146   : > { %v606_v48 = vsel %vm605_vm4, %v602_v5, %v11970_v57  ;;  %v607_v60 = vsel %vm605_vm4, %v600_v13, %v602_v5  ;;  %14159 = vst [vmem:[#allocation57_spill] sm:$0xff] %v12155_v20  ;;  %v556_v57 = vsel %vm553_vm6, %v12042_v37, %v548_v56  ;;  %v12169_v13 = vperm.slane %v11728_v45, 5 }
 0x147   : > { %14160 = vst [vmem:[#allocation58_spill] sm:$0xff] %v12158_v31  ;;  %v638_v43 = vmul.f32 %v12135_v42, %v607_v60  ;;  %v639_v39 = vmul.f32 %v12138_v2, %v606_v48  ;;  %v827_v19 = vpack.c.bf16 %v743_v23, %v691_v32  ;;  %v826_v8 = vpack.c.bf16 %v742_v17, %v690_v18 }
 0x148   : > { %14161 = vst [vmem:[#allocation59_spill] sm:$0xff] %v12169_v13  ;;  %v586_v17 = vmul.f32 %v12155_v20, %v556_v57  ;;  %v587_v41 = vmul.f32 %v12158_v31, %v555_v12  ;;  %v12190_v12 = vperm.slane %v11777_v26, 6 }
 0x149   : > { %973 = vmatpush.bf16.msrb.mxu2 %v827_v19  ;;  %14162 = vst [vmem:[#allocation60_spill] sm:$0xff] %v12172_v46  ;;  %959 = vmatpush.bf16.msrb.mxu1 %v826_v8  ;;  %v819_v5 = vpack.c.bf16 %v639_v39, %v11541_v9  ;;  %v818_v18 = vpack.c.bf16 %v638_v43, %v11600_v28  ;;  %v12187_v28 = vperm.slane %v11777_v26, 5  ;;  %v12199_v43 = vperm.slane %v11782_v3, 5 }
 0x14a   : > { %14164 = vst [vmem:[#allocation62_spill] sm:$0xff] %v12190_v12  ;;  %v12202_v39 = vperm.slane %v11782_v3, 6 }
 0x14b   : > { %v496_v32 = vpop.permute.xlu1 %495  ;;  %14163 = vst [vmem:[#allocation61_spill] sm:$0xff] %v12187_v28 }
 0x14c   : > { %v503_v37 = vsel %vm501_vm5, %v496_v32, %v11941_v14  ;;  %v504_v23 = vsel %vm501_vm5, %v12051_v33, %v496_v32  ;;  %14165 = vst [vmem:[#allocation63_spill] sm:$0xff] %v12199_v43 }
 0x14d   : > { %v534_v45 = vmul.f32 %v12169_v13, %v504_v23  ;;  %v535_v56 = vmul.f32 %v12172_v46, %v503_v37  ;;  %974 = vmatpush.bf16.msrb.mxu2 %v819_v5  ;;  %960 = vmatpush.bf16.msrb.mxu1 %v818_v18  ;;  %v391_v9 = vpop.permute.xlu0 %390  ;;  %14166 = vst [vmem:[#allocation64_spill] sm:$0xff] %v12202_v39 }
 0x14e   : > { %v400_v14 = vsel %vm398_vm7, %v391_v9, %v11994_v7  ;;  %v401_v33 = vsel %vm398_vm7, %v12085_v53, %v391_v9 }
 0x14f   : > { %v811_v48 = vpack.c.bf16 %v587_v41, %v535_v56  ;;  %v810_v60 = vpack.c.bf16 %v586_v17, %v534_v45  ;;  %v430_v26 = vmul.f32 %v12187_v28, %v401_v33  ;;  %v431_v19 = vmul.f32 %v12190_v12, %v400_v14 }
 0x151   : > { %975 = vmatpush.bf16.msrb.mxu2 %v811_v48  ;;  %961 = vmatpush.bf16.msrb.mxu1 %v810_v60 }
 0x153   : > { %v444_v8 = vpop.permute.xlu1 %443 }
 0x154   : > { %v451_v7 = vsel %vm449_vm8, %v444_v8, %v11976_v54  ;;  %v452_v53 = vsel %vm449_vm8, %v12083_v62, %v444_v8 }
 0x155   : > { %v482_v57 = vmul.f32 %v12199_v43, %v452_v53  ;;  %v483_v3 = vmul.f32 %v12202_v39, %v451_v7 }
 0x157   : > { %v802_v5 = vpack.c.bf16 %v482_v57, %v430_v26  ;;  %v803_v18 = vpack.c.bf16 %v483_v3, %v431_v19 }
 0x159   : > { %962 = vmatpush.bf16.msrb.mxu1 %v802_v5  ;;  %976 = vmatpush.bf16.msrb.mxu2 %v803_v18 }
 0x15c   : > { %8324 = vmatmul.msk.bf16.vlgmr.msrb.gmra.mxu1 %vm856_vm9, %v11824_v61  ;;  %8325 = vmatmul.msk.bf16.vlgmr.msrb.gmra.mxu2 %vm856_vm9, %v11824_v61  ;;  %vm2004_vm9 = vcmask 1041408  }
 0x170   : > { %v922_v62 = vpop.f32.mrf.mxu2 }
 0x171   : > { %v923_v61 = vadd.f32 %v922_v62, %v12081_v49 }
 0x173   : > { %v12230_v41 = vmax.f32 %v923_v61, 0.0 }
 0x178   : > { %v924_v19 = vpop.f32.mrf.mxu2 }
 0x179   : > { %v925_v7 = vadd.f32 %v924_v19, %v12110_v50 }
 0x17b   : > { %v12286_v53 = vmax.f32 %v925_v7, 0.0 }
 0x17d   : > { %14167 = vst [vmem:[#allocation65_spill] sm:$0xff] %v12286_v53 }
 0x182   : > { %v908_v32 = vpop.f32.mrf.mxu1 }
 0x183   : > { %v909_v54 = vadd.f32 %v908_v32, %v12081_v49 }
 0x185   : > { %v12219_v17 = vmax.f32 %v909_v54, 0.0 }
 0x187   : > { %1273 = vrot.lane.b32.xlu0 %v12219_v17, %s11280_s12  ;;  %1337 = vrot.lane.b32.xlu1 %v12219_v17, %s11278_s23 }
 0x188   : > { %1401 = vrot.lane.b32.xlu2 %v12219_v17, %s11277_s17 }
 0x18a   : > { %v910_v37 = vpop.f32.mrf.mxu1 }
 0x18b   : > { %v911_v23 = vadd.f32 %v910_v37, %v12110_v50 }
 0x18d   : > { %v12236_v9 = vmax.f32 %v911_v23, 0.0 }
 0x18f   : > { %1209 = vrot.lane.b32.xlu0 %v12219_v17, %s11282_s18 }
 0x190   : > { %v936_v26 = vpop.f32.mrf.mxu3 }
 0x191   : > { %v937_v19 = vadd.f32 %v936_v26, %v12081_v49 }
 0x197   : > { %1341 = vrot.lane.b32.xlu0 %v12230_v41, %s11278_s23 }
 0x198   : > { %v938_v8 = vpop.f32.mrf.mxu3 }
 0x199   : > { %v939_v7 = vadd.f32 %v938_v8, %v12110_v50 }
 0x19a   : > { %v894_v45 = vpop.f32.mrf.mxu0 }
 0x19b   : > { %v895_v56 = vadd.f32 %v894_v45, %v12081_v49 }
 0x19d   : > { %v12238_v48 = vmax.f32 %v895_v56, 0.0 }
 0x19f   : > { %1403 = vrot.lane.b32.xlu0 %v12236_v9, %s11277_s17  ;;  %1333 = vrot.lane.b32.xlu1 %v12238_v48, %s11278_s23 }
 0x1a0   : > { %1397 = vrot.lane.b32.xlu2 %v12238_v48, %s11277_s17 }
 0x1a2   : > { %v896_v60 = vpop.f32.mrf.mxu0 }
 0x1a3   : > { %v897_v14 = vadd.f32 %v896_v60, %v12110_v50 }
 0x1a5   : > { %v12247_v33 = vmax.f32 %v897_v14, 0.0 }
 0x1a7   : > { %1399 = vrot.lane.b32.xlu0 %v12247_v33, %s11277_s17  ;;  %1205 = vrot.lane.b32.xlu1 %v12238_v48, %s11282_s18 }
 0x1a8   : > { %1269 = vrot.lane.b32.xlu2 %v12238_v48, %s11280_s12 }
 0x1ac   : > { %v992_v57 = vpop.f32.mrf.mxu3 }
 0x1ad   : > { %v993_v3 = vadd.f32 %v992_v57, %v12081_v49 }
 0x1af   : > { %1271 = vrot.lane.b32.xlu0 %v12247_v33, %s11280_s12  ;;  %1145 = vrot.lane.b32.xlu1 %v12219_v17, %s11281_s13  ;;  %v12295_v5 = vmax.f32 %v993_v3, 0.0 }
 0x1b0   : > { %1141 = vrot.lane.b32.xlu2 %v12238_v48, %s11281_s13 }
 0x1b1   : > { %14168 = vst [vmem:[#allocation66_spill] sm:$0xff] %v12295_v5 }
 0x1b4   : > { %v994_v18 = vpop.f32.mrf.mxu3 }
 0x1b5   : > { %v995_v32 = vadd.f32 %v994_v18, %v12110_v50 }
 0x1b7   : > { %1143 = vrot.lane.b32.xlu0 %v12247_v33, %s11281_s13  ;;  %1081 = vrot.lane.b32.xlu1 %v12219_v17, %s11284_s21  ;;  %v12310_v54 = vmax.f32 %v995_v32, 0.0  ;;  %v12357_v32 = vmax.f32 %v937_v19, 0.0 }
 0x1b8   : > { %1077 = vrot.lane.b32.xlu2 %v12238_v48, %s11284_s21 }
 0x1b9   : > { %14169 = vst [vmem:[#allocation67_spill] sm:$0xff] %v12310_v54 }
 0x1bb   : > { %v950_v23 = vpop.f32.mrf.mxu0 }
 0x1bc   : > { %v951_v45 = vadd.f32 %v950_v23, %v12081_v49  ;;  %v12359_v23 = vmax.f32 %v939_v7, 0.0 }
 0x1be   : > { %v12341_v14 = vmax.f32 %v951_v45, 0.0 }
 0x1bf   : > { %1079 = vrot.lane.b32.xlu0 %v12247_v33, %s11284_s21  ;;  %1405 = vrot.lane.b32.xlu1 %v12230_v41, %s11277_s17 }
 0x1c0   : > { %1277 = vrot.lane.b32.xlu2 %v12230_v41, %s11280_s12 }
 0x1c3   : > { %v952_v45 = vpop.f32.mrf.mxu0 }
 0x1c4   : > { %v953_v26 = vadd.f32 %v952_v45, %v12110_v50 }
 0x1c6   : > { %v12374_v7 = vmax.f32 %v953_v26, 0.0 }
 0x1c7   : > { %1015 = vrot.lane.b32.xlu0 %v12247_v33, %s11283_s19  ;;  %1275 = vrot.lane.b32.xlu1 %v12236_v9, %s11280_s12 }
 0x1c8   : > { %1339 = vrot.lane.b32.xlu2 %v12236_v9, %s11278_s23 }
 0x1cf   : > { %1467 = vrot.lane.b32.xlu0 %v12236_v9, %s11279_s26  ;;  %1211 = vrot.lane.b32.xlu1 %v12236_v9, %s11282_s18 }
 0x1d0   : > { %1335 = vrot.lane.b32.xlu2 %v12247_v33, %s11278_s23 }
 0x1d7   : > { %1279 = vrot.lane.b32.xlu0 %v12286_v53, %s11280_s12  ;;  %1017 = vrot.lane.b32.xlu1 %v12219_v17, %s11283_s19 }
 0x1d8   : > { %1207 = vrot.lane.b32.xlu2 %v12247_v33, %s11282_s18 }
 0x1df   : > { %1233 = vrot.lane.b32.xlu0 %v12295_v5, %s11282_s18  ;;  %1469 = vrot.lane.b32.xlu1 %v12230_v41, %s11279_s26 }
 0x1e0   : > { %1147 = vrot.lane.b32.xlu2 %v12236_v9, %s11281_s13 }
 0x1e2   : > { %v12318_v62 = vpop.permute.xlu2 %1401 }
 0x1e7   : > { %1169 = vrot.lane.b32.xlu0 %v12295_v5, %s11281_s13  ;;  %1343 = vrot.lane.b32.xlu1 %v12286_v53, %s11278_s23 }
 0x1e8   : > { %1083 = vrot.lane.b32.xlu2 %v12236_v9, %s11284_s21 }
 0x1ef   : > { %1105 = vrot.lane.b32.xlu0 %v12295_v5, %s11284_s21  ;;  %1235 = vrot.lane.b32.xlu1 %v12310_v54, %s11282_s18 }
 0x1f0   : > { %1407 = vrot.lane.b32.xlu2 %v12286_v53, %s11277_s17 }
 0x1f7   : > { %1041 = vrot.lane.b32.xlu0 %v12295_v5, %s11283_s19  ;;  %1171 = vrot.lane.b32.xlu1 %v12310_v54, %s11281_s13 }
 0x1f8   : > { %1013 = vrot.lane.b32.xlu2 %v12238_v48, %s11283_s19 }
 0x1f9   : > { %v12326_v61 = vpop.permute.xlu0 %1273  ;;  %v12351_v57 = vpop.permute.xlu1 %1337 }
 0x1fa   : > { %v12328_v37 = vpop.permute.xlu2 %1397 }
 0x1fb   : > { %14170 = vst [vmem:[#allocation68_spill] sm:$0xff] %v12328_v37  ;;  %v1441_v39 = vsel %vm709_vm1, %v12328_v37, %v12318_v62 }
 0x1fc   : > { %v1445_v2 = vmul.f32 %v1441_v39, %v11791_v30 }
 0x1ff   : > { %1463 = vrot.lane.b32.xlu0 %v12247_v33, %s11279_s26  ;;  %1107 = vrot.lane.b32.xlu1 %v12310_v54, %s11284_s21 }
 0x200   : > { %1019 = vrot.lane.b32.xlu2 %v12236_v9, %s11283_s19 }
 0x201   : > { %v12337_v56 = vpop.permute.xlu0 %1209 }
 0x202   : > { %v12339_v60 = vpop.permute.xlu2 %1269 }
 0x203   : > { %14171 = vst [vmem:[#allocation69_spill] sm:$0xff] %v12339_v60 }
 0x207   : > { %1413 = vrot.lane.b32.xlu0 %v12341_v14, %s11277_s17  ;;  %1043 = vrot.lane.b32.xlu1 %v12310_v54, %s11283_s19 }
 0x208   : > { %1465 = vrot.lane.b32.xlu2 %v12219_v17, %s11279_s26 }
 0x209   : > { %v12353_v3 = vpop.permute.xlu0 %1341 }
 0x20a   : > { %v12355_v18 = vpop.permute.xlu2 %1141 }
 0x20f   : > { %1347 = vrot.lane.b32.xlu0 %v12359_v23, %s11278_s23  ;;  %1409 = vrot.lane.b32.xlu1 %v12357_v32, %s11277_s17 }
 0x210   : > { %1471 = vrot.lane.b32.xlu2 %v12286_v53, %s11279_s26 }
 0x211   : > { %v12368_v8 = vpop.permute.xlu0 %1403  ;;  %v12370_v12 = vpop.permute.xlu1 %1333 }
 0x212   : > { %14172 = vst [vmem:[#allocation70_spill] sm:$0xff] %v12370_v12  ;;  %v12372_v19 = vpop.permute.xlu2 %1077 }
 0x217   : > { %1281 = vrot.lane.b32.xlu0 %v12357_v32, %s11280_s12  ;;  %1415 = vrot.lane.b32.xlu1 %v12374_v7, %s11277_s17 }
 0x218   : > { %1461 = vrot.lane.b32.xlu2 %v12238_v48, %s11279_s26 }
 0x219   : > { %v12386_v45 = vpop.permute.xlu0 %1399  ;;  %v12388_v46 = vpop.permute.xlu1 %1205 }
 0x21a   : > { %14173 = vst [vmem:[#allocation71_spill] sm:$0xff] %v12386_v45  ;;  %v1442_v26 = vsel %vm709_vm1, %v12386_v45, %v12368_v8  ;;  %v12394_v31 = vpop.permute.xlu2 %1277 }
 0x21b   : > { %v1453_v40 = vmul.f32 %v1442_v26, %v11791_v30  ;;  %v1377_v30 = vsel %vm657_vm2, %v12370_v12, %v12351_v57  ;;  %v1311_v54 = vsel %vm605_vm4, %v12326_v61, %v12394_v31 }
 0x21c   : > { %v1381_v26 = vmul.f32 %v1377_v30, %v11788_v29 }
 0x21d   : > { %v1581_v21 = vpack.c.bf16 %v1453_v40, %v1445_v2 }
 0x21f   : > { %1287 = vrot.lane.b32.xlu0 %v12374_v7, %s11280_s12  ;;  %1349 = vrot.lane.b32.xlu1 %v12341_v14, %s11278_s23 }
 0x220   : > { %1411 = vrot.lane.b32.xlu2 %v12359_v23, %s11277_s17  ;;  %1650 = vmatpush.bf16.msra.mxu0 %v1581_v21 }
 0x221   : > { %v12404_v37 = vpop.permute.xlu0 %1271  ;;  %v12406_v45 = vpop.permute.xlu1 %1145 }
 0x222   : > { %14174 = vst [vmem:[#allocation72_spill] sm:$0xff] %v12404_v37  ;;  %v12408_v28 = vpop.permute.xlu2 %1339 }
 0x227   : > { %1217 = vrot.lane.b32.xlu0 %v12357_v32, %s11282_s18  ;;  %1283 = vrot.lane.b32.xlu1 %v12359_v23, %s11280_s12 }
 0x228   : > { %1345 = vrot.lane.b32.xlu2 %v12357_v32, %s11278_s23 }
 0x229   : > { %v12420_v40 = vpop.permute.xlu0 %1143  ;;  %v12422_v21 = vpop.permute.xlu1 %1081 }
 0x22a   : > { %v12424_v2 = vpop.permute.xlu2 %1335 }
 0x22b   : > { %14175 = vst [vmem:[#allocation73_spill] sm:$0xff] %v12424_v2  ;;  %v1378_v39 = vsel %vm657_vm2, %v12424_v2, %v12408_v28 }
 0x22c   : > { %v1389_v63 = vmul.f32 %v1378_v39, %v11788_v29  ;;  %v1313_v29 = vsel %vm605_vm4, %v12339_v60, %v12326_v61 }
 0x22e   : > { %v1573_v22 = vpack.c.bf16 %v1389_v63, %v1381_v26  ;;  %v1317_v26 = vmul.f32 %v1313_v29, %v11848_v59 }
 0x22f   : > { %1151 = vrot.lane.b32.xlu0 %v12286_v53, %s11281_s13  ;;  %1213 = vrot.lane.b32.xlu1 %v12230_v41, %s11282_s18 }
 0x230   : > { %1351 = vrot.lane.b32.xlu2 %v12374_v7, %s11278_s23  ;;  %1651 = vmatpush.bf16.msra.mxu0 %v1573_v22 }
 0x231   : > { %v12438_v12 = vpop.permute.xlu0 %1079  ;;  %v12440_v43 = vpop.permute.xlu1 %1405 }
 0x232   : > { %v12442_v2 = vpop.permute.xlu2 %1207 }
 0x237   : > { %1085 = vrot.lane.b32.xlu0 %v12230_v41, %s11284_s21  ;;  %1219 = vrot.lane.b32.xlu1 %v12359_v23, %s11282_s18 }
 0x238   : > { %1285 = vrot.lane.b32.xlu2 %v12341_v14, %s11280_s12 }
 0x239   : > { %v12454_v63 = vpop.permute.xlu0 %1015  ;;  %v1276_v22 = vpop.permute.xlu1 %1275 }
 0x23a   : > { %v1314_v30 = vsel %vm605_vm4, %v12404_v37, %v1276_v22  ;;  %v12459_v39 = vpop.permute.xlu2 %1147 }
 0x23b   : > { %v1325_v52 = vmul.f32 %v1314_v30, %v11848_v59  ;;  %v1557_v59 = vpack.c.bf16 %v12247_v33, %v12238_v48 }
 0x23d   : > { %v1565_v13 = vpack.c.bf16 %v1325_v52, %v1317_v26  ;;  %v1439_v52 = vsel %vm709_vm1, %v12318_v62, %v12440_v43 }
 0x23e   : > { %v1446_v30 = vmul.f32 %v1439_v52, %v11683_v11  ;;  %v12511_v52 = vpop.f32.mrf.mxu2 }
 0x23f   : > { %1091 = vrot.lane.b32.xlu0 %v12359_v23, %s11284_s21  ;;  %1153 = vrot.lane.b32.xlu1 %v12357_v32, %s11281_s13 }
 0x240   : > { %1215 = vrot.lane.b32.xlu2 %v12286_v53, %s11282_s18  ;;  %1652 = vmatpush.bf16.msra.mxu0 %v1565_v13 }
 0x241   : > { %v12469_v60 = vpop.permute.xlu0 %1467  ;;  %v12471_v37 = vpop.permute.xlu1 %1211 }
 0x242   : > { %v12473_v20 = vpop.permute.xlu2 %1083 }
 0x244   : > { %1653 = vmatpush.bf16.msra.mxu0 %v1557_v59 }
 0x247   : > { %1477 = vrot.lane.b32.xlu0 %v12341_v14, %s11279_s26  ;;  %1087 = vrot.lane.b32.xlu1 %v12286_v53, %s11284_s21 }
 0x248   : > { %1149 = vrot.lane.b32.xlu2 %v12230_v41, %s11281_s13 }
 0x249   : > { %v12487_v13 = vpop.permute.xlu0 %1279  ;;  %v12489_v29 = vpop.permute.xlu1 %1017 }
 0x24a   : > { %v12491_v48 = vpop.permute.xlu2 %1407 }
 0x24b   : > { %v1440_v33 = vsel %vm709_vm1, %v12368_v8, %v12491_v48 }
 0x24c   : > { %v1454_v26 = vmul.f32 %v1440_v33, %v11683_v11  ;;  %v1601_v11 = vld [vmem:[%s13989_s5] sm:$0xff]  ;;  %v964_v33 = vpop.f32.mrf.mxu1 }
 0x24e   : > { %v1582_v59 = vpack.c.bf16 %v1454_v26, %v1446_v30  ;;  %v1375_v30 = vsel %vm657_vm2, %v12351_v57, %v12353_v3  ;;  %v965_v26 = vadd.f32 %v964_v33, %v12081_v49  ;;  %v1312_v57 = vsel %vm605_vm4, %v1276_v22, %v12487_v13 }
 0x24f   : > { %1023 = vrot.lane.b32.xlu0 %v12286_v53, %s11283_s19  ;;  %1473 = vrot.lane.b32.xlu1 %v12357_v32, %s11279_s26  ;;  %v1382_v27 = vmul.f32 %v1375_v30, %v11680_v0  ;;  %v980_v53 = vpop.f32.mrf.mxu2  ;;  %v1318_v22 = vmul.f32 %v1311_v54, %v11739_v1 }
 0x250   : > { %1155 = vrot.lane.b32.xlu2 %v12359_v23, %s11281_s13  ;;  %1688 = vmatpush.bf16.msra.mxu2 %v1582_v59  ;;  %v12540_v33 = vmax.f32 %v965_v26, 0.0 }
 0x251   : > { %v12505_v62 = vpop.permute.xlu0 %1233  ;;  %v12507_v42 = vpop.permute.xlu1 %1469 }
 0x252   : > { %14176 = vst [vmem:[#allocation74_spill] sm:$0xff] %v12505_v62  ;;  %v12509_v8 = vpop.permute.xlu2 %1013 }
 0x257   : > { %1607 = vperm.xlu0 %11070, %v1601_v11   ;;  %1479 = vrot.lane.b32.xlu1 %v12374_v7, %s11279_s26 }
 0x258   : > { %1089 = vrot.lane.b32.xlu2 %v12357_v32, %s11284_s21 }
 0x259   : > { %v12525_v59 = vpop.permute.xlu0 %1169  ;;  %v12527_v16 = vpop.permute.xlu1 %1343 }
 0x25a   : > { %14177 = vst [vmem:[#allocation75_spill] sm:$0xff] %v12525_v59  ;;  %v1376_v11 = vsel %vm657_vm2, %v12408_v28, %v12527_v16  ;;  %v12533_v4 = vpop.permute.xlu2 %1019  ;;  %v1326_v28 = vmul.f32 %v1312_v57, %v11739_v1 }
 0x25b   : > { %v1390_v34 = vmul.f32 %v1376_v11, %v11680_v0  ;;  %v1251_v0 = vsel %vm553_vm6, %v12505_v62, %v12388_v46  ;;  %v966_v62 = vpop.f32.mrf.mxu1 }
 0x25c   : > { %v1566_v30 = vpack.c.bf16 %v1326_v28, %v1318_v22  ;;  %v1253_v26 = vmul.f32 %v1251_v0, %v11903_v38  ;;  %v1249_v28 = vsel %vm553_vm6, %v12388_v46, %v12337_v56  ;;  %v1558_v22 = vpack.c.bf16 %v12236_v9, %v12219_v17 }
 0x25d   : > { %v1574_v5 = vpack.c.bf16 %v1390_v34, %v1382_v27  ;;  %v981_v34 = vadd.f32 %v980_v53, %v12110_v50  ;;  %v1250_v53 = vsel %vm553_vm6, %v12442_v2, %v12471_v37  ;;  %v1187_v0 = vsel %vm501_vm5, %v12525_v59, %v12355_v18  ;;  %v8331_v59 = vld [vmem:[#allocation6 + $0x8] sm:$0xf0] }
 0x25e   : > { %v967_v46 = vadd.f32 %v966_v62, %v12110_v50 }
 0x25f   : > { %1025 = vrot.lane.b32.xlu1 %v12357_v32, %s11283_s19  ;;  %1417 = vrot.lane.b32.xlu0 %v12540_v33, %s11277_s17  ;;  %v12578_v57 = vmax.f32 %v981_v34, 0.0  ;;  %v1254_v34 = vmul.f32 %v1249_v28, %v11830_v10 }
 0x260   : > { %1475 = vrot.lane.b32.xlu2 %v12359_v23, %s11279_s26  ;;  %1689 = vmatpush.bf16.msra.mxu2 %v1574_v5  ;;  %v1602_v5 = vld [vmem:[%s13989_s5 + $0x8] sm:$0xff] }
 0x261   : > { %v12559_v27 = vpop.permute.xlu0 %1105  ;;  %v12561_v61 = vpop.permute.xlu1 %1235 }
 0x262   : > { %14178 = vst [vmem:[#allocation76_spill] sm:$0xff] %v12561_v61  ;;  %v1252_v1 = vsel %vm553_vm6, %v12561_v61, %v12442_v2  ;;  %v12567_v54 = vpop.permute.xlu2 %1465  ;;  %v1262_v2 = vmul.f32 %v1250_v53, %v11830_v10  ;;  %v1122_v10 = vsel %vm449_vm8, %v12438_v12, %v12473_v20 }
 0x263   : > { %v1261_v11 = vmul.f32 %v1252_v1, %v11903_v38  ;;  %v1186_v38 = vsel %vm501_vm5, %v12420_v40, %v12459_v39  ;;  %v1503_v1 = vsel %vm761_vm0, %v12567_v54, %v12507_v42 }
 0x264   : > { %1690 = vmatpush.bf16.msra.mxu2 %v1566_v30  ;;  %v1185_v30 = vsel %vm501_vm5, %v12355_v18, %v12406_v45  ;;  %v1550_v53 = vpack.c.bf16 %v1262_v2, %v1254_v34  ;;  %v1510_v28 = vmul.f32 %v1503_v1, %v11619_v36  ;;  %v1058_v1 = vsel %vm398_vm7, %v12454_v63, %v12533_v4 }
 0x265   : > { %v1549_v61 = vpack.c.bf16 %v1261_v11, %v1253_v26  ;;  %v1189_v26 = vmul.f32 %v1187_v0, %v11900_v6 }
 0x267   : > { %1612 = vperm.xlu1 %11071, %v1602_v5   ;;  %1423 = vrot.lane.b32.xlu0 %v12578_v57, %s11277_s17  ;;  %v1121_v5 = vsel %vm449_vm8, %v12372_v19, %v12422_v21 }
 0x268   : > { %1021 = vrot.lane.b32.xlu2 %v12230_v41, %s11283_s19  ;;  %1654 = vmatpush.bf16.msra.mxu0 %v1549_v61  ;;  %v1198_v61 = vmul.f32 %v1186_v38, %v11827_v55  ;;  %v12636_v38 = vmax.f32 %v967_v46, 0.0  ;;  %v1126_v34 = vmul.f32 %v1121_v5, %v11880_v51 }
 0x269   : > { %1691 = vmatpush.bf16.msra.mxu2 %v1558_v22  ;;  %v12605_v17 = vpop.permute.xlu0 %1041  ;;  %v12607_v9 = vpop.permute.xlu1 %1171  ;;  %v1190_v22 = vmul.f32 %v1185_v30, %v11827_v55  ;;  %v1123_v55 = vsel %vm449_vm8, %v12559_v27, %v12372_v19  ;;  %v1070_v19 = vmul.f32 %v1058_v1, %v11877_v47 }
 0x26a   : > { %v1188_v50 = vsel %vm501_vm5, %v12607_v9, %v12420_v40  ;;  %v12622_v62 = vpop.permute.xlu2 %1471 }
 0x26b   : > { %v1197_v11 = vmul.f32 %v1188_v50, %v11900_v6  ;;  %v1504_v18 = vsel %vm761_vm0, %v12469_v60, %v12622_v62  ;;  %v1134_v6 = vmul.f32 %v1122_v10, %v11880_v51  ;;  %v10460_v50 = vld [vmem:[#allocation6 + $0x4] sm:$0xf] }
 0x26c   : > { %v1518_v40 = vmul.f32 %v1504_v18, %v11619_v36  ;;  %v1542_v36 = vpack.c.bf16 %v1198_v61, %v1190_v22  ;;  %v12655_v51 = vor.u32 %v10460_v50, %v8331_v59  ;;  %v1057_v61 = vsel %vm398_vm7, %v12509_v8, %v12489_v29 }
 0x26d   : > { %1692 = vmatpush.bf16.msra.mxu2 %v1550_v53  ;;  %v1541_v0 = vpack.c.bf16 %v1197_v11, %v1189_v26  ;;  %v1534_v10 = vpack.c.bf16 %v1134_v6, %v1126_v34  ;;  %v1125_v18 = vmul.f32 %v1123_v55, %v11966_v44  ;;  %v8329_v6 = vld [vmem:[#allocation6] sm:$0xf]  ;;  %v1059_v50 = vsel %vm398_vm7, %v12605_v17, %v12509_v8 }
 0x26e   : > { %v1590_v2 = vpack.c.bf16 %v1518_v40, %v1510_v28  ;;  %v1062_v40 = vmul.f32 %v1057_v61, %v11877_v47  ;;  %v1061_v8 = vmul.f32 %v1059_v50, %v11963_v58  ;;  %v10462_v61 = vld [vmem:[#allocation6 + $0x14] sm:$0xf] }
 0x26f   : > { %1419 = vrot.lane.b32.xlu1 %v12636_v38, %s11277_s17  ;;  %1355 = vrot.lane.b32.xlu0 %v12636_v38, %s11278_s23 }
 0x270   : > { %1027 = vrot.lane.b32.xlu2 %v12359_v23, %s11283_s19  ;;  %1655 = vmatpush.bf16.msra.mxu0 %v1541_v0  ;;  %v10461_v0 = vld [vmem:[#allocation6 + $0x4] sm:$0xf0] }
 0x271   : > { %1693 = vmatpush.bf16.msra.mxu2 %v1542_v36  ;;  %1714 = vmatpush.bf16.msra.mxu3 %v1590_v2  ;;  %v12657_v46 = vpop.permute.xlu0 %1463  ;;  %v12659_v30 = vpop.permute.xlu1 %1107  ;;  %v12699_v47 = vor.u32 %v10461_v0, %v8329_v6  ;;  %v979_v2 = vadd.f32 %v12511_v52, %v12081_v49 }
 0x272   : > { %14179 = vst [vmem:[#allocation77_spill] sm:$0xff] %v12657_v46  ;;  %v1506_v59 = vsel %vm761_vm0, %v12657_v46, %v12469_v60  ;;  %v1124_v26 = vsel %vm449_vm8, %v12659_v30, %v12438_v12  ;;  %v12674_v11 = vpop.permute.xlu2 %1461  ;;  %v1604_v12 = vld [vmem:[%s13989_s5 + $0x18] sm:$0xff] }
 0x273   : > { %14180 = vst [vmem:[#allocation78_spill] sm:$0xff] %v12674_v11  ;;  %v1517_v53 = vmul.f32 %v1506_v59, %v11616_v35  ;;  %v1133_v5 = vmul.f32 %v1124_v26, %v11966_v44  ;;  %v1505_v28 = vsel %vm761_vm0, %v12674_v11, %v12567_v54  ;;  %v1603_v44 = vld [vmem:[%s13989_s5 + $0x10] sm:$0xff]  ;;  %v12716_v49 = vmax.f32 %v979_v2, 0.0 }
 0x274   : > { %v1509_v60 = vmul.f32 %v1505_v28, %v11616_v35  ;;  %8345 = vmatmul.msk.bf16.vlgmr.msra.gmra.mxu3 %vm1643_vm10, %v12655_v51  ;;  %v1526_v35 = vpack.c.bf16 %v1070_v19, %v1062_v40  ;;  %v8339_v19 = vld [vmem:[#allocation6 + $0x18] sm:$0xf0]  ;;  %v10463_v40 = vld [vmem:[#allocation6 + $0x14] sm:$0xf0] }
 0x275   : > { %1694 = vmatpush.bf16.msra.mxu2 %v1534_v10  ;;  %v1533_v22 = vpack.c.bf16 %v1133_v5, %v1125_v18 }
 0x276   : > { %v1589_v54 = vpack.c.bf16 %v1517_v53, %v1509_v60 }
 0x277   : > { %1622 = vperm.xlu1 %11071, %v1604_v12   ;;  %1289 = vrot.lane.b32.xlu0 %v12540_v33, %s11280_s12 }
 0x278   : > { %1617 = vperm.xlu2 %11069, %v1603_v44   ;;  %1656 = vmatpush.bf16.msra.mxu0 %v1533_v22 }
 0x279   : > { %1676 = vmatpush.bf16.msra.mxu1 %v1589_v54  ;;  %1695 = vmatpush.bf16.msra.mxu2 %v1526_v35  ;;  %v12703_v34 = vpop.permute.xlu0 %1413  ;;  %v12705_v1 = vpop.permute.xlu1 %1043  ;;  %v14181_v35 = vld [vmem:[#allocation23_spill] sm:$0xff] }
 0x27a   : > { %v1060_v36 = vsel %vm398_vm7, %v12705_v1, %v12454_v63  ;;  %v1412_v55 = vpop.permute.xlu2 %1411  ;;  %v12727_v63 = vor.u32 %v10462_v61, %v8339_v19  ;;  %v14182_v19 = vld [vmem:[#allocation22_spill] sm:$0xff] }
 0x27b   : > { %v1069_v10 = vmul.f32 %v1060_v36, %v11963_v58  ;;  %v1438_v58 = vsel %vm709_vm1, %v12491_v48, %v1412_v55 }
 0x27c   : > { %1696 = vmatmul.bf16.vlgmr.msra.gmra.mxu2 %v12699_v47  ;;  %8343 = vmatmul.msk.bf16.vlgmr.msra.gmra.mxu1 %vm1643_vm10, %v12655_v51  ;;  %v1455_v5 = vmul.f32 %v1438_v58, %v11590_v25 }
 0x27d   : > { %v1525_v52 = vpack.c.bf16 %v1069_v10, %v1061_v8 }
 0x27f   : > { %1295 = vrot.lane.b32.xlu0 %v12578_v57, %s11280_s12  ;;  %1357 = vrot.lane.b32.xlu1 %v12716_v49, %s11278_s23 }
 0x280   : > { %1421 = vrot.lane.b32.xlu2 %v12716_v49, %s11277_s17  ;;  %1657 = vmatpush.bf16.msra.mxu0 %v1525_v52 }
 0x281   : > { %v1348_v59 = vpop.permute.xlu0 %1347  ;;  %v1410_v26 = vpop.permute.xlu1 %1409 }
 0x282   : > { %v1437_v18 = vsel %vm709_vm1, %v12440_v43, %v1410_v26  ;;  %v1346_v53 = vpop.permute.xlu2 %1345  ;;  %v1374_v28 = vsel %vm657_vm2, %v12527_v16, %v1348_v59  ;;  %v8337_v43 = vld [vmem:[#allocation6 + $0x10] sm:$0xf] }
 0x283   : > { %v1447_v48 = vmul.f32 %v1437_v18, %v11590_v25  ;;  %v1373_v60 = vsel %vm657_vm2, %v12353_v3, %v1346_v53  ;;  %1658 = vmatmul.bf16.vlgmr.msra.gmra.mxu0 %v12699_v47  ;;  %v1391_v44 = vmul.f32 %v1374_v28, %v11587_v24  ;;  %v1435_v25 = vsel %vm709_vm1, %v1410_v26, %v12703_v34 }
 0x284   : > { %8346 = vmatmul.msk.bf16.gmra.mxu3 %vm1643_vm10, %v12727_v63  ;;  %v1383_v22 = vmul.f32 %v1373_v60, %v11587_v24  ;;  %v12754_v16 = vor.u32 %v10463_v40, %v8337_v43  ;;  %v1448_v50 = vmul.f32 %v1435_v25, %v14181_v35  ;;  %v14184_v40 = vld [vmem:[#allocation24_spill] sm:$0xff] }
 0x285   : > { %v1583_v12 = vpack.c.bf16 %v1455_v5, %v1447_v48 }
 0x286   : > { %v1575_v54 = vpack.c.bf16 %v1391_v44, %v1383_v22 }
 0x287   : > { %1225 = vrot.lane.b32.xlu0 %v12540_v33, %s11282_s18  ;;  %1291 = vrot.lane.b32.xlu1 %v12636_v38, %s11280_s12 }
 0x288   : > { %1353 = vrot.lane.b32.xlu2 %v12540_v33, %s11278_s23  ;;  %1726 = vmatpush.bf16.msrb.mxu1 %v1583_v12  ;;  %v14183_v12 = vld [vmem:[#allocation21_spill] sm:$0xff] }
 0x289   : > { %v1282_v3 = vpop.permute.xlu0 %1281  ;;  %v12756_v6 = vpop.permute.xlu1 %1415 }
 0x28a   : > { %v1436_v24 = vsel %vm709_vm1, %v1412_v55, %v12756_v6  ;;  %v12761_v0 = vpop.permute.xlu2 %1351  ;;  %v1309_v18 = vsel %vm605_vm4, %v12394_v31, %v1282_v3 }
 0x28b   : > { %v1456_v2 = vmul.f32 %v1436_v24, %v14181_v35  ;;  %v1372_v55 = vsel %vm657_vm2, %v1348_v59, %v12761_v0  ;;  %v1319_v43 = vmul.f32 %v1309_v18, %v14183_v12  ;;  %v14187_v18 = vld [vmem:[#allocation25_spill] sm:$0xff] }
 0x28c   : > { %1701 = vmatmul.bf16.gmra.mxu2 %v12754_v16  ;;  %1727 = vmatpush.bf16.msrb.mxu1 %v1575_v54  ;;  %v1392_v58 = vmul.f32 %v1372_v55, %v14182_v19 }
 0x28d   : > { %v1584_v36 = vpack.c.bf16 %v1456_v2, %v1448_v50  ;;  %8344 = vmatmul.msk.bf16.gmra.mxu1 %vm1643_vm10, %v12727_v63 }
 0x28f   : > { %1159 = vrot.lane.b32.xlu0 %v12374_v7, %s11281_s13  ;;  %1221 = vrot.lane.b32.xlu1 %v12341_v14, %s11282_s18 }
 0x290   : > { %1359 = vrot.lane.b32.xlu2 %v12578_v57, %s11278_s23  ;;  %1764 = vmatpush.bf16.msrb.mxu0 %v1584_v36  ;;  %v14185_v36 = vld [vmem:[#allocation65_spill] sm:$0xff] }
 0x291   : > { %v12777_v8 = vpop.permute.xlu0 %1287  ;;  %v12779_v10 = vpop.permute.xlu1 %1349  ;;  %v1559_v55 = vpack.c.bf16 %v14185_v36, %v12230_v41 }
 0x292   : > { %v1371_v52 = vsel %vm657_vm2, %v1346_v53, %v12779_v10  ;;  %v12784_v61 = vpop.permute.xlu2 %1285 }
 0x293   : > { %v1384_v26 = vmul.f32 %v1371_v52, %v14182_v19  ;;  %1663 = vmatmul.bf16.gmra.mxu0 %v12754_v16  ;;  %v1307_v53 = vsel %vm605_vm4, %v1282_v3, %v12784_v61  ;;  %v1560_v52 = vpack.c.bf16 %v12359_v23, %v12357_v32  ;;  %v14186_v19 = vld [vmem:[#allocation26_spill] sm:$0xff] }
 0x294   : > { %v1320_v44 = vmul.f32 %v1307_v53, %v14184_v40 }
 0x295   : > { %v1576_v59 = vpack.c.bf16 %v1392_v58, %v1384_v26 }
 0x297   : > { %1093 = vrot.lane.b32.xlu0 %v12341_v14, %s11284_s21  ;;  %1227 = vrot.lane.b32.xlu1 %v12636_v38, %s11282_s18 }
 0x298   : > { %1293 = vrot.lane.b32.xlu2 %v12716_v49, %s11280_s12  ;;  %1765 = vmatpush.bf16.msrb.mxu0 %v1576_v59 }
 0x299   : > { %v12801_v5 = vpop.permute.xlu0 %1217  ;;  %v1284_v28 = vpop.permute.xlu1 %1283 }
 0x29a   : > { %v1308_v48 = vsel %vm605_vm4, %v1284_v28, %v12777_v8  ;;  %v1310_v60 = vsel %vm605_vm4, %v12487_v13, %v1284_v28  ;;  %v1216_v31 = vpop.permute.xlu2 %1215 }
 0x29b   : > { %v1327_v22 = vmul.f32 %v1310_v60, %v14183_v12  ;;  %v1328_v25 = vmul.f32 %v1308_v48, %v14184_v40  ;;  %v1248_v13 = vsel %vm553_vm6, %v12471_v37, %v1216_v31  ;;  %v14188_v60 = vld [vmem:[#allocation30_spill] sm:$0xff] }
 0x29c   : > { %v1263_v37 = vmul.f32 %v1248_v13, %v14186_v19 }
 0x29d   : > { %v1567_v3 = vpack.c.bf16 %v1327_v22, %v1319_v43  ;;  %v1568_v24 = vpack.c.bf16 %v1328_v25, %v1320_v44 }
 0x29f   : > { %1099 = vrot.lane.b32.xlu0 %v12636_v38, %s11284_s21  ;;  %1161 = vrot.lane.b32.xlu1 %v12540_v33, %s11281_s13 }
 0x2a0   : > { %1223 = vrot.lane.b32.xlu2 %v12374_v7, %s11282_s18  ;;  %1728 = vmatpush.bf16.msrb.mxu1 %v1567_v3 }
 0x2a1   : > { %1766 = vmatpush.bf16.msrb.mxu0 %v1568_v24  ;;  %v1152_v54 = vpop.permute.xlu0 %1151  ;;  %v1214_v35 = vpop.permute.xlu1 %1213  ;;  %v14189_v24 = vld [vmem:[#allocation29_spill] sm:$0xff] }
 0x2a2   : > { %v1247_v50 = vsel %vm553_vm6, %v12337_v56, %v1214_v35  ;;  %v1150_v2 = vpop.permute.xlu2 %1149  ;;  %v1184_v58 = vsel %vm501_vm5, %v12459_v39, %v1152_v54  ;;  %v1245_v32 = vsel %vm553_vm6, %v1214_v35, %v12801_v5 }
 0x2a3   : > { %v1255_v26 = vmul.f32 %v1247_v50, %v14186_v19  ;;  %v1183_v59 = vsel %vm501_vm5, %v12406_v45, %v1150_v2  ;;  %v1199_v41 = vmul.f32 %v1184_v58, %v14187_v18  ;;  %v1256_v12 = vmul.f32 %v1245_v32, %v14188_v60  ;;  %v14191_v58 = vld [vmem:[#allocation28_spill] sm:$0xff] }
 0x2a4   : > { %1729 = vmatpush.bf16.msrb.mxu1 %v1559_v55  ;;  %v1191_v53 = vmul.f32 %v1183_v59, %v14187_v18  ;;  %v14192_v59 = vld [vmem:[#allocation33_spill] sm:$0xff] }
 0x2a5   : > { %1767 = vmatpush.bf16.msrb.mxu0 %v1560_v52  ;;  %v1551_v56 = vpack.c.bf16 %v1263_v37, %v1255_v26 }
 0x2a6   : > { %v1543_v48 = vpack.c.bf16 %v1199_v41, %v1191_v53 }
 0x2a7   : > { %1485 = vrot.lane.b32.xlu0 %v12716_v49, %s11279_s26  ;;  %1095 = vrot.lane.b32.xlu1 %v12374_v7, %s11284_s21 }
 0x2a8   : > { %1157 = vrot.lane.b32.xlu2 %v12341_v14, %s11281_s13  ;;  %1730 = vmatpush.bf16.msrb.mxu1 %v1551_v56 }
 0x2a9   : > { %v1086_v23 = vpop.permute.xlu0 %1085  ;;  %v12848_v45 = vpop.permute.xlu1 %1219 }
 0x2aa   : > { %v1246_v39 = vsel %vm553_vm6, %v1216_v31, %v12848_v45  ;;  %v12853_v28 = vpop.permute.xlu2 %1155  ;;  %v1119_v36 = vsel %vm449_vm8, %v12422_v21, %v1086_v23 }
 0x2ab   : > { %v1264_v43 = vmul.f32 %v1246_v39, %v14188_v60  ;;  %v1182_v44 = vsel %vm501_vm5, %v1152_v54, %v12853_v28  ;;  %v14190_v54 = vld [vmem:[#allocation66_spill] sm:$0xff]  ;;  %v1127_v26 = vmul.f32 %v1119_v36, %v14191_v58 }
 0x2ac   : > { %1731 = vmatpush.bf16.msrb.mxu1 %v1543_v48  ;;  %v1200_v13 = vmul.f32 %v1182_v44, %v14189_v24 }
 0x2ad   : > { %v1552_v40 = vpack.c.bf16 %v1264_v43, %v1256_v12 }
 0x2af   : > { %1031 = vrot.lane.b32.xlu0 %v12374_v7, %s11283_s19  ;;  %1481 = vrot.lane.b32.xlu1 %v12540_v33, %s11279_s26 }
 0x2b0   : > { %1163 = vrot.lane.b32.xlu2 %v12636_v38, %s11281_s13  ;;  %1768 = vmatpush.bf16.msrb.mxu0 %v1552_v40  ;;  %v14194_v40 = vld [vmem:[#allocation19_spill] sm:$0xff] }
 0x2b1   : > { %v12866_v31 = vpop.permute.xlu0 %1091  ;;  %v12868_v22 = vpop.permute.xlu1 %1153 }
 0x2b2   : > { %v1181_v25 = vsel %vm501_vm5, %v1150_v2, %v12868_v22  ;;  %v12873_v3 = vpop.permute.xlu2 %1089 }
 0x2b3   : > { %v1192_v35 = vmul.f32 %v1181_v25, %v14189_v24  ;;  %v1117_v2 = vsel %vm449_vm8, %v1086_v23, %v12873_v3  ;;  %v14193_v23 = vld [vmem:[#allocation67_spill] sm:$0xff] }
 0x2b4   : > { %v1128_v56 = vmul.f32 %v1117_v2, %v14192_v59  ;;  %v14195_v25 = vld [vmem:[#allocation27_spill] sm:$0xff] }
 0x2b5   : > { %v1544_v50 = vpack.c.bf16 %v1200_v13, %v1192_v35 }
 0x2b7   : > { %1425 = vrot.lane.b32.xlu0 %v14190_v54, %s11277_s17  ;;  %1487 = vrot.lane.b32.xlu1 %v12578_v57, %s11279_s26 }
 0x2b8   : > { %1097 = vrot.lane.b32.xlu2 %v12540_v33, %s11284_s21  ;;  %1769 = vmatpush.bf16.msrb.mxu0 %v1544_v50 }
 0x2b9   : > { %v12889_v55 = vpop.permute.xlu0 %1477  ;;  %v1088_v52 = vpop.permute.xlu1 %1087 }
 0x2ba   : > { %v1118_v19 = vsel %vm449_vm8, %v1088_v52, %v12866_v31  ;;  %v1120_v37 = vsel %vm449_vm8, %v12473_v20, %v1088_v52  ;;  %v1476_v21 = vpop.permute.xlu2 %1475 }
 0x2bb   : > { %v1135_v18 = vmul.f32 %v1120_v37, %v14191_v58  ;;  %v1136_v41 = vmul.f32 %v1118_v19, %v14192_v59  ;;  %v1502_v20 = vsel %vm761_vm0, %v12622_v62, %v1476_v21  ;;  %v14196_v19 = vld [vmem:[#allocation20_spill] sm:$0xff] }
 0x2bc   : > { %v1519_v44 = vmul.f32 %v1502_v20, %v14194_v40 }
 0x2bd   : > { %v1535_v53 = vpack.c.bf16 %v1135_v18, %v1127_v26  ;;  %v1536_v32 = vpack.c.bf16 %v1136_v41, %v1128_v56 }
 0x2bf   : > { %1363 = vrot.lane.b32.xlu0 %v14193_v23, %s11278_s23  ;;  %1033 = vrot.lane.b32.xlu1 %v12540_v33, %s11283_s19 }
 0x2c0   : > { %1483 = vrot.lane.b32.xlu2 %v12636_v38, %s11279_s26  ;;  %1732 = vmatpush.bf16.msrb.mxu1 %v1535_v53  ;;  %v14198_v53 = vld [vmem:[#allocation32_spill] sm:$0xff] }
 0x2c1   : > { %1770 = vmatpush.bf16.msrb.mxu0 %v1536_v32  ;;  %v1024_v39 = vpop.permute.xlu0 %1023  ;;  %v1474_v48 = vpop.permute.xlu1 %1473 }
 0x2c2   : > { %v1056_v60 = vsel %vm398_vm7, %v12533_v4, %v1024_v39  ;;  %v1501_v12 = vsel %vm761_vm0, %v12507_v42, %v1474_v48  ;;  %v1022_v43 = vpop.permute.xlu2 %1021  ;;  %v1499_v4 = vsel %vm761_vm0, %v1474_v48, %v12889_v55 }
 0x2c3   : > { %v1071_v62 = vmul.f32 %v1056_v60, %v14195_v25  ;;  %v1511_v24 = vmul.f32 %v1501_v12, %v14194_v40  ;;  %v1055_v13 = vsel %vm398_vm7, %v12489_v29, %v1022_v43  ;;  %v1512_v37 = vmul.f32 %v1499_v4, %v14196_v19 }
 0x2c4   : > { %v1063_v35 = vmul.f32 %v1055_v13, %v14195_v25 }
 0x2c5   : > { %v1591_v50 = vpack.c.bf16 %v1519_v44, %v1511_v24 }
 0x2c6   : > { %v1527_v36 = vpack.c.bf16 %v1071_v62, %v1063_v35  ;;  %v14200_v62 = vld [vmem:[#allocation43_spill] sm:$0xff] }
 0x2c7   : > { %1229 = vrot.lane.b32.xlu0 %v12716_v49, %s11282_s18  ;;  %1427 = vrot.lane.b32.xlu1 %v14193_v23, %s11277_s17  ;;  %s362_s17 = sand.u32 1, %s11259_s28  }
 0x2c8   : > { %1029 = vrot.lane.b32.xlu2 %v12341_v14, %s11283_s19  ;;  %1733 = vmatpush.bf16.msrb.mxu1 %v1527_v36  ;;  %v14201_v36 = vld [vmem:[#allocation53_spill] sm:$0xff] }
 0x2c9   : > { %1752 = vmatpush.bf16.msrb.mxu3 %v1591_v50  ;;  %v12932_v42 = vpop.permute.xlu0 %1607  ;;  %v12934_v29 = vpop.permute.xlu1 %1479 }
 0x2ca   : > { %v1500_v2 = vsel %vm761_vm0, %v1476_v21, %v12934_v29  ;;  %v12939_v52 = vpop.permute.xlu2 %1027 }
 0x2cb   : > { %v1520_v58 = vmul.f32 %v1500_v2, %v14196_v19  ;;  %1734 = vmatmul.bf16.vlgmr.msrb.gmra.mxu1 %v12699_v47  ;;  %v1054_v21 = vsel %vm398_vm7, %v1024_v39, %v12939_v52 }
 0x2cc   : > { %8347 = vmatmul.msk.bf16.vlgmr.msrb.gmra.mxu3 %vm1643_vm10, %v12655_v51  ;;  %v1072_v32 = vmul.f32 %v1054_v21, %v14198_v53 }
 0x2cd   : > { %v1592_v26 = vpack.c.bf16 %v1520_v58, %v1512_v37 }
 0x2cf   : > { %1167 = vrot.lane.b32.xlu0 %v12578_v57, %s11281_s13  ;;  %1297 = vrot.lane.b32.xlu1 %v14190_v54, %s11280_s12 }
 0x2d0   : > { %1035 = vrot.lane.b32.xlu2 %v12636_v38, %s11283_s19  ;;  %1790 = vmatpush.bf16.msrb.mxu2 %v1592_v26  ;;  %v14202_v26 = vld [vmem:[#allocation42_spill] sm:$0xff] }
 0x2d1   : > { %v12955_v59 = vpop.permute.xlu1 %1025  ;;  %v1418_v56 = vpop.permute.xlu0 %1417 }
 0x2d2   : > { %v1053_v18 = vsel %vm398_vm7, %v1022_v43, %v12955_v59  ;;  %v12960_v41 = vpop.permute.xlu2 %1617  ;;  %v1433_v43 = vsel %vm709_vm1, %v12703_v34, %v1418_v56 }
 0x2d3   : > { %14197 = vst [vmem:[#allocation23_spill] sm:$0xff] %v12960_v41  ;;  %v1064_v20 = vmul.f32 %v1053_v18, %v14198_v53  ;;  %8349 = vmatmul.msk.bf16.vlgmr.msrb.gmra.mxu2 %vm1643_vm10, %v12655_v51  ;;  %v1449_v24 = vmul.f32 %v1433_v43, %v14200_v62 }
 0x2d5   : > { %v1528_v39 = vpack.c.bf16 %v1072_v32, %v1064_v20 }
 0x2d7   : > { %1489 = vrot.lane.b32.xlu0 %v14190_v54, %s11279_s26  ;;  %1231 = vrot.lane.b32.xlu1 %v12578_v57, %s11282_s18 }
 0x2d8   : > { %1361 = vrot.lane.b32.xlu2 %v14190_v54, %s11278_s23  ;;  %1771 = vmatpush.bf16.msrb.mxu0 %v1528_v39  ;;  %s8305_s23 = sshll.u32 %s362_s17, 2 }
 0x2d9   : > { %v12972_v48 = vpop.permute.xlu1 %1612  ;;  %v12974_v60 = vpop.permute.xlu0 %1423 }
 0x2da   : > { %14199 = vst [vmem:[#allocation22_spill] sm:$0xff] %v12972_v48  ;;  %v12976_v12 = vpop.permute.xlu2 %1421 }
 0x2db   : > { %1739 = vmatmul.bf16.gmra.mxu1 %v12754_v16  ;;  %1772 = vmatmul.bf16.vlgmr.msrb.gmra.mxu0 %v12699_v47  ;;  %v1431_v40 = vsel %vm709_vm1, %v1418_v56, %v12976_v12 }
 0x2dc   : > { %8348 = vmatmul.msk.bf16.gmra.mxu3 %vm1643_vm10, %v12727_v63  ;;  %v1450_v4 = vmul.f32 %v1431_v40, %v14201_v36 }
 0x2df   : > { %1039 = vrot.lane.b32.xlu0 %v12578_v57, %s11283_s19  ;;  %1101 = vrot.lane.b32.xlu1 %v12716_v49, %s11284_s21 }
 0x2e0   : > { %1299 = vrot.lane.b32.xlu2 %v14193_v23, %s11280_s12 }
 0x2e1   : > { %v1420_v44 = vpop.permute.xlu1 %1419  ;;  %v1356_v25 = vpop.permute.xlu0 %1355 }
 0x2e2   : > { %v1432_v34 = vsel %vm709_vm1, %v1420_v44, %v12974_v60  ;;  %v1434_v13 = vsel %vm709_vm1, %v12756_v6, %v1420_v44  ;;  %v1370_v35 = vsel %vm657_vm2, %v12761_v0, %v1356_v25  ;;  %v1354_v50 = vpop.permute.xlu2 %1353  ;;  %v14204_v44 = vld [vmem:[#allocation51_spill] sm:$0xff] }
 0x2e3   : > { %v1457_v2 = vmul.f32 %v1434_v13, %v14200_v62  ;;  %v1458_v19 = vmul.f32 %v1432_v34, %v14201_v36  ;;  %v1369_v37 = vsel %vm657_vm2, %v12779_v10, %v1354_v50  ;;  %8350 = vmatmul.msk.bf16.gmra.mxu2 %vm1643_vm10, %v12727_v63  ;;  %v1393_v21 = vmul.f32 %v1370_v35, %v14202_v26 }
 0x2e4   : > { %v1385_v0 = vmul.f32 %v1369_v37, %v14202_v26  ;;  %v14206_v37 = vld [vmem:[#allocation55_spill] sm:$0xff] }
 0x2e5   : > { %v1585_v58 = vpack.c.bf16 %v1457_v2, %v1449_v24  ;;  %v1586_v6 = vpack.c.bf16 %v1458_v19, %v1450_v4 }
 0x2e6   : > { %v1577_v18 = vpack.c.bf16 %v1393_v21, %v1385_v0 }
 0x2e7   : > { %1491 = vrot.lane.b32.xlu1 %v14193_v23, %s11279_s26  ;;  %1802 = vmatpush.bf16.msra.mxu1 %v1585_v58  ;;  %s10456_s26 = sshll.u32 %s11352_s9, 2  ;;  %s8178_s9 = scalar_lea.sflag [#allocation5], %s362_s17 }
 0x2e8   : > { %1165 = vrot.lane.b32.xlu2 %v12716_v49, %s11281_s13  ;;  %1840 = vmatpush.bf16.msra.mxu0 %v1586_v6  ;;  %s8188_s18 = scalar_lea.hbm %s13992_s8, %s10456_s26 }
 0x2e9   : > { %v13018_v56 = vpop.permute.xlu1 %1622  ;;  %v1290_v10 = vpop.permute.xlu0 %1289  ;;  %s8192_s11 = sshll.u32 %s8188_s18, 4  ;;  %s8193_s11 = int_to_ptr.hbm [resolvable:$true] %s8192_s11 }
 0x2ea   : > { %14203 = vst [vmem:[#allocation21_spill] sm:$0xff] %v13018_v56  ;;  %v13020_v53 = vpop.permute.xlu2 %1359  ;;  %s11207_s14 = sshra.s32 %s8193_s11, 4  ;;  %s11208_s14 = int_to_ptr.hbm [resolvable:$true] %s11207_s14 }
 0x2eb   : > { %1777 = vmatmul.bf16.gmra.mxu0 %v12754_v16  ;;  %1803 = vmatpush.bf16.msra.mxu1 %v1577_v18  ;;  %v1368_v32 = vsel %vm657_vm2, %v1356_v25, %v13020_v53  ;;  %v1305_v25 = vsel %vm605_vm4, %v12784_v61, %v1290_v10  ;;  %v14205_v61 = vld [vmem:[#allocation44_spill] sm:$0xff]  ;;  %s11209_s24 = scalar_lea.hbm %s11208_s14, 4  ;;  %p11214_p3 = scmp.lt.s32.totalorder %s11208_s14, %s13992_s8 }
 0x2ec   : > { %v1394_v62 = vmul.f32 %v1368_v32, %v14204_v44  ;;  %v1321_v19 = vmul.f32 %v1305_v25, %v14205_v61  ;;  %p11210_p0 = scmp.ne.s32.totalorder %s11208_s14, %s11209_s24  ;;  %p11215_p4 = scmp.lt.s32.totalorder %s11213_s22, %s11209_s24 }
 0x2ee   : > { %p11211_p1 = pnand %p11210_p0, %p11369_p5  ;;  %p11216_p7 = por %p11215_p4, %p11214_p3 }
 0x2f0   : > { %1103 = vrot.lane.b32.xlu2 %v12578_v57, %s11284_s21  ;;  %p11212_p2 = pneg %p11211_p1 }
 0x2f1   : > { %v13028_v20 = vpop.permute.xlu0 %1295  ;;  %v13030_v39 = vpop.permute.xlu1 %1357 }
 0x2f2   : > { %v1367_v43 = vsel %vm657_vm2, %v1354_v50, %v13030_v39  ;;  %v13035_v40 = vpop.permute.xlu2 %1293  ;;  %p11217_p8 = pnand %p11216_p7, %p11212_p2 }
 0x2f3   : > { %v1386_v24 = vmul.f32 %v1367_v43, %v14204_v44  ;;  %v1303_v13 = vsel %vm605_vm4, %v1290_v10, %v13035_v40 }
 0x2f4   : > { %v1322_v58 = vmul.f32 %v1303_v13, %v14206_v37  ;;  %v1562_v13 = vpack.c.bf16 %v12636_v38, %v12540_v33  ;;  %v14208_v33 = vld [vmem:[#allocation45_spill] sm:$0xff] }
 0x2f5   : > { %v1578_v34 = vpack.c.bf16 %v1394_v62, %v1386_v24  ;;  %v1561_v62 = vpack.c.bf16 %v12374_v7, %v12341_v14 }
 0x2f7   : > { %1841 = vmatpush.bf16.msra.mxu0 %v1578_v34  ;;  %v1716_v21 = vpop.f32.mrf.mxu3 }
 0x2f8   : > { %1037 = vrot.lane.b32.xlu2 %v12716_v49, %s11283_s19  ;;  %s364_s19 = scalar_lea.vmem [#allocation11], %s8305_s23 }
 0x2f9   : > { %v13047_v35 = vpop.permute.xlu0 %1225  ;;  %v1292_v50 = vpop.permute.xlu1 %1291  ;;  %s8190_s21 = sshll.u32 %s364_s19, 4  ;;  %s8191_s21 = int_to_ptr.vmem [resolvable:$true] %s8190_s21 }
 0x2fa   : > { %v1304_v36 = vsel %vm605_vm4, %v1292_v50, %v13028_v20  ;;  %v1306_v4 = vsel %vm605_vm4, %v12777_v8, %v1292_v50  ;;  %v1224_v2 = vpop.permute.xlu2 %1223  ;;  %v1678_v18 = vpop.f32.mrf.mxu1 }
 0x2fb   : > { %v1329_v6 = vmul.f32 %v1306_v4, %v14205_v61  ;;  %v1330_v26 = vmul.f32 %v1304_v36, %v14206_v37  ;;  %v1244_v8 = vsel %vm553_vm6, %v12848_v45, %v1224_v2  ;;  %v14207_v36 = vld [vmem:[#allocation46_spill] sm:$0xff] }
 0x2fc   : > { %v1265_v4 = vmul.f32 %v1244_v8, %v14207_v36 }
 0x2fd   : > { %v1569_v0 = vpack.c.bf16 %v1329_v6, %v1321_v19  ;;  %v1570_v10 = vpack.c.bf16 %v1330_v26, %v1322_v58 }
 0x2ff   : > { %v1697_v32 = vpop.f32.mrf.mxu2  ;;  %1804 = vmatpush.bf16.msra.mxu1 %v1569_v0  ;;  %1842 = vmatpush.bf16.msra.mxu0 %v1570_v10 }
 0x300   : > { %v1698_v43 = vadd.f32 %v1697_v32, %v12932_v42  ;;  %v1659_v44 = vpop.f32.mrf.mxu0 }
 0x301   : > { %v1660_v24 = vadd.f32 %v1659_v44, %v12932_v42  ;;  %v13066_v34 = vpop.permute.xlu0 %1159  ;;  %v1222_v25 = vpop.permute.xlu1 %1221  ;;  %v2016_v44 = vld [vmem:[#allocation2] sm:$0x5] }
 0x302   : > { %v1717_v50 = vadd.f32 %v1716_v21, %v1698_v43  ;;  %v1180_v45 = vsel %vm501_vm5, %v12853_v28, %v13066_v34  ;;  %v1243_v14 = vsel %vm553_vm6, %v12801_v5, %v1222_v25  ;;  %v13077_v7 = vpop.permute.xlu2 %1157  ;;  %v1718_v21 = vpop.f32.mrf.mxu3 }
 0x303   : > { %v1679_v61 = vadd.f32 %v1678_v18, %v1660_v24  ;;  %v1257_v19 = vmul.f32 %v1243_v14, %v14207_v36  ;;  %1805 = vmatpush.bf16.msra.mxu1 %v1561_v62  ;;  %v1201_v38 = vmul.f32 %v1180_v45, %v14208_v33  ;;  %v1179_v28 = vsel %vm501_vm5, %v12868_v22, %v13077_v7  ;;  %v1680_v10 = vpop.f32.mrf.mxu1 }
 0x304   : > { %1843 = vmatpush.bf16.msra.mxu0 %v1562_v13  ;;  %v1955_v37 = vmax.f32 %v1717_v50, 0.0  ;;  %v1193_v5 = vmul.f32 %v1179_v28, %v14208_v33  ;;  %v1241_v22 = vsel %vm553_vm6, %v1222_v25, %v13047_v35 }
 0x305   : > { %v1954_v58 = vmax.f32 %v1679_v61, 0.0  ;;  %v1553_v6 = vpack.c.bf16 %v1265_v4, %v1257_v19  ;;  %v2024_v4 = vld [vmem:[#allocation2 + $0x4] sm:$0x5]  ;;  %v2031_v61 = vld [vmem:[#allocation2 + $0x8] sm:$0x5] }
 0x306   : > { %v1545_v25 = vpack.c.bf16 %v1201_v38, %v1193_v5  ;;  %v14211_v19 = vld [vmem:[#allocation57_spill] sm:$0xff] }
 0x307   : > { %v13090_v26 = vpack.c.bf16 %v1955_v37, %v1954_v58  ;;  %v1699_v0 = vpop.f32.mrf.mxu2  ;;  %1806 = vmatpush.bf16.msra.mxu1 %v1553_v6  ;;  %v1258_v33 = vmul.f32 %v1241_v22, %v14211_v19 }
 0x308   : > { %v1700_v18 = vadd.f32 %v1699_v0, %v12972_v48  ;;  %v1661_v32 = vpop.f32.mrf.mxu0 }
 0x309   : > { %v2003_v8 = vrot.slane %v13090_v26, 2  ;;  %2040 = vst.sshfl [vmem:[#allocation1] sm:$0xff pattern:$0x75643120] %v13090_v26  ;;  %v1662_v62 = vadd.f32 %v1661_v32, %v12972_v48  ;;  %v13103_v24 = vpop.permute.xlu0 %1093  ;;  %v13105_v13 = vpop.permute.xlu1 %1227  ;;  %v2044_v32 = vld [vmem:[#allocation2 + $0x10] sm:$0x5] }
 0x30a   : > { %v1719_v50 = vadd.f32 %v1718_v21, %v1700_v18  ;;  %v1242_v45 = vsel %vm553_vm6, %v1224_v2, %v13105_v13  ;;  %v13110_v14 = vpop.permute.xlu2 %1163  ;;  %v2037_v2 = vld [vmem:[#allocation2 + $0xc] sm:$0x5]  ;;  %v2055_v48 = vld [vmem:[#allocation2 + $0x14] sm:$0x5] }
 0x30b   : > { %v2007_v36 = vsel %vm2004_vm9, %v13090_v26, %v2003_v8  ;;  %v1681_v28 = vadd.f32 %v1680_v10, %v1662_v62  ;;  %v1266_v37 = vmul.f32 %v1242_v45, %v14211_v19  ;;  %1807 = vmatpush.bf16.msra.mxu1 %v1545_v25  ;;  %v1178_v45 = vsel %vm501_vm5, %v13066_v34, %v13110_v14 }
 0x30c   : > { %v2017_v38 = vsel %vm13097_vm12, %v2007_v36, %v2016_v44  ;;  %v2019_v58 = vshrl.u32 %v2007_v36, 16  ;;  %v8360_v5 = vrot.slane %v2007_v36, 9  ;;  %v1963_v6 = vmax.f32 %v1719_v50, 0.0  ;;  %v1721_v44 = vpop.f32.mrf.mxu3 }
 0x30d   : > { %2018 = vst [vmem:[#allocation2] sm:$0x5] %v2017_v38  ;;  %v1962_v21 = vmax.f32 %v1681_v28, 0.0  ;;  %v1554_v0 = vpack.c.bf16 %v1266_v37, %v1258_v33  ;;  %v2085_v33 = vld [vmem:[#allocation2 + $0x20] sm:$0x5] }
 0x30e   : > { %v2025_v18 = vsel %vm13097_vm12, %v2019_v58, %v2024_v4  ;;  %v2032_v22 = vsel %vm13097_vm12, %v8360_v5, %v2031_v61  ;;  %v8361_v10 = vrot.slane %v2019_v58, 9  ;;  %v1683_v61 = vpop.f32.mrf.mxu1 }
 0x30f   : > { %2026 = vst [vmem:[#allocation2 + $0x4] sm:$0x5] %v2025_v18  ;;  %v13122_v8 = vpack.c.bf16 %v1963_v6, %v1962_v21  ;;  %v1702_v62 = vpop.f32.mrf.mxu2  ;;  %1844 = vmatpush.bf16.msra.mxu0 %v1554_v0  ;;  %v2093_v21 = vld [vmem:[#allocation2 + $0x24] sm:$0x5]  ;;  %v2100_v0 = vld [vmem:[#allocation2 + $0x28] sm:$0x5] }
 0x310   : > { %2033 = vst [vmem:[#allocation2 + $0x8] sm:$0x5] %v2032_v22  ;;  %v2038_v25 = vsel %vm13097_vm12, %v8361_v10, %v2037_v2  ;;  %v2042_v50 = vld [vmem:[#allocation1 + $0x1] ss:$2 sm:$0xff]  ;;  %v1703_v36 = vadd.f32 %v1702_v62, %v12960_v41  ;;  %v1664_v4 = vpop.f32.mrf.mxu0 }
 0x311   : > { %2039 = vst [vmem:[#allocation2 + $0xc] sm:$0x5] %v2038_v25  ;;  %v2080_v19 = vrot.slane %v13122_v8, 2  ;;  %v1665_v28 = vadd.f32 %v1664_v4, %v12960_v41  ;;  %v13133_v37 = vpop.permute.xlu0 %1099  ;;  %v13135_v38 = vpop.permute.xlu1 %1161  ;;  %v2045_v58 = vsel %vm13097_vm12, %v2042_v50, %v2044_v32  ;;  %v14212_v18 = vld [vmem:[#allocation59_spill] sm:$0xff] }
 0x312   : > { %2047 = vst.sshfl [vmem:[#allocation1] sm:$0xff pattern:$0x75643120] %v13090_v26  ;;  %v1722_v34 = vadd.f32 %v1721_v44, %v1703_v36  ;;  %v1177_v5 = vsel %vm501_vm5, %v13077_v7, %v13135_v38  ;;  %v13144_v2 = vpop.permute.xlu2 %1097  ;;  %v1202_v22 = vmul.f32 %v1178_v45, %v14212_v18  ;;  %v2106_v7 = vld [vmem:[#allocation2 + $0x2c] sm:$0x5] }
 0x313   : > { %v2083_v6 = vsel %vm2004_vm9, %v13122_v8, %v2080_v19  ;;  %v1194_v10 = vmul.f32 %v1177_v5, %v14212_v18  ;;  %v1684_v32 = vadd.f32 %v1683_v61, %v1665_v28  ;;  %2046 = vst [vmem:[#allocation2 + $0x10] sm:$0x5] %v2045_v58  ;;  %v1115_v61 = vsel %vm449_vm8, %v12873_v3, %v13103_v24  ;;  %v2154_v5 = vld [vmem:[#allocation2 + $0x40] sm:$0x5] }
 0x314   : > { %v2086_v62 = vsel %vm13097_vm12, %v2083_v6, %v2085_v33  ;;  %v2088_v44 = vshrl.u32 %v2083_v6, 16  ;;  %v8366_v25 = vrot.slane %v2083_v6, 9  ;;  %v1971_v50 = vmax.f32 %v1722_v34, 0.0  ;;  %v1723_v58 = vpop.f32.mrf.mxu3 }
 0x315   : > { %2087 = vst [vmem:[#allocation2 + $0x20] sm:$0x5] %v2086_v62  ;;  %v1970_v36 = vmax.f32 %v1684_v32, 0.0  ;;  %v1546_v4 = vpack.c.bf16 %v1202_v22, %v1194_v10  ;;  %v1113_v6 = vsel %vm449_vm8, %v13103_v24, %v13144_v2 }
 0x316   : > { %v2094_v19 = vsel %vm13097_vm12, %v2088_v44, %v2093_v21  ;;  %v2101_v45 = vsel %vm13097_vm12, %v8366_v25, %v2100_v0  ;;  %v8367_v41 = vrot.slane %v2088_v44, 9 }
 0x317   : > { %2095 = vst [vmem:[#allocation2 + $0x24] sm:$0x5] %v2094_v19  ;;  %v13160_v33 = vpack.c.bf16 %v1971_v50, %v1970_v36  ;;  %1845 = vmatpush.bf16.msra.mxu0 %v1546_v4  ;;  %v1704_v28 = vpop.f32.mrf.mxu2  ;;  %v2162_v4 = vld [vmem:[#allocation2 + $0x44] sm:$0x5]  ;;  %v2169_v19 = vld [vmem:[#allocation2 + $0x48] sm:$0x5] }
 0x318   : > { %2102 = vst [vmem:[#allocation2 + $0x28] sm:$0x5] %v2101_v45  ;;  %v2107_v34 = vsel %vm13097_vm12, %v8367_v41, %v2106_v7  ;;  %v1666_v21 = vpop.f32.mrf.mxu0  ;;  %v1705_v0 = vadd.f32 %v1704_v28, %v13018_v56  ;;  %v14213_v41 = vld [vmem:[#allocation47_spill] sm:$0xff]  ;;  %v1685_v7 = vpop.f32.mrf.mxu1 }
 0x319   : > { %v2049_v18 = vld [vmem:[#allocation1 + $0x1] ss:$2 sm:$0xff]  ;;  %2108 = vst [vmem:[#allocation2 + $0x2c] sm:$0x5] %v2107_v34  ;;  %v2149_v3 = vrot.slane %v13160_v33, 2  ;;  %v13170_v22 = vpop.permute.xlu0 %1485  ;;  %v1096_v10 = vpop.permute.xlu1 %1095  ;;  %v1667_v32 = vadd.f32 %v1666_v21, %v13018_v56  ;;  %v1129_v62 = vmul.f32 %v1115_v61, %v14213_v41 }
 0x31a   : > { %2058 = vst.sshfl [vmem:[#allocation1] sm:$0xff pattern:$0x75643120] %v13090_v26  ;;  %v1114_v24 = vsel %vm449_vm8, %v1096_v10, %v13133_v37  ;;  %v1116_v44 = vsel %vm449_vm8, %v12866_v31, %v1096_v10  ;;  %v13181_v25 = vpop.permute.xlu2 %1483  ;;  %v1724_v50 = vadd.f32 %v1723_v58, %v1705_v0  ;;  %v14214_v45 = vld [vmem:[#allocation63_spill] sm:$0xff]  ;;  %v2050_v10 = vshrl.u32 %v2049_v18, 16 }
 0x31b   : > { %v2152_v36 = vsel %vm2004_vm9, %v13160_v33, %v2149_v3  ;;  %v1130_v28 = vmul.f32 %v1113_v6, %v14214_v45  ;;  %v1137_v61 = vmul.f32 %v1116_v44, %v14213_v41  ;;  %v1138_v34 = vmul.f32 %v1114_v24, %v14214_v45  ;;  %v2175_v58 = vld [vmem:[#allocation2 + $0x4c] sm:$0x5] }
 0x31c   : > { %v2155_v21 = vsel %vm13097_vm12, %v2152_v36, %v2154_v5  ;;  %v2157_v56 = vshrl.u32 %v2152_v36, 16  ;;  %v8372_v31 = vrot.slane %v2152_v36, 9  ;;  %v1686_v0 = vadd.f32 %v1685_v7, %v1667_v32  ;;  %v2065_v36 = vld [vmem:[#allocation2 + $0x18] sm:$0x5] }
 0x31d   : > { %2156 = vst [vmem:[#allocation2 + $0x40] sm:$0x5] %v2155_v21  ;;  %v1979_v46 = vmax.f32 %v1724_v50, 0.0  ;;  %v1537_v3 = vpack.c.bf16 %v1137_v61, %v1129_v62  ;;  %v1538_v11 = vpack.c.bf16 %v1138_v34, %v1130_v28  ;;  %v1498_v18 = vsel %vm761_vm0, %v12934_v29, %v13181_v25  ;;  %v2223_v28 = vld [vmem:[#allocation2 + $0x60] sm:$0x5] }
 0x31e   : > { %v2163_v6 = vsel %vm13097_vm12, %v2157_v56, %v2162_v4  ;;  %v2170_v41 = vsel %vm13097_vm12, %v8372_v31, %v2169_v19  ;;  %v8373_v24 = vrot.slane %v2157_v56, 9  ;;  %v1978_v44 = vmax.f32 %v1686_v0, 0.0  ;;  %v14216_v61 = vld [vmem:[#allocation48_spill] sm:$0xff]  ;;  %v2231_v31 = vld [vmem:[#allocation2 + $0x64] sm:$0x5] }
 0x31f   : > { %2164 = vst [vmem:[#allocation2 + $0x44] sm:$0x5] %v2163_v6  ;;  %1808 = vmatpush.bf16.msra.mxu1 %v1537_v3  ;;  %1846 = vmatpush.bf16.msra.mxu0 %v1538_v11  ;;  %v2056_v32 = vsel %vm13097_vm12, %v2050_v10, %v2055_v48  ;;  %v14215_v48 = vld [vmem:[#allocation41_spill] sm:$0xff] }
 0x320   : > { %2171 = vst [vmem:[#allocation2 + $0x48] sm:$0x5] %v2170_v41  ;;  %v2176_v5 = vsel %vm13097_vm12, %v8373_v24, %v2175_v58  ;;  %v13202_v7 = vpack.c.bf16 %v1979_v46, %v1978_v44  ;;  %v1521_v45 = vmul.f32 %v1498_v18, %v14215_v48  ;;  %v2238_v10 = vld [vmem:[#allocation2 + $0x68] sm:$0x5]  ;;  %v2244_v24 = vld [vmem:[#allocation2 + $0x6c] sm:$0x5] }
 0x321   : > { %v2060_v62 = vld [vmem:[#allocation1 + $0x1] ss:$2 sm:$0xff]  ;;  %2177 = vst [vmem:[#allocation2 + $0x4c] sm:$0x5] %v2176_v5  ;;  %v1032_v56 = vpop.permute.xlu0 %1031  ;;  %v1482_v50 = vpop.permute.xlu1 %1481 }
 0x322   : > { %2068 = vst.sshfl [vmem:[#allocation1] sm:$0xff pattern:$0x75643120] %v13090_v26  ;;  %v1052_v11 = vsel %vm398_vm7, %v12939_v52, %v1032_v56  ;;  %v1497_v29 = vsel %vm761_vm0, %v12889_v55, %v1482_v50  ;;  %v1030_v4 = vpop.permute.xlu2 %1029  ;;  %v8363_v19 = vrot.slane %v2060_v62, 9  ;;  %v2218_v46 = vrot.slane %v13202_v7, 2 }
 0x323   : > { %v1073_v34 = vmul.f32 %v1052_v11, %v14216_v61  ;;  %v1513_v21 = vmul.f32 %v1497_v29, %v14215_v48  ;;  %2057 = vst [vmem:[#allocation2 + $0x14] sm:$0x5] %v2056_v32  ;;  %v1051_v52 = vsel %vm398_vm7, %v12955_v59, %v1030_v4  ;;  %v1495_v32 = vsel %vm761_vm0, %v1482_v50, %v13170_v22  ;;  %v14217_v50 = vld [vmem:[#allocation49_spill] sm:$0xff] }
 0x324   : > { %v2066_v26 = vsel %vm13097_vm12, %v8363_v19, %v2065_v36  ;;  %v2221_v55 = vsel %vm2004_vm9, %v13202_v7, %v2218_v46  ;;  %v1065_v0 = vmul.f32 %v1051_v52, %v14216_v61 }
 0x325   : > { %v1593_v58 = vpack.c.bf16 %v1521_v45, %v1513_v21  ;;  %2067 = vst [vmem:[#allocation2 + $0x18] sm:$0x5] %v2066_v26  ;;  %v2224_v3 = vsel %vm13097_vm12, %v2221_v55, %v2223_v28  ;;  %v2226_v6 = vshrl.u32 %v2221_v55, 16  ;;  %v8378_v41 = vrot.slane %v2221_v55, 9 }
 0x326   : > { %2225 = vst [vmem:[#allocation2 + $0x60] sm:$0x5] %v2224_v3  ;;  %v1529_v59 = vpack.c.bf16 %v1073_v34, %v1065_v0  ;;  %v1514_v45 = vmul.f32 %v1495_v32, %v14217_v50  ;;  %v2076_v34 = vld [vmem:[#allocation2 + $0x1c] sm:$0x5] }
 0x327   : > { %1828 = vmatpush.bf16.msra.mxu3 %v1593_v58  ;;  %v2232_v44 = vsel %vm13097_vm12, %v2226_v6, %v2231_v31  ;;  %v2239_v5 = vsel %vm13097_vm12, %v8378_v41, %v2238_v10  ;;  %v8379_v18 = vrot.slane %v2226_v6, 9  ;;  %v2113_v10 = vld [vmem:[#allocation2 + $0x30] sm:$0x5] }
 0x328   : > { %2233 = vst [vmem:[#allocation2 + $0x64] sm:$0x5] %v2232_v44  ;;  %1809 = vmatpush.bf16.msra.mxu1 %v1529_v59  ;;  %v14219_v44 = vld [vmem:[#allocation68_spill] sm:$0xff] }
 0x329   : > { %v2070_v62 = vld [vmem:[#allocation1 + $0x1] ss:$2 sm:$0xff]  ;;  %v1426_v36 = vpop.permute.xlu0 %1425  ;;  %v13232_v11 = vpop.permute.xlu1 %1487  ;;  %v2245_v29 = vsel %vm13097_vm12, %v8379_v18, %v2244_v24  ;;  %2240 = vst [vmem:[#allocation2 + $0x68] sm:$0x5] %v2239_v5  ;;  %v14220_v18 = vld [vmem:[#allocation54_spill] sm:$0xff] }
 0x32a   : > { %2109 = vst.sshfl [vmem:[#allocation1] sm:$0xff pattern:$0x75643120] %v13122_v8  ;;  %v1496_v19 = vsel %vm761_vm0, %v13181_v25, %v13232_v11  ;;  %v13241_v48 = vpop.permute.xlu2 %1035  ;;  %8351 = vmatmul.msk.bf16.vlgmr.msra.gmra.mxu3 %vm1643_vm10, %v12655_v51  ;;  %v2071_v28 = vshrl.u32 %v2070_v62, 16  ;;  %v1429_v59 = vsel %vm709_vm1, %v12976_v12, %v1426_v36  ;;  %v14221_v62 = vld [vmem:[#allocation34_spill] sm:$0xff] }
 0x32b   : > { %v1522_v46 = vmul.f32 %v1496_v19, %v14217_v50  ;;  %2246 = vst [vmem:[#allocation2 + $0x6c] sm:$0x5] %v2245_v29  ;;  %1810 = vmatmul.bf16.vlgmr.msra.gmra.mxu1 %v12699_v47  ;;  %v1050_v25 = vsel %vm398_vm7, %v1032_v56, %v13241_v48  ;;  %v14218_v56 = vld [vmem:[#allocation61_spill] sm:$0xff]  ;;  %v1451_v32 = vmul.f32 %v1429_v59, %v14220_v18 }
 0x32c   : > { %v8364_v21 = vrot.slane %v2071_v28, 9  ;;  %v1074_v3 = vmul.f32 %v1050_v25, %v14218_v56  ;;  %v14224_v25 = vld [vmem:[#allocation70_spill] sm:$0xff] }
 0x32d   : > { %v1594_v61 = vpack.c.bf16 %v1522_v46, %v1514_v45  ;;  %v14222_v46 = vld [vmem:[#allocation71_spill] sm:$0xff] }
 0x32e   : > { %v2077_v52 = vsel %vm13097_vm12, %v8364_v21, %v2076_v34  ;;  %v14223_v34 = vld [vmem:[#allocation73_spill] sm:$0xff] }
 0x32f   : > { %1866 = vmatpush.bf16.msra.mxu2 %v1594_v61  ;;  %2078 = vst [vmem:[#allocation2 + $0x1c] sm:$0x5] %v2077_v52 }
 0x331   : > { %v2111_v26 = vld [vmem:[#allocation1 + $0x1] ss:$2 sm:$0xff]  ;;  %v1364_v55 = vpop.permute.xlu0 %1363  ;;  %v13253_v31 = vpop.permute.xlu1 %1033 }
 0x332   : > { %2116 = vst.sshfl [vmem:[#allocation1] sm:$0xff pattern:$0x75643120] %v13122_v8  ;;  %v1049_v58 = vsel %vm398_vm7, %v1030_v4, %v13253_v31  ;;  %v1362_v0 = vpop.permute.xlu2 %1361  ;;  %8353 = vmatmul.msk.bf16.vlgmr.msra.gmra.mxu2 %vm1643_vm10, %v12655_v51  ;;  %v2114_v41 = vsel %vm13097_vm12, %v2111_v26, %v2113_v10  ;;  %v1443_v4 = vsel %vm709_vm1, %v1426_v36, %v14219_v44  ;;  %v14225_v10 = vld [vmem:[#allocation52_spill] sm:$0xff] }
 0x333   : > { %v1066_v6 = vmul.f32 %v1049_v58, %v14218_v56  ;;  %2115 = vst [vmem:[#allocation2 + $0x30] sm:$0x5] %v2114_v41  ;;  %v1452_v29 = vmul.f32 %v1443_v4, %v14221_v62  ;;  %v1366_v45 = vsel %vm657_vm2, %v13020_v53, %v1364_v55  ;;  %v1365_v12 = vsel %vm657_vm2, %v13030_v39, %v1362_v0  ;;  %v14227_v44 = vld [vmem:[#allocation72_spill] sm:$0xff] }
 0x334   : > { %v1380_v21 = vsel %vm657_vm2, %v1364_v55, %v14223_v34  ;;  %v1379_v53 = vsel %vm657_vm2, %v1362_v0, %v14224_v25  ;;  %v1395_v58 = vmul.f32 %v1366_v45, %v14225_v10  ;;  %v1387_v55 = vmul.f32 %v1365_v12, %v14225_v10  ;;  %v14226_v0 = vld [vmem:[#allocation35_spill] sm:$0xff] }
 0x335   : > { %v1530_v24 = vpack.c.bf16 %v1074_v3, %v1066_v6  ;;  %v1396_v6 = vmul.f32 %v1380_v21, %v14226_v0  ;;  %v1388_v41 = vmul.f32 %v1379_v53, %v14226_v0  ;;  %v2134_v25 = vld [vmem:[#allocation2 + $0x38] sm:$0x5]  ;;  %v14231_v53 = vld [vmem:[#allocation74_spill] sm:$0xff]  ;;  %vm2296_vm2 = vsmask.f32 7946 }
 0x337   : > { %1847 = vmatpush.bf16.msra.mxu0 %v1530_v24 }
 0x339   : > { %v2118_v5 = vld [vmem:[#allocation1 + $0x1] ss:$2 sm:$0xff]  ;;  %v1230_v19 = vpop.permute.xlu0 %1229  ;;  %v1428_v50 = vpop.permute.xlu1 %1427 }
 0x33a   : > { %2127 = vst.sshfl [vmem:[#allocation1] sm:$0xff pattern:$0x75643120] %v13122_v8  ;;  %v1430_v36 = vsel %vm709_vm1, %v12974_v60, %v1428_v50  ;;  %v1444_v28 = vsel %vm709_vm1, %v1428_v50, %v14222_v46  ;;  %v1300_v61 = vpop.permute.xlu2 %1299  ;;  %1848 = vmatmul.bf16.vlgmr.msra.gmra.mxu0 %v12699_v47  ;;  %v2124_v60 = vld [vmem:[#allocation2 + $0x34] sm:$0x5]  ;;  %8352 = vmatmul.msk.bf16.gmra.mxu3 %vm1643_vm10, %v12727_v63  ;;  %v2119_v26 = vshrl.u32 %v2118_v5, 16 }
 0x33b   : > { %v1459_v52 = vmul.f32 %v1430_v36, %v14220_v18  ;;  %v1460_v39 = vmul.f32 %v1444_v28, %v14221_v62  ;;  %1815 = vmatmul.bf16.gmra.mxu1 %v12754_v16  ;;  %v1302_v59 = vsel %vm605_vm4, %v13028_v20, %v1300_v61  ;;  %v1316_v4 = vsel %vm605_vm4, %v1300_v61, %v14227_v44  ;;  %v14228_v50 = vld [vmem:[#allocation69_spill] sm:$0xff]  ;;  %v14229_v36 = vld [vmem:[#allocation56_spill] sm:$0xff] }
 0x33c   : > { %v2125_v24 = vsel %vm13097_vm12, %v2119_v26, %v2124_v60  ;;  %v1579_v62 = vpack.c.bf16 %v1395_v58, %v1387_v55  ;;  %v1580_v20 = vpack.c.bf16 %v1396_v6, %v1388_v41  ;;  %v1331_v46 = vmul.f32 %v1302_v59, %v14229_v36  ;;  %v14230_v28 = vld [vmem:[#allocation36_spill] sm:$0xff]  ;;  %v14232_v58 = vld [vmem:[#allocation58_spill] sm:$0xff] }
 0x33d   : > { %v1587_v56 = vpack.c.bf16 %v1459_v52, %v1451_v32  ;;  %v1588_v3 = vpack.c.bf16 %v1460_v39, %v1452_v29  ;;  %2126 = vst [vmem:[#allocation2 + $0x34] sm:$0x5] %v2125_v24  ;;  %v1332_v61 = vmul.f32 %v1316_v4, %v14230_v28  ;;  %v1237_v52 = vsel %vm553_vm6, %v1230_v19, %v14231_v53  ;;  %v14234_v59 = vld [vmem:[#allocation76_spill] sm:$0xff] }
 0x33e   : > { %v1239_v39 = vsel %vm553_vm6, %v13047_v35, %v1230_v19  ;;  %v1563_v41 = vpack.c.bf16 %v12578_v57, %v12716_v49  ;;  %v1564_v35 = vpack.c.bf16 %v14193_v23, %v14190_v54  ;;  %v14235_v23 = vld [vmem:[#allocation75_spill] sm:$0xff]  ;;  %v14238_v53 = vld [vmem:[#allocation64_spill] sm:$0xff]  ;;  %vm2294_vm1 = vsmask.f32 7938 }
 0x33f   : > { %1878 = vmatpush.bf16.msrb.mxu1 %v1587_v56  ;;  %1916 = vmatpush.bf16.msrb.mxu0 %v1588_v3  ;;  %v1259_v55 = vmul.f32 %v1239_v39, %v14232_v58  ;;  %v14233_v56 = vld [vmem:[#allocation38_spill] sm:$0xff] }
 0x340   : > { %v1260_v3 = vmul.f32 %v1237_v52, %v14233_v56 }
 0x341   : > { %v2129_v5 = vld [vmem:[#allocation1 + $0x1] ss:$2 sm:$0xff]  ;;  %v1168_v18 = vpop.permute.xlu0 %1167  ;;  %v1298_v32 = vpop.permute.xlu1 %1297 }
 0x342   : > { %2137 = vst.sshfl [vmem:[#allocation1] sm:$0xff pattern:$0x75643120] %v13122_v8  ;;  %v1301_v29 = vsel %vm605_vm4, %v13035_v40, %v1298_v32  ;;  %v1315_v45 = vsel %vm605_vm4, %v1298_v32, %v14228_v50  ;;  %v1166_v12 = vpop.permute.xlu2 %1165  ;;  %8354 = vmatmul.msk.bf16.gmra.mxu2 %vm1643_vm10, %v12727_v63  ;;  %v8369_v60 = vrot.slane %v2129_v5, 9  ;;  %v1176_v19 = vsel %vm501_vm5, %v13110_v14, %v1168_v18  ;;  %v14236_v32 = vld [vmem:[#allocation60_spill] sm:$0xff]  ;;  %vm2297_vm4 = vmand %vm2012_vm13, %vm2296_vm2 }
 0x343   : > { %v1323_v34 = vmul.f32 %v1301_v29, %v14229_v36  ;;  %v1324_v21 = vmul.f32 %v1315_v45, %v14230_v28  ;;  %1879 = vmatpush.bf16.msrb.mxu1 %v1579_v62  ;;  %1917 = vmatpush.bf16.msrb.mxu0 %v1580_v20  ;;  %v1175_v24 = vsel %vm501_vm5, %v13135_v38, %v1166_v12 }
 0x344   : > { %v2135_v26 = vsel %vm13097_vm12, %v8369_v60, %v2134_v25  ;;  %v1174_v54 = vsel %vm501_vm5, %v1168_v18, %v12607_v9  ;;  %v1173_v14 = vsel %vm501_vm5, %v1166_v12, %v14235_v23  ;;  %v1195_v62 = vmul.f32 %v1175_v24, %v14236_v32  ;;  %v2145_v9 = vld [vmem:[#allocation2 + $0x3c] sm:$0x5]  ;;  %v14237_v18 = vld [vmem:[#allocation37_spill] sm:$0xff] }
 0x345   : > { %v1571_v40 = vpack.c.bf16 %v1331_v46, %v1323_v34  ;;  %v1572_v8 = vpack.c.bf16 %v1332_v61, %v1324_v21  ;;  %2136 = vst [vmem:[#allocation2 + $0x38] sm:$0x5] %v2135_v26  ;;  %v1204_v45 = vmul.f32 %v1174_v54, %v14237_v18  ;;  %v1196_v12 = vmul.f32 %v1173_v14, %v14237_v18  ;;  %v2182_v26 = vld [vmem:[#allocation2 + $0x50] sm:$0x5]  ;;  %v14244_v18 = vld [vmem:[#allocation77_spill] sm:$0xff] }
 0x346   : > { %v14242_v54 = vld [vmem:[#allocation78_spill] sm:$0xff] }
 0x347   : > { %1880 = vmatpush.bf16.msrb.mxu1 %v1571_v40  ;;  %1918 = vmatpush.bf16.msrb.mxu0 %v1572_v8  ;;  %v1548_v60 = vpack.c.bf16 %v1204_v45, %v1196_v12 }
 0x348   : > { %v1735_v20 = vpop.f32.mrf.mxu1 }
 0x349   : > { %v2139_v10 = vld [vmem:[#allocation1 + $0x1] ss:$2 sm:$0xff]  ;;  %v13333_v0 = vpop.permute.xlu0 %1489  ;;  %v1232_v6 = vpop.permute.xlu1 %1231 }
 0x34a   : > { %2178 = vst.sshfl [vmem:[#allocation1] sm:$0xff pattern:$0x75643120] %v13160_v33  ;;  %v1238_v44 = vsel %vm553_vm6, %v1232_v6, %v14234_v59  ;;  %v1240_v57 = vsel %vm553_vm6, %v13105_v13, %v1232_v6  ;;  %v1104_v49 = vpop.permute.xlu2 %1103  ;;  %1853 = vmatmul.bf16.gmra.mxu0 %v12754_v16  ;;  %v2140_v5 = vshrl.u32 %v2139_v10, 16  ;;  %v1203_v13 = vmul.f32 %v1176_v19, %v14236_v32  ;;  %v14239_v10 = vld [vmem:[#allocation40_spill] sm:$0xff] }
 0x34b   : > { %v1267_v4 = vmul.f32 %v1240_v57, %v14232_v58  ;;  %v1268_v38 = vmul.f32 %v1238_v44, %v14233_v56  ;;  %1881 = vmatpush.bf16.msrb.mxu1 %v1563_v41  ;;  %1919 = vmatpush.bf16.msrb.mxu0 %v1564_v35  ;;  %v1112_v46 = vsel %vm449_vm8, %v13133_v37, %v1104_v49  ;;  %v14240_v41 = vld [vmem:[#allocation62_spill] sm:$0xff]  ;;  %vm2559_vm6 = vcmask 1041409  }
 0x34c   : > { %v8370_v36 = vrot.slane %v2140_v5, 9  ;;  %v1110_v28 = vsel %vm449_vm8, %v1104_v49, %v12659_v30  ;;  %v1547_v25 = vpack.c.bf16 %v1203_v13, %v1195_v62  ;;  %v1139_v52 = vmul.f32 %v1112_v46, %v14238_v53 }
 0x34d   : > { %v1555_v29 = vpack.c.bf16 %v1267_v4, %v1259_v55  ;;  %v1556_v50 = vpack.c.bf16 %v1268_v38, %v1260_v3  ;;  %v1140_v58 = vmul.f32 %v1110_v28, %v14239_v10  ;;  %v1493_v24 = vsel %vm761_vm0, %v13170_v22, %v13333_v0  ;;  %v14243_v38 = vld [vmem:[#allocation50_spill] sm:$0xff] }
 0x34e   : > { %v2146_v34 = vsel %vm13097_vm12, %v8370_v36, %v2145_v9  ;;  %v1736_v49 = vadd.f32 %v1735_v20, %v12932_v42  ;;  %v1507_v23 = vsel %vm761_vm0, %v13333_v0, %v14242_v54  ;;  %v1515_v5 = vmul.f32 %v1493_v24, %v14243_v38  ;;  %v14245_v36 = vld [vmem:[#allocation31_spill] sm:$0xff]  ;;  %v2316_v24 = vld [vmem:[#allocation2 + $0xc] sm:$0x5]  ;;  %v2309_v54 = vld [vmem:[#allocation2 + $0x8] sm:$0x5] }
 0x34f   : > { %v1754_v61 = vpop.f32.mrf.mxu3  ;;  %1882 = vmatpush.bf16.msrb.mxu1 %v1555_v29  ;;  %1920 = vmatpush.bf16.msrb.mxu0 %v1556_v50  ;;  %2147 = vst [vmem:[#allocation2 + $0x3c] sm:$0x5] %v2146_v34  ;;  %v2193_v50 = vld [vmem:[#allocation2 + $0x54] sm:$0x5]  ;;  %v1516_v46 = vmul.f32 %v1507_v23, %v14245_v36 }
 0x350   : > { %v1737_v14 = vpop.f32.mrf.mxu1  ;;  %v1755_v32 = vadd.f32 %v1754_v61, %v1736_v49 }
 0x351   : > { %v2180_v21 = vld [vmem:[#allocation1 + $0x1] ss:$2 sm:$0xff]  ;;  %v1040_v40 = vpop.permute.xlu0 %1039  ;;  %v1102_v8 = vpop.permute.xlu1 %1101 }
 0x352   : > { %2185 = vst.sshfl [vmem:[#allocation1] sm:$0xff pattern:$0x75643120] %v13160_v33  ;;  %v1048_v37 = vsel %vm398_vm7, %v13241_v48, %v1040_v40  ;;  %v1109_v30 = vsel %vm449_vm8, %v1102_v8, %v12559_v27  ;;  %v1038_v39 = vpop.permute.xlu2 %1037  ;;  %v1046_v55 = vsel %vm398_vm7, %v1040_v40, %v12705_v1  ;;  %v1111_v56 = vsel %vm449_vm8, %v13144_v2, %v1102_v8 }
 0x353   : > { %v1132_v3 = vmul.f32 %v1109_v30, %v14239_v10  ;;  %v1131_v48 = vmul.f32 %v1111_v56, %v14238_v53  ;;  %v1045_v27 = vsel %vm398_vm7, %v1038_v39, %v12605_v17  ;;  %v1047_v6 = vsel %vm398_vm7, %v13253_v31, %v1038_v39  ;;  %1883 = vmatpush.bf16.msrb.mxu1 %v1547_v25  ;;  %v14241_v17 = vld [vmem:[#allocation39_spill] sm:$0xff]  ;;  %v14246_v53 = vld [vmem:[#allocation22_spill] sm:$0xff] }
 0x354   : > { %1921 = vmatpush.bf16.msrb.mxu0 %v1548_v60  ;;  %v1075_v1 = vmul.f32 %v1048_v37, %v14240_v41  ;;  %v1067_v35 = vmul.f32 %v1047_v6, %v14240_v41  ;;  %v2183_v2 = vsel %vm13097_vm12, %v2180_v21, %v2182_v26  ;;  %v1076_v59 = vmul.f32 %v1046_v55, %v14241_v17  ;;  %v2203_v55 = vld [vmem:[#allocation2 + $0x58] sm:$0x5]  ;;  %v2299_v41 = vld [vmem:[#allocation2] sm:$0x5] }
 0x355   : > { %v1540_v19 = vpack.c.bf16 %v1140_v58, %v1132_v3  ;;  %v1068_v44 = vmul.f32 %v1045_v27, %v14241_v17  ;;  %v1539_v31 = vpack.c.bf16 %v1139_v52, %v1131_v48  ;;  %2184 = vst [vmem:[#allocation2 + $0x50] sm:$0x5] %v2183_v2  ;;  %v1956_v40 = vmax.f32 %v1755_v32, 0.0  ;;  %v2303_v48 = vld [vmem:[#allocation2 + $0x4] sm:$0x5] }
 0x356   : > { %v1792_v57 = vpop.f32.mrf.mxu2  ;;  %v1531_v29 = vpack.c.bf16 %v1075_v1, %v1067_v35  ;;  %v1738_v52 = vadd.f32 %v1737_v14, %v14246_v53  ;;  %vm2560_vm7 = vsmask.f32 1280  ;;  %vm2562_vm8 = vcmask 1043459  }
 0x357   : > { %1884 = vmatpush.bf16.msrb.mxu1 %v1539_v31  ;;  %v1756_v9 = vpop.f32.mrf.mxu3  ;;  %v1532_v12 = vpack.c.bf16 %v1076_v59, %v1068_v44 }
 0x358   : > { %v1773_v4 = vpop.f32.mrf.mxu0  ;;  %1922 = vmatpush.bf16.msrb.mxu0 %v1540_v19  ;;  %v1757_v60 = vadd.f32 %v1756_v9, %v1738_v52  ;;  %v1740_v56 = vpop.f32.mrf.mxu1 }
 0x359   : > { %v2187_v22 = vld [vmem:[#allocation1 + $0x1] ss:$2 sm:$0xff]  ;;  %v1774_v13 = vadd.f32 %v1773_v4, %v12932_v42  ;;  %v1492_v62 = vpop.permute.xlu1 %1491 }
 0x35a   : > { %2196 = vst.sshfl [vmem:[#allocation1] sm:$0xff pattern:$0x75643120] %v13160_v33  ;;  %v1494_v0 = vsel %vm761_vm0, %v13232_v11, %v1492_v62  ;;  %v1508_v45 = vsel %vm761_vm0, %v1492_v62, %v14244_v18  ;;  %v2188_v20 = vshrl.u32 %v2187_v22, 16  ;;  %vm2295_vm0 = vmand %vm2009_vm11, %vm2294_vm1  ;;  %v1964_v2 = vmax.f32 %v1757_v60, 0.0 }
 0x35b   : > { %v1523_v28 = vmul.f32 %v1494_v0, %v14243_v38  ;;  %v1524_v61 = vmul.f32 %v1508_v45, %v14245_v36  ;;  %v1793_v34 = vadd.f32 %v1792_v57, %v1774_v13  ;;  %1885 = vmatpush.bf16.msrb.mxu1 %v1531_v29  ;;  %vm13435_vm5 = vmor %vm2297_vm4, %vm2295_vm0  ;;  %v14249_v57 = vld [vmem:[#allocation23_spill] sm:$0xff]  ;;  %v2364_v29 = vld [vmem:[#allocation2 + $0x20] sm:$0x5] }
 0x35c   : > { %1923 = vmatpush.bf16.msrb.mxu0 %v1532_v12  ;;  %v2194_v21 = vsel %vm13097_vm12, %v2188_v20, %v2193_v50  ;;  %v1741_v49 = vadd.f32 %v1740_v56, %v14249_v57  ;;  %v2368_v50 = vld [vmem:[#allocation2 + $0x24] sm:$0x5]  ;;  %v2381_v20 = vld [vmem:[#allocation2 + $0x2c] sm:$0x5]  ;;  %vm2561_vm11 = vmand %vm2559_vm6, %vm2560_vm7 }
 0x35d   : > { %v1595_v11 = vpack.c.bf16 %v1523_v28, %v1515_v5  ;;  %v1596_v8 = vpack.c.bf16 %v1524_v61, %v1516_v46  ;;  %v1957_v25 = vmax.f32 %v1793_v34, 0.0  ;;  %2195 = vst [vmem:[#allocation2 + $0x54] sm:$0x5] %v2194_v21  ;;  %v2214_v61 = vld [vmem:[#allocation2 + $0x5c] sm:$0x5]  ;;  %vm2830_vm1 = vmand %vm2562_vm8, %vm2829_vm3 }
 0x35e   : > { %v1794_v15 = vpop.f32.mrf.mxu2  ;;  %1886 = vmatmul.bf16.vlgmr.msrb.gmra.mxu1 %v12699_v47 }
 0x35f   : > { %v13430_v37 = vpack.c.bf16 %v1957_v25, %v1956_v40  ;;  %1924 = vmatmul.bf16.vlgmr.msrb.gmra.mxu0 %v12699_v47  ;;  %1904 = vmatpush.bf16.msrb.mxu3 %v1595_v11 }
 0x360   : > { %v1775_v30 = vpop.f32.mrf.mxu0  ;;  %1942 = vmatpush.bf16.msrb.mxu2 %v1596_v8  ;;  %v1742_v0 = vpop.f32.mrf.mxu1  ;;  %v14250_v8 = vld [vmem:[#allocation21_spill] sm:$0xff] }
 0x361   : > { %v2198_v39 = vld [vmem:[#allocation1 + $0x1] ss:$2 sm:$0xff]  ;;  %v2287_v26 = vrot.slane %v13430_v37, 2  ;;  %v1776_v58 = vadd.f32 %v1775_v30, %v14246_v53  ;;  %v1743_v25 = vadd.f32 %v1742_v0, %v14250_v8  ;;  %v2251_v30 = vld [vmem:[#allocation2 + $0x70] sm:$0x5] }
 0x362   : > { %2206 = vst.sshfl [vmem:[#allocation1] sm:$0xff pattern:$0x75643120] %v13160_v33  ;;  %v8375_v3 = vrot.slane %v2198_v39, 9  ;;  %8355 = vmatmul.msk.bf16.vlgmr.msrb.gmra.mxu3 %vm1643_vm10, %v12655_v51  ;;  %v1759_v33 = vpop.f32.mrf.mxu3 }
 0x363   : > { %v2290_v47 = vsel %vm2004_vm9, %v13430_v37, %v2287_v26  ;;  %v1795_v27 = vadd.f32 %v1794_v15, %v1776_v58  ;;  %8357 = vmatmul.msk.bf16.vlgmr.msrb.gmra.mxu2 %vm1643_vm10, %v12655_v51  ;;  %v1760_v38 = vadd.f32 %v1759_v33, %v1741_v49  ;;  %v2374_v15 = vld [vmem:[#allocation2 + $0x28] sm:$0x5]  ;;  %v2262_v49 = vld [vmem:[#allocation2 + $0x74] sm:$0x5] }
 0x364   : > { %v2291_v6 = vshll.u32 %v2290_v47, 16  ;;  %v2304_v1 = vsel %vm13435_vm5, %v2290_v47, %v2303_v48  ;;  %v8384_v35 = vrot.slane %v2290_v47, 9  ;;  %v2204_v19 = vsel %vm13097_vm12, %v8375_v3, %v2203_v55 }
 0x365   : > { %2305 = vst [vmem:[#allocation2 + $0x4] sm:$0x5] %v2304_v1  ;;  %v1965_v17 = vmax.f32 %v1795_v27, 0.0  ;;  %v1972_v46 = vmax.f32 %v1760_v38, 0.0  ;;  %v2433_v27 = vld [vmem:[#allocation2 + $0x44] sm:$0x5] }
 0x366   : > { %v2300_v59 = vsel %vm13435_vm5, %v2291_v6, %v2299_v41  ;;  %v8383_v44 = vrot.slane %v2291_v6, 9  ;;  %v2317_v51 = vsel %vm13435_vm5, %v8384_v35, %v2316_v24  ;;  %v1797_v31 = vpop.f32.mrf.mxu2  ;;  %2205 = vst [vmem:[#allocation2 + $0x58] sm:$0x5] %v2204_v19  ;;  %v2429_v1 = vld [vmem:[#allocation2 + $0x40] sm:$0x5] }
 0x367   : > { %2301 = vst [vmem:[#allocation2] sm:$0x5] %v2300_v59  ;;  %v13456_v23 = vpack.c.bf16 %v1965_v17, %v1964_v2  ;;  %v2446_v2 = vld [vmem:[#allocation2 + $0x4c] sm:$0x5]  ;;  %v2498_v38 = vld [vmem:[#allocation2 + $0x64] sm:$0x5] }
 0x368   : > { %v2310_v14 = vsel %vm13435_vm5, %v8383_v44, %v2309_v54  ;;  %2318 = vst [vmem:[#allocation2 + $0xc] sm:$0x5] %v2317_v51  ;;  %v1778_v4 = vpop.f32.mrf.mxu0 }
 0x369   : > { %v2208_v22 = vld [vmem:[#allocation1 + $0x1] ss:$2 sm:$0xff]  ;;  %2311 = vst [vmem:[#allocation2 + $0x8] sm:$0x5] %v2310_v14  ;;  %v2357_v5 = vrot.slane %v13456_v23, 2  ;;  %v1779_v32 = vadd.f32 %v1778_v4, %v14249_v57 }
 0x36a   : > { %2247 = vst.sshfl [vmem:[#allocation1] sm:$0xff pattern:$0x75643120] %v13202_v7  ;;  %v2209_v13 = vshrl.u32 %v2208_v22, 16  ;;  %v1761_v11 = vpop.f32.mrf.mxu3 }
 0x36b   : > { %v2360_v62 = vsel %vm2004_vm9, %v13456_v23, %v2357_v5  ;;  %v1798_v9 = vadd.f32 %v1797_v31, %v1779_v32  ;;  %v1762_v56 = vadd.f32 %v1761_v11, %v1743_v25 }
 0x36c   : > { %v2361_v18 = vshll.u32 %v2360_v62, 16  ;;  %v2369_v45 = vsel %vm13435_vm5, %v2360_v62, %v2368_v50  ;;  %v8388_v12 = vrot.slane %v2360_v62, 9  ;;  %v8376_v36 = vrot.slane %v2209_v13, 9  ;;  %v2511_v50 = vld [vmem:[#allocation2 + $0x6c] sm:$0x5] }
 0x36d   : > { %2370 = vst [vmem:[#allocation2 + $0x24] sm:$0x5] %v2369_v45  ;;  %v1973_v28 = vmax.f32 %v1798_v9, 0.0  ;;  %v1980_v19 = vmax.f32 %v1762_v56, 0.0  ;;  %v2504_v45 = vld [vmem:[#allocation2 + $0x68] sm:$0x5] }
 0x36e   : > { %v2365_v34 = vsel %vm13435_vm5, %v2361_v18, %v2364_v29  ;;  %v8387_v21 = vrot.slane %v2361_v18, 9  ;;  %v2382_v40 = vsel %vm13435_vm5, %v8388_v12, %v2381_v20  ;;  %1891 = vmatmul.bf16.gmra.mxu1 %v12754_v16  ;;  %v1799_v26 = vpop.f32.mrf.mxu2  ;;  %v2215_v58 = vsel %vm13097_vm12, %v8376_v36, %v2214_v61  ;;  %v2494_v29 = vld [vmem:[#allocation2 + $0x60] sm:$0x5]  ;;  %v2272_v36 = vld [vmem:[#allocation2 + $0x78] sm:$0x5] }
 0x36f   : > { %2366 = vst [vmem:[#allocation2 + $0x20] sm:$0x5] %v2365_v34  ;;  %v13472_v52 = vpack.c.bf16 %v1973_v28, %v1972_v46  ;;  %1929 = vmatmul.bf16.gmra.mxu0 %v12754_v16  ;;  %v2343_v56 = vld [vmem:[#allocation2 + $0x18] sm:$0x5] }
 0x370   : > { %v2375_v39 = vsel %vm13435_vm5, %v8387_v21, %v2374_v15  ;;  %2383 = vst [vmem:[#allocation2 + $0x2c] sm:$0x5] %v2382_v40  ;;  %v1780_v60 = vpop.f32.mrf.mxu0  ;;  %v2283_v21 = vld [vmem:[#allocation2 + $0x7c] sm:$0x5] }
 0x371   : > { %v2249_v55 = vld [vmem:[#allocation1 + $0x1] ss:$2 sm:$0xff]  ;;  %2376 = vst [vmem:[#allocation2 + $0x28] sm:$0x5] %v2375_v39  ;;  %v2422_v3 = vrot.slane %v13472_v52, 2  ;;  %v1781_v47 = vadd.f32 %v1780_v60, %v14250_v8 }
 0x372   : > { %2254 = vst.sshfl [vmem:[#allocation1] sm:$0xff pattern:$0x75643120] %v13202_v7  ;;  %v2252_v16 = vsel %vm13097_vm12, %v2249_v55, %v2251_v30  ;;  %8356 = vmatmul.msk.bf16.gmra.mxu3 %vm1643_vm10, %v12727_v63  ;;  %v2332_v60 = vld [vmem:[#allocation2 + $0x14] sm:$0x5] }
 0x373   : > { %v2425_v48 = vsel %vm2004_vm9, %v13472_v52, %v2422_v3  ;;  %v1800_v6 = vadd.f32 %v1799_v26, %v1781_v47  ;;  %8358 = vmatmul.msk.bf16.gmra.mxu2 %vm1643_vm10, %v12727_v63  ;;  %2216 = vst [vmem:[#allocation2 + $0x5c] sm:$0x5] %v2215_v58  ;;  %v2439_v63 = vld [vmem:[#allocation2 + $0x48] sm:$0x5]  ;;  %vm2563_vm10 = vsmask.f32 3328 }
 0x374   : > { %v2426_v41 = vshll.u32 %v2425_v48, 16  ;;  %v2434_v35 = vsel %vm13435_vm5, %v2425_v48, %v2433_v27  ;;  %v8392_v33 = vrot.slane %v2425_v48, 9  ;;  %2253 = vst [vmem:[#allocation2 + $0x70] sm:$0x5] %v2252_v16  ;;  %v2353_v48 = vld [vmem:[#allocation2 + $0x1c] sm:$0x5]  ;;  %vm2564_vm13 = vmand %vm2562_vm8, %vm2563_vm10 }
 0x375   : > { %2435 = vst [vmem:[#allocation2 + $0x44] sm:$0x5] %v2434_v35  ;;  %v1981_v24 = vmax.f32 %v1800_v6, 0.0  ;;  %v2390_v35 = vld [vmem:[#allocation2 + $0x30] sm:$0x5]  ;;  %vm13547_vm14 = vmor %vm2564_vm13, %vm2561_vm11 }
 0x376   : > { %v2430_v17 = vsel %vm13435_vm5, %v2426_v41, %v2429_v1  ;;  %v8391_v59 = vrot.slane %v2426_v41, 9  ;;  %v2447_v44 = vsel %vm13435_vm5, %v8392_v33, %v2446_v2 }
 0x377   : > { %2431 = vst [vmem:[#allocation2 + $0x40] sm:$0x5] %v2430_v17  ;;  %v13497_v51 = vpack.c.bf16 %v1981_v24, %v1980_v19 }
 0x378   : > { %v2440_v31 = vsel %vm13435_vm5, %v8391_v59, %v2439_v63  ;;  %2448 = vst [vmem:[#allocation2 + $0x4c] sm:$0x5] %v2447_v44 }
 0x379   : > { %v2256_v54 = vld [vmem:[#allocation1 + $0x1] ss:$2 sm:$0xff]  ;;  %2441 = vst [vmem:[#allocation2 + $0x48] sm:$0x5] %v2440_v31  ;;  %v2487_v14 = vrot.slane %v13497_v51, 2 }
 0x37a   : > { %2265 = vst.sshfl [vmem:[#allocation1] sm:$0xff pattern:$0x75643120] %v13202_v7  ;;  %v2257_v4 = vshrl.u32 %v2256_v54, 16  ;;  %v2397_v31 = vld [vmem:[#allocation2 + $0x34] sm:$0x5] }
 0x37b   : > { %v2490_v22 = vsel %vm2004_vm9, %v13497_v51, %v2487_v14 }
 0x37c   : > { %v2491_v5 = vshll.u32 %v2490_v22, 16  ;;  %v2499_v32 = vsel %vm13435_vm5, %v2490_v22, %v2498_v38  ;;  %v8396_v13 = vrot.slane %v2490_v22, 9  ;;  %v2263_v62 = vsel %vm13097_vm12, %v2257_v4, %v2262_v49 }
 0x37d   : > { %2500 = vst [vmem:[#allocation2 + $0x64] sm:$0x5] %v2499_v32 }
 0x37e   : > { %v2495_v9 = vsel %vm13435_vm5, %v2491_v5, %v2494_v29  ;;  %v8395_v0 = vrot.slane %v2491_v5, 9  ;;  %v2512_v18 = vsel %vm13435_vm5, %v8396_v13, %v2511_v50  ;;  %2264 = vst [vmem:[#allocation2 + $0x74] sm:$0x5] %v2263_v62 }
 0x37f   : > { %2496 = vst [vmem:[#allocation2 + $0x60] sm:$0x5] %v2495_v9 }
 0x380   : > { %v2505_v12 = vsel %vm13435_vm5, %v8395_v0, %v2504_v45  ;;  %2513 = vst [vmem:[#allocation2 + $0x6c] sm:$0x5] %v2512_v18  ;;  %v2577_v0 = vld [vmem:[#allocation2 + $0x8] sm:$0xa] }
 0x381   : > { %v2267_v20 = vld [vmem:[#allocation1 + $0x1] ss:$2 sm:$0xff]  ;;  %2506 = vst [vmem:[#allocation2 + $0x68] sm:$0x5] %v2505_v12 }
 0x382   : > { %2275 = vst.sshfl [vmem:[#allocation1] sm:$0xff pattern:$0x75643120] %v13202_v7  ;;  %v8381_v46 = vrot.slane %v2267_v20, 9  ;;  %v2325_v7 = vld [vmem:[#allocation2 + $0x10] sm:$0x5] }
 0x384   : > { %v2273_v28 = vsel %vm13097_vm12, %v8381_v46, %v2272_v36  ;;  %v2566_v36 = vld [vmem:[#allocation2] sm:$0xa]  ;;  %v2583_v46 = vld [vmem:[#allocation2 + $0xc] sm:$0xa] }
 0x385   : > { %2274 = vst [vmem:[#allocation2 + $0x78] sm:$0x5] %v2273_v28 }
 0x389   : > { %v2277_v61 = vld [vmem:[#allocation1 + $0x1] ss:$2 sm:$0xff] }
 0x38a   : > { %2319 = vst.sshfl [vmem:[#allocation1] sm:$0xff pattern:$0x75643120] %v13430_v37  ;;  %v2278_v34 = vshrl.u32 %v2277_v61, 16 }
 0x38c   : > { %v8382_v40 = vrot.slane %v2278_v34, 9 }
 0x38e   : > { %v2284_v11 = vsel %vm13097_vm12, %v8382_v40, %v2283_v21  ;;  %vm2828_vm12 = vmand %vm2559_vm6, %vm2827_vm15 }
 0x38f   : > { %2285 = vst [vmem:[#allocation2 + $0x7c] sm:$0x5] %v2284_v11  ;;  %vm13632_vm2 = vmor %vm2830_vm1, %vm2828_vm12 }
 0x391   : > { %v2321_v25 = vld [vmem:[#allocation1 + $0x1] ss:$2 sm:$0xff] }
 0x392   : > { %2328 = vst.sshfl [vmem:[#allocation1] sm:$0xff pattern:$0x75643120] %v13430_v37  ;;  %v2322_v15 = vshll.u32 %v2321_v25, 16 }
 0x394   : > { %v2326_v30 = vsel %vm13435_vm5, %v2322_v15, %v2325_v7  ;;  %v2573_v15 = vld [vmem:[#allocation2 + $0x4] sm:$0xa] }
 0x395   : > { %2327 = vst [vmem:[#allocation2 + $0x10] sm:$0x5] %v2326_v30 }
 0x399   : > { %v2330_v39 = vld [vmem:[#allocation1 + $0x1] ss:$2 sm:$0xff] }
 0x39a   : > { %2335 = vst.sshfl [vmem:[#allocation1] sm:$0xff pattern:$0x75643120] %v13430_v37  ;;  %v2333_v26 = vsel %vm13435_vm5, %v2330_v39, %v2332_v60 }
 0x39b   : > { %2334 = vst [vmem:[#allocation2 + $0x14] sm:$0x5] %v2333_v26 }
 0x3a1   : > { %v2337_v43 = vld [vmem:[#allocation1 + $0x1] ss:$2 sm:$0xff] }
 0x3a2   : > { %2346 = vst.sshfl [vmem:[#allocation1] sm:$0xff pattern:$0x75643120] %v13430_v37  ;;  %v2338_v58 = vshll.u32 %v2337_v43, 16 }
 0x3a4   : > { %v8385_v55 = vrot.slane %v2338_v58, 9  ;;  %v2408_v58 = vld [vmem:[#allocation2 + $0x38] sm:$0x5] }
 0x3a6   : > { %v2344_v3 = vsel %vm13435_vm5, %v8385_v55, %v2343_v56  ;;  %v2642_v56 = vld [vmem:[#allocation2 + $0x28] sm:$0xa] }
 0x3a7   : > { %2345 = vst [vmem:[#allocation2 + $0x18] sm:$0x5] %v2344_v3 }
 0x3a8   : > { %v1811_v6 = vpop.f32.mrf.mxu1 }
 0x3a9   : > { %v2348_v47 = vld [vmem:[#allocation1 + $0x1] ss:$2 sm:$0xff]  ;;  %v1812_v2 = vadd.f32 %v1811_v6, %v12932_v42 }
 0x3aa   : > { %2384 = vst.sshfl [vmem:[#allocation1] sm:$0xff pattern:$0x75643120] %v13456_v23  ;;  %v8386_v16 = vrot.slane %v2348_v47, 9 }
 0x3ac   : > { %v2354_v27 = vsel %vm13435_vm5, %v8386_v16, %v2353_v48 }
 0x3ad   : > { %2355 = vst [vmem:[#allocation2 + $0x1c] sm:$0x5] %v2354_v27  ;;  %v1830_v41 = vpop.f32.mrf.mxu3 }
 0x3ae   : > { %v1831_v44 = vadd.f32 %v1830_v41, %v1812_v2 }
 0x3b0   : > { %v1813_v24 = vpop.f32.mrf.mxu1  ;;  %v1958_v4 = vmax.f32 %v1831_v44, 0.0 }
 0x3b1   : > { %v2386_v1 = vld [vmem:[#allocation1 + $0x1] ss:$2 sm:$0xff]  ;;  %v1814_v5 = vadd.f32 %v1813_v24, %v14246_v53 }
 0x3b2   : > { %2393 = vst.sshfl [vmem:[#allocation1] sm:$0xff pattern:$0x75643120] %v13456_v23  ;;  %v2387_v37 = vshll.u32 %v2386_v1, 16  ;;  %v2418_v1 = vld [vmem:[#allocation2 + $0x3c] sm:$0x5] }
 0x3b4   : > { %v2391_v33 = vsel %vm13435_vm5, %v2387_v37, %v2390_v35  ;;  %v2631_v35 = vld [vmem:[#allocation2 + $0x20] sm:$0xa] }
 0x3b5   : > { %v1868_v19 = vpop.f32.mrf.mxu2  ;;  %2392 = vst [vmem:[#allocation2 + $0x30] sm:$0x5] %v2391_v33  ;;  %v1832_v49 = vpop.f32.mrf.mxu3  ;;  %v2648_v33 = vld [vmem:[#allocation2 + $0x2c] sm:$0xa] }
 0x3b6   : > { %v1833_v29 = vadd.f32 %v1832_v49, %v1814_v5 }
 0x3b7   : > { %v1849_v17 = vpop.f32.mrf.mxu0 }
 0x3b8   : > { %v1850_v63 = vadd.f32 %v1849_v17, %v12932_v42  ;;  %v1816_v45 = vpop.f32.mrf.mxu1  ;;  %v1966_v25 = vmax.f32 %v1833_v29, 0.0 }
 0x3b9   : > { %v2395_v59 = vld [vmem:[#allocation1 + $0x1] ss:$2 sm:$0xff]  ;;  %v1817_v60 = vadd.f32 %v1816_v45, %v14249_v57 }
 0x3ba   : > { %2400 = vst.sshfl [vmem:[#allocation1] sm:$0xff pattern:$0x75643120] %v13456_v23  ;;  %v2398_v54 = vsel %vm13435_vm5, %v2395_v59, %v2397_v31  ;;  %v1869_v14 = vadd.f32 %v1868_v19, %v1850_v63  ;;  %v2638_v31 = vld [vmem:[#allocation2 + $0x24] sm:$0xa] }
 0x3bb   : > { %2399 = vst [vmem:[#allocation2 + $0x34] sm:$0x5] %v2398_v54 }
 0x3bc   : > { %v1959_v22 = vmax.f32 %v1869_v14, 0.0 }
 0x3bd   : > { %v1870_v38 = vpop.f32.mrf.mxu2  ;;  %v1835_v40 = vpop.f32.mrf.mxu3 }
 0x3be   : > { %v13544_v32 = vpack.c.bf16 %v1959_v22, %v1958_v4  ;;  %v1836_v48 = vadd.f32 %v1835_v40, %v1817_v60 }
 0x3bf   : > { %v1851_v13 = vpop.f32.mrf.mxu0 }
 0x3c0   : > { %v2552_v50 = vrot.slane %v13544_v32, 2  ;;  %v1852_v18 = vadd.f32 %v1851_v13, %v14246_v53  ;;  %v1818_v2 = vpop.f32.mrf.mxu1  ;;  %v1974_v63 = vmax.f32 %v1836_v48, 0.0 }
 0x3c1   : > { %v2402_v62 = vld [vmem:[#allocation1 + $0x1] ss:$2 sm:$0xff] }
 0x3c2   : > { %2411 = vst.sshfl [vmem:[#allocation1] sm:$0xff pattern:$0x75643120] %v13456_v23  ;;  %v2403_v12 = vshll.u32 %v2402_v62, 16  ;;  %v2555_v20 = vsel %vm2004_vm9, %v13544_v32, %v2552_v50  ;;  %v1871_v28 = vadd.f32 %v1870_v38, %v1852_v18  ;;  %v1819_v38 = vadd.f32 %v1818_v2, %v14250_v8  ;;  %v2707_v62 = vld [vmem:[#allocation2 + $0x48] sm:$0xa] }
 0x3c3   : > { %v2557_v61 = vrot.slane %v2555_v20, 7  ;;  %v2569_v34 = vshrl.u32 %v2555_v20, 16  ;;  %v2578_v21 = vsel %vm13547_vm14, %v2555_v20, %v2577_v0 }
 0x3c4   : > { %v8389_v11 = vrot.slane %v2403_v12, 9  ;;  %2579 = vst [vmem:[#allocation2 + $0x8] sm:$0xa] %v2578_v21  ;;  %v1967_v7 = vmax.f32 %v1871_v28, 0.0  ;;  %v2713_v28 = vld [vmem:[#allocation2 + $0x4c] sm:$0xa] }
 0x3c5   : > { %v2567_v23 = vsel %vm13547_vm14, %v2557_v61, %v2566_v36  ;;  %v2571_v30 = vrot.slane %v2569_v34, 7  ;;  %v2584_v39 = vsel %vm13547_vm14, %v2569_v34, %v2583_v46  ;;  %v1873_v43 = vpop.f32.mrf.mxu2  ;;  %v1837_v22 = vpop.f32.mrf.mxu3  ;;  %v2696_v46 = vld [vmem:[#allocation2 + $0x40] sm:$0xa]  ;;  %v2455_v34 = vld [vmem:[#allocation2 + $0x50] sm:$0x5] }
 0x3c6   : > { %2568 = vst [vmem:[#allocation2] sm:$0xa] %v2567_v23  ;;  %v13562_v26 = vpack.c.bf16 %v1967_v7, %v1966_v25  ;;  %v2409_v47 = vsel %vm13435_vm5, %v8389_v11, %v2408_v58  ;;  %v1838_v18 = vadd.f32 %v1837_v22, %v1819_v38  ;;  %v2703_v7 = vld [vmem:[#allocation2 + $0x44] sm:$0xa]  ;;  %v2473_v22 = vld [vmem:[#allocation2 + $0x58] sm:$0x5] }
 0x3c7   : > { %v2574_v55 = vsel %vm13547_vm14, %v2571_v30, %v2573_v15  ;;  %2585 = vst [vmem:[#allocation2 + $0xc] sm:$0xa] %v2584_v39  ;;  %v1854_v3 = vpop.f32.mrf.mxu0 }
 0x3c8   : > { %2575 = vst [vmem:[#allocation2 + $0x4] sm:$0xa] %v2574_v55  ;;  %v2624_v27 = vrot.slane %v13562_v26, 2  ;;  %v1855_v6 = vadd.f32 %v1854_v3, %v14249_v57  ;;  %v1982_v15 = vmax.f32 %v1838_v18, 0.0  ;;  %v2772_v55 = vld [vmem:[#allocation2 + $0x68] sm:$0xa] }
 0x3c9   : > { %v2413_v16 = vld [vmem:[#allocation1 + $0x1] ss:$2 sm:$0xff]  ;;  %2410 = vst [vmem:[#allocation2 + $0x38] sm:$0x5] %v2409_v47 }
 0x3ca   : > { %2449 = vst.sshfl [vmem:[#allocation1] sm:$0xff pattern:$0x75643120] %v13472_v52  ;;  %v8390_v41 = vrot.slane %v2413_v16, 9  ;;  %v2627_v37 = vsel %vm2004_vm9, %v13562_v26, %v2624_v27  ;;  %v1874_v19 = vadd.f32 %v1873_v43, %v1855_v6  ;;  %v2761_v27 = vld [vmem:[#allocation2 + $0x60] sm:$0xa] }
 0x3cb   : > { %v2629_v24 = vrot.slane %v2627_v37, 7  ;;  %v2634_v17 = vshrl.u32 %v2627_v37, 16  ;;  %v2643_v59 = vsel %vm13547_vm14, %v2627_v37, %v2642_v56  ;;  %v2462_v56 = vld [vmem:[#allocation2 + $0x54] sm:$0x5]  ;;  %v2778_v6 = vld [vmem:[#allocation2 + $0x6c] sm:$0xa] }
 0x3cc   : > { %v2419_v44 = vsel %vm13435_vm5, %v8390_v41, %v2418_v1  ;;  %2644 = vst [vmem:[#allocation2 + $0x28] sm:$0xa] %v2643_v59  ;;  %v1975_v49 = vmax.f32 %v1874_v19, 0.0  ;;  %v2768_v19 = vld [vmem:[#allocation2 + $0x64] sm:$0xa] }
 0x3cd   : > { %v2632_v54 = vsel %vm13547_vm14, %v2629_v24, %v2631_v35  ;;  %v2636_v14 = vrot.slane %v2634_v17, 7  ;;  %v2649_v4 = vsel %vm13547_vm14, %v2634_v17, %v2648_v33  ;;  %2420 = vst [vmem:[#allocation2 + $0x3c] sm:$0x5] %v2419_v44  ;;  %v1875_v50 = vpop.f32.mrf.mxu2 }
 0x3ce   : > { %2633 = vst [vmem:[#allocation2 + $0x20] sm:$0xa] %v2632_v54  ;;  %v13582_v5 = vpack.c.bf16 %v1975_v49, %v1974_v63 }
 0x3cf   : > { %v2639_v13 = vsel %vm13547_vm14, %v2636_v14, %v2638_v31  ;;  %2650 = vst [vmem:[#allocation2 + $0x2c] sm:$0xa] %v2649_v4  ;;  %v1856_v29 = vpop.f32.mrf.mxu0 }
 0x3d0   : > { %2640 = vst [vmem:[#allocation2 + $0x24] sm:$0xa] %v2639_v13  ;;  %v2689_v45 = vrot.slane %v13582_v5, 2  ;;  %v1857_v12 = vadd.f32 %v1856_v29, %v14250_v8 }
 0x3d1   : > { %v2451_v0 = vld [vmem:[#allocation1 + $0x1] ss:$2 sm:$0xff] }
 0x3d2   : > { %2458 = vst.sshfl [vmem:[#allocation1] sm:$0xff pattern:$0x75643120] %v13472_v52  ;;  %v2452_v20 = vshll.u32 %v2451_v0, 16  ;;  %v2692_v36 = vsel %vm2004_vm9, %v13582_v5, %v2689_v45  ;;  %v1876_v61 = vadd.f32 %v1875_v50, %v1857_v12  ;;  %v2483_v12 = vld [vmem:[#allocation2 + $0x5c] sm:$0x5] }
 0x3d3   : > { %v2694_v21 = vrot.slane %v2692_v36, 7  ;;  %v2699_v40 = vshrl.u32 %v2692_v36, 16  ;;  %v2708_v11 = vsel %vm13547_vm14, %v2692_v36, %v2707_v62 }
 0x3d4   : > { %v2456_v25 = vsel %vm13435_vm5, %v2452_v20, %v2455_v34  ;;  %2709 = vst [vmem:[#allocation2 + $0x48] sm:$0xa] %v2708_v11  ;;  %v1983_v23 = vmax.f32 %v1876_v61, 0.0  ;;  %v2846_v11 = vld [vmem:[#allocation2 + $0xc] sm:$0xa]  ;;  %v10533_v61 = vld [vmem:[#allocation8 + $0x228] sm:$0xff] }
 0x3d5   : > { %v2697_v30 = vsel %vm13547_vm14, %v2694_v21, %v2696_v46  ;;  %v2701_v39 = vrot.slane %v2699_v40, 7  ;;  %v2714_v60 = vsel %vm13547_vm14, %v2699_v40, %v2713_v28  ;;  %2457 = vst [vmem:[#allocation2 + $0x50] sm:$0x5] %v2456_v25 }
 0x3d6   : > { %2698 = vst [vmem:[#allocation2 + $0x40] sm:$0xa] %v2697_v30  ;;  %v13599_v43 = vpack.c.bf16 %v1983_v23, %v1982_v15  ;;  %v2838_v30 = vld [vmem:[#allocation2 + $0x4] sm:$0xa] }
 0x3d7   : > { %v2704_v58 = vsel %vm13547_vm14, %v2701_v39, %v2703_v7  ;;  %2715 = vst [vmem:[#allocation2 + $0x4c] sm:$0xa] %v2714_v60  ;;  %v2842_v39 = vld [vmem:[#allocation2 + $0x8] sm:$0xa] }
 0x3d8   : > { %2705 = vst [vmem:[#allocation2 + $0x44] sm:$0xa] %v2704_v58  ;;  %v2754_v47 = vrot.slane %v13599_v43, 2 }
 0x3d9   : > { %v2460_v3 = vld [vmem:[#allocation1 + $0x1] ss:$2 sm:$0xff] }
 0x3da   : > { %2465 = vst.sshfl [vmem:[#allocation1] sm:$0xff pattern:$0x75643120] %v13472_v52  ;;  %v2463_v16 = vsel %vm13435_vm5, %v2460_v3, %v2462_v56  ;;  %v2757_v48 = vsel %vm2004_vm9, %v13599_v43, %v2754_v47 }
 0x3db   : > { %2464 = vst [vmem:[#allocation2 + $0x54] sm:$0x5] %v2463_v16  ;;  %v2759_v41 = vrot.slane %v2757_v48, 7  ;;  %v2764_v1 = vshrl.u32 %v2757_v48, 16  ;;  %v2773_v37 = vsel %vm13547_vm14, %v2757_v48, %v2772_v55  ;;  %v1887_v35 = vpop.f32.mrf.mxu1 }
 0x3dc   : > { %v1925_v33 = vpop.f32.mrf.mxu0  ;;  %2774 = vst [vmem:[#allocation2 + $0x68] sm:$0xa] %v2773_v37  ;;  %v1888_v49 = vadd.f32 %v1887_v35, %v12932_v42 }
 0x3dd   : > { %v2762_v2 = vsel %vm13547_vm14, %v2759_v41, %v2761_v27  ;;  %v2766_v24 = vrot.slane %v2764_v1, 7  ;;  %v2779_v17 = vsel %vm13547_vm14, %v2764_v1, %v2778_v6  ;;  %v1926_v54 = vadd.f32 %v1925_v33, %v12932_v42  ;;  %v2832_v6 = vld [vmem:[#allocation2] sm:$0xa]  ;;  %v2520_v1 = vld [vmem:[#allocation2 + $0x70] sm:$0x5] }
 0x3de   : > { %2763 = vst [vmem:[#allocation2 + $0x60] sm:$0xa] %v2762_v2 }
 0x3df   : > { %v2769_v59 = vsel %vm13547_vm14, %v2766_v24, %v2768_v19  ;;  %2780 = vst [vmem:[#allocation2 + $0x6c] sm:$0xa] %v2779_v17 }
 0x3e0   : > { %2770 = vst [vmem:[#allocation2 + $0x64] sm:$0xa] %v2769_v59 }
 0x3e1   : > { %v2467_v44 = vld [vmem:[#allocation1 + $0x1] ss:$2 sm:$0xff] }
 0x3e2   : > { %2476 = vst.sshfl [vmem:[#allocation1] sm:$0xff pattern:$0x75643120] %v13472_v52  ;;  %v2468_v63 = vshll.u32 %v2467_v44, 16  ;;  %v2907_v44 = vld [vmem:[#allocation2 + $0x2c] sm:$0xa] }
 0x3e3   : > { %v1889_v14 = vpop.f32.mrf.mxu1 }
 0x3e4   : > { %v8393_v31 = vrot.slane %v2468_v63, 9  ;;  %v1927_v4 = vpop.f32.mrf.mxu0  ;;  %v1890_v36 = vadd.f32 %v1889_v14, %v14246_v53  ;;  %v2899_v14 = vld [vmem:[#allocation2 + $0x24] sm:$0xa] }
 0x3e5   : > { %v1906_v38 = vpop.f32.mrf.mxu3  ;;  %v1928_v46 = vadd.f32 %v1927_v4, %v14246_v53  ;;  %v2903_v4 = vld [vmem:[#allocation2 + $0x28] sm:$0xa] }
 0x3e6   : > { %v1944_v13 = vpop.f32.mrf.mxu2  ;;  %v2474_v62 = vsel %vm13435_vm5, %v8393_v31, %v2473_v22  ;;  %v1907_v29 = vadd.f32 %v1906_v38, %v1888_v49 }
 0x3e7   : > { %v1945_v50 = vadd.f32 %v1944_v13, %v1926_v54  ;;  %2475 = vst [vmem:[#allocation2 + $0x58] sm:$0x5] %v2474_v62 }
 0x3e8   : > { %v1960_v0 = vmax.f32 %v1907_v29, 0.0 }
 0x3e9   : > { %v2478_v52 = vld [vmem:[#allocation1 + $0x1] ss:$2 sm:$0xff]  ;;  %v1961_v18 = vmax.f32 %v1945_v50, 0.0 }
 0x3ea   : > { %2514 = vst.sshfl [vmem:[#allocation1] sm:$0xff pattern:$0x75643120] %v13497_v51  ;;  %v8394_v42 = vrot.slane %v2478_v52, 9 }
 0x3eb   : > { %v13625_v45 = vpack.c.bf16 %v1961_v18, %v1960_v0  ;;  %v1892_v60 = vpop.f32.mrf.mxu1  ;;  %v2527_v18 = vld [vmem:[#allocation2 + $0x74] sm:$0x5] }
 0x3ec   : > { %v2484_v20 = vsel %vm13435_vm5, %v8394_v42, %v2483_v12  ;;  %v1930_v58 = vpop.f32.mrf.mxu0  ;;  %v1893_v33 = vadd.f32 %v1892_v60, %v14249_v57  ;;  %v2893_v42 = vld [vmem:[#allocation2 + $0x20] sm:$0xa]  ;;  %v2964_v60 = vld [vmem:[#allocation2 + $0x48] sm:$0xa] }
 0x3ed   : > { %v2819_v28 = vrot.slane %v13625_v45, 2  ;;  %2485 = vst [vmem:[#allocation2 + $0x5c] sm:$0x5] %v2484_v20  ;;  %v1908_v34 = vpop.f32.mrf.mxu3  ;;  %v1931_v19 = vadd.f32 %v1930_v58, %v14249_v57 }
 0x3ee   : > { %v1946_v21 = vpop.f32.mrf.mxu2  ;;  %v1909_v25 = vadd.f32 %v1908_v34, %v1890_v36 }
 0x3ef   : > { %v2822_v40 = vsel %vm2004_vm9, %v13625_v45, %v2819_v28  ;;  %v1947_v15 = vadd.f32 %v1946_v21, %v1928_v46 }
 0x3f0   : > { %v2823_v7 = vshll.u32 %v2822_v40, 16  ;;  %v2836_v23 = vrot.slane %v2822_v40, 7  ;;  %v2847_v53 = vsel %vm13632_vm2, %v2822_v40, %v2846_v11  ;;  %v1968_v56 = vmax.f32 %v1909_v25, 0.0 }
 0x3f1   : > { %v2516_v55 = vld [vmem:[#allocation1 + $0x1] ss:$2 sm:$0xff]  ;;  %2848 = vst [vmem:[#allocation2 + $0xc] sm:$0xa] %v2847_v53  ;;  %v1969_v3 = vmax.f32 %v1947_v15, 0.0 }
 0x3f2   : > { %2523 = vst.sshfl [vmem:[#allocation1] sm:$0xff pattern:$0x75643120] %v13497_v51  ;;  %v2825_v47 = vrot.slane %v2823_v7, 7  ;;  %v2839_v16 = vsel %vm13632_vm2, %v2836_v23, %v2838_v30  ;;  %v2843_v48 = vsel %vm13632_vm2, %v2823_v7, %v2842_v39  ;;  %v2517_v27 = vshll.u32 %v2516_v55, 16 }
 0x3f3   : > { %2840 = vst [vmem:[#allocation2 + $0x4] sm:$0xa] %v2839_v16  ;;  %v13645_v41 = vpack.c.bf16 %v1969_v3, %v1968_v56  ;;  %v1894_v52 = vpop.f32.mrf.mxu1  ;;  %v2968_v15 = vld [vmem:[#allocation2 + $0x4c] sm:$0xa]  ;;  %v2960_v53 = vld [vmem:[#allocation2 + $0x44] sm:$0xa] }
 0x3f4   : > { %v2833_v37 = vsel %vm13632_vm2, %v2825_v47, %v2832_v6  ;;  %2844 = vst [vmem:[#allocation2 + $0x8] sm:$0xa] %v2843_v48  ;;  %v2521_v35 = vsel %vm13435_vm5, %v2517_v27, %v2520_v1  ;;  %v1932_v0 = vpop.f32.mrf.mxu0  ;;  %v1895_v28 = vadd.f32 %v1894_v52, %v14250_v8  ;;  %v2954_v27 = vld [vmem:[#allocation2 + $0x40] sm:$0xa] }
 0x3f5   : > { %2834 = vst [vmem:[#allocation2] sm:$0xa] %v2833_v37  ;;  %v2885_v2 = vrot.slane %v13645_v41, 2  ;;  %v1911_v24 = vpop.f32.mrf.mxu3  ;;  %v1933_v34 = vadd.f32 %v1932_v0, %v14250_v8 }
 0x3f6   : > { %v1949_v17 = vpop.f32.mrf.mxu2  ;;  %2522 = vst [vmem:[#allocation2 + $0x70] sm:$0x5] %v2521_v35  ;;  %v1912_v63 = vadd.f32 %v1911_v24, %v1893_v33  ;;  %v2538_v35 = vld [vmem:[#allocation2 + $0x78] sm:$0x5] }
 0x3f7   : > { %v2888_v59 = vsel %vm2004_vm9, %v13645_v41, %v2885_v2  ;;  %v1950_v31 = vadd.f32 %v1949_v17, %v1931_v19  ;;  %v3029_v2 = vld [vmem:[#allocation2 + $0x6c] sm:$0xa] }
 0x3f8   : > { %v2889_v49 = vshll.u32 %v2888_v59, 16  ;;  %v2897_v54 = vrot.slane %v2888_v59, 7  ;;  %v2908_v22 = vsel %vm13632_vm2, %v2888_v59, %v2907_v44  ;;  %v1976_v57 = vmax.f32 %v1912_v63, 0.0  ;;  %v3025_v59 = vld [vmem:[#allocation2 + $0x68] sm:$0xa] }
 0x3f9   : > { %v2525_v38 = vld [vmem:[#allocation1 + $0x1] ss:$2 sm:$0xff]  ;;  %2909 = vst [vmem:[#allocation2 + $0x2c] sm:$0xa] %v2908_v22  ;;  %v1977_v13 = vmax.f32 %v1950_v31, 0.0 }
 0x3fa   : > { %2530 = vst.sshfl [vmem:[#allocation1] sm:$0xff pattern:$0x75643120] %v13497_v51  ;;  %v2891_v62 = vrot.slane %v2889_v49, 7  ;;  %v2900_v29 = vsel %vm13632_vm2, %v2897_v54, %v2899_v14  ;;  %v2904_v50 = vsel %vm13632_vm2, %v2889_v49, %v2903_v4  ;;  %v2528_v46 = vsel %vm13435_vm5, %v2525_v38, %v2527_v18  ;;  %v3021_v31 = vld [vmem:[#allocation2 + $0x64] sm:$0xa] }
 0x3fb   : > { %2901 = vst [vmem:[#allocation2 + $0x24] sm:$0xa] %v2900_v29  ;;  %v13663_v12 = vpack.c.bf16 %v1977_v13, %v1976_v57  ;;  %v3068_v20 = vld [vmem:[#allocation2 + $0x8] sm:$0xff]  ;;  %v3015_v22 = vld [vmem:[#allocation2 + $0x60] sm:$0xa] }
 0x3fc   : > { %v2894_v36 = vsel %vm13632_vm2, %v2891_v62, %v2893_v42  ;;  %2905 = vst [vmem:[#allocation2 + $0x28] sm:$0xa] %v2904_v50  ;;  %v2548_v38 = vld [vmem:[#allocation2 + $0x7c] sm:$0x5]  ;;  %v2592_v29 = vld [vmem:[#allocation2 + $0x10] sm:$0xa] }
 0x3fd   : > { %2895 = vst [vmem:[#allocation2 + $0x20] sm:$0xa] %v2894_v36  ;;  %v2946_v21 = vrot.slane %v13663_v12, 2  ;;  %v1913_v40 = vpop.f32.mrf.mxu3  ;;  %v2602_v42 = vld [vmem:[#allocation2 + $0x14] sm:$0xa] }
 0x3fe   : > { %v1951_v11 = vpop.f32.mrf.mxu2  ;;  %4115 = vst [vmem:[#allocation1 + $0x20] ss:$4 sm:$0xff] %v3068_v20  ;;  %v1914_v7 = vadd.f32 %v1913_v40, %v1895_v28  ;;  %v2609_v36 = vld [vmem:[#allocation2 + $0x18] sm:$0xa] }
 0x3ff   : > { %v2949_v25 = vsel %vm2004_vm9, %v13663_v12, %v2946_v21  ;;  %v1952_v23 = vadd.f32 %v1951_v11, %v1933_v34  ;;  %2529 = vst [vmem:[#allocation2 + $0x74] sm:$0x5] %v2528_v46  ;;  %v2620_v21 = vld [vmem:[#allocation2 + $0x1c] sm:$0xa] }
 0x400   : > { %v2950_v30 = vshll.u32 %v2949_v25, 16  ;;  %v2958_v39 = vrot.slane %v2949_v25, 7  ;;  %v2969_v58 = vsel %vm13632_vm2, %v2949_v25, %v2968_v15  ;;  %v1984_v55 = vmax.f32 %v1914_v7, 0.0  ;;  %v2657_v15 = vld [vmem:[#allocation2 + $0x30] sm:$0xa] }
 0x401   : > { %v2532_v8 = vld [vmem:[#allocation1 + $0x1] ss:$2 sm:$0xff]  ;;  %2970 = vst [vmem:[#allocation2 + $0x4c] sm:$0xa] %v2969_v58  ;;  %v1985_v56 = vmax.f32 %v1952_v23, 0.0 }
 0x402   : > { %2541 = vst.sshfl [vmem:[#allocation1] sm:$0xff pattern:$0x75643120] %v13497_v51  ;;  %v2952_v3 = vrot.slane %v2950_v30, 7  ;;  %v2961_v47 = vsel %vm13632_vm2, %v2958_v39, %v2960_v53  ;;  %v2965_v16 = vsel %vm13632_vm2, %v2950_v30, %v2964_v60  ;;  %v2533_v48 = vshll.u32 %v2532_v8, 16 }
 0x403   : > { %2962 = vst [vmem:[#allocation2 + $0x44] sm:$0xa] %v2961_v47  ;;  %v13681_v6 = vpack.c.bf16 %v1985_v56, %v1984_v55  ;;  %v2667_v39 = vld [vmem:[#allocation2 + $0x34] sm:$0xa]  ;;  %v2674_v58 = vld [vmem:[#allocation2 + $0x38] sm:$0xa] }
 0x404   : > { %v2955_v1 = vsel %vm13632_vm2, %v2952_v3, %v2954_v27  ;;  %2966 = vst [vmem:[#allocation2 + $0x48] sm:$0xa] %v2965_v16  ;;  %v8397_v37 = vrot.slane %v2533_v48, 9  ;;  %v2685_v3 = vld [vmem:[#allocation2 + $0x3c] sm:$0xa]  ;;  %v10471_v47 = vld [vmem:[#allocation8 + $0x38] sm:$0xff] }
 0x405   : > { %2956 = vst [vmem:[#allocation2 + $0x40] sm:$0xa] %v2955_v1  ;;  %v3007_v51 = vrot.slane %v13681_v6, 2  ;;  %v10479_v16 = vld [vmem:[#allocation8 + $0x78] sm:$0xff]  ;;  %7344 = vmatpush.bf16.msra.mxu1 %v10471_v47 }
 0x406   : > { %v2539_v33 = vsel %vm13435_vm5, %v8397_v37, %v2538_v35  ;;  %v10487_v48 = vld [vmem:[#allocation8 + $0xb8] sm:$0xff]  ;;  %7357 = vmatpush.bf16.msra.mxu3 %v10479_v16  ;;  %v10470_v37 = vld [vmem:[#allocation8 + $0x30] sm:$0xff]  ;;  %v10501_v16 = vld [vmem:[#allocation8 + $0x128] sm:$0xff] }
 0x407   : > { %v3010_v19 = vsel %vm2004_vm9, %v13681_v6, %v3007_v51  ;;  %2540 = vst [vmem:[#allocation2 + $0x78] sm:$0x5] %v2539_v33  ;;  %v10495_v27 = vld [vmem:[#allocation8 + $0xf8] sm:$0xff]  ;;  %v10478_v51 = vld [vmem:[#allocation8 + $0x70] sm:$0xff]  ;;  %7370 = vmatpush.bf16.msra.mxu0 %v10487_v48  ;;  %v10509_v48 = vld [vmem:[#allocation8 + $0x168] sm:$0xff] }
 0x408   : > { %v3011_v24 = vshll.u32 %v3010_v19, 16  ;;  %v3019_v17 = vrot.slane %v3010_v19, 7  ;;  %v3030_v44 = vsel %vm13632_vm2, %v3010_v19, %v3029_v2  ;;  %7383 = vmatpush.bf16.msra.mxu2 %v10495_v27  ;;  %v10494_v35 = vld [vmem:[#allocation8 + $0xf0] sm:$0xff]  ;;  %v10469_v19 = vld [vmem:[#allocation8 + $0x28] sm:$0xff] }
 0x409   : > { %v2543_v63 = vld [vmem:[#allocation1 + $0x1] ss:$2 sm:$0xff]  ;;  %3031 = vst [vmem:[#allocation2 + $0x6c] sm:$0xa] %v3030_v44  ;;  %7345 = vmatpush.bf16.msra.mxu1 %v10470_v37  ;;  %v10477_v2 = vld [vmem:[#allocation8 + $0x68] sm:$0xff] }
 0x40a   : > { %2586 = vst.sshfl [vmem:[#allocation1] sm:$0xff pattern:$0x75643120] %v13544_v32  ;;  %v3013_v49 = vrot.slane %v3011_v24, 7  ;;  %v3022_v54 = vsel %vm13632_vm2, %v3019_v17, %v3021_v31  ;;  %v3026_v14 = vsel %vm13632_vm2, %v3011_v24, %v3025_v59  ;;  %v8398_v4 = vrot.slane %v2543_v63, 9  ;;  %7358 = vmatpush.bf16.msra.mxu3 %v10478_v51  ;;  %v10485_v17 = vld [vmem:[#allocation8 + $0xa8] sm:$0xff] }
 0x40b   : > { %3023 = vst [vmem:[#allocation2 + $0x64] sm:$0xa] %v3022_v54  ;;  %v10493_v59 = vld [vmem:[#allocation8 + $0xe8] sm:$0xff]  ;;  %v10468_v31 = vld [vmem:[#allocation8 + $0x20] sm:$0xff] }
 0x40c   : > { %v3016_v57 = vsel %vm13632_vm2, %v3013_v49, %v3015_v22  ;;  %3027 = vst [vmem:[#allocation2 + $0x68] sm:$0xa] %v3026_v14  ;;  %v2549_v13 = vsel %vm13435_vm5, %v8398_v4, %v2548_v38  ;;  %7384 = vmatpush.bf16.msra.mxu2 %v10494_v35  ;;  %v2722_v44 = vld [vmem:[#allocation2 + $0x50] sm:$0xa]  ;;  %v10476_v49 = vld [vmem:[#allocation8 + $0x60] sm:$0xff]  ;;  %v10467_v22 = vld [vmem:[#allocation8 + $0x18] sm:$0xff] }
 0x40d   : > { %3017 = vst [vmem:[#allocation2 + $0x60] sm:$0xa] %v3016_v57  ;;  %7346 = vmatpush.bf16.msra.mxu1 %v10469_v19  ;;  %v10484_v54 = vld [vmem:[#allocation8 + $0xa0] sm:$0xff]  ;;  %v10475_v38 = vld [vmem:[#allocation8 + $0x58] sm:$0xff]  ;;  %v10517_v27 = vld [vmem:[#allocation8 + $0x1a8] sm:$0xff] }
 0x40e   : > { %2550 = vst [vmem:[#allocation2 + $0x7c] sm:$0x5] %v2549_v13  ;;  %7359 = vmatpush.bf16.msra.mxu3 %v10477_v2  ;;  %v10492_v14 = vld [vmem:[#allocation8 + $0xe0] sm:$0xff]  ;;  %v10483_v13 = vld [vmem:[#allocation8 + $0x98] sm:$0xff]  ;;  %v2787_v51 = vld [vmem:[#allocation2 + $0x70] sm:$0xa] }
 0x40f   : > { %v10508_v35 = vld [vmem:[#allocation8 + $0x160] sm:$0xff] }
 0x410   : > { %7385 = vmatpush.bf16.msra.mxu2 %v10493_v59  ;;  %v10516_v19 = vld [vmem:[#allocation8 + $0x1a0] sm:$0xff]  ;;  %v10507_v59 = vld [vmem:[#allocation8 + $0x158] sm:$0xff] }
 0x411   : > { %v2588_v62 = vld [vmem:[#allocation1 + $0x1] ss:$2 sm:$0xff]  ;;  %7347 = vmatpush.bf16.msra.mxu1 %v10468_v31  ;;  %v10524_v2 = vld [vmem:[#allocation8 + $0x1e0] sm:$0xff] }
 0x412   : > { %2595 = vst.sshfl [vmem:[#allocation1] sm:$0xff pattern:$0x75643120] %v13544_v32  ;;  %v2590_v50 = vrot.slane %v2588_v62, 7  ;;  %7360 = vmatpush.bf16.msra.mxu3 %v10476_v49  ;;  %v10491_v62 = vld [vmem:[#allocation8 + $0xd8] sm:$0xff]  ;;  %v10498_v49 = vld [vmem:[#allocation8 + $0x110] sm:$0xff] }
 0x414   : > { %v2593_v52 = vsel %vm13547_vm14, %v2590_v50, %v2592_v29  ;;  %7386 = vmatpush.bf16.msra.mxu2 %v10492_v14  ;;  %v10466_v50 = vld [vmem:[#allocation8 + $0x10] sm:$0xff] }
 0x415   : > { %2594 = vst [vmem:[#allocation2 + $0x10] sm:$0xa] %v2593_v52  ;;  %7348 = vmatpush.bf16.msra.mxu1 %v10467_v22  ;;  %v10474_v52 = vld [vmem:[#allocation8 + $0x50] sm:$0xff] }
 0x416   : > { %7361 = vmatpush.bf16.msra.mxu3 %v10475_v38  ;;  %v10522_v22 = vld [vmem:[#allocation8 + $0x1d0] sm:$0xff]  ;;  %v2797_v38 = vld [vmem:[#allocation2 + $0x74] sm:$0xa] }
 0x418   : > { %7387 = vmatpush.bf16.msra.mxu2 %v10491_v62  ;;  %v10505_v62 = vld [vmem:[#allocation8 + $0x148] sm:$0xff] }
 0x419   : > { %v2597_v0 = vld [vmem:[#allocation1 + $0x1] ss:$2 sm:$0xff]  ;;  %7349 = vmatpush.bf16.msra.mxu1 %v10466_v50  ;;  %v10513_v50 = vld [vmem:[#allocation8 + $0x188] sm:$0xff] }
 0x41a   : > { %2605 = vst.sshfl [vmem:[#allocation1] sm:$0xff pattern:$0x75643120] %v13544_v32  ;;  %v2598_v18 = vshrl.u32 %v2597_v0, 16  ;;  %v10482_v0 = vld [vmem:[#allocation8 + $0x90] sm:$0xff]  ;;  %7362 = vmatpush.bf16.msra.mxu3 %v10474_v52  ;;  %v10521_v52 = vld [vmem:[#allocation8 + $0x1c8] sm:$0xff] }
 0x41c   : > { %v2600_v20 = vrot.slane %v2598_v18, 7  ;;  %v10490_v18 = vld [vmem:[#allocation8 + $0xd0] sm:$0xff] }
 0x41d   : > { %7388 = vmatpush.bf16.msra.mxu2 %v10490_v18 }
 0x41e   : > { %v2603_v10 = vsel %vm13547_vm14, %v2600_v20, %v2602_v42  ;;  %v2732_v20 = vld [vmem:[#allocation2 + $0x54] sm:$0xa] }
 0x41f   : > { %2604 = vst [vmem:[#allocation2 + $0x14] sm:$0xa] %v2603_v10 }
 0x421   : > { %v2607_v46 = vld [vmem:[#allocation1 + $0x1] ss:$2 sm:$0xff] }
 0x422   : > { %2612 = vst.sshfl [vmem:[#allocation1] sm:$0xff pattern:$0x75643120] %v13544_v32  ;;  %v2610_v28 = vsel %vm13547_vm14, %v2607_v46, %v2609_v36  ;;  %v2739_v36 = vld [vmem:[#allocation2 + $0x58] sm:$0xa]  ;;  %v10465_v46 = vld [vmem:[#allocation8 + $0x8] sm:$0xff] }
 0x423   : > { %2611 = vst [vmem:[#allocation2 + $0x18] sm:$0xa] %v2610_v28  ;;  %v10473_v28 = vld [vmem:[#allocation8 + $0x48] sm:$0xff]  ;;  %7350 = vmatpush.bf16.msra.mxu1 %v10465_v46  ;;  %v10520_v46 = vld [vmem:[#allocation8 + $0x1c0] sm:$0xff] }
 0x424   : > { %7363 = vmatpush.bf16.msra.mxu3 %v10473_v28 }
 0x429   : > { %v2614_v34 = vld [vmem:[#allocation1 + $0x1] ss:$2 sm:$0xff] }
 0x42a   : > { %2651 = vst.sshfl [vmem:[#allocation1] sm:$0xff pattern:$0x75643120] %v13562_v26  ;;  %v2615_v40 = vshrl.u32 %v2614_v34, 16 }
 0x42c   : > { %v2621_v11 = vsel %vm13547_vm14, %v2615_v40, %v2620_v21  ;;  %v10481_v21 = vld [vmem:[#allocation8 + $0x88] sm:$0xff] }
 0x42d   : > { %2622 = vst [vmem:[#allocation2 + $0x1c] sm:$0xa] %v2621_v11  ;;  %v10489_v40 = vld [vmem:[#allocation8 + $0xc8] sm:$0xff] }
 0x42e   : > { %7389 = vmatpush.bf16.msra.mxu2 %v10489_v40 }
 0x431   : > { %v2653_v25 = vld [vmem:[#allocation1 + $0x1] ss:$2 sm:$0xff] }
 0x432   : > { %2660 = vst.sshfl [vmem:[#allocation1] sm:$0xff pattern:$0x75643120] %v13562_v26  ;;  %v2655_v7 = vrot.slane %v2653_v25, 7  ;;  %v10464_v25 = vld [vmem:[#allocation8] sm:$0xff] }
 0x433   : > { %7351 = vmatpush.bf16.msra.mxu1 %v10464_v25 }
 0x434   : > { %v2658_v32 = vsel %vm13547_vm14, %v2655_v7, %v2657_v15  ;;  %v10472_v15 = vld [vmem:[#allocation8 + $0x40] sm:$0xff] }
 0x435   : > { %2659 = vst [vmem:[#allocation2 + $0x30] sm:$0xa] %v2658_v32  ;;  %v10480_v7 = vld [vmem:[#allocation8 + $0x80] sm:$0xff]  ;;  %7364 = vmatpush.bf16.msra.mxu3 %v10472_v15  ;;  %v2856_v15 = vld [vmem:[#allocation2 + $0x10] sm:$0xa] }
 0x436   : > { %v10488_v32 = vld [vmem:[#allocation8 + $0xc0] sm:$0xff] }
 0x437   : > { %7390 = vmatpush.bf16.msra.mxu2 %v10488_v32 }
 0x439   : > { %v2662_v23 = vld [vmem:[#allocation1 + $0x1] ss:$2 sm:$0xff] }
 0x43a   : > { %2670 = vst.sshfl [vmem:[#allocation1] sm:$0xff pattern:$0x75643120] %v13562_v26  ;;  %v2663_v30 = vshrl.u32 %v2662_v23, 16  ;;  %v10503_v23 = vld [vmem:[#allocation8 + $0x138] sm:$0xff] }
 0x43b   : > { %7396 = vmatpush.bf16.msrb.mxu1 %v10503_v23 }
 0x43c   : > { %v2665_v53 = vrot.slane %v2663_v30, 7  ;;  %v10511_v30 = vld [vmem:[#allocation8 + $0x178] sm:$0xff] }
 0x43d   : > { %7409 = vmatpush.bf16.msrb.mxu3 %v10511_v30  ;;  %v2865_v30 = vld [vmem:[#allocation2 + $0x14] sm:$0xa] }
 0x43e   : > { %v2668_v60 = vsel %vm13547_vm14, %v2665_v53, %v2667_v39  ;;  %v10519_v39 = vld [vmem:[#allocation8 + $0x1b8] sm:$0xff] }
 0x43f   : > { %2669 = vst [vmem:[#allocation2 + $0x34] sm:$0xa] %v2668_v60  ;;  %v10527_v53 = vld [vmem:[#allocation8 + $0x1f8] sm:$0xff] }
 0x440   : > { %7435 = vmatpush.bf16.msrb.mxu2 %v10527_v53 }
 0x441   : > { %v2672_v8 = vld [vmem:[#allocation1 + $0x1] ss:$2 sm:$0xff] }
 0x442   : > { %2677 = vst.sshfl [vmem:[#allocation1] sm:$0xff pattern:$0x75643120] %v13562_v26  ;;  %v2675_v55 = vsel %vm13547_vm14, %v2672_v8, %v2674_v58  ;;  %v10486_v26 = vld [vmem:[#allocation8 + $0xb0] sm:$0xff] }
 0x443   : > { %2676 = vst [vmem:[#allocation2 + $0x38] sm:$0xa] %v2675_v55  ;;  %7371 = vmatpush.bf16.msra.mxu0 %v10486_v26  ;;  %v10502_v58 = vld [vmem:[#allocation8 + $0x130] sm:$0xff]  ;;  %v10500_v26 = vld [vmem:[#allocation8 + $0x120] sm:$0xff] }
 0x444   : > { %v10510_v8 = vld [vmem:[#allocation8 + $0x170] sm:$0xff]  ;;  %7397 = vmatpush.bf16.msrb.mxu1 %v10502_v58 }
 0x445   : > { %7410 = vmatpush.bf16.msrb.mxu3 %v10510_v8  ;;  %v2881_v8 = vld [vmem:[#allocation2 + $0x1c] sm:$0xa] }
 0x447   : > { %7372 = vmatpush.bf16.msra.mxu0 %v10485_v17  ;;  %v10499_v17 = vld [vmem:[#allocation8 + $0x118] sm:$0xff] }
 0x448   : > { %7398 = vmatpush.bf16.msrb.mxu1 %v10501_v16  ;;  %v13767_v16 = vld.sshfl [vmem:[#allocation1 + $0x38] sm:$0xff pattern:$0x73625140] }
 0x449   : > { %v2679_v56 = vld [vmem:[#allocation1 + $0x1] ss:$2 sm:$0xff]  ;;  %7411 = vmatpush.bf16.msrb.mxu3 %v10509_v48 }
 0x44a   : > { %2716 = vst.sshfl [vmem:[#allocation1] sm:$0xff pattern:$0x75643120] %v13582_v5  ;;  %v2680_v1 = vshrl.u32 %v2679_v56, 16  ;;  %v10518_v56 = vld [vmem:[#allocation8 + $0x1b0] sm:$0xff] }
 0x44b   : > { %7373 = vmatpush.bf16.msra.mxu0 %v10484_v54  ;;  %v10506_v54 = vld [vmem:[#allocation8 + $0x150] sm:$0xff] }
 0x44c   : > { %v2686_v33 = vsel %vm13547_vm14, %v2680_v1, %v2685_v3  ;;  %v10526_v3 = vld [vmem:[#allocation8 + $0x1f0] sm:$0xff]  ;;  %v10525_v1 = vld [vmem:[#allocation8 + $0x1e8] sm:$0xff]  ;;  %7399 = vmatpush.bf16.msrb.mxu1 %v10500_v26 }
 0x44d   : > { %2687 = vst [vmem:[#allocation2 + $0x3c] sm:$0xa] %v2686_v33  ;;  %7436 = vmatpush.bf16.msrb.mxu2 %v10526_v3  ;;  %7412 = vmatpush.bf16.msrb.mxu3 %v10508_v35  ;;  %v13763_v3 = vld.sshfl [vmem:[#allocation1 + $0x28] sm:$0xff pattern:$0x73625140] }
 0x44f   : > { %7374 = vmatpush.bf16.msra.mxu0 %v10483_v13  ;;  %v10497_v13 = vld [vmem:[#allocation8 + $0x108] sm:$0xff] }
 0x450   : > { %7400 = vmatpush.bf16.msrb.mxu1 %v10499_v17 }
 0x451   : > { %v2718_v24 = vld [vmem:[#allocation1 + $0x1] ss:$2 sm:$0xff]  ;;  %7437 = vmatpush.bf16.msrb.mxu2 %v10525_v1  ;;  %7413 = vmatpush.bf16.msrb.mxu3 %v10507_v59  ;;  %v2926_v59 = vld [vmem:[#allocation2 + $0x34] sm:$0xa] }
 0x452   : > { %2725 = vst.sshfl [vmem:[#allocation1] sm:$0xff pattern:$0x75643120] %v13582_v5  ;;  %v2720_v63 = vrot.slane %v2718_v24, 7 }
 0x453   : > { %7375 = vmatpush.bf16.msra.mxu0 %v10482_v0  ;;  %v2804_v0 = vld [vmem:[#allocation2 + $0x78] sm:$0xa] }
 0x454   : > { %v2723_v4 = vsel %vm13547_vm14, %v2720_v63, %v2722_v44  ;;  %v10515_v44 = vld [vmem:[#allocation8 + $0x198] sm:$0xff]  ;;  %7401 = vmatpush.bf16.msrb.mxu1 %v10498_v49  ;;  %v2935_v49 = vld [vmem:[#allocation2 + $0x38] sm:$0xa] }
 0x455   : > { %2724 = vst [vmem:[#allocation2 + $0x50] sm:$0xa] %v2723_v4  ;;  %7438 = vmatpush.bf16.msrb.mxu2 %v10524_v2  ;;  %v10523_v63 = vld [vmem:[#allocation8 + $0x1d8] sm:$0xff]  ;;  %v10514_v4 = vld [vmem:[#allocation8 + $0x190] sm:$0xff]  ;;  %7414 = vmatpush.bf16.msrb.mxu3 %v10506_v54  ;;  %v3072_v2 = vld [vmem:[#allocation2 + $0x28] sm:$0xff] }
 0x457   : > { %7376 = vmatpush.bf16.msra.mxu0 %v10481_v21 }
 0x458   : > { %7402 = vmatpush.bf16.msrb.mxu1 %v10497_v13 }
 0x459   : > { %v2727_v57 = vld [vmem:[#allocation1 + $0x1] ss:$2 sm:$0xff]  ;;  %7439 = vmatpush.bf16.msrb.mxu2 %v10523_v63  ;;  %7415 = vmatpush.bf16.msrb.mxu3 %v10505_v62 }
 0x45a   : > { %2735 = vst.sshfl [vmem:[#allocation1] sm:$0xff pattern:$0x75643120] %v13582_v5  ;;  %v2728_v29 = vshrl.u32 %v2727_v57, 16 }
 0x45b   : > { %7377 = vmatpush.bf16.msra.mxu0 %v10480_v7 }
 0x45c   : > { %v2730_v42 = vrot.slane %v2728_v29, 7 }
 0x45d   : > { %7440 = vmatpush.bf16.msrb.mxu2 %v10522_v22 }
 0x45e   : > { %v2733_v10 = vsel %vm13547_vm14, %v2730_v42, %v2732_v20  ;;  %v10496_v42 = vld [vmem:[#allocation8 + $0x100] sm:$0xff] }
 0x45f   : > { %2734 = vst [vmem:[#allocation2 + $0x54] sm:$0xa] %v2733_v10  ;;  %7422 = vmatpush.bf16.msrb.mxu0 %v10519_v39  ;;  %v10504_v20 = vld [vmem:[#allocation8 + $0x140] sm:$0xff]  ;;  %7403 = vmatpush.bf16.msrb.mxu1 %v10496_v42 }
 0x460   : > { %7416 = vmatpush.bf16.msrb.mxu3 %v10504_v20 }
 0x461   : > { %v2737_v34 = vld [vmem:[#allocation1 + $0x1] ss:$2 sm:$0xff]  ;;  %7441 = vmatpush.bf16.msrb.mxu2 %v10521_v52 }
 0x462   : > { %2742 = vst.sshfl [vmem:[#allocation1] sm:$0xff pattern:$0x75643120] %v13582_v5  ;;  %v2740_v11 = vsel %vm13547_vm14, %v2737_v34, %v2739_v36  ;;  %v2750_v5 = vld [vmem:[#allocation2 + $0x5c] sm:$0xa]  ;;  %v10512_v36 = vld [vmem:[#allocation8 + $0x180] sm:$0xff] }
 0x463   : > { %2741 = vst [vmem:[#allocation2 + $0x58] sm:$0xa] %v2740_v11  ;;  %7423 = vmatpush.bf16.msrb.mxu0 %v10518_v56  ;;  %v2815_v34 = vld [vmem:[#allocation2 + $0x7c] sm:$0xa] }
 0x464   : > { %v13761_v56 = vld.sshfl [vmem:[#allocation1 + $0x20] sm:$0xff pattern:$0x73625140] }
 0x465   : > { %7442 = vmatpush.bf16.msrb.mxu2 %v10520_v46  ;;  %v3076_v46 = vld [vmem:[#allocation2 + $0x48] sm:$0xff] }
 0x467   : > { %7424 = vmatpush.bf16.msrb.mxu0 %v10517_v27 }
 0x469   : > { %v2744_v60 = vld [vmem:[#allocation1 + $0x1] ss:$2 sm:$0xff] }
 0x46a   : > { %2781 = vst.sshfl [vmem:[#allocation1] sm:$0xff pattern:$0x75643120] %v13599_v43  ;;  %v2745_v55 = vshrl.u32 %v2744_v60, 16  ;;  %v2874_v60 = vld [vmem:[#allocation2 + $0x18] sm:$0xa] }
 0x46b   : > { %7425 = vmatpush.bf16.msrb.mxu0 %v10516_v19 }
 0x46c   : > { %v2751_v47 = vsel %vm13547_vm14, %v2745_v55, %v2750_v5 }
 0x46d   : > { %2752 = vst [vmem:[#allocation2 + $0x5c] sm:$0xa] %v2751_v47  ;;  %v13765_v47 = vld.sshfl [vmem:[#allocation1 + $0x30] sm:$0xff pattern:$0x73625140] }
 0x46f   : > { %7426 = vmatpush.bf16.msrb.mxu0 %v10515_v44 }
 0x471   : > { %v2783_v37 = vld [vmem:[#allocation1 + $0x1] ss:$2 sm:$0xff] }
 0x472   : > { %2790 = vst.sshfl [vmem:[#allocation1] sm:$0xff pattern:$0x75643120] %v13599_v43  ;;  %v2785_v33 = vrot.slane %v2783_v37, 7  ;;  %v2917_v37 = vld [vmem:[#allocation2 + $0x30] sm:$0xa] }
 0x473   : > { %7427 = vmatpush.bf16.msrb.mxu0 %v10514_v4  ;;  %v2942_v4 = vld [vmem:[#allocation2 + $0x3c] sm:$0xa] }
 0x474   : > { %v2788_v24 = vsel %vm13547_vm14, %v2785_v33, %v2787_v51 }
 0x475   : > { %2789 = vst [vmem:[#allocation2 + $0x70] sm:$0xa] %v2788_v24 }
 0x477   : > { %7428 = vmatpush.bf16.msrb.mxu0 %v10513_v50 }
 0x479   : > { %v2792_v31 = vld [vmem:[#allocation1 + $0x1] ss:$2 sm:$0xff] }
 0x47a   : > { %2800 = vst.sshfl [vmem:[#allocation1] sm:$0xff pattern:$0x75643120] %v13599_v43  ;;  %v2793_v14 = vshrl.u32 %v2792_v31, 16 }
 0x47b   : > { %7429 = vmatpush.bf16.msrb.mxu0 %v10512_v36 }
 0x47c   : > { %v2795_v57 = vrot.slane %v2793_v14, 7 }
 0x47e   : > { %v2798_v29 = vsel %vm13547_vm14, %v2795_v57, %v2797_v38 }
 0x47f   : > { %2799 = vst [vmem:[#allocation2 + $0x74] sm:$0xa] %v2798_v29 }
 0x481   : > { %v2802_v18 = vld [vmem:[#allocation1 + $0x1] ss:$2 sm:$0xff] }
 0x482   : > { %2807 = vst.sshfl [vmem:[#allocation1] sm:$0xff pattern:$0x75643120] %v13599_v43  ;;  %v2805_v10 = vsel %vm13547_vm14, %v2802_v18, %v2804_v0  ;;  %v2978_v0 = vld [vmem:[#allocation2 + $0x50] sm:$0xa] }
 0x483   : > { %2806 = vst [vmem:[#allocation2 + $0x78] sm:$0xa] %v2805_v10 }
 0x489   : > { %v2809_v28 = vld [vmem:[#allocation1 + $0x1] ss:$2 sm:$0xff] }
 0x48a   : > { %2849 = vst.sshfl [vmem:[#allocation1] sm:$0xff pattern:$0x75643120] %v13625_v45  ;;  %v2810_v21 = vshrl.u32 %v2809_v28, 16 }
 0x48c   : > { %v2816_v43 = vsel %vm13547_vm14, %v2810_v21, %v2815_v34  ;;  %v2987_v21 = vld [vmem:[#allocation2 + $0x54] sm:$0xa] }
 0x48d   : > { %2817 = vst [vmem:[#allocation2 + $0x7c] sm:$0xa] %v2816_v43 }
 0x491   : > { %v2851_v40 = vld [vmem:[#allocation1 + $0x1] ss:$2 sm:$0xff] }
 0x492   : > { %2859 = vst.sshfl [vmem:[#allocation1] sm:$0xff pattern:$0x75643120] %v13625_v45  ;;  %v2852_v11 = vshll.u32 %v2851_v40, 16 }
 0x494   : > { %v2854_v25 = vrot.slane %v2852_v11, 7 }
 0x496   : > { %v2857_v7 = vsel %vm13632_vm2, %v2854_v25, %v2856_v15  ;;  %v2996_v25 = vld [vmem:[#allocation2 + $0x58] sm:$0xa] }
 0x497   : > { %2858 = vst [vmem:[#allocation2 + $0x10] sm:$0xa] %v2857_v7 }
 0x499   : > { %v2861_v32 = vld [vmem:[#allocation1 + $0x1] ss:$2 sm:$0xff] }
 0x49a   : > { %2868 = vst.sshfl [vmem:[#allocation1] sm:$0xff pattern:$0x75643120] %v13625_v45  ;;  %v2863_v23 = vrot.slane %v2861_v32, 7  ;;  %v3003_v32 = vld [vmem:[#allocation2 + $0x5c] sm:$0xa] }
 0x49c   : > { %v2866_v9 = vsel %vm13632_vm2, %v2863_v23, %v2865_v30 }
 0x49d   : > { %2867 = vst [vmem:[#allocation2 + $0x14] sm:$0xa] %v2866_v9 }
 0x4a1   : > { %v2870_v39 = vld [vmem:[#allocation1 + $0x1] ss:$2 sm:$0xff] }
 0x4a2   : > { %2877 = vst.sshfl [vmem:[#allocation1] sm:$0xff pattern:$0x75643120] %v13625_v45  ;;  %v2871_v53 = vshll.u32 %v2870_v39, 16 }
 0x4a4   : > { %v2875_v5 = vsel %vm13632_vm2, %v2871_v53, %v2874_v60 }
 0x4a5   : > { %2876 = vst [vmem:[#allocation2 + $0x18] sm:$0xa] %v2875_v5 }
 0x4a9   : > { %v2879_v58 = vld [vmem:[#allocation1 + $0x1] ss:$2 sm:$0xff] }
 0x4aa   : > { %2910 = vst.sshfl [vmem:[#allocation1] sm:$0xff pattern:$0x75643120] %v13645_v41  ;;  %v2882_v55 = vsel %vm13632_vm2, %v2879_v58, %v2881_v8  ;;  %v3039_v8 = vld [vmem:[#allocation2 + $0x70] sm:$0xa] }
 0x4ab   : > { %2883 = vst [vmem:[#allocation2 + $0x1c] sm:$0xa] %v2882_v55 }
 0x4b1   : > { %v2912_v45 = vld [vmem:[#allocation1 + $0x1] ss:$2 sm:$0xff] }
 0x4b2   : > { %2920 = vst.sshfl [vmem:[#allocation1] sm:$0xff pattern:$0x75643120] %v13645_v41  ;;  %v3070_v48 = vld [vmem:[#allocation2 + $0x18] sm:$0xff]  ;;  %v2913_v27 = vshll.u32 %v2912_v45, 16 }
 0x4b3   : > { %4127 = vst [vmem:[#allocation1 + $0x20] ss:$4 sm:$0xff] %v3070_v48 }
 0x4b4   : > { %v2915_v1 = vrot.slane %v2913_v27, 7  ;;  %v3048_v27 = vld [vmem:[#allocation2 + $0x74] sm:$0xa] }
 0x4b6   : > { %v2918_v51 = vsel %vm13632_vm2, %v2915_v1, %v2917_v37 }
 0x4b7   : > { %2919 = vst [vmem:[#allocation2 + $0x30] sm:$0xa] %v2918_v51 }
 0x4b9   : > { %v2922_v26 = vld [vmem:[#allocation1 + $0x1] ss:$2 sm:$0xff] }
 0x4ba   : > { %2929 = vst.sshfl [vmem:[#allocation1] sm:$0xff pattern:$0x75643120] %v13645_v41  ;;  %v13773_v35 = vld.sshfl [vmem:[#allocation1 + $0x20] sm:$0xff pattern:$0x73625140] }
 0x4bb   : > { %v13775_v33 = vld.sshfl [vmem:[#allocation1 + $0x28] sm:$0xff pattern:$0x73625140]  ;;  %v13777_v19 = vld.sshfl [vmem:[#allocation1 + $0x30] sm:$0xff pattern:$0x73625140] }
 0x4bc   : > { %v13779_v24 = vld.sshfl [vmem:[#allocation1 + $0x38] sm:$0xff pattern:$0x73625140]  ;;  %v2924_v17 = vrot.slane %v2922_v26, 7 }
 0x4bd   : > { %4139 = vst [vmem:[#allocation1 + $0x20] ss:$4 sm:$0xff] %v3072_v2  ;;  %v3080_v2 = vld [vmem:[#allocation2 + $0x68] sm:$0xff] }
 0x4be   : > { %v2927_v44 = vsel %vm13632_vm2, %v2924_v17, %v2926_v59 }
 0x4bf   : > { %2928 = vst [vmem:[#allocation2 + $0x34] sm:$0xa] %v2927_v44  ;;  %v3067_v44 = vld [vmem:[#allocation2] sm:$0xff] }
 0x4c1   : > { %v2931_v63 = vld [vmem:[#allocation1 + $0x1] ss:$2 sm:$0xff] }
 0x4c2   : > { %2938 = vst.sshfl [vmem:[#allocation1] sm:$0xff pattern:$0x75643120] %v13645_v41  ;;  %v2932_v31 = vshll.u32 %v2931_v63, 16 }
 0x4c4   : > { %v2936_v54 = vsel %vm13632_vm2, %v2932_v31, %v2935_v49  ;;  %v13789_v38 = vld.sshfl [vmem:[#allocation1 + $0x20] sm:$0xff pattern:$0x73625140]  ;;  %v13791_v57 = vld.sshfl [vmem:[#allocation1 + $0x28] sm:$0xff pattern:$0x73625140] }
 0x4c5   : > { %2937 = vst [vmem:[#allocation2 + $0x38] sm:$0xa] %v2936_v54  ;;  %v13793_v13 = vld.sshfl [vmem:[#allocation1 + $0x30] sm:$0xff pattern:$0x73625140]  ;;  %v10535_v54 = vld [vmem:[#allocation8 + $0x238] sm:$0xff] }
 0x4c6   : > { %v13795_v62 = vld.sshfl [vmem:[#allocation1 + $0x38] sm:$0xff pattern:$0x73625140]  ;;  %v3057_v31 = vld [vmem:[#allocation2 + $0x78] sm:$0xa] }
 0x4c9   : > { %v2940_v14 = vld [vmem:[#allocation1 + $0x1] ss:$2 sm:$0xff] }
 0x4ca   : > { %2971 = vst.sshfl [vmem:[#allocation1] sm:$0xff pattern:$0x75643120] %v13663_v12  ;;  %v2943_v22 = vsel %vm13632_vm2, %v2940_v14, %v2942_v4  ;;  %v10543_v14 = vld [vmem:[#allocation8 + $0x278] sm:$0xff]  ;;  %v3064_v4 = vld [vmem:[#allocation2 + $0x7c] sm:$0xa] }
 0x4cb   : > { %2944 = vst [vmem:[#allocation2 + $0x3c] sm:$0xa] %v2943_v22  ;;  %v3069_v22 = vld [vmem:[#allocation2 + $0x10] sm:$0xff] }
 0x4d1   : > { %v2973_v41 = vld [vmem:[#allocation1 + $0x1] ss:$2 sm:$0xff] }
 0x4d2   : > { %2981 = vst.sshfl [vmem:[#allocation1] sm:$0xff pattern:$0x75643120] %v13663_v12  ;;  %v3074_v29 = vld [vmem:[#allocation2 + $0x38] sm:$0xff]  ;;  %v2974_v50 = vshll.u32 %v2973_v41, 16  ;;  %v10551_v41 = vld [vmem:[#allocation8 + $0x2b8] sm:$0xff] }
 0x4d3   : > { %4151 = vst [vmem:[#allocation1 + $0x20] ss:$4 sm:$0xff] %v3074_v29  ;;  %v10559_v29 = vld [vmem:[#allocation8 + $0x2f8] sm:$0xff] }
 0x4d4   : > { %v2976_v52 = vrot.slane %v2974_v50, 7 }
 0x4d6   : > { %v2979_v18 = vsel %vm13632_vm2, %v2976_v52, %v2978_v0 }
 0x4d7   : > { %2980 = vst [vmem:[#allocation2 + $0x50] sm:$0xa] %v2979_v18 }
 0x4d9   : > { %v2983_v42 = vld [vmem:[#allocation1 + $0x1] ss:$2 sm:$0xff] }
 0x4da   : > { %2990 = vst.sshfl [vmem:[#allocation1] sm:$0xff pattern:$0x75643120] %v13663_v12  ;;  %v13801_v20 = vld.sshfl [vmem:[#allocation1 + $0x20] sm:$0xff pattern:$0x73625140] }
 0x4db   : > { %v13803_v10 = vld.sshfl [vmem:[#allocation1 + $0x28] sm:$0xff pattern:$0x73625140]  ;;  %v13805_v36 = vld.sshfl [vmem:[#allocation1 + $0x30] sm:$0xff pattern:$0x73625140] }
 0x4dc   : > { %v13807_v28 = vld.sshfl [vmem:[#allocation1 + $0x38] sm:$0xff pattern:$0x73625140]  ;;  %v2985_v34 = vrot.slane %v2983_v42, 7 }
 0x4dd   : > { %4163 = vst [vmem:[#allocation1 + $0x20] ss:$4 sm:$0xff] %v3076_v46  ;;  %v10534_v46 = vld [vmem:[#allocation8 + $0x230] sm:$0xff] }
 0x4de   : > { %v2988_v43 = vsel %vm13632_vm2, %v2985_v34, %v2987_v21  ;;  %v10542_v34 = vld [vmem:[#allocation8 + $0x270] sm:$0xff] }
 0x4df   : > { %2989 = vst [vmem:[#allocation2 + $0x54] sm:$0xa] %v2988_v43  ;;  %v10550_v21 = vld [vmem:[#allocation8 + $0x2b0] sm:$0xff] }
 0x4e0   : > { %v10558_v43 = vld [vmem:[#allocation8 + $0x2f0] sm:$0xff] }
 0x4e1   : > { %v2992_v40 = vld [vmem:[#allocation1 + $0x1] ss:$2 sm:$0xff] }
 0x4e2   : > { %2999 = vst.sshfl [vmem:[#allocation1] sm:$0xff pattern:$0x75643120] %v13663_v12  ;;  %v2993_v11 = vshll.u32 %v2992_v40, 16  ;;  %v10541_v40 = vld [vmem:[#allocation8 + $0x268] sm:$0xff] }
 0x4e4   : > { %v2997_v15 = vsel %vm13632_vm2, %v2993_v11, %v2996_v25  ;;  %v13817_v30 = vld.sshfl [vmem:[#allocation1 + $0x20] sm:$0xff pattern:$0x73625140]  ;;  %v13819_v9 = vld.sshfl [vmem:[#allocation1 + $0x28] sm:$0xff pattern:$0x73625140] }
 0x4e5   : > { %2998 = vst [vmem:[#allocation2 + $0x58] sm:$0xa] %v2997_v15  ;;  %v13821_v39 = vld.sshfl [vmem:[#allocation1 + $0x30] sm:$0xff pattern:$0x73625140]  ;;  %v3071_v11 = vld [vmem:[#allocation2 + $0x20] sm:$0xff] }
 0x4e6   : > { %v13823_v53 = vld.sshfl [vmem:[#allocation1 + $0x38] sm:$0xff pattern:$0x73625140] }
 0x4e7   : > { %v10549_v25 = vld [vmem:[#allocation8 + $0x2a8] sm:$0xff] }
 0x4e8   : > { %v10557_v15 = vld [vmem:[#allocation8 + $0x2e8] sm:$0xff] }
 0x4e9   : > { %v3001_v7 = vld [vmem:[#allocation1 + $0x1] ss:$2 sm:$0xff] }
 0x4ea   : > { %3032 = vst.sshfl [vmem:[#allocation1] sm:$0xff pattern:$0x75643120] %v13681_v6  ;;  %v3004_v23 = vsel %vm13632_vm2, %v3001_v7, %v3003_v32  ;;  %v10532_v7 = vld [vmem:[#allocation8 + $0x220] sm:$0xff] }
 0x4eb   : > { %3005 = vst [vmem:[#allocation2 + $0x5c] sm:$0xa] %v3004_v23  ;;  %v10540_v32 = vld [vmem:[#allocation8 + $0x260] sm:$0xff] }
 0x4f1   : > { %v3034_v12 = vld [vmem:[#allocation1 + $0x1] ss:$2 sm:$0xff] }
 0x4f2   : > { %3042 = vst.sshfl [vmem:[#allocation1] sm:$0xff pattern:$0x75643120] %v13681_v6  ;;  %v3078_v60 = vld [vmem:[#allocation2 + $0x58] sm:$0xff]  ;;  %v3035_v5 = vshll.u32 %v3034_v12, 16 }
 0x4f3   : > { %4175 = vst [vmem:[#allocation1 + $0x20] ss:$4 sm:$0xff] %v3078_v60 }
 0x4f4   : > { %v3037_v58 = vrot.slane %v3035_v5, 7 }
 0x4f6   : > { %v3040_v55 = vsel %vm13632_vm2, %v3037_v58, %v3039_v8 }
 0x4f7   : > { %3041 = vst [vmem:[#allocation2 + $0x70] sm:$0xa] %v3040_v55  ;;  %v10548_v55 = vld [vmem:[#allocation8 + $0x2a0] sm:$0xff] }
 0x4f9   : > { %v3044_v45 = vld [vmem:[#allocation1 + $0x1] ss:$2 sm:$0xff] }
 0x4fa   : > { %3051 = vst.sshfl [vmem:[#allocation1] sm:$0xff pattern:$0x75643120] %v13681_v6  ;;  %v3046_v48 = vrot.slane %v3044_v45, 7 }
 0x4fb   : > { %v13829_v1 = vld.sshfl [vmem:[#allocation1 + $0x20] sm:$0xff pattern:$0x73625140]  ;;  %v13831_v37 = vld.sshfl [vmem:[#allocation1 + $0x28] sm:$0xff pattern:$0x73625140] }
 0x4fc   : > { %v13833_v51 = vld.sshfl [vmem:[#allocation1 + $0x30] sm:$0xff pattern:$0x73625140]  ;;  %v3049_v26 = vsel %vm13632_vm2, %v3046_v48, %v3048_v27  ;;  %v13837_v17 = vld.sshfl [vmem:[#allocation1 + $0x38] sm:$0xff pattern:$0x73625140] }
 0x4fd   : > { %4187 = vst [vmem:[#allocation1 + $0x20] ss:$4 sm:$0xff] %v3080_v2  ;;  %v10556_v48 = vld [vmem:[#allocation8 + $0x2e0] sm:$0xff]  ;;  %v10531_v2 = vld [vmem:[#allocation8 + $0x218] sm:$0xff] }
 0x4fe   : > { %3050 = vst [vmem:[#allocation2 + $0x74] sm:$0xa] %v3049_v26 }
 0x501   : > { %v3053_v59 = vld [vmem:[#allocation1 + $0x1] ss:$2 sm:$0xff] }
 0x502   : > { %3060 = vst.sshfl [vmem:[#allocation1] sm:$0xff pattern:$0x75643120] %v13681_v6  ;;  %v3054_v63 = vshll.u32 %v3053_v59, 16  ;;  %v10539_v59 = vld [vmem:[#allocation8 + $0x258] sm:$0xff] }
 0x503   : > { %4112 = vst [vmem:[#allocation1] ss:$4 sm:$0xff] %v3067_v44  ;;  %v10547_v44 = vld [vmem:[#allocation8 + $0x298] sm:$0xff] }
 0x504   : > { %v3058_v49 = vsel %vm13632_vm2, %v3054_v63, %v3057_v31  ;;  %v13852_v58 = vld.sshfl [vmem:[#allocation1 + $0x20] sm:$0xff pattern:$0x73625140]  ;;  %v13854_v8 = vld.sshfl [vmem:[#allocation1 + $0x28] sm:$0xff pattern:$0x73625140] }
 0x505   : > { %3059 = vst [vmem:[#allocation2 + $0x78] sm:$0xa] %v3058_v49  ;;  %v13856_v45 = vld.sshfl [vmem:[#allocation1 + $0x30] sm:$0xff pattern:$0x73625140]  ;;  %v10555_v63 = vld [vmem:[#allocation8 + $0x2d8] sm:$0xff] }
 0x506   : > { %v13858_v27 = vld.sshfl [vmem:[#allocation1 + $0x38] sm:$0xff pattern:$0x73625140]  ;;  %v10530_v31 = vld [vmem:[#allocation8 + $0x210] sm:$0xff] }
 0x507   : > { %v10538_v49 = vld [vmem:[#allocation8 + $0x250] sm:$0xff] }
 0x509   : > { %v3062_v50 = vld [vmem:[#allocation1 + $0x1] ss:$2 sm:$0xff] }
 0x50a   : > { %v4116_v52 = vld.sshfl [vmem:[#allocation1] sm:$0xff pattern:$0x73625140]  ;;  %v4117_v0 = vld.sshfl [vmem:[#allocation1 + $0x8] sm:$0xff pattern:$0x73625140]  ;;  %v3065_v6 = vsel %vm13632_vm2, %v3062_v50, %v3064_v4 }
 0x50b   : > { %7352 = vmatmul.bf16.vlgmr.msra.gmra.mxu1 %v4116_v52  ;;  %7365 = vmatmul.bf16.vlgmr.msra.gmra.mxu3 %v4117_v0  ;;  %v4118_v18 = vld.sshfl [vmem:[#allocation1 + $0x10] sm:$0xff pattern:$0x73625140]  ;;  %v4119_v42 = vld.sshfl [vmem:[#allocation1 + $0x18] sm:$0xff pattern:$0x73625140] }
 0x50c   : > { %7378 = vmatmul.bf16.vlgmr.msra.gmra.mxu0 %v4118_v18  ;;  %4125 = vst [vmem:[#allocation1] ss:$4 sm:$0xff] %v3069_v22  ;;  %7391 = vmatmul.bf16.vlgmr.msra.gmra.mxu2 %v4119_v42  ;;  %v10553_v50 = vld [vmem:[#allocation8 + $0x2c8] sm:$0xff]  ;;  %v10528_v52 = vld [vmem:[#allocation8 + $0x200] sm:$0xff]  ;;  %v3075_v42 = vld [vmem:[#allocation2 + $0x40] sm:$0xff] }
 0x50d   : > { %7448 = vmatpush.bf16.msra.mxu1 %v10535_v54  ;;  %7461 = vmatpush.bf16.msra.mxu3 %v10543_v14  ;;  %3066 = vst [vmem:[#allocation2 + $0x7c] sm:$0xa] %v3065_v6  ;;  %v3073_v14 = vld [vmem:[#allocation2 + $0x30] sm:$0xff]  ;;  %v10536_v0 = vld [vmem:[#allocation8 + $0x240] sm:$0xff] }
 0x50e   : > { %7474 = vmatpush.bf16.msra.mxu0 %v10551_v41  ;;  %7487 = vmatpush.bf16.msra.mxu2 %v10559_v29  ;;  %v10554_v41 = vld [vmem:[#allocation8 + $0x2d0] sm:$0xff]  ;;  %v10545_v29 = vld [vmem:[#allocation8 + $0x288] sm:$0xff]  ;;  %v10544_v6 = vld [vmem:[#allocation8 + $0x280] sm:$0xff] }
 0x50f   : > { %v10552_v18 = vld [vmem:[#allocation8 + $0x2c0] sm:$0xff] }
 0x511   : > { %7449 = vmatpush.bf16.msra.mxu1 %v10534_v46  ;;  %7462 = vmatpush.bf16.msra.mxu3 %v10542_v34 }
 0x512   : > { %7475 = vmatpush.bf16.msra.mxu0 %v10550_v21  ;;  %7488 = vmatpush.bf16.msra.mxu2 %v10558_v43  ;;  %v10567_v21 = vld [vmem:[#allocation8 + $0x338] sm:$0xff] }
 0x513   : > { %v13844_v23 = vld.sshfl [vmem:[#allocation1] sm:$0xff pattern:$0x73625140]  ;;  %v13846_v12 = vld.sshfl [vmem:[#allocation1 + $0x8] sm:$0xff pattern:$0x73625140] }
 0x514   : > { %v13848_v60 = vld.sshfl [vmem:[#allocation1 + $0x10] sm:$0xff pattern:$0x73625140]  ;;  %v13850_v5 = vld.sshfl [vmem:[#allocation1 + $0x18] sm:$0xff pattern:$0x73625140] }
 0x515   : > { %7450 = vmatpush.bf16.msra.mxu1 %v10533_v61  ;;  %7463 = vmatpush.bf16.msra.mxu3 %v10541_v40  ;;  %4137 = vst [vmem:[#allocation1] ss:$4 sm:$0xff] %v3071_v11  ;;  %v3082_v26 = vld [vmem:[#allocation2 + $0x78] sm:$0xff]  ;;  %v10575_v43 = vld [vmem:[#allocation8 + $0x378] sm:$0xff] }
 0x516   : > { %7476 = vmatpush.bf16.msra.mxu0 %v10549_v25  ;;  %7489 = vmatpush.bf16.msra.mxu2 %v10557_v15  ;;  %4199 = vst [vmem:[#allocation1 + $0x20] ss:$4 sm:$0xff] %v3082_v26  ;;  %v10583_v40 = vld [vmem:[#allocation8 + $0x3b8] sm:$0xff]  ;;  %v10566_v15 = vld [vmem:[#allocation8 + $0x330] sm:$0xff]  ;;  %v10573_v26 = vld [vmem:[#allocation8 + $0x368] sm:$0xff] }
 0x517   : > { %v10591_v11 = vld [vmem:[#allocation8 + $0x3f8] sm:$0xff] }
 0x519   : > { %7451 = vmatpush.bf16.msra.mxu1 %v10532_v7  ;;  %7464 = vmatpush.bf16.msra.mxu3 %v10540_v32  ;;  %v10574_v7 = vld [vmem:[#allocation8 + $0x370] sm:$0xff] }
 0x51a   : > { %7477 = vmatpush.bf16.msra.mxu0 %v10548_v55  ;;  %7490 = vmatpush.bf16.msra.mxu2 %v10556_v48  ;;  %v10582_v32 = vld [vmem:[#allocation8 + $0x3b0] sm:$0xff]  ;;  %v10565_v48 = vld [vmem:[#allocation8 + $0x328] sm:$0xff] }
 0x51b   : > { %7404 = vmatmul.bf16.vlgmr.msrb.gmra.mxu1 %v13761_v56  ;;  %7417 = vmatmul.bf16.vlgmr.msrb.gmra.mxu3 %v13763_v3  ;;  %v10546_v56 = vld [vmem:[#allocation8 + $0x290] sm:$0xff] }
 0x51c   : > { %7430 = vmatmul.bf16.vlgmr.msrb.gmra.mxu0 %v13765_v47  ;;  %7443 = vmatmul.bf16.vlgmr.msrb.gmra.mxu2 %v13767_v16  ;;  %v13864_v54 = vld.sshfl [vmem:[#allocation1] sm:$0xff pattern:$0x73625140]  ;;  %v13866_v4 = vld.sshfl [vmem:[#allocation1 + $0x8] sm:$0xff pattern:$0x73625140] }
 0x51d   : > { %7452 = vmatpush.bf16.msra.mxu1 %v10531_v2  ;;  %7465 = vmatpush.bf16.msra.mxu3 %v10539_v59  ;;  %v13868_v22 = vld.sshfl [vmem:[#allocation1 + $0x10] sm:$0xff pattern:$0x73625140]  ;;  %v13870_v3 = vld.sshfl [vmem:[#allocation1 + $0x18] sm:$0xff pattern:$0x73625140] }
 0x51e   : > { %7478 = vmatpush.bf16.msra.mxu0 %v10547_v44  ;;  %7491 = vmatpush.bf16.msra.mxu2 %v10555_v63  ;;  %4149 = vst [vmem:[#allocation1] ss:$4 sm:$0xff] %v3073_v14  ;;  %v10529_v47 = vld [vmem:[#allocation8 + $0x208] sm:$0xff]  ;;  %v10590_v55 = vld [vmem:[#allocation8 + $0x3f0] sm:$0xff]  ;;  %v10588_v14 = vld [vmem:[#allocation8 + $0x3e0] sm:$0xff] }
 0x51f   : > { %v10537_v16 = vld [vmem:[#allocation8 + $0x248] sm:$0xff] }
 0x520   : > { %v10581_v2 = vld [vmem:[#allocation8 + $0x3a8] sm:$0xff] }
 0x521   : > { %7453 = vmatpush.bf16.msra.mxu1 %v10530_v31  ;;  %7466 = vmatpush.bf16.msra.mxu3 %v10538_v49  ;;  %v10589_v59 = vld [vmem:[#allocation8 + $0x3e8] sm:$0xff]  ;;  %v10580_v49 = vld [vmem:[#allocation8 + $0x3a0] sm:$0xff] }
 0x522   : > { %7479 = vmatpush.bf16.msra.mxu0 %v10546_v56  ;;  %7492 = vmatpush.bf16.msra.mxu2 %v10554_v41  ;;  %v10563_v56 = vld [vmem:[#allocation8 + $0x318] sm:$0xff] }
 0x523   : > { %v10571_v41 = vld [vmem:[#allocation8 + $0x358] sm:$0xff] }
 0x525   : > { %7454 = vmatpush.bf16.msra.mxu1 %v10529_v47  ;;  %7467 = vmatpush.bf16.msra.mxu3 %v10537_v16  ;;  %v13872_v46 = vld.sshfl [vmem:[#allocation1] sm:$0xff pattern:$0x73625140]  ;;  %v13874_v34 = vld.sshfl [vmem:[#allocation1 + $0x8] sm:$0xff pattern:$0x73625140] }
 0x526   : > { %7480 = vmatpush.bf16.msra.mxu0 %v10545_v29  ;;  %7493 = vmatpush.bf16.msra.mxu2 %v10553_v50  ;;  %v13876_v61 = vld.sshfl [vmem:[#allocation1 + $0x10] sm:$0xff pattern:$0x73625140]  ;;  %v13878_v25 = vld.sshfl [vmem:[#allocation1 + $0x18] sm:$0xff pattern:$0x73625140] }
 0x527   : > { %4161 = vst [vmem:[#allocation1] ss:$4 sm:$0xff] %v3075_v42  ;;  %v10579_v47 = vld [vmem:[#allocation8 + $0x398] sm:$0xff]  ;;  %v10562_v29 = vld [vmem:[#allocation8 + $0x310] sm:$0xff] }
 0x528   : > { %v10587_v16 = vld [vmem:[#allocation8 + $0x3d8] sm:$0xff] }
 0x529   : > { %7455 = vmatpush.bf16.msra.mxu1 %v10528_v52  ;;  %7468 = vmatpush.bf16.msra.mxu3 %v10536_v0  ;;  %v3079_v50 = vld [vmem:[#allocation2 + $0x60] sm:$0xff]  ;;  %v10570_v52 = vld [vmem:[#allocation8 + $0x350] sm:$0xff] }
 0x52a   : > { %7481 = vmatpush.bf16.msra.mxu0 %v10544_v6  ;;  %7494 = vmatpush.bf16.msra.mxu2 %v10552_v18  ;;  %v10578_v0 = vld [vmem:[#allocation8 + $0x390] sm:$0xff] }
 0x52b   : > { %v10586_v6 = vld [vmem:[#allocation8 + $0x3d0] sm:$0xff] }
 0x52c   : > { %7456 = vmatmul.bf16.vlgmr.msra.gmra.mxu1 %v13844_v23  ;;  %7469 = vmatmul.bf16.vlgmr.msra.gmra.mxu3 %v13846_v12  ;;  %v3077_v23 = vld [vmem:[#allocation2 + $0x50] sm:$0xff]  ;;  %v10564_v12 = vld [vmem:[#allocation8 + $0x320] sm:$0xff] }
 0x52d   : > { %7500 = vmatpush.bf16.msrb.mxu1 %v10567_v21  ;;  %7513 = vmatpush.bf16.msrb.mxu3 %v10575_v43 }
 0x52e   : > { %7526 = vmatpush.bf16.msrb.mxu0 %v10583_v40  ;;  %7539 = vmatpush.bf16.msrb.mxu2 %v10591_v11  ;;  %v13884_v44 = vld.sshfl [vmem:[#allocation1] sm:$0xff pattern:$0x73625140]  ;;  %v13886_v63 = vld.sshfl [vmem:[#allocation1 + $0x8] sm:$0xff pattern:$0x73625140] }
 0x52f   : > { %7482 = vmatmul.bf16.vlgmr.msra.gmra.mxu0 %v13848_v60  ;;  %7495 = vmatmul.bf16.vlgmr.msra.gmra.mxu2 %v13850_v5  ;;  %v13888_v31 = vld.sshfl [vmem:[#allocation1 + $0x10] sm:$0xff pattern:$0x73625140]  ;;  %v13890_v5 = vld.sshfl [vmem:[#allocation1 + $0x18] sm:$0xff pattern:$0x73625140] }
 0x530   : > { %v10572_v60 = vld [vmem:[#allocation8 + $0x360] sm:$0xff]  ;;  %4173 = vst [vmem:[#allocation1] ss:$4 sm:$0xff] %v3077_v23  ;;  %v10561_v40 = vld [vmem:[#allocation8 + $0x308] sm:$0xff]  ;;  %v10615_v23 = vld [vmem:[#allocation8 + $0x4b8] sm:$0xff] }
 0x531   : > { %7501 = vmatpush.bf16.msrb.mxu1 %v10566_v15  ;;  %7514 = vmatpush.bf16.msrb.mxu3 %v10574_v7  ;;  %v10569_v11 = vld [vmem:[#allocation8 + $0x348] sm:$0xff] }
 0x532   : > { %7527 = vmatpush.bf16.msrb.mxu0 %v10582_v32  ;;  %7540 = vmatpush.bf16.msrb.mxu2 %v10590_v55  ;;  %v10577_v15 = vld [vmem:[#allocation8 + $0x388] sm:$0xff]  ;;  %v10560_v32 = vld [vmem:[#allocation8 + $0x300] sm:$0xff] }
 0x533   : > { %v10585_v7 = vld [vmem:[#allocation8 + $0x3c8] sm:$0xff]  ;;  %v10568_v55 = vld [vmem:[#allocation8 + $0x340] sm:$0xff] }
 0x535   : > { %7502 = vmatpush.bf16.msrb.mxu1 %v10565_v48  ;;  %7515 = vmatpush.bf16.msrb.mxu3 %v10573_v26  ;;  %v10576_v48 = vld [vmem:[#allocation8 + $0x380] sm:$0xff] }
 0x536   : > { %7528 = vmatpush.bf16.msrb.mxu0 %v10581_v2  ;;  %7541 = vmatpush.bf16.msrb.mxu2 %v10589_v59  ;;  %v10584_v26 = vld [vmem:[#allocation8 + $0x3c0] sm:$0xff]  ;;  %v10599_v2 = vld [vmem:[#allocation8 + $0x438] sm:$0xff] }
 0x537   : > { %v13892_v18 = vld.sshfl [vmem:[#allocation1] sm:$0xff pattern:$0x73625140]  ;;  %v13894_v42 = vld.sshfl [vmem:[#allocation1 + $0x8] sm:$0xff pattern:$0x73625140] }
 0x538   : > { %v13896_v21 = vld.sshfl [vmem:[#allocation1 + $0x10] sm:$0xff pattern:$0x73625140]  ;;  %v13898_v43 = vld.sshfl [vmem:[#allocation1 + $0x18] sm:$0xff pattern:$0x73625140] }
 0x539   : > { %7503 = vmatpush.bf16.msrb.mxu1 %v10564_v12  ;;  %7516 = vmatpush.bf16.msrb.mxu3 %v10572_v60  ;;  %4185 = vst [vmem:[#allocation1] ss:$4 sm:$0xff] %v3079_v50  ;;  %v10607_v59 = vld [vmem:[#allocation8 + $0x478] sm:$0xff]  ;;  %v10622_v50 = vld [vmem:[#allocation8 + $0x4f0] sm:$0xff] }
 0x53a   : > { %7529 = vmatpush.bf16.msrb.mxu0 %v10580_v49  ;;  %7542 = vmatpush.bf16.msrb.mxu2 %v10588_v14  ;;  %v10623_v12 = vld [vmem:[#allocation8 + $0x4f8] sm:$0xff] }
 0x53d   : > { %7504 = vmatpush.bf16.msrb.mxu1 %v10563_v56  ;;  %7517 = vmatpush.bf16.msrb.mxu3 %v10571_v41  ;;  %v3081_v41 = vld [vmem:[#allocation2 + $0x70] sm:$0xff] }
 0x53e   : > { %7530 = vmatpush.bf16.msrb.mxu0 %v10579_v47  ;;  %7543 = vmatpush.bf16.msrb.mxu2 %v10587_v16  ;;  %v10598_v47 = vld [vmem:[#allocation8 + $0x430] sm:$0xff] }
 0x53f   : > { %v10606_v16 = vld [vmem:[#allocation8 + $0x470] sm:$0xff] }
 0x540   : > { %v13900_v60 = vld.sshfl [vmem:[#allocation1] sm:$0xff pattern:$0x73625140]  ;;  %v13902_v49 = vld.sshfl [vmem:[#allocation1 + $0x8] sm:$0xff pattern:$0x73625140] }
 0x541   : > { %7505 = vmatpush.bf16.msrb.mxu1 %v10562_v29  ;;  %7518 = vmatpush.bf16.msrb.mxu3 %v10570_v52  ;;  %v13904_v14 = vld.sshfl [vmem:[#allocation1 + $0x10] sm:$0xff pattern:$0x73625140]  ;;  %v13906_v56 = vld.sshfl [vmem:[#allocation1 + $0x18] sm:$0xff pattern:$0x73625140] }
 0x542   : > { %7531 = vmatpush.bf16.msrb.mxu0 %v10578_v0  ;;  %7544 = vmatpush.bf16.msrb.mxu2 %v10586_v6  ;;  %4197 = vst [vmem:[#allocation1] ss:$4 sm:$0xff] %v3081_v41  ;;  %v10614_v29 = vld [vmem:[#allocation8 + $0x4b0] sm:$0xff]  ;;  %v10597_v52 = vld [vmem:[#allocation8 + $0x428] sm:$0xff] }
 0x543   : > { %v10605_v0 = vld [vmem:[#allocation8 + $0x468] sm:$0xff] }
 0x544   : > { %v10613_v6 = vld [vmem:[#allocation8 + $0x4a8] sm:$0xff] }
 0x545   : > { %7506 = vmatpush.bf16.msrb.mxu1 %v10561_v40  ;;  %7519 = vmatpush.bf16.msrb.mxu3 %v10569_v11  ;;  %v10621_v40 = vld [vmem:[#allocation8 + $0x4e8] sm:$0xff]  ;;  %v10596_v11 = vld [vmem:[#allocation8 + $0x420] sm:$0xff] }
 0x546   : > { %7532 = vmatpush.bf16.msrb.mxu0 %v10577_v15  ;;  %7545 = vmatpush.bf16.msrb.mxu2 %v10585_v7  ;;  %v10604_v15 = vld [vmem:[#allocation8 + $0x460] sm:$0xff]  ;;  %v10611_v7 = vld [vmem:[#allocation8 + $0x498] sm:$0xff]  ;;  %v10617_v41 = vld [vmem:[#allocation8 + $0x4c8] sm:$0xff] }
 0x549   : > { %7507 = vmatpush.bf16.msrb.mxu1 %v10560_v32  ;;  %7520 = vmatpush.bf16.msrb.mxu3 %v10568_v55  ;;  %v10619_v32 = vld [vmem:[#allocation8 + $0x4d8] sm:$0xff]  ;;  %v10594_v55 = vld [vmem:[#allocation8 + $0x410] sm:$0xff] }
 0x54a   : > { %7533 = vmatpush.bf16.msrb.mxu0 %v10576_v48  ;;  %7546 = vmatpush.bf16.msrb.mxu2 %v10584_v26  ;;  %v10602_v48 = vld [vmem:[#allocation8 + $0x450] sm:$0xff] }
 0x54b   : > { %v10610_v26 = vld [vmem:[#allocation8 + $0x490] sm:$0xff] }
 0x54c   : > { %7508 = vmatmul.bf16.vlgmr.msrb.gmra.mxu1 %v13773_v35  ;;  %7521 = vmatmul.bf16.vlgmr.msrb.gmra.mxu3 %v13775_v33  ;;  %v10612_v35 = vld [vmem:[#allocation8 + $0x4a0] sm:$0xff] }
 0x54d   : > { %7552 = vmatpush.bf16.msra.mxu1 %v10599_v2  ;;  %7565 = vmatpush.bf16.msra.mxu3 %v10607_v59  ;;  %v10620_v33 = vld [vmem:[#allocation8 + $0x4e0] sm:$0xff]  ;;  %v10618_v2 = vld [vmem:[#allocation8 + $0x4d0] sm:$0xff]  ;;  %v10593_v59 = vld [vmem:[#allocation8 + $0x408] sm:$0xff] }
 0x54e   : > { %7578 = vmatpush.bf16.msra.mxu0 %v10615_v23  ;;  %7591 = vmatpush.bf16.msra.mxu2 %v10623_v12  ;;  %v10601_v23 = vld [vmem:[#allocation8 + $0x448] sm:$0xff] }
 0x54f   : > { %7534 = vmatmul.bf16.vlgmr.msrb.gmra.mxu0 %v13777_v19  ;;  %7547 = vmatmul.bf16.vlgmr.msrb.gmra.mxu2 %v13779_v24  ;;  %v10595_v19 = vld [vmem:[#allocation8 + $0x418] sm:$0xff]  ;;  %v10609_v12 = vld [vmem:[#allocation8 + $0x488] sm:$0xff] }
 0x550   : > { %v10603_v24 = vld [vmem:[#allocation8 + $0x458] sm:$0xff] }
 0x551   : > { %7553 = vmatpush.bf16.msra.mxu1 %v10598_v47  ;;  %7566 = vmatpush.bf16.msra.mxu3 %v10606_v16  ;;  %v10592_v47 = vld [vmem:[#allocation8 + $0x400] sm:$0xff] }
 0x552   : > { %7579 = vmatpush.bf16.msra.mxu0 %v10614_v29  ;;  %7592 = vmatpush.bf16.msra.mxu2 %v10622_v50  ;;  %v10600_v16 = vld [vmem:[#allocation8 + $0x440] sm:$0xff] }
 0x553   : > { %v10608_v29 = vld [vmem:[#allocation8 + $0x480] sm:$0xff] }
 0x554   : > { %v10616_v50 = vld [vmem:[#allocation8 + $0x4c0] sm:$0xff] }
 0x555   : > { %7554 = vmatpush.bf16.msra.mxu1 %v10597_v52  ;;  %7567 = vmatpush.bf16.msra.mxu3 %v10605_v0  ;;  %v10631_v52 = vld [vmem:[#allocation8 + $0x538] sm:$0xff] }
 0x556   : > { %7580 = vmatpush.bf16.msra.mxu0 %v10613_v6  ;;  %7593 = vmatpush.bf16.msra.mxu2 %v10621_v40  ;;  %v10639_v0 = vld [vmem:[#allocation8 + $0x578] sm:$0xff] }
 0x557   : > { %v10647_v6 = vld [vmem:[#allocation8 + $0x5b8] sm:$0xff] }
 0x558   : > { %v10655_v40 = vld [vmem:[#allocation8 + $0x5f8] sm:$0xff] }
 0x559   : > { %7555 = vmatpush.bf16.msra.mxu1 %v10596_v11  ;;  %7568 = vmatpush.bf16.msra.mxu3 %v10604_v15  ;;  %v10630_v11 = vld [vmem:[#allocation8 + $0x530] sm:$0xff] }
 0x55a   : > { %7581 = vmatpush.bf16.msra.mxu0 %v10612_v35  ;;  %7594 = vmatpush.bf16.msra.mxu2 %v10620_v33  ;;  %v10638_v15 = vld [vmem:[#allocation8 + $0x570] sm:$0xff] }
 0x55b   : > { %v10646_v35 = vld [vmem:[#allocation8 + $0x5b0] sm:$0xff] }
 0x55c   : > { %v10654_v33 = vld [vmem:[#allocation8 + $0x5f0] sm:$0xff] }
 0x55d   : > { %7556 = vmatpush.bf16.msra.mxu1 %v10595_v19  ;;  %7569 = vmatpush.bf16.msra.mxu3 %v10603_v24  ;;  %v10629_v19 = vld [vmem:[#allocation8 + $0x528] sm:$0xff] }
 0x55e   : > { %7582 = vmatpush.bf16.msra.mxu0 %v10611_v7  ;;  %7595 = vmatpush.bf16.msra.mxu2 %v10619_v32  ;;  %v10637_v24 = vld [vmem:[#allocation8 + $0x568] sm:$0xff] }
 0x55f   : > { %v10645_v7 = vld [vmem:[#allocation8 + $0x5a8] sm:$0xff] }
 0x560   : > { %v10653_v32 = vld [vmem:[#allocation8 + $0x5e8] sm:$0xff] }
 0x561   : > { %7557 = vmatpush.bf16.msra.mxu1 %v10594_v55  ;;  %7570 = vmatpush.bf16.msra.mxu3 %v10602_v48  ;;  %v10628_v55 = vld [vmem:[#allocation8 + $0x520] sm:$0xff] }
 0x562   : > { %7583 = vmatpush.bf16.msra.mxu0 %v10610_v26  ;;  %7596 = vmatpush.bf16.msra.mxu2 %v10618_v2  ;;  %v10636_v48 = vld [vmem:[#allocation8 + $0x560] sm:$0xff]  ;;  %v10643_v26 = vld [vmem:[#allocation8 + $0x598] sm:$0xff] }
 0x563   : > { %v10651_v2 = vld [vmem:[#allocation8 + $0x5d8] sm:$0xff] }
 0x565   : > { %7558 = vmatpush.bf16.msra.mxu1 %v10593_v59  ;;  %7571 = vmatpush.bf16.msra.mxu3 %v10601_v23  ;;  %v10626_v59 = vld [vmem:[#allocation8 + $0x510] sm:$0xff] }
 0x566   : > { %7584 = vmatpush.bf16.msra.mxu0 %v10609_v12  ;;  %7597 = vmatpush.bf16.msra.mxu2 %v10617_v41  ;;  %v10634_v23 = vld [vmem:[#allocation8 + $0x550] sm:$0xff] }
 0x567   : > { %v10642_v12 = vld [vmem:[#allocation8 + $0x590] sm:$0xff] }
 0x568   : > { %v10650_v41 = vld [vmem:[#allocation8 + $0x5d0] sm:$0xff] }
 0x569   : > { %7559 = vmatpush.bf16.msra.mxu1 %v10592_v47  ;;  %7572 = vmatpush.bf16.msra.mxu3 %v10600_v16  ;;  %v10625_v47 = vld [vmem:[#allocation8 + $0x508] sm:$0xff] }
 0x56a   : > { %7585 = vmatpush.bf16.msra.mxu0 %v10608_v29  ;;  %7598 = vmatpush.bf16.msra.mxu2 %v10616_v50  ;;  %v10633_v16 = vld [vmem:[#allocation8 + $0x548] sm:$0xff] }
 0x56b   : > { %v10641_v29 = vld [vmem:[#allocation8 + $0x588] sm:$0xff] }
 0x56c   : > { %7560 = vmatmul.bf16.vlgmr.msra.gmra.mxu1 %v13864_v54  ;;  %7573 = vmatmul.bf16.vlgmr.msra.gmra.mxu3 %v13866_v4  ;;  %v10644_v54 = vld [vmem:[#allocation8 + $0x5a0] sm:$0xff]  ;;  %v10649_v50 = vld [vmem:[#allocation8 + $0x5c8] sm:$0xff] }
 0x56d   : > { %7604 = vmatpush.bf16.msrb.mxu1 %v10631_v52  ;;  %7617 = vmatpush.bf16.msrb.mxu3 %v10639_v0  ;;  %v10652_v4 = vld [vmem:[#allocation8 + $0x5e0] sm:$0xff] }
 0x56e   : > { %7630 = vmatpush.bf16.msrb.mxu0 %v10647_v6  ;;  %7643 = vmatpush.bf16.msrb.mxu2 %v10655_v40  ;;  %v10624_v52 = vld [vmem:[#allocation8 + $0x500] sm:$0xff] }
 0x56f   : > { %7586 = vmatmul.bf16.vlgmr.msra.gmra.mxu0 %v13868_v22  ;;  %7599 = vmatmul.bf16.vlgmr.msra.gmra.mxu2 %v13870_v3  ;;  %v10627_v22 = vld [vmem:[#allocation8 + $0x518] sm:$0xff]  ;;  %v10632_v0 = vld [vmem:[#allocation8 + $0x540] sm:$0xff] }
 0x570   : > { %v10635_v3 = vld [vmem:[#allocation8 + $0x558] sm:$0xff]  ;;  %v10640_v6 = vld [vmem:[#allocation8 + $0x580] sm:$0xff] }
 0x571   : > { %7605 = vmatpush.bf16.msrb.mxu1 %v10630_v11  ;;  %7618 = vmatpush.bf16.msrb.mxu3 %v10638_v15  ;;  %v10648_v40 = vld [vmem:[#allocation8 + $0x5c0] sm:$0xff]  ;;  %v10663_v11 = vld [vmem:[#allocation8 + $0x638] sm:$0xff] }
 0x572   : > { %7631 = vmatpush.bf16.msrb.mxu0 %v10646_v35  ;;  %7644 = vmatpush.bf16.msrb.mxu2 %v10654_v33  ;;  %v10671_v15 = vld [vmem:[#allocation8 + $0x678] sm:$0xff] }
 0x573   : > { %v10679_v35 = vld [vmem:[#allocation8 + $0x6b8] sm:$0xff] }
 0x574   : > { %v10687_v33 = vld [vmem:[#allocation8 + $0x6f8] sm:$0xff] }
 0x575   : > { %7606 = vmatpush.bf16.msrb.mxu1 %v10629_v19  ;;  %7619 = vmatpush.bf16.msrb.mxu3 %v10637_v24  ;;  %v10662_v19 = vld [vmem:[#allocation8 + $0x630] sm:$0xff] }
 0x576   : > { %7632 = vmatpush.bf16.msrb.mxu0 %v10645_v7  ;;  %7645 = vmatpush.bf16.msrb.mxu2 %v10653_v32  ;;  %v10670_v24 = vld [vmem:[#allocation8 + $0x670] sm:$0xff] }
 0x577   : > { %v10678_v7 = vld [vmem:[#allocation8 + $0x6b0] sm:$0xff] }
 0x578   : > { %v10686_v32 = vld [vmem:[#allocation8 + $0x6f0] sm:$0xff] }
 0x579   : > { %7607 = vmatpush.bf16.msrb.mxu1 %v10628_v55  ;;  %7620 = vmatpush.bf16.msrb.mxu3 %v10636_v48  ;;  %v10661_v48 = vld [vmem:[#allocation8 + $0x628] sm:$0xff] }
 0x57a   : > { %7633 = vmatpush.bf16.msrb.mxu0 %v10644_v54  ;;  %7646 = vmatpush.bf16.msrb.mxu2 %v10652_v4  ;;  %v10669_v54 = vld [vmem:[#allocation8 + $0x668] sm:$0xff]  ;;  %v11072_v4 = vld [vmem:[#allocation9] ss:$0 sm:$0xff] }
 0x57d   : > { %7608 = vmatpush.bf16.msrb.mxu1 %v10627_v22  ;;  %7621 = vmatpush.bf16.msrb.mxu3 %v10635_v3  ;;  %v10677_v3 = vld [vmem:[#allocation8 + $0x6a8] sm:$0xff] }
 0x57e   : > { %7634 = vmatpush.bf16.msrb.mxu0 %v10643_v26  ;;  %7647 = vmatpush.bf16.msrb.mxu2 %v10651_v2  ;;  %v10685_v26 = vld [vmem:[#allocation8 + $0x6e8] sm:$0xff]  ;;  %v10660_v2 = vld [vmem:[#allocation8 + $0x620] sm:$0xff] }
 0x581   : > { %7609 = vmatpush.bf16.msrb.mxu1 %v10626_v59  ;;  %7622 = vmatpush.bf16.msrb.mxu3 %v10634_v23 }
 0x582   : > { %7635 = vmatpush.bf16.msrb.mxu0 %v10642_v12  ;;  %7648 = vmatpush.bf16.msrb.mxu2 %v10650_v41 }
 0x585   : > { %7610 = vmatpush.bf16.msrb.mxu1 %v10625_v47  ;;  %7623 = vmatpush.bf16.msrb.mxu3 %v10633_v16  ;;  %v10659_v16 = vld [vmem:[#allocation8 + $0x618] sm:$0xff] }
 0x586   : > { %7636 = vmatpush.bf16.msrb.mxu0 %v10641_v29  ;;  %7649 = vmatpush.bf16.msrb.mxu2 %v10649_v50  ;;  %v10667_v29 = vld [vmem:[#allocation8 + $0x658] sm:$0xff] }
 0x588   : > { %v7353_v55 = vpop.f32.mrf.mxu1 }
 0x589   : > { %7611 = vmatpush.bf16.msrb.mxu1 %v10624_v52  ;;  %7624 = vmatpush.bf16.msrb.mxu3 %v10632_v0  ;;  %v7379_v22 = vpop.f32.mrf.mxu0  ;;  %v10675_v52 = vld [vmem:[#allocation8 + $0x698] sm:$0xff] }
 0x58a   : > { %7637 = vmatpush.bf16.msrb.mxu0 %v10640_v6  ;;  %7650 = vmatpush.bf16.msrb.mxu2 %v10648_v40  ;;  %v10683_v0 = vld [vmem:[#allocation8 + $0x6d8] sm:$0xff]  ;;  %v10658_v40 = vld [vmem:[#allocation8 + $0x610] sm:$0xff] }
 0x58c   : > { %7612 = vmatmul.bf16.vlgmr.msrb.gmra.mxu1 %v13789_v38  ;;  %7625 = vmatmul.bf16.vlgmr.msrb.gmra.mxu3 %v13791_v57  ;;  %v7354_v38 = vadd.f32 %v11072_v4, %v7353_v55  ;;  %v10668_v57 = vld [vmem:[#allocation8 + $0x660] sm:$0xff]  ;;  %v10681_v4 = vld [vmem:[#allocation8 + $0x6c8] sm:$0xff] }
 0x58d   : > { %7656 = vmatpush.bf16.msra.mxu1 %v10663_v11  ;;  %7669 = vmatpush.bf16.msra.mxu3 %v10671_v15  ;;  %v10666_v11 = vld [vmem:[#allocation8 + $0x650] sm:$0xff] }
 0x58e   : > { %7682 = vmatpush.bf16.msra.mxu0 %v10679_v35  ;;  %7695 = vmatpush.bf16.msra.mxu2 %v10687_v33  ;;  %v7366_v59 = vpop.f32.mrf.mxu3  ;;  %v10674_v15 = vld [vmem:[#allocation8 + $0x690] sm:$0xff] }
 0x58f   : > { %7638 = vmatmul.bf16.vlgmr.msrb.gmra.mxu0 %v13793_v13  ;;  %7651 = vmatmul.bf16.vlgmr.msrb.gmra.mxu2 %v13795_v62  ;;  %v10676_v13 = vld [vmem:[#allocation8 + $0x6a0] sm:$0xff]  ;;  %v7367_v23 = vadd.f32 %v7366_v59, %v7354_v38  ;;  %v7392_v12 = vpop.f32.mrf.mxu2  ;;  %v10682_v35 = vld [vmem:[#allocation8 + $0x6d0] sm:$0xff] }
 0x590   : > { %v10684_v62 = vld [vmem:[#allocation8 + $0x6e0] sm:$0xff]  ;;  %v7355_v41 = vpop.f32.mrf.mxu1 }
 0x591   : > { %7657 = vmatpush.bf16.msra.mxu1 %v10662_v19  ;;  %7670 = vmatpush.bf16.msra.mxu3 %v10670_v24  ;;  %v7380_v47 = vadd.f32 %v7379_v22, %v7367_v23  ;;  %v7381_v50 = vpop.f32.mrf.mxu0  ;;  %v10656_v22 = vld [vmem:[#allocation8 + $0x600] sm:$0xff]  ;;  %v10711_v23 = vld [vmem:[#allocation8 + $0x7b8] sm:$0xff] }
 0x592   : > { %7683 = vmatpush.bf16.msra.mxu0 %v10678_v7  ;;  %7696 = vmatpush.bf16.msra.mxu2 %v10686_v32  ;;  %v10657_v7 = vld [vmem:[#allocation8 + $0x608] sm:$0xff]  ;;  %v10680_v38 = vld [vmem:[#allocation8 + $0x6c0] sm:$0xff]  ;;  %v10694_v50 = vld [vmem:[#allocation8 + $0x730] sm:$0xff] }
 0x593   : > { %v7393_v6 = vadd.f32 %v7392_v12, %v7380_v47  ;;  %v10665_v32 = vld [vmem:[#allocation8 + $0x648] sm:$0xff]  ;;  %v10719_v12 = vld [vmem:[#allocation8 + $0x7f8] sm:$0xff] }
 0x595   : > { %7658 = vmatpush.bf16.msra.mxu1 %v10661_v48  ;;  %7671 = vmatpush.bf16.msra.mxu3 %v10669_v54  ;;  %v10673_v54 = vld [vmem:[#allocation8 + $0x688] sm:$0xff] }
 0x596   : > { %7684 = vmatpush.bf16.msra.mxu0 %v10677_v3  ;;  %7697 = vmatpush.bf16.msra.mxu2 %v10685_v26  ;;  %v7368_v33 = vpop.f32.mrf.mxu3  ;;  %v10664_v3 = vld [vmem:[#allocation8 + $0x640] sm:$0xff] }
 0x597   : > { %v7394_v19 = vpop.f32.mrf.mxu2  ;;  %v10672_v26 = vld [vmem:[#allocation8 + $0x680] sm:$0xff]  ;;  %v10709_v33 = vld [vmem:[#allocation8 + $0x7a8] sm:$0xff] }
 0x598   : > { %v7405_v24 = vpop.f32.mrf.mxu1  ;;  %v10717_v19 = vld [vmem:[#allocation8 + $0x7e8] sm:$0xff] }
 0x599   : > { %7659 = vmatpush.bf16.msra.mxu1 %v10660_v2  ;;  %7672 = vmatpush.bf16.msra.mxu3 %v10668_v57  ;;  %v7406_v55 = vadd.f32 %v7405_v24, %v7393_v6  ;;  %v7431_v48 = vpop.f32.mrf.mxu0  ;;  %v10695_v57 = vld [vmem:[#allocation8 + $0x738] sm:$0xff]  ;;  %v10718_v6 = vld [vmem:[#allocation8 + $0x7f0] sm:$0xff] }
 0x59a   : > { %7685 = vmatpush.bf16.msra.mxu0 %v10676_v13  ;;  %7698 = vmatpush.bf16.msra.mxu2 %v10684_v62  ;;  %v10703_v13 = vld [vmem:[#allocation8 + $0x778] sm:$0xff] }
 0x59d   : > { %7660 = vmatpush.bf16.msra.mxu1 %v10659_v16  ;;  %7673 = vmatpush.bf16.msra.mxu3 %v10667_v29 }
 0x59e   : > { %7686 = vmatpush.bf16.msra.mxu0 %v10675_v52  ;;  %7699 = vmatpush.bf16.msra.mxu2 %v10683_v0  ;;  %v7418_v2 = vpop.f32.mrf.mxu3  ;;  %v10702_v52 = vld [vmem:[#allocation8 + $0x770] sm:$0xff] }
 0x59f   : > { %v7419_v62 = vadd.f32 %v7418_v2, %v7406_v55  ;;  %v7444_v59 = vpop.f32.mrf.mxu2  ;;  %v10710_v0 = vld [vmem:[#allocation8 + $0x7b0] sm:$0xff]  ;;  %v10691_v55 = vld [vmem:[#allocation8 + $0x718] sm:$0xff] }
 0x5a0   : > { %v7407_v41 = vpop.f32.mrf.mxu1 }
 0x5a1   : > { %7661 = vmatpush.bf16.msra.mxu1 %v10658_v40  ;;  %7674 = vmatpush.bf16.msra.mxu3 %v10666_v11  ;;  %v7432_v47 = vadd.f32 %v7431_v48, %v7419_v62  ;;  %v7433_v16 = vpop.f32.mrf.mxu0  ;;  %v10693_v11 = vld [vmem:[#allocation8 + $0x728] sm:$0xff]  ;;  %v10699_v48 = vld [vmem:[#allocation8 + $0x758] sm:$0xff]  ;;  %v10698_v62 = vld [vmem:[#allocation8 + $0x750] sm:$0xff] }
 0x5a2   : > { %7687 = vmatpush.bf16.msra.mxu0 %v10674_v15  ;;  %7700 = vmatpush.bf16.msra.mxu2 %v10682_v35  ;;  %v10701_v15 = vld [vmem:[#allocation8 + $0x768] sm:$0xff] }
 0x5a3   : > { %v7445_v29 = vadd.f32 %v7444_v59, %v7432_v47  ;;  %v10706_v59 = vld [vmem:[#allocation8 + $0x790] sm:$0xff]  ;;  %v10689_v41 = vld [vmem:[#allocation8 + $0x708] sm:$0xff] }
 0x5a4   : > { %v10697_v47 = vld [vmem:[#allocation8 + $0x748] sm:$0xff] }
 0x5a5   : > { %7662 = vmatpush.bf16.msra.mxu1 %v10657_v7  ;;  %7675 = vmatpush.bf16.msra.mxu3 %v10665_v32  ;;  %v10700_v32 = vld [vmem:[#allocation8 + $0x760] sm:$0xff]  ;;  %v10705_v16 = vld [vmem:[#allocation8 + $0x788] sm:$0xff] }
 0x5a6   : > { %7688 = vmatpush.bf16.msra.mxu0 %v10673_v54  ;;  %7701 = vmatpush.bf16.msra.mxu2 %v10681_v4  ;;  %v7420_v40 = vpop.f32.mrf.mxu3  ;;  %v10707_v54 = vld [vmem:[#allocation8 + $0x798] sm:$0xff] }
 0x5a7   : > { %v7446_v35 = vpop.f32.mrf.mxu2  ;;  %v10715_v4 = vld [vmem:[#allocation8 + $0x7d8] sm:$0xff]  ;;  %v10704_v40 = vld [vmem:[#allocation8 + $0x780] sm:$0xff] }
 0x5a8   : > { %v10735_v35 = vld [vmem:[#allocation8 + $0x878] sm:$0xff] }
 0x5a9   : > { %7663 = vmatpush.bf16.msra.mxu1 %v10656_v22  ;;  %7676 = vmatpush.bf16.msra.mxu3 %v10664_v3  ;;  %v7457_v24 = vpop.f32.mrf.mxu1 }
 0x5aa   : > { %7689 = vmatpush.bf16.msra.mxu0 %v10672_v26  ;;  %7702 = vmatpush.bf16.msra.mxu2 %v10680_v38 }
 0x5ac   : > { %7664 = vmatmul.bf16.vlgmr.msra.gmra.mxu1 %v13872_v46  ;;  %7677 = vmatmul.bf16.vlgmr.msra.gmra.mxu3 %v13874_v34  ;;  %v7458_v46 = vadd.f32 %v7457_v24, %v7445_v29  ;;  %v7483_v7 = vpop.f32.mrf.mxu0  ;;  %v10692_v34 = vld [vmem:[#allocation8 + $0x720] sm:$0xff]  ;;  %v10713_v29 = vld [vmem:[#allocation8 + $0x7c8] sm:$0xff]  ;;  %v10726_v24 = vld [vmem:[#allocation8 + $0x830] sm:$0xff] }
 0x5ad   : > { %7708 = vmatpush.bf16.msrb.mxu1 %v10695_v57  ;;  %7721 = vmatpush.bf16.msrb.mxu3 %v10703_v13  ;;  %v10690_v13 = vld [vmem:[#allocation8 + $0x710] sm:$0xff] }
 0x5ae   : > { %7734 = vmatpush.bf16.msrb.mxu0 %v10711_v23  ;;  %7747 = vmatpush.bf16.msrb.mxu2 %v10719_v12  ;;  %v10714_v23 = vld [vmem:[#allocation8 + $0x7d0] sm:$0xff] }
 0x5af   : > { %7690 = vmatmul.bf16.vlgmr.msra.gmra.mxu0 %v13876_v61  ;;  %7703 = vmatmul.bf16.vlgmr.msra.gmra.mxu2 %v13878_v25  ;;  %v10708_v61 = vld [vmem:[#allocation8 + $0x7a0] sm:$0xff]  ;;  %v7470_v22 = vpop.f32.mrf.mxu3 }
 0x5b0   : > { %v10716_v25 = vld [vmem:[#allocation8 + $0x7e0] sm:$0xff]  ;;  %v7471_v3 = vadd.f32 %v7470_v22, %v7458_v46  ;;  %v10734_v46 = vld [vmem:[#allocation8 + $0x870] sm:$0xff] }
 0x5b1   : > { %7709 = vmatpush.bf16.msrb.mxu1 %v10694_v50  ;;  %7722 = vmatpush.bf16.msrb.mxu3 %v10702_v52  ;;  %v7459_v38 = vpop.f32.mrf.mxu1  ;;  %v10732_v22 = vld [vmem:[#allocation8 + $0x860] sm:$0xff] }
 0x5b2   : > { %7735 = vmatpush.bf16.msrb.mxu0 %v10710_v0  ;;  %7748 = vmatpush.bf16.msrb.mxu2 %v10718_v6  ;;  %v7496_v26 = vpop.f32.mrf.mxu2  ;;  %v7484_v2 = vadd.f32 %v7483_v7, %v7471_v3  ;;  %v10688_v0 = vld [vmem:[#allocation8 + $0x700] sm:$0xff]  ;;  %v10742_v7 = vld [vmem:[#allocation8 + $0x8b0] sm:$0xff]  ;;  %v10731_v3 = vld [vmem:[#allocation8 + $0x858] sm:$0xff] }
 0x5b3   : > { %v10696_v6 = vld [vmem:[#allocation8 + $0x740] sm:$0xff]  ;;  %v10747_v38 = vld [vmem:[#allocation8 + $0x8d8] sm:$0xff] }
 0x5b4   : > { %v7485_v57 = vpop.f32.mrf.mxu0  ;;  %v7497_v12 = vadd.f32 %v7496_v26, %v7484_v2  ;;  %v10739_v26 = vld [vmem:[#allocation8 + $0x898] sm:$0xff] }
 0x5b5   : > { %7710 = vmatpush.bf16.msrb.mxu1 %v10693_v11  ;;  %7723 = vmatpush.bf16.msrb.mxu3 %v10701_v15  ;;  %v10712_v11 = vld [vmem:[#allocation8 + $0x7c0] sm:$0xff]  ;;  %v10727_v15 = vld [vmem:[#allocation8 + $0x838] sm:$0xff] }
 0x5b6   : > { %7736 = vmatpush.bf16.msrb.mxu0 %v10709_v33  ;;  %7749 = vmatpush.bf16.msrb.mxu2 %v10717_v19  ;;  %v10743_v33 = vld [vmem:[#allocation8 + $0x8b8] sm:$0xff] }
 0x5b7   : > { %v7472_v50 = vpop.f32.mrf.mxu3  ;;  %v10751_v19 = vld [vmem:[#allocation8 + $0x8f8] sm:$0xff] }
 0x5b8   : > { %v10721_v50 = vld [vmem:[#allocation8 + $0x808] sm:$0xff] }
 0x5b9   : > { %7711 = vmatpush.bf16.msrb.mxu1 %v10692_v34  ;;  %7724 = vmatpush.bf16.msrb.mxu3 %v10700_v32  ;;  %v10750_v34 = vld [vmem:[#allocation8 + $0x8f0] sm:$0xff]  ;;  %v10725_v32 = vld [vmem:[#allocation8 + $0x828] sm:$0xff] }
 0x5ba   : > { %7737 = vmatpush.bf16.msrb.mxu0 %v10708_v61  ;;  %7750 = vmatpush.bf16.msrb.mxu2 %v10716_v25  ;;  %v7498_v52 = vpop.f32.mrf.mxu2  ;;  %v10733_v61 = vld [vmem:[#allocation8 + $0x868] sm:$0xff] }
 0x5bb   : > { %v10741_v25 = vld [vmem:[#allocation8 + $0x8a8] sm:$0xff] }
 0x5bc   : > { %v10729_v52 = vld [vmem:[#allocation8 + $0x848] sm:$0xff] }
 0x5bd   : > { %7712 = vmatpush.bf16.msrb.mxu1 %v10691_v55  ;;  %7725 = vmatpush.bf16.msrb.mxu3 %v10699_v48  ;;  %v10749_v55 = vld [vmem:[#allocation8 + $0x8e8] sm:$0xff] }
 0x5be   : > { %7738 = vmatpush.bf16.msrb.mxu0 %v10707_v54  ;;  %7751 = vmatpush.bf16.msrb.mxu2 %v10715_v4 }
 0x5c1   : > { %7713 = vmatpush.bf16.msrb.mxu1 %v10690_v13  ;;  %7726 = vmatpush.bf16.msrb.mxu3 %v10698_v62 }
 0x5c2   : > { %7739 = vmatpush.bf16.msrb.mxu0 %v10706_v59  ;;  %7752 = vmatpush.bf16.msrb.mxu2 %v10714_v23 }
 0x5c5   : > { %7714 = vmatpush.bf16.msrb.mxu1 %v10689_v41  ;;  %7727 = vmatpush.bf16.msrb.mxu3 %v10697_v47  ;;  %v10730_v41 = vld [vmem:[#allocation8 + $0x850] sm:$0xff] }
 0x5c6   : > { %7740 = vmatpush.bf16.msrb.mxu0 %v10705_v16  ;;  %7753 = vmatpush.bf16.msrb.mxu2 %v10713_v29  ;;  %v10738_v47 = vld [vmem:[#allocation8 + $0x890] sm:$0xff] }
 0x5c7   : > { %v10746_v16 = vld [vmem:[#allocation8 + $0x8d0] sm:$0xff] }
 0x5c9   : > { %7715 = vmatpush.bf16.msrb.mxu1 %v10688_v0  ;;  %7728 = vmatpush.bf16.msrb.mxu3 %v10696_v6  ;;  %v7509_v48 = vpop.f32.mrf.mxu1  ;;  %v10737_v0 = vld [vmem:[#allocation8 + $0x888] sm:$0xff] }
 0x5ca   : > { %7741 = vmatpush.bf16.msrb.mxu0 %v10704_v40  ;;  %7754 = vmatpush.bf16.msrb.mxu2 %v10712_v11  ;;  %v7510_v54 = vadd.f32 %v7509_v48, %v7497_v12  ;;  %v10722_v12 = vld [vmem:[#allocation8 + $0x810] sm:$0xff]  ;;  %v10745_v6 = vld [vmem:[#allocation8 + $0x8c8] sm:$0xff] }
 0x5cb   : > { %v10757_v48 = vld [vmem:[#allocation8 + $0x928] sm:$0xff] }
 0x5cc   : > { %7716 = vmatmul.bf16.vlgmr.msrb.gmra.mxu1 %v13801_v20  ;;  %7729 = vmatmul.bf16.vlgmr.msrb.gmra.mxu3 %v13803_v10  ;;  %v7535_v4 = vpop.f32.mrf.mxu0  ;;  %v10724_v20 = vld [vmem:[#allocation8 + $0x820] sm:$0xff] }
 0x5cd   : > { %7760 = vmatpush.bf16.msra.mxu1 %v10727_v15  ;;  %7773 = vmatpush.bf16.msra.mxu3 %v10735_v35  ;;  %v10740_v10 = vld [vmem:[#allocation8 + $0x8a0] sm:$0xff] }
 0x5ce   : > { %7786 = vmatpush.bf16.msra.mxu0 %v10743_v33  ;;  %7799 = vmatpush.bf16.msra.mxu2 %v10751_v19  ;;  %v10720_v15 = vld [vmem:[#allocation8 + $0x800] sm:$0xff] }
 0x5cf   : > { %7742 = vmatmul.bf16.vlgmr.msrb.gmra.mxu0 %v13805_v36  ;;  %7755 = vmatmul.bf16.vlgmr.msrb.gmra.mxu2 %v13807_v28  ;;  %v10748_v36 = vld [vmem:[#allocation8 + $0x8e0] sm:$0xff]  ;;  %v10723_v28 = vld [vmem:[#allocation8 + $0x818] sm:$0xff]  ;;  %v7522_v2 = vpop.f32.mrf.mxu3 }
 0x5d0   : > { %v7523_v57 = vadd.f32 %v7522_v2, %v7510_v54  ;;  %v10728_v35 = vld [vmem:[#allocation8 + $0x840] sm:$0xff]  ;;  %v10765_v54 = vld [vmem:[#allocation8 + $0x968] sm:$0xff] }
 0x5d1   : > { %7761 = vmatpush.bf16.msra.mxu1 %v10726_v24  ;;  %7774 = vmatpush.bf16.msra.mxu3 %v10734_v46  ;;  %v7511_v62 = vpop.f32.mrf.mxu1  ;;  %v10736_v33 = vld [vmem:[#allocation8 + $0x880] sm:$0xff]  ;;  %v10759_v24 = vld [vmem:[#allocation8 + $0x938] sm:$0xff] }
 0x5d2   : > { %7787 = vmatpush.bf16.msra.mxu0 %v10742_v7  ;;  %7800 = vmatpush.bf16.msra.mxu2 %v10750_v34  ;;  %v7548_v13 = vpop.f32.mrf.mxu2  ;;  %v7536_v59 = vadd.f32 %v7535_v4, %v7523_v57  ;;  %v10744_v19 = vld [vmem:[#allocation8 + $0x8c0] sm:$0xff]  ;;  %v10767_v46 = vld [vmem:[#allocation8 + $0x978] sm:$0xff]  ;;  %v10773_v4 = vld [vmem:[#allocation8 + $0x9a8] sm:$0xff] }
 0x5d3   : > { %v10775_v7 = vld [vmem:[#allocation8 + $0x9b8] sm:$0xff] }
 0x5d4   : > { %v7537_v23 = vpop.f32.mrf.mxu0  ;;  %v7549_v29 = vadd.f32 %v7548_v13, %v7536_v59  ;;  %v10783_v34 = vld [vmem:[#allocation8 + $0x9f8] sm:$0xff] }
 0x5d5   : > { %7762 = vmatpush.bf16.msra.mxu1 %v10725_v32  ;;  %7775 = vmatpush.bf16.msra.mxu3 %v10733_v61  ;;  %v10758_v32 = vld [vmem:[#allocation8 + $0x930] sm:$0xff] }
 0x5d6   : > { %7788 = vmatpush.bf16.msra.mxu0 %v10741_v25  ;;  %7801 = vmatpush.bf16.msra.mxu2 %v10749_v55  ;;  %v10766_v61 = vld [vmem:[#allocation8 + $0x970] sm:$0xff] }
 0x5d7   : > { %v7524_v40 = vpop.f32.mrf.mxu3  ;;  %v10774_v25 = vld [vmem:[#allocation8 + $0x9b0] sm:$0xff] }
 0x5d8   : > { %v10782_v55 = vld [vmem:[#allocation8 + $0x9f0] sm:$0xff] }
 0x5d9   : > { %7763 = vmatpush.bf16.msra.mxu1 %v10724_v20  ;;  %7776 = vmatpush.bf16.msra.mxu3 %v10732_v22  ;;  %v10781_v20 = vld [vmem:[#allocation8 + $0x9e8] sm:$0xff] }
 0x5da   : > { %7789 = vmatpush.bf16.msra.mxu0 %v10740_v10  ;;  %7802 = vmatpush.bf16.msra.mxu2 %v10748_v36  ;;  %v7550_v11 = vpop.f32.mrf.mxu2 }
 0x5dd   : > { %7764 = vmatpush.bf16.msra.mxu1 %v10723_v28  ;;  %7777 = vmatpush.bf16.msra.mxu3 %v10731_v3  ;;  %v10764_v28 = vld [vmem:[#allocation8 + $0x960] sm:$0xff]  ;;  %v10763_v3 = vld [vmem:[#allocation8 + $0x958] sm:$0xff] }
 0x5de   : > { %7790 = vmatpush.bf16.msra.mxu0 %v10739_v26  ;;  %7803 = vmatpush.bf16.msra.mxu2 %v10747_v38  ;;  %v10771_v26 = vld [vmem:[#allocation8 + $0x998] sm:$0xff] }
 0x5df   : > { %v10779_v38 = vld [vmem:[#allocation8 + $0x9d8] sm:$0xff] }
 0x5e1   : > { %7765 = vmatpush.bf16.msra.mxu1 %v10722_v12  ;;  %7778 = vmatpush.bf16.msra.mxu3 %v10730_v41  ;;  %v10754_v12 = vld [vmem:[#allocation8 + $0x910] sm:$0xff] }
 0x5e2   : > { %7791 = vmatpush.bf16.msra.mxu0 %v10738_v47  ;;  %7804 = vmatpush.bf16.msra.mxu2 %v10746_v16  ;;  %v10762_v41 = vld [vmem:[#allocation8 + $0x950] sm:$0xff] }
 0x5e3   : > { %v10770_v47 = vld [vmem:[#allocation8 + $0x990] sm:$0xff] }
 0x5e4   : > { %v10778_v16 = vld [vmem:[#allocation8 + $0x9d0] sm:$0xff] }
 0x5e5   : > { %7766 = vmatpush.bf16.msra.mxu1 %v10721_v50  ;;  %7779 = vmatpush.bf16.msra.mxu3 %v10729_v52  ;;  %v10753_v50 = vld [vmem:[#allocation8 + $0x908] sm:$0xff] }
 0x5e6   : > { %7792 = vmatpush.bf16.msra.mxu0 %v10737_v0  ;;  %7805 = vmatpush.bf16.msra.mxu2 %v10745_v6  ;;  %v10761_v52 = vld [vmem:[#allocation8 + $0x948] sm:$0xff] }
 0x5e7   : > { %v10769_v0 = vld [vmem:[#allocation8 + $0x988] sm:$0xff] }
 0x5e8   : > { %v10777_v6 = vld [vmem:[#allocation8 + $0x9c8] sm:$0xff] }
 0x5e9   : > { %7767 = vmatpush.bf16.msra.mxu1 %v10720_v15  ;;  %7780 = vmatpush.bf16.msra.mxu3 %v10728_v35  ;;  %v7561_v22 = vpop.f32.mrf.mxu1  ;;  %v10752_v15 = vld [vmem:[#allocation8 + $0x900] sm:$0xff] }
 0x5ea   : > { %7793 = vmatpush.bf16.msra.mxu0 %v10736_v33  ;;  %7806 = vmatpush.bf16.msra.mxu2 %v10744_v19  ;;  %v7562_v10 = vadd.f32 %v7561_v22, %v7549_v29  ;;  %v10760_v35 = vld [vmem:[#allocation8 + $0x940] sm:$0xff] }
 0x5eb   : > { %v10768_v33 = vld [vmem:[#allocation8 + $0x980] sm:$0xff] }
 0x5ec   : > { %7768 = vmatmul.bf16.vlgmr.msra.gmra.mxu1 %v13884_v44  ;;  %7781 = vmatmul.bf16.vlgmr.msra.gmra.mxu3 %v13886_v63  ;;  %v7587_v36 = vpop.f32.mrf.mxu0  ;;  %v10756_v44 = vld [vmem:[#allocation8 + $0x920] sm:$0xff] }
 0x5ed   : > { %7812 = vmatpush.bf16.msrb.mxu1 %v10759_v24  ;;  %7825 = vmatpush.bf16.msrb.mxu3 %v10767_v46  ;;  %v10772_v63 = vld [vmem:[#allocation8 + $0x9a0] sm:$0xff]  ;;  %v10791_v24 = vld [vmem:[#allocation8 + $0xa38] sm:$0xff] }
 0x5ee   : > { %7838 = vmatpush.bf16.msrb.mxu0 %v10775_v7  ;;  %7851 = vmatpush.bf16.msrb.mxu2 %v10783_v34  ;;  %v10776_v19 = vld [vmem:[#allocation8 + $0x9c0] sm:$0xff]  ;;  %v10799_v46 = vld [vmem:[#allocation8 + $0xa78] sm:$0xff] }
 0x5ef   : > { %7794 = vmatmul.bf16.vlgmr.msra.gmra.mxu0 %v13888_v31  ;;  %7807 = vmatmul.bf16.vlgmr.msra.gmra.mxu2 %v13890_v5  ;;  %v10780_v31 = vld [vmem:[#allocation8 + $0x9e0] sm:$0xff]  ;;  %v10755_v5 = vld [vmem:[#allocation8 + $0x918] sm:$0xff]  ;;  %v7574_v2 = vpop.f32.mrf.mxu3 }
 0x5f0   : > { %v7575_v57 = vadd.f32 %v7574_v2, %v7562_v10  ;;  %v10807_v7 = vld [vmem:[#allocation8 + $0xab8] sm:$0xff] }
 0x5f1   : > { %7813 = vmatpush.bf16.msrb.mxu1 %v10758_v32  ;;  %7826 = vmatpush.bf16.msrb.mxu3 %v10766_v61  ;;  %v7563_v62 = vpop.f32.mrf.mxu1  ;;  %v10815_v34 = vld [vmem:[#allocation8 + $0xaf8] sm:$0xff]  ;;  %v10790_v32 = vld [vmem:[#allocation8 + $0xa30] sm:$0xff] }
 0x5f2   : > { %7839 = vmatpush.bf16.msrb.mxu0 %v10774_v25  ;;  %7852 = vmatpush.bf16.msrb.mxu2 %v10782_v55  ;;  %v7600_v13 = vpop.f32.mrf.mxu2  ;;  %v7588_v59 = vadd.f32 %v7587_v36, %v7575_v57  ;;  %v10798_v61 = vld [vmem:[#allocation8 + $0xa70] sm:$0xff] }
 0x5f3   : > { %v10806_v25 = vld [vmem:[#allocation8 + $0xab0] sm:$0xff] }
 0x5f4   : > { %v7589_v23 = vpop.f32.mrf.mxu0  ;;  %v7601_v29 = vadd.f32 %v7600_v13, %v7588_v59  ;;  %v10814_v55 = vld [vmem:[#allocation8 + $0xaf0] sm:$0xff] }
 0x5f5   : > { %7814 = vmatpush.bf16.msrb.mxu1 %v10757_v48  ;;  %7827 = vmatpush.bf16.msrb.mxu3 %v10765_v54  ;;  %v10789_v48 = vld [vmem:[#allocation8 + $0xa28] sm:$0xff]  ;;  %v10786_v13 = vld [vmem:[#allocation8 + $0xa10] sm:$0xff] }
 0x5f6   : > { %7840 = vmatpush.bf16.msrb.mxu0 %v10773_v4  ;;  %7853 = vmatpush.bf16.msrb.mxu2 %v10781_v20  ;;  %v10797_v54 = vld [vmem:[#allocation8 + $0xa68] sm:$0xff]  ;;  %v10794_v62 = vld [vmem:[#allocation8 + $0xa50] sm:$0xff] }
 0x5f7   : > { %v7576_v40 = vpop.f32.mrf.mxu3  ;;  %v10805_v4 = vld [vmem:[#allocation8 + $0xaa8] sm:$0xff]  ;;  %v10802_v59 = vld [vmem:[#allocation8 + $0xa90] sm:$0xff] }
 0x5f8   : > { %v10813_v20 = vld [vmem:[#allocation8 + $0xae8] sm:$0xff]  ;;  %v10810_v23 = vld [vmem:[#allocation8 + $0xad0] sm:$0xff]  ;;  %v10800_v40 = vld [vmem:[#allocation8 + $0xa80] sm:$0xff] }
 0x5f9   : > { %7815 = vmatpush.bf16.msrb.mxu1 %v10756_v44  ;;  %7828 = vmatpush.bf16.msrb.mxu3 %v10764_v28  ;;  %v10796_v44 = vld [vmem:[#allocation8 + $0xa60] sm:$0xff]  ;;  %v10795_v28 = vld [vmem:[#allocation8 + $0xa58] sm:$0xff] }
 0x5fa   : > { %7841 = vmatpush.bf16.msrb.mxu0 %v10772_v63  ;;  %7854 = vmatpush.bf16.msrb.mxu2 %v10780_v31  ;;  %v7602_v11 = vpop.f32.mrf.mxu2  ;;  %v10803_v63 = vld [vmem:[#allocation8 + $0xa98] sm:$0xff] }
 0x5fb   : > { %v10811_v31 = vld [vmem:[#allocation8 + $0xad8] sm:$0xff]  ;;  %v10808_v11 = vld [vmem:[#allocation8 + $0xac0] sm:$0xff] }
 0x5fd   : > { %7816 = vmatpush.bf16.msrb.mxu1 %v10755_v5  ;;  %7829 = vmatpush.bf16.msrb.mxu3 %v10763_v3 }
 0x5fe   : > { %7842 = vmatpush.bf16.msrb.mxu0 %v10771_v26  ;;  %7855 = vmatpush.bf16.msrb.mxu2 %v10779_v38 }
 0x601   : > { %7817 = vmatpush.bf16.msrb.mxu1 %v10754_v12  ;;  %7830 = vmatpush.bf16.msrb.mxu3 %v10762_v41  ;;  %v10785_v41 = vld [vmem:[#allocation8 + $0xa08] sm:$0xff] }
 0x602   : > { %7843 = vmatpush.bf16.msrb.mxu0 %v10770_v47  ;;  %7856 = vmatpush.bf16.msrb.mxu2 %v10778_v16  ;;  %v10793_v47 = vld [vmem:[#allocation8 + $0xa48] sm:$0xff] }
 0x603   : > { %v10801_v16 = vld [vmem:[#allocation8 + $0xa88] sm:$0xff] }
 0x605   : > { %7818 = vmatpush.bf16.msrb.mxu1 %v10753_v50  ;;  %7831 = vmatpush.bf16.msrb.mxu3 %v10761_v52 }
 0x606   : > { %7844 = vmatpush.bf16.msrb.mxu0 %v10769_v0  ;;  %7857 = vmatpush.bf16.msrb.mxu2 %v10777_v6  ;;  %v10784_v0 = vld [vmem:[#allocation8 + $0xa00] sm:$0xff] }
 0x607   : > { %v10792_v6 = vld [vmem:[#allocation8 + $0xa40] sm:$0xff] }
 0x609   : > { %7819 = vmatpush.bf16.msrb.mxu1 %v10752_v15  ;;  %7832 = vmatpush.bf16.msrb.mxu3 %v10760_v35  ;;  %v7613_v22 = vpop.f32.mrf.mxu1  ;;  %v10823_v15 = vld [vmem:[#allocation8 + $0xb38] sm:$0xff] }
 0x60a   : > { %7845 = vmatpush.bf16.msrb.mxu0 %v10768_v33  ;;  %7858 = vmatpush.bf16.msrb.mxu2 %v10776_v19  ;;  %v7614_v10 = vadd.f32 %v7613_v22, %v7601_v29  ;;  %v10809_v29 = vld [vmem:[#allocation8 + $0xac8] sm:$0xff]  ;;  %v10831_v35 = vld [vmem:[#allocation8 + $0xb78] sm:$0xff] }
 0x60b   : > { %v10839_v33 = vld [vmem:[#allocation8 + $0xbb8] sm:$0xff] }
 0x60c   : > { %7820 = vmatmul.bf16.vlgmr.msrb.gmra.mxu1 %v13817_v30  ;;  %7833 = vmatmul.bf16.vlgmr.msrb.gmra.mxu3 %v13819_v9  ;;  %v7639_v36 = vpop.f32.mrf.mxu0  ;;  %v10788_v30 = vld [vmem:[#allocation8 + $0xa20] sm:$0xff]  ;;  %v10847_v19 = vld [vmem:[#allocation8 + $0xbf8] sm:$0xff] }
 0x60d   : > { %7864 = vmatpush.bf16.msra.mxu1 %v10791_v24  ;;  %7877 = vmatpush.bf16.msra.mxu3 %v10799_v46  ;;  %v10804_v9 = vld [vmem:[#allocation8 + $0xaa0] sm:$0xff]  ;;  %v10822_v24 = vld [vmem:[#allocation8 + $0xb30] sm:$0xff]  ;;  %v10827_v22 = vld [vmem:[#allocation8 + $0xb58] sm:$0xff] }
 0x60e   : > { %7890 = vmatpush.bf16.msra.mxu0 %v10807_v7  ;;  %7903 = vmatpush.bf16.msra.mxu2 %v10815_v34  ;;  %v10830_v46 = vld [vmem:[#allocation8 + $0xb70] sm:$0xff] }
 0x60f   : > { %7846 = vmatmul.bf16.vlgmr.msrb.gmra.mxu0 %v13821_v39  ;;  %7859 = vmatmul.bf16.vlgmr.msrb.gmra.mxu2 %v13823_v53  ;;  %v10812_v39 = vld [vmem:[#allocation8 + $0xae0] sm:$0xff]  ;;  %v10787_v53 = vld [vmem:[#allocation8 + $0xa18] sm:$0xff]  ;;  %v7626_v5 = vpop.f32.mrf.mxu3  ;;  %v10838_v7 = vld [vmem:[#allocation8 + $0xbb0] sm:$0xff] }
 0x610   : > { %v7627_v3 = vadd.f32 %v7626_v5, %v7614_v10  ;;  %v10846_v34 = vld [vmem:[#allocation8 + $0xbf0] sm:$0xff]  ;;  %v10835_v10 = vld [vmem:[#allocation8 + $0xb98] sm:$0xff] }
 0x611   : > { %7865 = vmatpush.bf16.msra.mxu1 %v10790_v32  ;;  %7878 = vmatpush.bf16.msra.mxu3 %v10798_v61  ;;  %v7615_v38 = vpop.f32.mrf.mxu1  ;;  %v10821_v32 = vld [vmem:[#allocation8 + $0xb28] sm:$0xff]  ;;  %v10834_v5 = vld [vmem:[#allocation8 + $0xb90] sm:$0xff] }
 0x612   : > { %7891 = vmatpush.bf16.msra.mxu0 %v10806_v25  ;;  %7904 = vmatpush.bf16.msra.mxu2 %v10814_v55  ;;  %v7652_v26 = vpop.f32.mrf.mxu2  ;;  %v7640_v2 = vadd.f32 %v7639_v36, %v7627_v3  ;;  %v10829_v61 = vld [vmem:[#allocation8 + $0xb68] sm:$0xff]  ;;  %v10843_v36 = vld [vmem:[#allocation8 + $0xbd8] sm:$0xff]  ;;  %v10842_v3 = vld [vmem:[#allocation8 + $0xbd0] sm:$0xff] }
 0x613   : > { %v10837_v25 = vld [vmem:[#allocation8 + $0xba8] sm:$0xff] }
 0x614   : > { %v7641_v57 = vpop.f32.mrf.mxu0  ;;  %v7653_v12 = vadd.f32 %v7652_v26, %v7640_v2  ;;  %v10845_v55 = vld [vmem:[#allocation8 + $0xbe8] sm:$0xff] }
 0x615   : > { %7866 = vmatpush.bf16.msra.mxu1 %v10789_v48  ;;  %7879 = vmatpush.bf16.msra.mxu3 %v10797_v54  ;;  %v10817_v38 = vld [vmem:[#allocation8 + $0xb08] sm:$0xff] }
 0x616   : > { %7892 = vmatpush.bf16.msra.mxu0 %v10805_v4  ;;  %7905 = vmatpush.bf16.msra.mxu2 %v10813_v20  ;;  %v10828_v20 = vld [vmem:[#allocation8 + $0xb60] sm:$0xff]  ;;  %v10825_v2 = vld [vmem:[#allocation8 + $0xb48] sm:$0xff] }
 0x617   : > { %v7628_v50 = vpop.f32.mrf.mxu3  ;;  %v10833_v57 = vld [vmem:[#allocation8 + $0xb88] sm:$0xff] }
 0x618   : > { %v10871_v50 = vld [vmem:[#allocation8 + $0xcb8] sm:$0xff] }
 0x619   : > { %7867 = vmatpush.bf16.msra.mxu1 %v10788_v30  ;;  %7880 = vmatpush.bf16.msra.mxu3 %v10796_v44 }
 0x61a   : > { %7893 = vmatpush.bf16.msra.mxu0 %v10804_v9  ;;  %7906 = vmatpush.bf16.msra.mxu2 %v10812_v39  ;;  %v7654_v52 = vpop.f32.mrf.mxu2 }
 0x61b   : > { %v10879_v52 = vld [vmem:[#allocation8 + $0xcf8] sm:$0xff] }
 0x61d   : > { %7868 = vmatpush.bf16.msra.mxu1 %v10787_v53  ;;  %7881 = vmatpush.bf16.msra.mxu3 %v10795_v28 }
 0x61e   : > { %7894 = vmatpush.bf16.msra.mxu0 %v10803_v63  ;;  %7907 = vmatpush.bf16.msra.mxu2 %v10811_v31  ;;  %v10818_v63 = vld [vmem:[#allocation8 + $0xb10] sm:$0xff] }
 0x61f   : > { %v10826_v31 = vld [vmem:[#allocation8 + $0xb50] sm:$0xff] }
 0x621   : > { %7869 = vmatpush.bf16.msra.mxu1 %v10786_v13  ;;  %7882 = vmatpush.bf16.msra.mxu3 %v10794_v62  ;;  %v10841_v13 = vld [vmem:[#allocation8 + $0xbc8] sm:$0xff] }
 0x622   : > { %7895 = vmatpush.bf16.msra.mxu0 %v10802_v59  ;;  %7908 = vmatpush.bf16.msra.mxu2 %v10810_v23  ;;  %v10816_v23 = vld [vmem:[#allocation8 + $0xb00] sm:$0xff] }
 0x625   : > { %7870 = vmatpush.bf16.msra.mxu1 %v10785_v41  ;;  %7883 = vmatpush.bf16.msra.mxu3 %v10793_v47  ;;  %v10832_v41 = vld [vmem:[#allocation8 + $0xb80] sm:$0xff] }
 0x626   : > { %7896 = vmatpush.bf16.msra.mxu0 %v10801_v16  ;;  %7909 = vmatpush.bf16.msra.mxu2 %v10809_v29  ;;  %v10840_v47 = vld [vmem:[#allocation8 + $0xbc0] sm:$0xff]  ;;  %v10855_v16 = vld [vmem:[#allocation8 + $0xc38] sm:$0xff] }
 0x627   : > { %v10863_v29 = vld [vmem:[#allocation8 + $0xc78] sm:$0xff] }
 0x629   : > { %7871 = vmatpush.bf16.msra.mxu1 %v10784_v0  ;;  %7884 = vmatpush.bf16.msra.mxu3 %v10792_v6  ;;  %v7665_v48 = vpop.f32.mrf.mxu1  ;;  %v10854_v0 = vld [vmem:[#allocation8 + $0xc30] sm:$0xff] }
 0x62a   : > { %7897 = vmatpush.bf16.msra.mxu0 %v10800_v40  ;;  %7910 = vmatpush.bf16.msra.mxu2 %v10808_v11  ;;  %v7666_v54 = vadd.f32 %v7665_v48, %v7653_v12  ;;  %v10824_v12 = vld [vmem:[#allocation8 + $0xb40] sm:$0xff]  ;;  %v10862_v6 = vld [vmem:[#allocation8 + $0xc70] sm:$0xff] }
 0x62b   : > { %v10870_v40 = vld [vmem:[#allocation8 + $0xcb0] sm:$0xff] }
 0x62c   : > { %7872 = vmatmul.bf16.vlgmr.msra.gmra.mxu1 %v13892_v18  ;;  %7885 = vmatmul.bf16.vlgmr.msra.gmra.mxu3 %v13894_v42  ;;  %v7691_v4 = vpop.f32.mrf.mxu0  ;;  %v10820_v18 = vld [vmem:[#allocation8 + $0xb20] sm:$0xff]  ;;  %v10878_v11 = vld [vmem:[#allocation8 + $0xcf0] sm:$0xff] }
 0x62d   : > { %7916 = vmatpush.bf16.msrb.mxu1 %v10823_v15  ;;  %7929 = vmatpush.bf16.msrb.mxu3 %v10831_v35  ;;  %v10836_v42 = vld [vmem:[#allocation8 + $0xba0] sm:$0xff]  ;;  %v10853_v15 = vld [vmem:[#allocation8 + $0xc28] sm:$0xff] }
 0x62e   : > { %7942 = vmatpush.bf16.msrb.mxu0 %v10839_v33  ;;  %7955 = vmatpush.bf16.msrb.mxu2 %v10847_v19  ;;  %v10861_v35 = vld [vmem:[#allocation8 + $0xc68] sm:$0xff] }
 0x62f   : > { %7898 = vmatmul.bf16.vlgmr.msra.gmra.mxu0 %v13896_v21  ;;  %7911 = vmatmul.bf16.vlgmr.msra.gmra.mxu2 %v13898_v43  ;;  %v10844_v21 = vld [vmem:[#allocation8 + $0xbe0] sm:$0xff]  ;;  %v10819_v43 = vld [vmem:[#allocation8 + $0xb18] sm:$0xff]  ;;  %v7678_v30 = vpop.f32.mrf.mxu3  ;;  %v10869_v33 = vld [vmem:[#allocation8 + $0xca8] sm:$0xff] }
 0x630   : > { %v7679_v44 = vadd.f32 %v7678_v30, %v7666_v54  ;;  %v10877_v19 = vld [vmem:[#allocation8 + $0xce8] sm:$0xff] }
 0x631   : > { %7917 = vmatpush.bf16.msrb.mxu1 %v10822_v24  ;;  %7930 = vmatpush.bf16.msrb.mxu3 %v10830_v46  ;;  %v7667_v39 = vpop.f32.mrf.mxu1  ;;  %v10857_v30 = vld [vmem:[#allocation8 + $0xc48] sm:$0xff] }
 0x632   : > { %7943 = vmatpush.bf16.msrb.mxu0 %v10838_v7  ;;  %7956 = vmatpush.bf16.msrb.mxu2 %v10846_v34  ;;  %v7704_v9 = vpop.f32.mrf.mxu2  ;;  %v7692_v53 = vadd.f32 %v7691_v4, %v7679_v44  ;;  %v10860_v34 = vld [vmem:[#allocation8 + $0xc60] sm:$0xff]  ;;  %v10865_v44 = vld [vmem:[#allocation8 + $0xc88] sm:$0xff] }
 0x634   : > { %v7693_v28 = vpop.f32.mrf.mxu0  ;;  %v7705_v26 = vadd.f32 %v7704_v9, %v7692_v53  ;;  %v10873_v9 = vld [vmem:[#allocation8 + $0xcc8] sm:$0xff] }
 0x635   : > { %7918 = vmatpush.bf16.msrb.mxu1 %v10821_v32  ;;  %7931 = vmatpush.bf16.msrb.mxu3 %v10829_v61  ;;  %v10859_v32 = vld [vmem:[#allocation8 + $0xc58] sm:$0xff]  ;;  %v10848_v28 = vld [vmem:[#allocation8 + $0xc00] sm:$0xff] }
 0x636   : > { %7944 = vmatpush.bf16.msrb.mxu0 %v10837_v25  ;;  %7957 = vmatpush.bf16.msrb.mxu2 %v10845_v55  ;;  %v10867_v61 = vld [vmem:[#allocation8 + $0xc98] sm:$0xff] }
 0x637   : > { %v7680_v62 = vpop.f32.mrf.mxu3  ;;  %v10875_v25 = vld [vmem:[#allocation8 + $0xcd8] sm:$0xff] }
 0x638   : > { %v10902_v62 = vld [vmem:[#allocation8 + $0xdb0] sm:$0xff] }
 0x639   : > { %7919 = vmatpush.bf16.msrb.mxu1 %v10820_v18  ;;  %7932 = vmatpush.bf16.msrb.mxu3 %v10828_v20 }
 0x63a   : > { %7945 = vmatpush.bf16.msrb.mxu0 %v10836_v42  ;;  %7958 = vmatpush.bf16.msrb.mxu2 %v10844_v21  ;;  %v7706_v59 = vpop.f32.mrf.mxu2  ;;  %v10850_v42 = vld [vmem:[#allocation8 + $0xc10] sm:$0xff] }
 0x63b   : > { %v10858_v21 = vld [vmem:[#allocation8 + $0xc50] sm:$0xff] }
 0x63c   : > { %v10910_v59 = vld [vmem:[#allocation8 + $0xdf0] sm:$0xff] }
 0x63d   : > { %7920 = vmatpush.bf16.msrb.mxu1 %v10819_v43  ;;  %7933 = vmatpush.bf16.msrb.mxu3 %v10827_v22  ;;  %v10866_v43 = vld [vmem:[#allocation8 + $0xc90] sm:$0xff] }
 0x63e   : > { %7946 = vmatpush.bf16.msrb.mxu0 %v10835_v10  ;;  %7959 = vmatpush.bf16.msrb.mxu2 %v10843_v36  ;;  %v10874_v22 = vld [vmem:[#allocation8 + $0xcd0] sm:$0xff]  ;;  %v10849_v36 = vld [vmem:[#allocation8 + $0xc08] sm:$0xff] }
 0x641   : > { %7921 = vmatpush.bf16.msrb.mxu1 %v10818_v63  ;;  %7934 = vmatpush.bf16.msrb.mxu3 %v10826_v31  ;;  %v10856_v63 = vld [vmem:[#allocation8 + $0xc40] sm:$0xff] }
 0x642   : > { %7947 = vmatpush.bf16.msrb.mxu0 %v10834_v5  ;;  %7960 = vmatpush.bf16.msrb.mxu2 %v10842_v3  ;;  %v10864_v31 = vld [vmem:[#allocation8 + $0xc80] sm:$0xff]  ;;  %v10887_v3 = vld [vmem:[#allocation8 + $0xd38] sm:$0xff] }
 0x643   : > { %v10872_v5 = vld [vmem:[#allocation8 + $0xcc0] sm:$0xff] }
 0x645   : > { %7922 = vmatpush.bf16.msrb.mxu1 %v10817_v38  ;;  %7935 = vmatpush.bf16.msrb.mxu3 %v10825_v2  ;;  %v10903_v38 = vld [vmem:[#allocation8 + $0xdb8] sm:$0xff] }
 0x646   : > { %7948 = vmatpush.bf16.msrb.mxu0 %v10833_v57  ;;  %7961 = vmatpush.bf16.msrb.mxu2 %v10841_v13  ;;  %v10911_v2 = vld [vmem:[#allocation8 + $0xdf8] sm:$0xff]  ;;  %v10886_v57 = vld [vmem:[#allocation8 + $0xd30] sm:$0xff] }
 0x647   : > { %v10894_v13 = vld [vmem:[#allocation8 + $0xd70] sm:$0xff] }
 0x649   : > { %7923 = vmatpush.bf16.msrb.mxu1 %v10816_v23  ;;  %7936 = vmatpush.bf16.msrb.mxu3 %v10824_v12  ;;  %v7717_v24 = vpop.f32.mrf.mxu1  ;;  %v10885_v23 = vld [vmem:[#allocation8 + $0xd28] sm:$0xff] }
 0x64a   : > { %7949 = vmatpush.bf16.msrb.mxu0 %v10832_v41  ;;  %7962 = vmatpush.bf16.msrb.mxu2 %v10840_v47  ;;  %v7718_v46 = vadd.f32 %v7717_v24, %v7705_v26  ;;  %v10895_v26 = vld [vmem:[#allocation8 + $0xd78] sm:$0xff]  ;;  %v10893_v12 = vld [vmem:[#allocation8 + $0xd68] sm:$0xff] }
 0x64b   : > { %v10901_v41 = vld [vmem:[#allocation8 + $0xda8] sm:$0xff] }
 0x64c   : > { %7924 = vmatmul.bf16.vlgmr.msrb.gmra.mxu1 %v13829_v1  ;;  %7937 = vmatmul.bf16.vlgmr.msrb.gmra.mxu3 %v13831_v37  ;;  %v7743_v7 = vpop.f32.mrf.mxu0  ;;  %v10852_v1 = vld [vmem:[#allocation8 + $0xc20] sm:$0xff]  ;;  %v10909_v47 = vld [vmem:[#allocation8 + $0xde8] sm:$0xff] }
 0x64d   : > { %7968 = vmatpush.bf16.msra.mxu1 %v10855_v16  ;;  %7981 = vmatpush.bf16.msra.mxu3 %v10863_v29  ;;  %v10868_v37 = vld [vmem:[#allocation8 + $0xca0] sm:$0xff] }
 0x64e   : > { %7994 = vmatpush.bf16.msra.mxu0 %v10871_v50  ;;  %8007 = vmatpush.bf16.msra.mxu2 %v10879_v52  ;;  %v10892_v52 = vld [vmem:[#allocation8 + $0xd60] sm:$0xff] }
 0x64f   : > { %7950 = vmatmul.bf16.vlgmr.msrb.gmra.mxu0 %v13833_v51  ;;  %7963 = vmatmul.bf16.vlgmr.msrb.gmra.mxu2 %v13837_v17  ;;  %v10876_v51 = vld [vmem:[#allocation8 + $0xce0] sm:$0xff]  ;;  %v10851_v17 = vld [vmem:[#allocation8 + $0xc18] sm:$0xff]  ;;  %v7730_v55 = vpop.f32.mrf.mxu3 }
 0x650   : > { %v7731_v48 = vadd.f32 %v7730_v55, %v7718_v46  ;;  %v10882_v46 = vld [vmem:[#allocation8 + $0xd10] sm:$0xff] }
 0x651   : > { %7969 = vmatpush.bf16.msra.mxu1 %v10854_v0  ;;  %7982 = vmatpush.bf16.msra.mxu3 %v10862_v6  ;;  %v7719_v4 = vpop.f32.mrf.mxu1  ;;  %v10891_v0 = vld [vmem:[#allocation8 + $0xd58] sm:$0xff] }
 0x652   : > { %7995 = vmatpush.bf16.msra.mxu0 %v10870_v40  ;;  %8008 = vmatpush.bf16.msra.mxu2 %v10878_v11  ;;  %v7756_v54 = vpop.f32.mrf.mxu2  ;;  %v7744_v18 = vadd.f32 %v7743_v7, %v7731_v48  ;;  %v10899_v6 = vld [vmem:[#allocation8 + $0xd98] sm:$0xff]  ;;  %v10890_v7 = vld [vmem:[#allocation8 + $0xd50] sm:$0xff]  ;;  %v10880_v48 = vld [vmem:[#allocation8 + $0xd00] sm:$0xff] }
 0x653   : > { %v10907_v40 = vld [vmem:[#allocation8 + $0xdd8] sm:$0xff]  ;;  %v10896_v4 = vld [vmem:[#allocation8 + $0xd80] sm:$0xff] }
 0x654   : > { %v7745_v20 = vpop.f32.mrf.mxu0  ;;  %v7757_v10 = vadd.f32 %v7756_v54, %v7744_v18  ;;  %v10888_v54 = vld [vmem:[#allocation8 + $0xd40] sm:$0xff] }
 0x655   : > { %7970 = vmatpush.bf16.msra.mxu1 %v10853_v15  ;;  %7983 = vmatpush.bf16.msra.mxu3 %v10861_v35  ;;  %v10904_v18 = vld [vmem:[#allocation8 + $0xdc0] sm:$0xff]  ;;  %v10919_v20 = vld [vmem:[#allocation8 + $0xe38] sm:$0xff] }
 0x656   : > { %7996 = vmatpush.bf16.msra.mxu0 %v10869_v33  ;;  %8009 = vmatpush.bf16.msra.mxu2 %v10877_v19 }
 0x657   : > { %v7732_v39 = vpop.f32.mrf.mxu3 }
 0x658   : > { %v10933_v39 = vld [vmem:[#allocation8 + $0xea8] sm:$0xff] }
 0x659   : > { %7971 = vmatpush.bf16.msra.mxu1 %v10852_v1  ;;  %7984 = vmatpush.bf16.msra.mxu3 %v10860_v34  ;;  %v10898_v1 = vld [vmem:[#allocation8 + $0xd90] sm:$0xff] }
 0x65a   : > { %7997 = vmatpush.bf16.msra.mxu0 %v10868_v37  ;;  %8010 = vmatpush.bf16.msra.mxu2 %v10876_v51  ;;  %v7758_v53 = vpop.f32.mrf.mxu2  ;;  %v10906_v34 = vld [vmem:[#allocation8 + $0xdd0] sm:$0xff]  ;;  %v10881_v51 = vld [vmem:[#allocation8 + $0xd08] sm:$0xff] }
 0x65b   : > { %v10941_v53 = vld [vmem:[#allocation8 + $0xee8] sm:$0xff] }
 0x65d   : > { %7972 = vmatpush.bf16.msra.mxu1 %v10851_v17  ;;  %7985 = vmatpush.bf16.msra.mxu3 %v10859_v32  ;;  %v10889_v17 = vld [vmem:[#allocation8 + $0xd48] sm:$0xff] }
 0x65e   : > { %7998 = vmatpush.bf16.msra.mxu0 %v10867_v61  ;;  %8011 = vmatpush.bf16.msra.mxu2 %v10875_v25  ;;  %v10897_v32 = vld [vmem:[#allocation8 + $0xd88] sm:$0xff] }
 0x65f   : > { %v10905_v61 = vld [vmem:[#allocation8 + $0xdc8] sm:$0xff] }
 0x661   : > { %7973 = vmatpush.bf16.msra.mxu1 %v10850_v42  ;;  %7986 = vmatpush.bf16.msra.mxu3 %v10858_v21  ;;  %v10927_v42 = vld [vmem:[#allocation8 + $0xe78] sm:$0xff] }
 0x662   : > { %7999 = vmatpush.bf16.msra.mxu0 %v10866_v43  ;;  %8012 = vmatpush.bf16.msra.mxu2 %v10874_v22  ;;  %v10935_v21 = vld [vmem:[#allocation8 + $0xeb8] sm:$0xff]  ;;  %v10918_v22 = vld [vmem:[#allocation8 + $0xe30] sm:$0xff] }
 0x663   : > { %v10943_v43 = vld [vmem:[#allocation8 + $0xef8] sm:$0xff] }
 0x665   : > { %7974 = vmatpush.bf16.msra.mxu1 %v10849_v36  ;;  %7987 = vmatpush.bf16.msra.mxu3 %v10857_v30  ;;  %v10934_v36 = vld [vmem:[#allocation8 + $0xeb0] sm:$0xff] }
 0x666   : > { %8000 = vmatpush.bf16.msra.mxu0 %v10865_v44  ;;  %8013 = vmatpush.bf16.msra.mxu2 %v10873_v9  ;;  %v10942_v30 = vld [vmem:[#allocation8 + $0xef0] sm:$0xff]  ;;  %v10917_v44 = vld [vmem:[#allocation8 + $0xe28] sm:$0xff] }
 0x667   : > { %v10925_v9 = vld [vmem:[#allocation8 + $0xe68] sm:$0xff] }
 0x669   : > { %7975 = vmatpush.bf16.msra.mxu1 %v10848_v28  ;;  %7988 = vmatpush.bf16.msra.mxu3 %v10856_v63  ;;  %v7769_v16 = vpop.f32.mrf.mxu1 }
 0x66a   : > { %8001 = vmatpush.bf16.msra.mxu0 %v10864_v31  ;;  %8014 = vmatpush.bf16.msra.mxu2 %v10872_v5  ;;  %v7770_v29 = vadd.f32 %v7769_v16, %v7757_v10  ;;  %v10926_v10 = vld [vmem:[#allocation8 + $0xe70] sm:$0xff]  ;;  %v10924_v5 = vld [vmem:[#allocation8 + $0xe60] sm:$0xff] }
 0x66b   : > { %v10938_v16 = vld [vmem:[#allocation8 + $0xed0] sm:$0xff] }
 0x66c   : > { %7976 = vmatmul.bf16.vlgmr.msra.gmra.mxu1 %v13900_v60  ;;  %7989 = vmatmul.bf16.vlgmr.msra.gmra.mxu3 %v13902_v49  ;;  %v7795_v50 = vpop.f32.mrf.mxu0  ;;  %v10884_v60 = vld [vmem:[#allocation8 + $0xd20] sm:$0xff] }
 0x66d   : > { %8020 = vmatpush.bf16.msrb.mxu1 %v10887_v3  ;;  %8033 = vmatpush.bf16.msrb.mxu3 %v10895_v26  ;;  %v10900_v49 = vld [vmem:[#allocation8 + $0xda0] sm:$0xff]  ;;  %v10923_v3 = vld [vmem:[#allocation8 + $0xe58] sm:$0xff] }
 0x66e   : > { %8046 = vmatpush.bf16.msrb.mxu0 %v10903_v38  ;;  %8059 = vmatpush.bf16.msrb.mxu2 %v10911_v2  ;;  %v10931_v26 = vld [vmem:[#allocation8 + $0xe98] sm:$0xff] }
 0x66f   : > { %8002 = vmatmul.bf16.vlgmr.msra.gmra.mxu0 %v13904_v14  ;;  %8015 = vmatmul.bf16.vlgmr.msra.gmra.mxu2 %v13906_v56  ;;  %v10908_v14 = vld [vmem:[#allocation8 + $0xde0] sm:$0xff]  ;;  %v10883_v56 = vld [vmem:[#allocation8 + $0xd18] sm:$0xff]  ;;  %v7782_v11 = vpop.f32.mrf.mxu3 }
 0x670   : > { %v7783_v15 = vadd.f32 %v7782_v11, %v7770_v29  ;;  %v10939_v38 = vld [vmem:[#allocation8 + $0xed8] sm:$0xff]  ;;  %v10936_v11 = vld [vmem:[#allocation8 + $0xec0] sm:$0xff] }
 0x671   : > { %8021 = vmatpush.bf16.msrb.mxu1 %v10886_v57  ;;  %8034 = vmatpush.bf16.msrb.mxu3 %v10894_v13  ;;  %v7771_v33 = vpop.f32.mrf.mxu1 }
 0x672   : > { %8047 = vmatpush.bf16.msrb.mxu0 %v10902_v62  ;;  %8060 = vmatpush.bf16.msrb.mxu2 %v10910_v59  ;;  %v7808_v35 = vpop.f32.mrf.mxu2  ;;  %v7796_v19 = vadd.f32 %v7795_v50, %v7783_v15  ;;  %v10913_v50 = vld [vmem:[#allocation8 + $0xe08] sm:$0xff]  ;;  %v10951_v15 = vld [vmem:[#allocation8 + $0xf38] sm:$0xff] }
 0x673   : > { %v10967_v33 = vld [vmem:[#allocation8 + $0xfb8] sm:$0xff] }
 0x674   : > { %v7797_v24 = vpop.f32.mrf.mxu0  ;;  %v7809_v37 = vadd.f32 %v7808_v35, %v7796_v19  ;;  %v10959_v35 = vld [vmem:[#allocation8 + $0xf78] sm:$0xff] }
 0x675   : > { %8022 = vmatpush.bf16.msrb.mxu1 %v10885_v23  ;;  %8035 = vmatpush.bf16.msrb.mxu3 %v10893_v12  ;;  %v10914_v12 = vld [vmem:[#allocation8 + $0xe10] sm:$0xff]  ;;  %v10975_v19 = vld [vmem:[#allocation8 + $0xff8] sm:$0xff] }
 0x676   : > { %8048 = vmatpush.bf16.msrb.mxu0 %v10901_v41  ;;  %8061 = vmatpush.bf16.msrb.mxu2 %v10909_v47  ;;  %v10922_v41 = vld [vmem:[#allocation8 + $0xe50] sm:$0xff] }
 0x677   : > { %v7784_v25 = vpop.f32.mrf.mxu3  ;;  %v10930_v47 = vld [vmem:[#allocation8 + $0xe90] sm:$0xff] }
 0x678   : > { %v4200_v24 = vld.sshfl [vmem:[#allocation1] sm:$0xff pattern:$0x73625140]  ;;  %v10965_v25 = vld [vmem:[#allocation8 + $0xfa8] sm:$0xff] }
 0x679   : > { %8023 = vmatpush.bf16.msrb.mxu1 %v10884_v60  ;;  %8036 = vmatpush.bf16.msrb.mxu3 %v10892_v52  ;;  %v10921_v60 = vld [vmem:[#allocation8 + $0xe48] sm:$0xff] }
 0x67a   : > { %8049 = vmatpush.bf16.msrb.mxu0 %v10900_v49  ;;  %8062 = vmatpush.bf16.msrb.mxu2 %v10908_v14  ;;  %v7810_v55 = vpop.f32.mrf.mxu2  ;;  %v10929_v52 = vld [vmem:[#allocation8 + $0xe88] sm:$0xff] }
 0x67b   : > { %v10937_v49 = vld [vmem:[#allocation8 + $0xec8] sm:$0xff] }
 0x67c   : > { %v10973_v55 = vld [vmem:[#allocation8 + $0xfe8] sm:$0xff] }
 0x67d   : > { %8024 = vmatpush.bf16.msrb.mxu1 %v10883_v56  ;;  %8037 = vmatpush.bf16.msrb.mxu3 %v10891_v0  ;;  %v10912_v0 = vld [vmem:[#allocation8 + $0xe00] sm:$0xff] }
 0x67e   : > { %8050 = vmatpush.bf16.msrb.mxu0 %v10899_v6  ;;  %8063 = vmatpush.bf16.msrb.mxu2 %v10907_v40  ;;  %v10920_v6 = vld [vmem:[#allocation8 + $0xe40] sm:$0xff] }
 0x67f   : > { %v10928_v40 = vld [vmem:[#allocation8 + $0xe80] sm:$0xff] }
 0x681   : > { %8025 = vmatpush.bf16.msrb.mxu1 %v10882_v46  ;;  %8038 = vmatpush.bf16.msrb.mxu3 %v10890_v7  ;;  %v10950_v46 = vld [vmem:[#allocation8 + $0xf30] sm:$0xff] }
 0x682   : > { %8051 = vmatpush.bf16.msrb.mxu0 %v10898_v1  ;;  %8064 = vmatpush.bf16.msrb.mxu2 %v10906_v34  ;;  %v10958_v7 = vld [vmem:[#allocation8 + $0xf70] sm:$0xff]  ;;  %v4201_v1 = vld.sshfl [vmem:[#allocation1 + $0x8] sm:$0xff pattern:$0x73625140] }
 0x683   : > { %v10966_v34 = vld [vmem:[#allocation8 + $0xfb0] sm:$0xff] }
 0x685   : > { %8026 = vmatpush.bf16.msrb.mxu1 %v10881_v51  ;;  %8039 = vmatpush.bf16.msrb.mxu3 %v10889_v17  ;;  %v4202_v51 = vld.sshfl [vmem:[#allocation1 + $0x10] sm:$0xff pattern:$0x73625140]  ;;  %v4203_v17 = vld.sshfl [vmem:[#allocation1 + $0x18] sm:$0xff pattern:$0x73625140] }
 0x686   : > { %8052 = vmatpush.bf16.msrb.mxu0 %v10897_v32  ;;  %8065 = vmatpush.bf16.msrb.mxu2 %v10905_v61  ;;  %v10949_v32 = vld [vmem:[#allocation8 + $0xf28] sm:$0xff] }
 0x687   : > { %v10957_v61 = vld [vmem:[#allocation8 + $0xf68] sm:$0xff] }
 0x689   : > { %8027 = vmatpush.bf16.msrb.mxu1 %v10880_v48  ;;  %8040 = vmatpush.bf16.msrb.mxu3 %v10888_v54  ;;  %v7821_v28 = vpop.f32.mrf.mxu1 }
 0x68a   : > { %8053 = vmatpush.bf16.msrb.mxu0 %v10896_v4  ;;  %8066 = vmatpush.bf16.msrb.mxu2 %v10904_v18  ;;  %v7822_v63 = vadd.f32 %v7821_v28, %v7809_v37  ;;  %v10974_v37 = vld [vmem:[#allocation8 + $0xff0] sm:$0xff]  ;;  %v10948_v18 = vld [vmem:[#allocation8 + $0xf20] sm:$0xff] }
 0x68c   : > { %8028 = vmatmul.bf16.vlgmr.msrb.gmra.mxu1 %v13852_v58  ;;  %8041 = vmatmul.bf16.vlgmr.msrb.gmra.mxu3 %v13854_v8  ;;  %v7847_v31 = vpop.f32.mrf.mxu0  ;;  %v10916_v58 = vld [vmem:[#allocation8 + $0xe20] sm:$0xff] }
 0x68d   : > { %8072 = vmatpush.bf16.msra.mxu1 %v10919_v20  ;;  %8085 = vmatpush.bf16.msra.mxu3 %v10927_v42  ;;  %v10932_v8 = vld [vmem:[#allocation8 + $0xea0] sm:$0xff] }
 0x68e   : > { %8098 = vmatpush.bf16.msra.mxu0 %v10935_v21  ;;  %8111 = vmatpush.bf16.msra.mxu2 %v10943_v43  ;;  %v10956_v20 = vld [vmem:[#allocation8 + $0xf60] sm:$0xff]  ;;  %v10947_v43 = vld [vmem:[#allocation8 + $0xf18] sm:$0xff] }
 0x68f   : > { %8054 = vmatmul.bf16.vlgmr.msrb.gmra.mxu0 %v13856_v45  ;;  %8067 = vmatmul.bf16.vlgmr.msrb.gmra.mxu2 %v13858_v27  ;;  %v10940_v45 = vld [vmem:[#allocation8 + $0xee0] sm:$0xff]  ;;  %v10915_v27 = vld [vmem:[#allocation8 + $0xe18] sm:$0xff]  ;;  %v7834_v2 = vpop.f32.mrf.mxu3 }
 0x690   : > { %v7835_v57 = vadd.f32 %v7834_v2, %v7822_v63  ;;  %v10964_v42 = vld [vmem:[#allocation8 + $0xfa0] sm:$0xff]  ;;  %v10946_v63 = vld [vmem:[#allocation8 + $0xf10] sm:$0xff] }
 0x691   : > { %8073 = vmatpush.bf16.msra.mxu1 %v10918_v22  ;;  %8086 = vmatpush.bf16.msra.mxu3 %v10926_v10  ;;  %v7823_v62 = vpop.f32.mrf.mxu1  ;;  %v10972_v21 = vld [vmem:[#allocation8 + $0xfe0] sm:$0xff]  ;;  %v10955_v22 = vld [vmem:[#allocation8 + $0xf58] sm:$0xff] }
 0x692   : > { %8099 = vmatpush.bf16.msra.mxu0 %v10934_v36  ;;  %8112 = vmatpush.bf16.msra.mxu2 %v10942_v30  ;;  %v7860_v13 = vpop.f32.mrf.mxu2  ;;  %v7848_v59 = vadd.f32 %v7847_v31, %v7835_v57  ;;  %v10963_v10 = vld [vmem:[#allocation8 + $0xf98] sm:$0xff]  ;;  %v10954_v31 = vld [vmem:[#allocation8 + $0xf50] sm:$0xff]  ;;  %v10944_v57 = vld [vmem:[#allocation8 + $0xf00] sm:$0xff] }
 0x693   : > { %v10971_v36 = vld [vmem:[#allocation8 + $0xfd8] sm:$0xff]  ;;  %v10960_v62 = vld [vmem:[#allocation8 + $0xf80] sm:$0xff] }
 0x694   : > { %v7849_v23 = vpop.f32.mrf.mxu0  ;;  %v7861_v29 = vadd.f32 %v7860_v13, %v7848_v59  ;;  %v10952_v13 = vld [vmem:[#allocation8 + $0xf40] sm:$0xff] }
 0x695   : > { %8074 = vmatpush.bf16.msra.mxu1 %v10917_v44  ;;  %8087 = vmatpush.bf16.msra.mxu3 %v10925_v9  ;;  %v10968_v59 = vld [vmem:[#allocation8 + $0xfc0] sm:$0xff]  ;;  %v4204_v23 = vld.sshfl [vmem:[#allocation1 + $0x20] sm:$0xff pattern:$0x73625140] }
 0x696   : > { %8100 = vmatpush.bf16.msra.mxu0 %v10933_v39  ;;  %8113 = vmatpush.bf16.msra.mxu2 %v10941_v53 }
 0x697   : > { %v7836_v14 = vpop.f32.mrf.mxu3 }
 0x699   : > { %8075 = vmatpush.bf16.msra.mxu1 %v10916_v58  ;;  %8088 = vmatpush.bf16.msra.mxu3 %v10924_v5  ;;  %v10962_v58 = vld [vmem:[#allocation8 + $0xf90] sm:$0xff] }
 0x69a   : > { %8101 = vmatpush.bf16.msra.mxu0 %v10932_v8  ;;  %8114 = vmatpush.bf16.msra.mxu2 %v10940_v45  ;;  %v7862_v56 = vpop.f32.mrf.mxu2  ;;  %v10970_v5 = vld [vmem:[#allocation8 + $0xfd0] sm:$0xff]  ;;  %v10945_v45 = vld [vmem:[#allocation8 + $0xf08] sm:$0xff] }
 0x69d   : > { %8076 = vmatpush.bf16.msra.mxu1 %v10915_v27  ;;  %8089 = vmatpush.bf16.msra.mxu3 %v10923_v3  ;;  %v10953_v27 = vld [vmem:[#allocation8 + $0xf48] sm:$0xff] }
 0x69e   : > { %8102 = vmatpush.bf16.msra.mxu0 %v10931_v26  ;;  %8115 = vmatpush.bf16.msra.mxu2 %v10939_v38  ;;  %v10961_v3 = vld [vmem:[#allocation8 + $0xf88] sm:$0xff] }
 0x69f   : > { %v10969_v26 = vld [vmem:[#allocation8 + $0xfc8] sm:$0xff] }
 0x6a1   : > { %8077 = vmatpush.bf16.msra.mxu1 %v10914_v12  ;;  %8090 = vmatpush.bf16.msra.mxu3 %v10922_v41  ;;  %v4205_v12 = vld.sshfl [vmem:[#allocation1 + $0x28] sm:$0xff pattern:$0x73625140]  ;;  %v4206_v41 = vld.sshfl [vmem:[#allocation1 + $0x30] sm:$0xff pattern:$0x73625140] }
 0x6a2   : > { %8103 = vmatpush.bf16.msra.mxu0 %v10930_v47  ;;  %8116 = vmatpush.bf16.msra.mxu2 %v10938_v16  ;;  %v4207_v47 = vld.sshfl [vmem:[#allocation1 + $0x38] sm:$0xff pattern:$0x73625140] }
 0x6a5   : > { %8078 = vmatpush.bf16.msra.mxu1 %v10913_v50  ;;  %8091 = vmatpush.bf16.msra.mxu3 %v10921_v60 }
 0x6a6   : > { %8104 = vmatpush.bf16.msra.mxu0 %v10929_v52  ;;  %8117 = vmatpush.bf16.msra.mxu2 %v10937_v49 }
 0x6a9   : > { %8079 = vmatpush.bf16.msra.mxu1 %v10912_v0  ;;  %8092 = vmatpush.bf16.msra.mxu3 %v10920_v6  ;;  %v7873_v48 = vpop.f32.mrf.mxu1 }
 0x6aa   : > { %8105 = vmatpush.bf16.msra.mxu0 %v10928_v40  ;;  %8118 = vmatpush.bf16.msra.mxu2 %v10936_v11  ;;  %v7874_v54 = vadd.f32 %v7873_v48, %v7861_v29 }
 0x6ac   : > { %8080 = vmatmul.bf16.vlgmr.msra.gmra.mxu1 %v4200_v24  ;;  %8093 = vmatmul.bf16.vlgmr.msra.gmra.mxu3 %v4201_v1  ;;  %v7899_v4 = vpop.f32.mrf.mxu0 }
 0x6ad   : > { %8124 = vmatpush.bf16.msrb.mxu1 %v10951_v15  ;;  %8137 = vmatpush.bf16.msrb.mxu3 %v10959_v35 }
 0x6ae   : > { %8150 = vmatpush.bf16.msrb.mxu0 %v10967_v33  ;;  %8163 = vmatpush.bf16.msrb.mxu2 %v10975_v19 }
 0x6af   : > { %8106 = vmatmul.bf16.vlgmr.msra.gmra.mxu0 %v4202_v51  ;;  %8119 = vmatmul.bf16.vlgmr.msra.gmra.mxu2 %v4203_v17  ;;  %v7886_v30 = vpop.f32.mrf.mxu3 }
 0x6b0   : > { %v7887_v44 = vadd.f32 %v7886_v30, %v7874_v54 }
 0x6b1   : > { %8125 = vmatpush.bf16.msrb.mxu1 %v10950_v46  ;;  %8138 = vmatpush.bf16.msrb.mxu3 %v10958_v7  ;;  %v7875_v39 = vpop.f32.mrf.mxu1 }
 0x6b2   : > { %8151 = vmatpush.bf16.msrb.mxu0 %v10966_v34  ;;  %8164 = vmatpush.bf16.msrb.mxu2 %v10974_v37  ;;  %v7912_v9 = vpop.f32.mrf.mxu2  ;;  %v7900_v53 = vadd.f32 %v7899_v4, %v7887_v44 }
 0x6b4   : > { %v7901_v28 = vpop.f32.mrf.mxu0  ;;  %v7913_v8 = vadd.f32 %v7912_v9, %v7900_v53 }
 0x6b5   : > { %8126 = vmatpush.bf16.msrb.mxu1 %v10949_v32  ;;  %8139 = vmatpush.bf16.msrb.mxu3 %v10957_v61 }
 0x6b6   : > { %8152 = vmatpush.bf16.msrb.mxu0 %v10965_v25  ;;  %8165 = vmatpush.bf16.msrb.mxu2 %v10973_v55 }
 0x6b7   : > { %v7888_v38 = vpop.f32.mrf.mxu3 }
 0x6b9   : > { %8127 = vmatpush.bf16.msrb.mxu1 %v10948_v18  ;;  %8140 = vmatpush.bf16.msrb.mxu3 %v10956_v20 }
 0x6ba   : > { %8153 = vmatpush.bf16.msrb.mxu0 %v10964_v42  ;;  %8166 = vmatpush.bf16.msrb.mxu2 %v10972_v21  ;;  %v7914_v2 = vpop.f32.mrf.mxu2 }
 0x6bd   : > { %8128 = vmatpush.bf16.msrb.mxu1 %v10947_v43  ;;  %8141 = vmatpush.bf16.msrb.mxu3 %v10955_v22 }
 0x6be   : > { %8154 = vmatpush.bf16.msrb.mxu0 %v10963_v10  ;;  %8167 = vmatpush.bf16.msrb.mxu2 %v10971_v36 }
 0x6c1   : > { %8129 = vmatpush.bf16.msrb.mxu1 %v10946_v63  ;;  %8142 = vmatpush.bf16.msrb.mxu3 %v10954_v31 }
 0x6c2   : > { %8155 = vmatpush.bf16.msrb.mxu0 %v10962_v58  ;;  %8168 = vmatpush.bf16.msrb.mxu2 %v10970_v5 }
 0x6c5   : > { %8130 = vmatpush.bf16.msrb.mxu1 %v10945_v45  ;;  %8143 = vmatpush.bf16.msrb.mxu3 %v10953_v27 }
 0x6c6   : > { %8156 = vmatpush.bf16.msrb.mxu0 %v10961_v3  ;;  %8169 = vmatpush.bf16.msrb.mxu2 %v10969_v26 }
 0x6c9   : > { %8131 = vmatpush.bf16.msrb.mxu1 %v10944_v57  ;;  %8144 = vmatpush.bf16.msrb.mxu3 %v10952_v13  ;;  %v7925_v16 = vpop.f32.mrf.mxu1 }
 0x6ca   : > { %8157 = vmatpush.bf16.msrb.mxu0 %v10960_v62  ;;  %8170 = vmatpush.bf16.msrb.mxu2 %v10968_v59  ;;  %v7926_v29 = vadd.f32 %v7925_v16, %v7913_v8 }
 0x6cc   : > { %8132 = vmatmul.bf16.vlgmr.msrb.gmra.mxu1 %v4204_v23  ;;  %8145 = vmatmul.bf16.vlgmr.msrb.gmra.mxu3 %v4205_v12  ;;  %v7951_v50 = vpop.f32.mrf.mxu0 }
 0x6cd   : > { %8158 = vmatmul.bf16.vlgmr.msrb.gmra.mxu0 %v4206_v41  ;;  %8171 = vmatmul.bf16.vlgmr.msrb.gmra.mxu2 %v4207_v47 }
 0x6cf   : > { %v7938_v60 = vpop.f32.mrf.mxu3 }
 0x6d0   : > { %v7939_v52 = vadd.f32 %v7938_v60, %v7926_v29 }
 0x6d1   : > { %v7927_v14 = vpop.f32.mrf.mxu1 }
 0x6d2   : > { %v7964_v49 = vpop.f32.mrf.mxu2  ;;  %v7952_v56 = vadd.f32 %v7951_v50, %v7939_v52 }
 0x6d4   : > { %v7953_v0 = vpop.f32.mrf.mxu0  ;;  %v7965_v6 = vadd.f32 %v7964_v49, %v7952_v56 }
 0x6d7   : > { %v7940_v40 = vpop.f32.mrf.mxu3 }
 0x6da   : > { %v7966_v11 = vpop.f32.mrf.mxu2 }
 0x6e9   : > { %v7977_v15 = vpop.f32.mrf.mxu1 }
 0x6ea   : > { %v7978_v35 = vadd.f32 %v7977_v15, %v7965_v6 }
 0x6ec   : > { %v8003_v33 = vpop.f32.mrf.mxu0 }
 0x6ef   : > { %v7990_v19 = vpop.f32.mrf.mxu3 }
 0x6f0   : > { %v7991_v24 = vadd.f32 %v7990_v19, %v7978_v35 }
 0x6f1   : > { %v7979_v7 = vpop.f32.mrf.mxu1 }
 0x6f2   : > { %v8016_v46 = vpop.f32.mrf.mxu2  ;;  %v8004_v1 = vadd.f32 %v8003_v33, %v7991_v24 }
 0x6f4   : > { %v8005_v34 = vpop.f32.mrf.mxu0  ;;  %v8017_v37 = vadd.f32 %v8016_v46, %v8004_v1 }
 0x6f7   : > { %v7992_v51 = vpop.f32.mrf.mxu3 }
 0x6fa   : > { %v8018_v17 = vpop.f32.mrf.mxu2 }
 0x709   : > { %v8029_v32 = vpop.f32.mrf.mxu1 }
 0x70a   : > { %v8030_v36 = vadd.f32 %v8029_v32, %v8017_v37 }
 0x70c   : > { %v8055_v61 = vpop.f32.mrf.mxu0 }
 0x70f   : > { %v8042_v25 = vpop.f32.mrf.mxu3 }
 0x710   : > { %v8043_v30 = vadd.f32 %v8042_v25, %v8030_v36 }
 0x711   : > { %v8031_v48 = vpop.f32.mrf.mxu1 }
 0x712   : > { %v8068_v55 = vpop.f32.mrf.mxu2  ;;  %v8056_v39 = vadd.f32 %v8055_v61, %v8043_v30 }
 0x714   : > { %v8057_v54 = vpop.f32.mrf.mxu0  ;;  %v8069_v53 = vadd.f32 %v8068_v55, %v8056_v39 }
 0x717   : > { %v8044_v4 = vpop.f32.mrf.mxu3 }
 0x71a   : > { %v8070_v18 = vpop.f32.mrf.mxu2 }
 0x729   : > { %v8081_v20 = vpop.f32.mrf.mxu1 }
 0x72a   : > { %v8082_v28 = vadd.f32 %v8081_v20, %v8069_v53 }
 0x72c   : > { %v8107_v42 = vpop.f32.mrf.mxu0 }
 0x72f   : > { %v8094_v21 = vpop.f32.mrf.mxu3 }
 0x730   : > { %v8095_v63 = vadd.f32 %v8094_v21, %v8082_v28 }
 0x731   : > { %v8083_v22 = vpop.f32.mrf.mxu1 }
 0x732   : > { %v8120_v43 = vpop.f32.mrf.mxu2  ;;  %v8108_v31 = vadd.f32 %v8107_v42, %v8095_v63 }
 0x734   : > { %v8109_v10 = vpop.f32.mrf.mxu0  ;;  %v8121_v8 = vadd.f32 %v8120_v43, %v8108_v31 }
 0x737   : > { %v8096_v44 = vpop.f32.mrf.mxu3 }
 0x73a   : > { %v8122_v9 = vpop.f32.mrf.mxu2 }
 0x749   : > { %v8133_v58 = vpop.f32.mrf.mxu1 }
 0x74a   : > { %v8159_v5 = vpop.f32.mrf.mxu0  ;;  %v8134_v45 = vadd.f32 %v8133_v58, %v8121_v8 }
 0x74f   : > { %v8146_v27 = vpop.f32.mrf.mxu3 }
 0x750   : > { %v8147_v3 = vadd.f32 %v8146_v27, %v8134_v45  ;;  %v8172_v26 = vpop.f32.mrf.mxu2 }
 0x751   : > { %v8135_v38 = vpop.f32.mrf.mxu1 }
 0x752   : > { %v8160_v2 = vadd.f32 %v8159_v5, %v8147_v3  ;;  %v8161_v57 = vpop.f32.mrf.mxu0 }
 0x754   : > { %v8173_v13 = vadd.f32 %v8172_v26, %v8160_v2 }
 0x756   : > { %8176 = vst [vmem:[%s364_s19] sm:$0xf] %v8173_v13 }
 0x757   : > { %v8148_v62 = vpop.f32.mrf.mxu3 }
 0x758   : > { %11220 = shalt.err (!%p11217_p8)
}
 0x759   : > { %10992 = dma.vmem_to_hbm [thread:$0]  (%p11369_p5), %s8191_s21, 64, %s8193_s11, %s8178_s9   ;;  %v8174_v59 = vpop.f32.mrf.mxu2 }
 0x75a PF: > { %p11019_p9 = scmp.ge.s32.totalorder %s11267_s30, 2  ;;  %s8204_s4 = sand.u32 1, %s11255_s27  }
 0x75b   : > { %s8205_s29 = scalar_lea.sflag [#allocation5], %s8204_s4 }
 0x75c   : > { %p11008_p10 = pnand %p11019_p9, %p11373_p6 }
 0x75e   : > { %p11009_p11 = pneg %p11008_p10 }
 0x760   : > { %11250 = dma.done.wait (%p11009_p11), %s8205_s29, 64  }
 0x761   : > { %11252 = vsyncadd (%p11009_p11), %s8205_s29, 4294967232  ;;  %s14255_s30 = sld [smem:[#allocation17_spill]]  ;;  %s14258_s27 = smov %s11259_s28 }
 0x762   : > { %s14256_s17 = sld [smem:[#allocation16_spill]] }
 0x763   : > { %s14257_s29 = sld [smem:[#allocation18_spill]] }
 0x767   : > { %p21_p12 = scmp.ge.s32.totalorder %s14255_s30, 4  }
 0x768   : > { %s14259_s28 = smov %s14256_s17 }
 0x769   :  { %23 = sbr.rel (!%p21_p12) target bundleno = 9 (0x9), region = 176 }
 0x76e   :  { %8211 = vsyncpa [#allocation4], 1 }
 0x76f   :  { %8213 = vsyncpa [#allocation4 + $0x1], 1 }
 0x770   :  { %8214 = vsyncpa [#allocation7], 1 }
 0x771   :  { %8215 = vsyncpa [#allocation10], 1 }
 0x772   :  { %8216 = vsyncpa [#allocation5], 1 }
 0x773   :  { %8218 = vsyncpa [#allocation5 + $0x1], 1 }

</bundles_post_ra>
